<compile_context>
chip_gen: v5e
topology: v5e:2x2
jax: 0.10.0
libtpu: 0.0.40
codegen_flags: <defaults>
</compile_context>

<pallas_src>
import numpy as np
import jax
import jax.numpy as jnp
from jax.experimental import pallas as pl
from jax.experimental.pallas import tpu as pltpu

EPS = 1e-5                       # torch LayerNorm default eps

# ----------------------------- model configuration --------------------------
N_BATCH = 2
C_IN, H_IN, W_IN = 1, 16, 16     # get_shape(); Conv1d path only uses C and W (=L)
CHANNELS = [10, 20, 40, 80]      # UNet1D default
PE_DIM = 10
N_STEPS = 100
LAYERS = len(CHANNELS)
Ls = [W_IN // (2 ** i) for i in range(LAYERS)]     # per-level signal length
OUT_LANES = 128                  # final conv out-channels zero-padded -> lane-dense store


# ----------------------------- parameter building ----------------------------

def build_pe_table(max_seq_len, d_model):
    i_seq = jnp.linspace(0.0, max_seq_len - 1, max_seq_len)
    j_seq = jnp.linspace(0.0, d_model - 2, d_model // 2)
    pos, two_i = jnp.meshgrid(i_seq, j_seq, indexing='ij')
    angle = pos / 10000 ** (two_i / d_model)
    pe = jnp.stack((jnp.sin(angle), jnp.cos(angle)), axis=2).reshape(max_seq_len, d_model)
    return pe.astype(jnp.float32)


def init_params(key):
    keys = iter(jax.random.split(key, 512))

    def nrm(shape, scale):
        return (scale * jax.random.normal(next(keys), shape)).astype(jnp.float32)

    def linear(din, dout):                 # torch Linear layout: w (out, in)
        return {'w': nrm((dout, din), 1.0 / np.sqrt(din)), 'b': nrm((dout,), 0.05)}

    def conv(cin, cout, k):                # torch Conv1d layout: w (out, in, k)
        return {'w': nrm((cout, cin, k), 1.0 / np.sqrt(cin * k)), 'b': nrm((cout,), 0.05)}

    def convT(cin, cout, k):               # torch ConvTranspose1d layout: w (in, out, k)
        return {'w': nrm((cin, cout, k), 1.0 / np.sqrt(cin * k)), 'b': nrm((cout,), 0.05)}

    def block(cin, cout, L):               # UNetBlock1D (residual=False)
        c1, c2 = conv(cin, cout, 3), conv(cout, cout, 3)
        return {'ln_w': 1.0 + nrm((cin, L), 0.05), 'ln_b': nrm((cin, L), 0.05),
                'w1': c1['w'], 'b1': c1['b'], 'w2': c2['w'], 'b2': c2['b']}

    p = {'pe_table': build_pe_table(N_STEPS, PE_DIM),
         'pe_en': [], 'enc': [], 'down': [], 'pe_de': [], 'up': [], 'dec': []}
    prev = C_IN
    for i, ch in enumerate(CHANNELS[:-1]):
        L = Ls[i]
        p['pe_en'].append((linear(PE_DIM, prev), linear(prev, prev)))
        p['enc'].append((block(prev, ch, L), block(ch, ch, L)))
        p['down'].append(conv(ch, ch, 2))
        prev = ch
    p['pe_mid'] = linear(PE_DIM, prev)
    p['mid'] = (block(prev, CHANNELS[-1], Ls[-1]),
                block(CHANNELS[-1], CHANNELS[-1], Ls[-1]))
    prev = CHANNELS[-1]
    for i, ch in enumerate(CHANNELS[-2::-1]):
        L = Ls[LAYERS - 2 - i]
        p['pe_de'].append(linear(PE_DIM, prev))
        p['up'].append(convT(prev, ch, 2))
        p['dec'].append((block(2 * ch, ch, L), block(ch, ch, L)))
        prev = ch
    p['out'] = conv(prev, C_IN, 3)
    return p


# ----------------------- constant structure matrices (host) ------------------

def _shift_and_sum_mats(n, L):
    m = n * L
    s_dn = np.zeros((m, m), np.float32)    # row r <- row r-1 (zero at l==0)
    s_up = np.zeros((m, m), np.float32)    # row r <- row r+1 (zero at l==L-1)
    e = np.zeros((m, n), np.float32)       # per-sample broadcast (M, N)
    for i in range(n):
        for l in range(L):
            r = i * L + l
            e[r, i] = 1.0
            if l > 0:
                s_dn[r, r - 1] = 1.0
            if l < L - 1:
                s_up[r, r + 1] = 1.0
    return s_dn, s_up, e @ e.T, e          # B = E E^T : per-sample sum+broadcast


def _down_mats(n, L):                      # stride-2 kernel-2 conv row selection
    m, mo = n * L, n * (L // 2)
    de = np.zeros((mo, m), np.float32)
    do = np.zeros((mo, m), np.float32)
    for i in range(n):
        for lo in range(L // 2):
            de[i * (L // 2) + lo, i * L + 2 * lo] = 1.0
            do[i * (L // 2) + lo, i * L + 2 * lo + 1] = 1.0
    return de, do


def _up_mats(n, L):                        # stride-2 kernel-2 transposed-conv scatter
    m, mo = n * L, n * 2 * L
    ue = np.zeros((mo, m), np.float32)
    uo = np.zeros((mo, m), np.float32)
    for i in range(n):
        for l in range(L):
            ue[i * 2 * L + 2 * l, i * L + l] = 1.0
            uo[i * 2 * L + 2 * l + 1, i * L + l] = 1.0
    return ue, uo


def _cat_mats(c):                          # channel concat as two lane projections
    pl_m = np.zeros((c, 2 * c), np.float32)
    pr_m = np.zeros((c, 2 * c), np.float32)
    pl_m[:, :c] = np.eye(c, dtype=np.float32)
    pr_m[:, c:] = np.eye(c, dtype=np.float32)
    return pl_m, pr_m


# --------------------------- host-side weight packing ------------------------

class _Packer:
    """Packs many small 2-D f32 params into one (R, 128) buffer, 8-aligned rows."""

    def __init__(self):
        self._chunks, self._index, self._row = [], {}, 0

    def add(self, name, arr):
        a = np.asarray(arr, np.float32)
        if a.ndim == 1:
            a = a.reshape(1, -1)
        r, c = a.shape
        assert c <= 128 and name not in self._index, name
        rp = ((r + 7) // 8) * 8
        buf = np.zeros((rp, 128), np.float32)
        buf[:r, :c] = a
        self._index[name] = (self._row, r, c)
        self._chunks.append(buf)
        self._row += rp

    def finalize(self):
        return np.concatenate(self._chunks, axis=0), self._index


def pack_params(p):
    pk = _Packer()
    add = pk.add

    def add_linear(name, lin):
        add(name + '.w', np.asarray(lin['w']).T)               # -> (in, out)
        add(name + '.b', lin['b'])

    def add_conv_taps(name, w, transpose_taps, cout_pad=None):
        w = np.asarray(w, np.float32)
        for j in range(w.shape[-1]):
            tap = w[:, :, j].T if transpose_taps else w[:, :, j]   # -> (in, out)
            if cout_pad is not None:
                t = np.zeros((tap.shape[0], cout_pad), np.float32)
                t[:, :tap.shape[1]] = tap
                tap = t
            add(name + '.w%d' % j, tap)

    def add_bias(name, b, cout_pad=None):
        b = np.asarray(b, np.float32).reshape(1, -1)
        if cout_pad is not None:
            t = np.zeros((1, cout_pad), np.float32)
            t[:, :b.shape[1]] = b
            b = t
        add(name + '.b', b)

    def add_block(name, bp):
        # LayerNorm affine (C, L) -> row layout (N*L, C)
        add(name + '.lng', np.tile(np.asarray(bp['ln_w']).T, (N_BATCH, 1)))
        add(name + '.lnb', np.tile(np.asarray(bp['ln_b']).T, (N_BATCH, 1)))
        add_conv_taps(name + '.c1', bp['w1'], True)
        add_bias(name + '.c1', bp['b1'])
        add_conv_taps(name + '.c2', bp['w2'], True)
        add_bias(name + '.c2', bp['b2'])

    for i in range(LAYERS - 1):
        add_linear('pe_en%d.0' % i, p['pe_en'][i][0])
        add_linear('pe_en%d.1' % i, p['pe_en'][i][1])
        add_block('enc%d.b0' % i, p['enc'][i][0])
        add_block('enc%d.b1' % i, p['enc'][i][1])
        add_conv_taps('down%d' % i, p['down'][i]['w'], True)
        add_bias('down%d' % i, p['down'][i]['b'])
    add_linear('pe_mid', p['pe_mid'])
    add_block('mid.b0', p['mid'][0])
    add_block('mid.b1', p['mid'][1])
    for i in range(LAYERS - 1):
        add_linear('pe_de%d' % i, p['pe_de'][i])
        add_conv_taps('up%d' % i, p['up'][i]['w'], False)       # ConvT weight is (in, out, k)
        add_bias('up%d' % i, p['up'][i]['b'])
        add_block('dec%d.b0' % i, p['dec'][i][0])
        add_block('dec%d.b1' % i, p['dec'][i][1])
    add_conv_taps('out', p['out']['w'], True, cout_pad=OUT_LANES)
    add_bias('out', p['out']['b'], cout_pad=OUT_LANES)

    for L in sorted(set(Ls)):
        s_dn, s_up, bm, e = _shift_and_sum_mats(N_BATCH, L)
        add('S%d.dn' % L, s_dn)
        add('S%d.up' % L, s_up)
        add('B%d' % L, bm)
        add('E%d' % L, e)
    for L in Ls[:-1]:
        de, do = _down_mats(N_BATCH, L)
        add('D%d.e' % L, de)
        add('D%d.o' % L, do)
    for L in Ls[1:]:
        ue, uo = _up_mats(N_BATCH, L)
        add('U%d.e' % L, ue)
        add('U%d.o' % L, uo)
    for c in CHANNELS[:-1]:
        pl_m, pr_m = _cat_mats(c)
        add('P%d.l' % c, pl_m)
        add('P%d.r' % c, pr_m)
    return pk.finalize()


# ------------------------------ fused Pallas kernel --------------------------

def make_kernel(index):
    def kernel(x_ref, temb_ref, p_ref, o_ref):
        def get(name):
            r0, nr, nc = index[name]
            return p_ref[pl.ds(r0, nr), pl.ds(0, nc)]

        def mm(a, b):
            if a.shape[1] == 1:            # degenerate K=1 contraction -> broadcast mul
                return a * b
            return jnp.dot(a, b, preferred_element_type=jnp.float32)

        shift = {L: (get('S%d.dn' % L), get('S%d.up' % L)) for L in set(Ls)}
        samp_sum = {L: get('B%d' % L) for L in set(Ls)}
        samp_bcast = {L: get('E%d' % L) for L in set(Ls)}

        def conv3(x, name, L):             # Conv1d(k=3, stride=1, pad=1)
            s_dn, s_up = shift[L]
            y = mm(x, get(name + '.w1'))
            y = y + mm(mm(s_dn, x), get(name + '.w0'))
            y = y + mm(mm(s_up, x), get(name + '.w2'))
            return y + get(name + '.b')

        def layer_norm(x, name, L):        # per-sample LN over (C, L), single pass
            inv = 1.0 / float(x.shape[1] * L)
            s1 = mm(samp_sum[L], jnp.sum(x, axis=1, keepdims=True)) * inv
            s2 = mm(samp_sum[L], jnp.sum(x * x, axis=1, keepdims=True)) * inv
            xn = (x - s1) * jax.lax.rsqrt(s2 - s1 * s1 + EPS)
            return xn * get(name + '.lng') + get(name + '.lnb')

        def block(x, name, L):             # UNetBlock1D, residual=False
            h = layer_norm(x, name, L)
            h = jnp.maximum(conv3(h, name + '.c1', L), 0.0)
            h = conv3(h, name + '.c2', L)
            return jnp.maximum(h, 0.0)

        def bcast_rows(v, L):              # (N, C) -> (N*L, C)
            return mm(samp_bcast[L], v)

        temb = temb_ref[...]
        x = x_ref[...]

        skips = []
        for i in range(LAYERS - 1):        # ---------------- encoder ----------------
            L = Ls[i]
            h = jnp.maximum(mm(temb, get('pe_en%d.0.w' % i)) + get('pe_en%d.0.b' % i), 0.0)
            pe = mm(h, get('pe_en%d.1.w' % i)) + get('pe_en%d.1.b' % i)
            x = x + bcast_rows(pe, L)
            x = block(x, 'enc%d.b0' % i, L)
            x = block(x, 'enc%d.b1' % i, L)
            skips.append(x)
            de, do = get('D%d.e' % L), get('D%d.o' % L)
            x = (mm(mm(de, x), get('down%d.w0' % i))
                 + mm(mm(do, x), get('down%d.w1' % i))
                 + get('down%d.b' % i))

        L = Ls[-1]                         # ------------------ mid -------------------
        pe = mm(temb, get('pe_mid.w')) + get('pe_mid.b')
        x = x + bcast_rows(pe, L)
        x = block(x, 'mid.b0', L)
        x = block(x, 'mid.b1', L)

        for i in range(LAYERS - 1):        # ---------------- decoder ----------------
            lvl = LAYERS - 2 - i
            l_in, L, ch = Ls[lvl + 1], Ls[lvl], CHANNELS[lvl]
            pe = mm(temb, get('pe_de%d.w' % i)) + get('pe_de%d.b' % i)
            ue, uo = get('U%d.e' % l_in), get('U%d.o' % l_in)
            up = (mm(ue, mm(x, get('up%d.w0' % i)))
                  + mm(uo, mm(x, get('up%d.w1' % i)))
                  + get('up%d.b' % i))
            # torch.cat((encoder_out, up), dim=1) as lane projections; F.pad is a no-op
            # here because lengths divide evenly.
            x = mm(skips[lvl], get('P%d.l' % ch)) + mm(up, get('P%d.r' % ch))
            x = x + bcast_rows(pe, L)
            x = block(x, 'dec%d.b0' % i, L)
            x = block(x, 'dec%d.b1' % i, L)

        o_ref[...] = conv3(x, 'out', Ls[0])    # out-channels zero-padded to 128 lanes
    return kernel


def make_forward(index):
    kernel = make_kernel(index)
    m0 = N_BATCH * Ls[0]

    @jax.jit
    def forward(x, t, pe_table, packed):
        temb = pe_table[t]                                   # embedding gather (glue)
        x_rows = jnp.transpose(x, (0, 2, 1)).reshape(m0, C_IN)
        y_rows = pl.pallas_call(
            kernel,
            out_shape=jax.ShapeDtypeStruct((m0, OUT_LANES), jnp.float32),
            in_specs=[pl.BlockSpec(memory_space=pltpu.MemorySpace.VMEM)] * 3,
            out_specs=pl.BlockSpec(memory_space=pltpu.MemorySpace.VMEM),
            compiler_params=pltpu.CompilerParams(vmem_limit_bytes=32 * 1024 * 1024),
        )(x_rows, temb, packed)
        y = y_rows[:, :C_IN].reshape(N_BATCH, Ls[0], C_IN)
        return jnp.transpose(y, (0, 2, 1))                   # back to (N, C, L)
    return forward


# ----------------------------- pure-JAX reference ----------------------------

def _ref_conv1d(x, w, b, stride=1, pad=0):
    y = jax.lax.conv_general_dilated(
        x[:, :, :, None], w[:, :, :, None],
        window_strides=(stride, 1), padding=[(pad, pad), (0, 0)],
        dimension_numbers=('NCHW', 'OIHW', 'NCHW'),
        precision=jax.lax.Precision.HIGHEST)
    return y[:, :, :, 0] + b[None, :, None]


def _ref_convT1d(x, w, b):                  # ConvTranspose1d(k=2, stride=2)
    y = jnp.einsum('ncl,cok->nolk', x, w, precision=jax.lax.Precision.HIGHEST)
    n, co, L, k = y.shape
    return y.reshape(n, co, L * k) + b[None, :, None]


def _ref_ln(x, g, b):
    mean = jnp.mean(x, axis=(1, 2), keepdims=True)
    var = jnp.mean(jnp.square(x - mean), axis=(1, 2), keepdims=True)
    return (x - mean) / jnp.sqrt(var + EPS) * g[None] + b[None]


def _ref_block(x, bp):
    h = _ref_ln(x, bp['ln_w'], bp['ln_b'])
    h = jnp.maximum(_ref_conv1d(h, bp['w1'], bp['b1'], 1, 1), 0.0)
    h = _ref_conv1d(h, bp['w2'], bp['b2'], 1, 1)
    return jnp.maximum(h, 0.0)


def ref_forward(x, t, p):
    def lin(l, h):
        return h @ l['w'].T + l['b']
    temb = p['pe_table'][t]
    skips = []
    for i in range(LAYERS - 1):
        l0, l1 = p['pe_en'][i]
        pe = lin(l1, jnp.maximum(lin(l0, temb), 0.0))
        x = x + pe[:, :, None]
        for bp in p['enc'][i]:
            x = _ref_block(x, bp)
        skips.append(x)
        x = _ref_conv1d(x, p['down'][i]['w'], p['down'][i]['b'], stride=2, pad=0)
    x = x + lin(p['pe_mid'], temb)[:, :, None]
    for bp in p['mid']:
        x = _ref_block(x, bp)
    for i in range(LAYERS - 1):
        pe = lin(p['pe_de'][i], temb)
        x = _ref_convT1d(x, p['up'][i]['w'], p['up'][i]['b'])
        x = jnp.concatenate([skips[LAYERS - 2 - i], x], axis=1)
        x = x + pe[:, :, None]
        for bp in p['dec'][i]:
            x = _ref_block(x, bp)
    return _ref_conv1d(x, p['out']['w'], p['out']['b'], 1, 1)


# ---------------------------------- main --------------------------------------

if __name__ == "__main__":
    key = jax.random.PRNGKey(0)
    kp, kx, kt = jax.random.split(key, 3)
    params = init_params(kp)
    x = jax.random.normal(kx, (N_BATCH, C_IN, W_IN), jnp.float32)
    t = jax.random.randint(kt, (N_BATCH,), 0, N_STEPS)

    packed_np, index = pack_params(params)       # host-side repack, once, outside jit
    packed = jnp.asarray(packed_np)

    forward = make_forward(index)
    out = jax.block_until_ready(forward(x, t, params['pe_table'], packed))
    assert out.shape == (N_BATCH, C_IN, W_IN), out.shape

    ref = ref_forward(x, t, params)
    err = float(jnp.max(jnp.abs(out - ref)))
    if not bool(jnp.allclose(out, ref, atol=2e-2, rtol=2e-2)):
        raise SystemExit("mismatch vs reference: max abs err %.3e" % err)

    print("KERNEL_OK")
</pallas_src>

<mosaic_0001>
module attributes {stable_mosaic.version = 11 : i64} {
  func.func @kernel(%arg0: memref<32x1xf32, #tpu.memory_space<vmem>>, %arg1: memref<2x10xf32, #tpu.memory_space<vmem>>, %arg2: memref<4944x128xf32, #tpu.memory_space<vmem>>, %arg3: memref<32x128xf32, #tpu.memory_space<vmem>>) attributes {dimension_semantics = [], scalar_prefetch = 0 : i64, scratch_operands = 0 : i64, tpu.core_type = #tpu.core_type<tc>} {
    %c4480 = arith.constant 4480 : index
    %c0 = arith.constant 0 : index
    %0 = vector.load %arg2[%c4480, %c0] : memref<4944x128xf32, #tpu.memory_space<vmem>>, vector<32x32xf32>
    %c4512 = arith.constant 4512 : index
    %c0_0 = arith.constant 0 : index
    %1 = vector.load %arg2[%c4512, %c0_0] : memref<4944x128xf32, #tpu.memory_space<vmem>>, vector<32x32xf32>
    %c4416 = arith.constant 4416 : index
    %c0_1 = arith.constant 0 : index
    %2 = vector.load %arg2[%c4416, %c0_1] : memref<4944x128xf32, #tpu.memory_space<vmem>>, vector<16x16xf32>
    %c4432 = arith.constant 4432 : index
    %c0_2 = arith.constant 0 : index
    %3 = vector.load %arg2[%c4432, %c0_2] : memref<4944x128xf32, #tpu.memory_space<vmem>>, vector<16x16xf32>
    %c4352 = arith.constant 4352 : index
    %c0_3 = arith.constant 0 : index
    %4 = vector.load %arg2[%c4352, %c0_3] : memref<4944x128xf32, #tpu.memory_space<vmem>>, vector<4x4xf32>
    %c4360 = arith.constant 4360 : index
    %c0_4 = arith.constant 0 : index
    %5 = vector.load %arg2[%c4360, %c0_4] : memref<4944x128xf32, #tpu.memory_space<vmem>>, vector<4x4xf32>
    %c4384 = arith.constant 4384 : index
    %c0_5 = arith.constant 0 : index
    %6 = vector.load %arg2[%c4384, %c0_5] : memref<4944x128xf32, #tpu.memory_space<vmem>>, vector<8x8xf32>
    %c4392 = arith.constant 4392 : index
    %c0_6 = arith.constant 0 : index
    %7 = vector.load %arg2[%c4392, %c0_6] : memref<4944x128xf32, #tpu.memory_space<vmem>>, vector<8x8xf32>
    %c4544 = arith.constant 4544 : index
    %c0_7 = arith.constant 0 : index
    %8 = vector.load %arg2[%c4544, %c0_7] : memref<4944x128xf32, #tpu.memory_space<vmem>>, vector<32x32xf32>
    %c4448 = arith.constant 4448 : index
    %c0_8 = arith.constant 0 : index
    %9 = vector.load %arg2[%c4448, %c0_8] : memref<4944x128xf32, #tpu.memory_space<vmem>>, vector<16x16xf32>
    %c4368 = arith.constant 4368 : index
    %c0_9 = arith.constant 0 : index
    %10 = vector.load %arg2[%c4368, %c0_9] : memref<4944x128xf32, #tpu.memory_space<vmem>>, vector<4x4xf32>
    %c4400 = arith.constant 4400 : index
    %c0_10 = arith.constant 0 : index
    %11 = vector.load %arg2[%c4400, %c0_10] : memref<4944x128xf32, #tpu.memory_space<vmem>>, vector<8x8xf32>
    %c4576 = arith.constant 4576 : index
    %c0_11 = arith.constant 0 : index
    %12 = vector.load %arg2[%c4576, %c0_11] : memref<4944x128xf32, #tpu.memory_space<vmem>>, vector<32x2xf32>
    %c4464 = arith.constant 4464 : index
    %c0_12 = arith.constant 0 : index
    %13 = vector.load %arg2[%c4464, %c0_12] : memref<4944x128xf32, #tpu.memory_space<vmem>>, vector<16x2xf32>
    %c4376 = arith.constant 4376 : index
    %c0_13 = arith.constant 0 : index
    %14 = vector.load %arg2[%c4376, %c0_13] : memref<4944x128xf32, #tpu.memory_space<vmem>>, vector<4x2xf32>
    %c4408 = arith.constant 4408 : index
    %c0_14 = arith.constant 0 : index
    %15 = vector.load %arg2[%c4408, %c0_14] : memref<4944x128xf32, #tpu.memory_space<vmem>>, vector<8x2xf32>
    %c0_15 = arith.constant 0 : index
    %c0_16 = arith.constant 0 : index
    %16 = vector.load %arg1[%c0_15, %c0_16] : memref<2x10xf32, #tpu.memory_space<vmem>>, vector<2x10xf32>
    %c0_17 = arith.constant 0 : index
    %c0_18 = arith.constant 0 : index
    %17 = vector.load %arg0[%c0_17, %c0_18] : memref<32x1xf32, #tpu.memory_space<vmem>>, vector<32x1xf32>
    %c0_19 = arith.constant 0 : index
    %c0_20 = arith.constant 0 : index
    %18 = vector.load %arg2[%c0_19, %c0_20] : memref<4944x128xf32, #tpu.memory_space<vmem>>, vector<10x1xf32>
    %cst = arith.constant dense<0.000000e+00> : vector<2x1xf32>
    %19 = tpu.matmul %16, %18, %cst {dimension_numbers = #tpu.dot_dimension_numbers<[1], [0], [0], [1], [0, 0, 1, 1], [], []>} : vector<2x10xf32>, vector<10x1xf32>, vector<2x1xf32> -> vector<2x1xf32>
    %c16 = arith.constant 16 : index
    %c0_21 = arith.constant 0 : index
    %20 = vector.load %arg2[%c16, %c0_21] : memref<4944x128xf32, #tpu.memory_space<vmem>>, vector<1x1xf32>
    %21 = vector.broadcast %20 : vector<1x1xf32> to vector<2x1xf32>
    %22 = arith.addf %19, %21 : vector<2x1xf32>
    %cst_22 = arith.constant 0.000000e+00 : f32
    %23 = vector.broadcast %cst_22 : f32 to vector<2x1xf32>
    %24 = arith.maximumf %22, %23 : vector<2x1xf32>
    %c24 = arith.constant 24 : index
    %c0_23 = arith.constant 0 : index
    %25 = vector.load %arg2[%c24, %c0_23] : memref<4944x128xf32, #tpu.memory_space<vmem>>, vector<1x1xf32>
    %26 = vector.broadcast %25 : vector<1x1xf32> to vector<2x1xf32>
    %27 = arith.mulf %24, %26 : vector<2x1xf32>
    %c32 = arith.constant 32 : index
    %c0_24 = arith.constant 0 : index
    %28 = vector.load %arg2[%c32, %c0_24] : memref<4944x128xf32, #tpu.memory_space<vmem>>, vector<1x1xf32>
    %29 = vector.broadcast %28 : vector<1x1xf32> to vector<2x1xf32>
    %30 = arith.addf %27, %29 : vector<2x1xf32>
    %cst_25 = arith.constant dense<0.000000e+00> : vector<32x1xf32>
    %31 = tpu.matmul %12, %30, %cst_25 {dimension_numbers = #tpu.dot_dimension_numbers<[1], [0], [0], [1], [0, 0, 1, 1], [], []>} : vector<32x2xf32>, vector<2x1xf32>, vector<32x1xf32> -> vector<32x1xf32>
    %32 = arith.addf %17, %31 : vector<32x1xf32>
    %cst_26 = arith.constant dense<0.000000e+00> : vector<32xf32>
    %33 = vector.multi_reduction <add>, %32, %cst_26 [1] : vector<32x1xf32> to vector<32xf32>
    %34 = vector.shape_cast %33 : vector<32xf32> to vector<32x1xf32>
    %cst_27 = arith.constant dense<0.000000e+00> : vector<32x1xf32>
    %35 = tpu.matmul %8, %34, %cst_27 {dimension_numbers = #tpu.dot_dimension_numbers<[1], [0], [0], [1], [0, 0, 1, 1], [], []>} : vector<32x32xf32>, vector<32x1xf32>, vector<32x1xf32> -> vector<32x1xf32>
    %cst_28 = arith.constant 6.250000e-02 : f32
    %36 = vector.broadcast %cst_28 : f32 to vector<32x1xf32>
    %37 = arith.mulf %35, %36 : vector<32x1xf32>
    %38 = arith.mulf %32, %32 : vector<32x1xf32>
    %cst_29 = arith.constant dense<0.000000e+00> : vector<32xf32>
    %39 = vector.multi_reduction <add>, %38, %cst_29 [1] : vector<32x1xf32> to vector<32xf32>
    %40 = vector.shape_cast %39 : vector<32xf32> to vector<32x1xf32>
    %cst_30 = arith.constant dense<0.000000e+00> : vector<32x1xf32>
    %41 = tpu.matmul %8, %40, %cst_30 {dimension_numbers = #tpu.dot_dimension_numbers<[1], [0], [0], [1], [0, 0, 1, 1], [], []>} : vector<32x32xf32>, vector<32x1xf32>, vector<32x1xf32> -> vector<32x1xf32>
    %cst_31 = arith.constant 6.250000e-02 : f32
    %42 = vector.broadcast %cst_31 : f32 to vector<32x1xf32>
    %43 = arith.mulf %41, %42 : vector<32x1xf32>
    %44 = arith.subf %32, %37 : vector<32x1xf32>
    %45 = arith.mulf %37, %37 : vector<32x1xf32>
    %46 = arith.subf %43, %45 : vector<32x1xf32>
    %cst_32 = arith.constant 9.99999974E-6 : f32
    %47 = vector.broadcast %cst_32 : f32 to vector<32x1xf32>
    %48 = arith.addf %46, %47 : vector<32x1xf32>
    %49 = math.rsqrt %48 : vector<32x1xf32>
    %50 = arith.mulf %44, %49 : vector<32x1xf32>
    %c40 = arith.constant 40 : index
    %c0_33 = arith.constant 0 : index
    %51 = vector.load %arg2[%c40, %c0_33] : memref<4944x128xf32, #tpu.memory_space<vmem>>, vector<32x1xf32>
    %52 = arith.mulf %50, %51 : vector<32x1xf32>
    %c72 = arith.constant 72 : index
    %c0_34 = arith.constant 0 : index
    %53 = vector.load %arg2[%c72, %c0_34] : memref<4944x128xf32, #tpu.memory_space<vmem>>, vector<32x1xf32>
    %54 = arith.addf %52, %53 : vector<32x1xf32>
    %c112 = arith.constant 112 : index
    %c0_35 = arith.constant 0 : index
    %55 = vector.load %arg2[%c112, %c0_35] : memref<4944x128xf32, #tpu.memory_space<vmem>>, vector<1x10xf32>
    %56 = vector.broadcast %54 : vector<32x1xf32> to vector<32x10xf32>
    %57 = vector.broadcast %55 : vector<1x10xf32> to vector<32x10xf32>
    %58 = arith.mulf %56, %57 : vector<32x10xf32>
    %cst_36 = arith.constant dense<0.000000e+00> : vector<32x1xf32>
    %59 = tpu.matmul %0, %54, %cst_36 {dimension_numbers = #tpu.dot_dimension_numbers<[1], [0], [0], [1], [0, 0, 1, 1], [], []>} : vector<32x32xf32>, vector<32x1xf32>, vector<32x1xf32> -> vector<32x1xf32>
    %c104 = arith.constant 104 : index
    %c0_37 = arith.constant 0 : index
    %60 = vector.load %arg2[%c104, %c0_37] : memref<4944x128xf32, #tpu.memory_space<vmem>>, vector<1x10xf32>
    %61 = vector.broadcast %59 : vector<32x1xf32> to vector<32x10xf32>
    %62 = vector.broadcast %60 : vector<1x10xf32> to vector<32x10xf32>
    %63 = arith.mulf %61, %62 : vector<32x10xf32>
    %64 = arith.addf %58, %63 : vector<32x10xf32>
    %cst_38 = arith.constant dense<0.000000e+00> : vector<32x1xf32>
    %65 = tpu.matmul %1, %54, %cst_38 {dimension_numbers = #tpu.dot_dimension_numbers<[1], [0], [0], [1], [0, 0, 1, 1], [], []>} : vector<32x32xf32>, vector<32x1xf32>, vector<32x1xf32> -> vector<32x1xf32>
    %c120 = arith.constant 120 : index
    %c0_39 = arith.constant 0 : index
    %66 = vector.load %arg2[%c120, %c0_39] : memref<4944x128xf32, #tpu.memory_space<vmem>>, vector<1x10xf32>
    %67 = vector.broadcast %65 : vector<32x1xf32> to vector<32x10xf32>
    %68 = vector.broadcast %66 : vector<1x10xf32> to vector<32x10xf32>
    %69 = arith.mulf %67, %68 : vector<32x10xf32>
    %70 = arith.addf %64, %69 : vector<32x10xf32>
    %c128 = arith.constant 128 : index
    %c0_40 = arith.constant 0 : index
    %71 = vector.load %arg2[%c128, %c0_40] : memref<4944x128xf32, #tpu.memory_space<vmem>>, vector<1x10xf32>
    %72 = vector.broadcast %71 : vector<1x10xf32> to vector<32x10xf32>
    %73 = arith.addf %70, %72 : vector<32x10xf32>
    %cst_41 = arith.constant 0.000000e+00 : f32
    %74 = vector.broadcast %cst_41 : f32 to vector<32x10xf32>
    %75 = arith.maximumf %73, %74 : vector<32x10xf32>
    %c152 = arith.constant 152 : index
    %c0_42 = arith.constant 0 : index
    %76 = vector.load %arg2[%c152, %c0_42] : memref<4944x128xf32, #tpu.memory_space<vmem>>, vector<10x10xf32>
    %cst_43 = arith.constant dense<0.000000e+00> : vector<32x10xf32>
    %77 = tpu.matmul %75, %76, %cst_43 {dimension_numbers = #tpu.dot_dimension_numbers<[1], [0], [0], [1], [0, 0, 1, 1], [], []>} : vector<32x10xf32>, vector<10x10xf32>, vector<32x10xf32> -> vector<32x10xf32>
    %cst_44 = arith.constant dense<0.000000e+00> : vector<32x10xf32>
    %78 = tpu.matmul %0, %75, %cst_44 {dimension_numbers = #tpu.dot_dimension_numbers<[1], [0], [0], [1], [0, 0, 1, 1], [], []>} : vector<32x32xf32>, vector<32x10xf32>, vector<32x10xf32> -> vector<32x10xf32>
    %c136 = arith.constant 136 : index
    %c0_45 = arith.constant 0 : index
    %79 = vector.load %arg2[%c136, %c0_45] : memref<4944x128xf32, #tpu.memory_space<vmem>>, vector<10x10xf32>
    %cst_46 = arith.constant dense<0.000000e+00> : vector<32x10xf32>
    %80 = tpu.matmul %78, %79, %cst_46 {dimension_numbers = #tpu.dot_dimension_numbers<[1], [0], [0], [1], [0, 0, 1, 1], [], []>} : vector<32x10xf32>, vector<10x10xf32>, vector<32x10xf32> -> vector<32x10xf32>
    %81 = arith.addf %77, %80 : vector<32x10xf32>
    %cst_47 = arith.constant dense<0.000000e+00> : vector<32x10xf32>
    %82 = tpu.matmul %1, %75, %cst_47 {dimension_numbers = #tpu.dot_dimension_numbers<[1], [0], [0], [1], [0, 0, 1, 1], [], []>} : vector<32x32xf32>, vector<32x10xf32>, vector<32x10xf32> -> vector<32x10xf32>
    %c168 = arith.constant 168 : index
    %c0_48 = arith.constant 0 : index
    %83 = vector.load %arg2[%c168, %c0_48] : memref<4944x128xf32, #tpu.memory_space<vmem>>, vector<10x10xf32>
    %cst_49 = arith.constant dense<0.000000e+00> : vector<32x10xf32>
    %84 = tpu.matmul %82, %83, %cst_49 {dimension_numbers = #tpu.dot_dimension_numbers<[1], [0], [0], [1], [0, 0, 1, 1], [], []>} : vector<32x10xf32>, vector<10x10xf32>, vector<32x10xf32> -> vector<32x10xf32>
    %85 = arith.addf %81, %84 : vector<32x10xf32>
    %c184 = arith.constant 184 : index
    %c0_50 = arith.constant 0 : index
    %86 = vector.load %arg2[%c184, %c0_50] : memref<4944x128xf32, #tpu.memory_space<vmem>>, vector<1x10xf32>
    %87 = vector.broadcast %86 : vector<1x10xf32> to vector<32x10xf32>
    %88 = arith.addf %85, %87 : vector<32x10xf32>
    %cst_51 = arith.constant 0.000000e+00 : f32
    %89 = vector.broadcast %cst_51 : f32 to vector<32x10xf32>
    %90 = arith.maximumf %88, %89 : vector<32x10xf32>
    %cst_52 = arith.constant dense<0.000000e+00> : vector<32xf32>
    %91 = vector.multi_reduction <add>, %90, %cst_52 [1] : vector<32x10xf32> to vector<32xf32>
    %92 = vector.shape_cast %91 : vector<32xf32> to vector<32x1xf32>
    %cst_53 = arith.constant dense<0.000000e+00> : vector<32x1xf32>
    %93 = tpu.matmul %8, %92, %cst_53 {dimension_numbers = #tpu.dot_dimension_numbers<[1], [0], [0], [1], [0, 0, 1, 1], [], []>} : vector<32x32xf32>, vector<32x1xf32>, vector<32x1xf32> -> vector<32x1xf32>
    %cst_54 = arith.constant 6.250000e-03 : f32
    %94 = vector.broadcast %cst_54 : f32 to vector<32x1xf32>
    %95 = arith.mulf %93, %94 : vector<32x1xf32>
    %96 = arith.mulf %90, %90 : vector<32x10xf32>
    %cst_55 = arith.constant dense<0.000000e+00> : vector<32xf32>
    %97 = vector.multi_reduction <add>, %96, %cst_55 [1] : vector<32x10xf32> to vector<32xf32>
    %98 = vector.shape_cast %97 : vector<32xf32> to vector<32x1xf32>
    %cst_56 = arith.constant dense<0.000000e+00> : vector<32x1xf32>
    %99 = tpu.matmul %8, %98, %cst_56 {dimension_numbers = #tpu.dot_dimension_numbers<[1], [0], [0], [1], [0, 0, 1, 1], [], []>} : vector<32x32xf32>, vector<32x1xf32>, vector<32x1xf32> -> vector<32x1xf32>
    %cst_57 = arith.constant 6.250000e-03 : f32
    %100 = vector.broadcast %cst_57 : f32 to vector<32x1xf32>
    %101 = arith.mulf %99, %100 : vector<32x1xf32>
    %102 = vector.broadcast %95 : vector<32x1xf32> to vector<32x10xf32>
    %103 = arith.subf %90, %102 : vector<32x10xf32>
    %104 = arith.mulf %95, %95 : vector<32x1xf32>
    %105 = arith.subf %101, %104 : vector<32x1xf32>
    %cst_58 = arith.constant 9.99999974E-6 : f32
    %106 = vector.broadcast %cst_58 : f32 to vector<32x1xf32>
    %107 = arith.addf %105, %106 : vector<32x1xf32>
    %108 = math.rsqrt %107 : vector<32x1xf32>
    %109 = vector.broadcast %108 : vector<32x1xf32> to vector<32x10xf32>
    %110 = arith.mulf %103, %109 : vector<32x10xf32>
    %c192 = arith.constant 192 : index
    %c0_59 = arith.constant 0 : index
    %111 = vector.load %arg2[%c192, %c0_59] : memref<4944x128xf32, #tpu.memory_space<vmem>>, vector<32x10xf32>
    %112 = arith.mulf %110, %111 : vector<32x10xf32>
    %c224 = arith.constant 224 : index
    %c0_60 = arith.constant 0 : index
    %113 = vector.load %arg2[%c224, %c0_60] : memref<4944x128xf32, #tpu.memory_space<vmem>>, vector<32x10xf32>
    %114 = arith.addf %112, %113 : vector<32x10xf32>
    %c272 = arith.constant 272 : index
    %c0_61 = arith.constant 0 : index
    %115 = vector.load %arg2[%c272, %c0_61] : memref<4944x128xf32, #tpu.memory_space<vmem>>, vector<10x10xf32>
    %cst_62 = arith.constant dense<0.000000e+00> : vector<32x10xf32>
    %116 = tpu.matmul %114, %115, %cst_62 {dimension_numbers = #tpu.dot_dimension_numbers<[1], [0], [0], [1], [0, 0, 1, 1], [], []>} : vector<32x10xf32>, vector<10x10xf32>, vector<32x10xf32> -> vector<32x10xf32>
    %cst_63 = arith.constant dense<0.000000e+00> : vector<32x10xf32>
    %117 = tpu.matmul %0, %114, %cst_63 {dimension_numbers = #tpu.dot_dimension_numbers<[1], [0], [0], [1], [0, 0, 1, 1], [], []>} : vector<32x32xf32>, vector<32x10xf32>, vector<32x10xf32> -> vector<32x10xf32>
    %c256 = arith.constant 256 : index
    %c0_64 = arith.constant 0 : index
    %118 = vector.load %arg2[%c256, %c0_64] : memref<4944x128xf32, #tpu.memory_space<vmem>>, vector<10x10xf32>
    %cst_65 = arith.constant dense<0.000000e+00> : vector<32x10xf32>
    %119 = tpu.matmul %117, %118, %cst_65 {dimension_numbers = #tpu.dot_dimension_numbers<[1], [0], [0], [1], [0, 0, 1, 1], [], []>} : vector<32x10xf32>, vector<10x10xf32>, vector<32x10xf32> -> vector<32x10xf32>
    %120 = arith.addf %116, %119 : vector<32x10xf32>
    %cst_66 = arith.constant dense<0.000000e+00> : vector<32x10xf32>
    %121 = tpu.matmul %1, %114, %cst_66 {dimension_numbers = #tpu.dot_dimension_numbers<[1], [0], [0], [1], [0, 0, 1, 1], [], []>} : vector<32x32xf32>, vector<32x10xf32>, vector<32x10xf32> -> vector<32x10xf32>
    %c288 = arith.constant 288 : index
    %c0_67 = arith.constant 0 : index
    %122 = vector.load %arg2[%c288, %c0_67] : memref<4944x128xf32, #tpu.memory_space<vmem>>, vector<10x10xf32>
    %cst_68 = arith.constant dense<0.000000e+00> : vector<32x10xf32>
    %123 = tpu.matmul %121, %122, %cst_68 {dimension_numbers = #tpu.dot_dimension_numbers<[1], [0], [0], [1], [0, 0, 1, 1], [], []>} : vector<32x10xf32>, vector<10x10xf32>, vector<32x10xf32> -> vector<32x10xf32>
    %124 = arith.addf %120, %123 : vector<32x10xf32>
    %c304 = arith.constant 304 : index
    %c0_69 = arith.constant 0 : index
    %125 = vector.load %arg2[%c304, %c0_69] : memref<4944x128xf32, #tpu.memory_space<vmem>>, vector<1x10xf32>
    %126 = vector.broadcast %125 : vector<1x10xf32> to vector<32x10xf32>
    %127 = arith.addf %124, %126 : vector<32x10xf32>
    %cst_70 = arith.constant 0.000000e+00 : f32
    %128 = vector.broadcast %cst_70 : f32 to vector<32x10xf32>
    %129 = arith.maximumf %127, %128 : vector<32x10xf32>
    %c328 = arith.constant 328 : index
    %c0_71 = arith.constant 0 : index
    %130 = vector.load %arg2[%c328, %c0_71] : memref<4944x128xf32, #tpu.memory_space<vmem>>, vector<10x10xf32>
    %cst_72 = arith.constant dense<0.000000e+00> : vector<32x10xf32>
    %131 = tpu.matmul %129, %130, %cst_72 {dimension_numbers = #tpu.dot_dimension_numbers<[1], [0], [0], [1], [0, 0, 1, 1], [], []>} : vector<32x10xf32>, vector<10x10xf32>, vector<32x10xf32> -> vector<32x10xf32>
    %cst_73 = arith.constant dense<0.000000e+00> : vector<32x10xf32>
    %132 = tpu.matmul %0, %129, %cst_73 {dimension_numbers = #tpu.dot_dimension_numbers<[1], [0], [0], [1], [0, 0, 1, 1], [], []>} : vector<32x32xf32>, vector<32x10xf32>, vector<32x10xf32> -> vector<32x10xf32>
    %c312 = arith.constant 312 : index
    %c0_74 = arith.constant 0 : index
    %133 = vector.load %arg2[%c312, %c0_74] : memref<4944x128xf32, #tpu.memory_space<vmem>>, vector<10x10xf32>
    %cst_75 = arith.constant dense<0.000000e+00> : vector<32x10xf32>
    %134 = tpu.matmul %132, %133, %cst_75 {dimension_numbers = #tpu.dot_dimension_numbers<[1], [0], [0], [1], [0, 0, 1, 1], [], []>} : vector<32x10xf32>, vector<10x10xf32>, vector<32x10xf32> -> vector<32x10xf32>
    %135 = arith.addf %131, %134 : vector<32x10xf32>
    %cst_76 = arith.constant dense<0.000000e+00> : vector<32x10xf32>
    %136 = tpu.matmul %1, %129, %cst_76 {dimension_numbers = #tpu.dot_dimension_numbers<[1], [0], [0], [1], [0, 0, 1, 1], [], []>} : vector<32x32xf32>, vector<32x10xf32>, vector<32x10xf32> -> vector<32x10xf32>
    %c344 = arith.constant 344 : index
    %c0_77 = arith.constant 0 : index
    %137 = vector.load %arg2[%c344, %c0_77] : memref<4944x128xf32, #tpu.memory_space<vmem>>, vector<10x10xf32>
    %cst_78 = arith.constant dense<0.000000e+00> : vector<32x10xf32>
    %138 = tpu.matmul %136, %137, %cst_78 {dimension_numbers = #tpu.dot_dimension_numbers<[1], [0], [0], [1], [0, 0, 1, 1], [], []>} : vector<32x10xf32>, vector<10x10xf32>, vector<32x10xf32> -> vector<32x10xf32>
    %139 = arith.addf %135, %138 : vector<32x10xf32>
    %c360 = arith.constant 360 : index
    %c0_79 = arith.constant 0 : index
    %140 = vector.load %arg2[%c360, %c0_79] : memref<4944x128xf32, #tpu.memory_space<vmem>>, vector<1x10xf32>
    %141 = vector.broadcast %140 : vector<1x10xf32> to vector<32x10xf32>
    %142 = arith.addf %139, %141 : vector<32x10xf32>
    %cst_80 = arith.constant 0.000000e+00 : f32
    %143 = vector.broadcast %cst_80 : f32 to vector<32x10xf32>
    %144 = arith.maximumf %142, %143 : vector<32x10xf32>
    %c4608 = arith.constant 4608 : index
    %c0_81 = arith.constant 0 : index
    %145 = vector.load %arg2[%c4608, %c0_81] : memref<4944x128xf32, #tpu.memory_space<vmem>>, vector<16x32xf32>
    %c4624 = arith.constant 4624 : index
    %c0_82 = arith.constant 0 : index
    %146 = vector.load %arg2[%c4624, %c0_82] : memref<4944x128xf32, #tpu.memory_space<vmem>>, vector<16x32xf32>
    %cst_83 = arith.constant dense<0.000000e+00> : vector<16x10xf32>
    %147 = tpu.matmul %145, %144, %cst_83 {dimension_numbers = #tpu.dot_dimension_numbers<[1], [0], [0], [1], [0, 0, 1, 1], [], []>} : vector<16x32xf32>, vector<32x10xf32>, vector<16x10xf32> -> vector<16x10xf32>
    %c368 = arith.constant 368 : index
    %c0_84 = arith.constant 0 : index
    %148 = vector.load %arg2[%c368, %c0_84] : memref<4944x128xf32, #tpu.memory_space<vmem>>, vector<10x10xf32>
    %cst_85 = arith.constant dense<0.000000e+00> : vector<16x10xf32>
    %149 = tpu.matmul %147, %148, %cst_85 {dimension_numbers = #tpu.dot_dimension_numbers<[1], [0], [0], [1], [0, 0, 1, 1], [], []>} : vector<16x10xf32>, vector<10x10xf32>, vector<16x10xf32> -> vector<16x10xf32>
    %cst_86 = arith.constant dense<0.000000e+00> : vector<16x10xf32>
    %150 = tpu.matmul %146, %144, %cst_86 {dimension_numbers = #tpu.dot_dimension_numbers<[1], [0], [0], [1], [0, 0, 1, 1], [], []>} : vector<16x32xf32>, vector<32x10xf32>, vector<16x10xf32> -> vector<16x10xf32>
    %c384 = arith.constant 384 : index
    %c0_87 = arith.constant 0 : index
    %151 = vector.load %arg2[%c384, %c0_87] : memref<4944x128xf32, #tpu.memory_space<vmem>>, vector<10x10xf32>
    %cst_88 = arith.constant dense<0.000000e+00> : vector<16x10xf32>
    %152 = tpu.matmul %150, %151, %cst_88 {dimension_numbers = #tpu.dot_dimension_numbers<[1], [0], [0], [1], [0, 0, 1, 1], [], []>} : vector<16x10xf32>, vector<10x10xf32>, vector<16x10xf32> -> vector<16x10xf32>
    %153 = arith.addf %149, %152 : vector<16x10xf32>
    %c400 = arith.constant 400 : index
    %c0_89 = arith.constant 0 : index
    %154 = vector.load %arg2[%c400, %c0_89] : memref<4944x128xf32, #tpu.memory_space<vmem>>, vector<1x10xf32>
    %155 = vector.broadcast %154 : vector<1x10xf32> to vector<16x10xf32>
    %156 = arith.addf %153, %155 : vector<16x10xf32>
    %c408 = arith.constant 408 : index
    %c0_90 = arith.constant 0 : index
    %157 = vector.load %arg2[%c408, %c0_90] : memref<4944x128xf32, #tpu.memory_space<vmem>>, vector<10x10xf32>
    %cst_91 = arith.constant dense<0.000000e+00> : vector<2x10xf32>
    %158 = tpu.matmul %16, %157, %cst_91 {dimension_numbers = #tpu.dot_dimension_numbers<[1], [0], [0], [1], [0, 0, 1, 1], [], []>} : vector<2x10xf32>, vector<10x10xf32>, vector<2x10xf32> -> vector<2x10xf32>
    %c424 = arith.constant 424 : index
    %c0_92 = arith.constant 0 : index
    %159 = vector.load %arg2[%c424, %c0_92] : memref<4944x128xf32, #tpu.memory_space<vmem>>, vector<1x10xf32>
    %160 = vector.broadcast %159 : vector<1x10xf32> to vector<2x10xf32>
    %161 = arith.addf %158, %160 : vector<2x10xf32>
    %cst_93 = arith.constant 0.000000e+00 : f32
    %162 = vector.broadcast %cst_93 : f32 to vector<2x10xf32>
    %163 = arith.maximumf %161, %162 : vector<2x10xf32>
    %c432 = arith.constant 432 : index
    %c0_94 = arith.constant 0 : index
    %164 = vector.load %arg2[%c432, %c0_94] : memref<4944x128xf32, #tpu.memory_space<vmem>>, vector<10x10xf32>
    %cst_95 = arith.constant dense<0.000000e+00> : vector<2x10xf32>
    %165 = tpu.matmul %163, %164, %cst_95 {dimension_numbers = #tpu.dot_dimension_numbers<[1], [0], [0], [1], [0, 0, 1, 1], [], []>} : vector<2x10xf32>, vector<10x10xf32>, vector<2x10xf32> -> vector<2x10xf32>
    %c448 = arith.constant 448 : index
    %c0_96 = arith.constant 0 : index
    %166 = vector.load %arg2[%c448, %c0_96] : memref<4944x128xf32, #tpu.memory_space<vmem>>, vector<1x10xf32>
    %167 = vector.broadcast %166 : vector<1x10xf32> to vector<2x10xf32>
    %168 = arith.addf %165, %167 : vector<2x10xf32>
    %cst_97 = arith.constant dense<0.000000e+00> : vector<16x10xf32>
    %169 = tpu.matmul %13, %168, %cst_97 {dimension_numbers = #tpu.dot_dimension_numbers<[1], [0], [0], [1], [0, 0, 1, 1], [], []>} : vector<16x2xf32>, vector<2x10xf32>, vector<16x10xf32> -> vector<16x10xf32>
    %170 = arith.addf %156, %169 : vector<16x10xf32>
    %cst_98 = arith.constant dense<0.000000e+00> : vector<16xf32>
    %171 = vector.multi_reduction <add>, %170, %cst_98 [1] : vector<16x10xf32> to vector<16xf32>
    %172 = vector.shape_cast %171 : vector<16xf32> to vector<16x1xf32>
    %cst_99 = arith.constant dense<0.000000e+00> : vector<16x1xf32>
    %173 = tpu.matmul %9, %172, %cst_99 {dimension_numbers = #tpu.dot_dimension_numbers<[1], [0], [0], [1], [0, 0, 1, 1], [], []>} : vector<16x16xf32>, vector<16x1xf32>, vector<16x1xf32> -> vector<16x1xf32>
    %cst_100 = arith.constant 1.250000e-02 : f32
    %174 = vector.broadcast %cst_100 : f32 to vector<16x1xf32>
    %175 = arith.mulf %173, %174 : vector<16x1xf32>
    %176 = arith.mulf %170, %170 : vector<16x10xf32>
    %cst_101 = arith.constant dense<0.000000e+00> : vector<16xf32>
    %177 = vector.multi_reduction <add>, %176, %cst_101 [1] : vector<16x10xf32> to vector<16xf32>
    %178 = vector.shape_cast %177 : vector<16xf32> to vector<16x1xf32>
    %cst_102 = arith.constant dense<0.000000e+00> : vector<16x1xf32>
    %179 = tpu.matmul %9, %178, %cst_102 {dimension_numbers = #tpu.dot_dimension_numbers<[1], [0], [0], [1], [0, 0, 1, 1], [], []>} : vector<16x16xf32>, vector<16x1xf32>, vector<16x1xf32> -> vector<16x1xf32>
    %cst_103 = arith.constant 1.250000e-02 : f32
    %180 = vector.broadcast %cst_103 : f32 to vector<16x1xf32>
    %181 = arith.mulf %179, %180 : vector<16x1xf32>
    %182 = vector.broadcast %175 : vector<16x1xf32> to vector<16x10xf32>
    %183 = arith.subf %170, %182 : vector<16x10xf32>
    %184 = arith.mulf %175, %175 : vector<16x1xf32>
    %185 = arith.subf %181, %184 : vector<16x1xf32>
    %cst_104 = arith.constant 9.99999974E-6 : f32
    %186 = vector.broadcast %cst_104 : f32 to vector<16x1xf32>
    %187 = arith.addf %185, %186 : vector<16x1xf32>
    %188 = math.rsqrt %187 : vector<16x1xf32>
    %189 = vector.broadcast %188 : vector<16x1xf32> to vector<16x10xf32>
    %190 = arith.mulf %183, %189 : vector<16x10xf32>
    %c456 = arith.constant 456 : index
    %c0_105 = arith.constant 0 : index
    %191 = vector.load %arg2[%c456, %c0_105] : memref<4944x128xf32, #tpu.memory_space<vmem>>, vector<16x10xf32>
    %192 = arith.mulf %190, %191 : vector<16x10xf32>
    %c472 = arith.constant 472 : index
    %c0_106 = arith.constant 0 : index
    %193 = vector.load %arg2[%c472, %c0_106] : memref<4944x128xf32, #tpu.memory_space<vmem>>, vector<16x10xf32>
    %194 = arith.addf %192, %193 : vector<16x10xf32>
    %c504 = arith.constant 504 : index
    %c0_107 = arith.constant 0 : index
    %195 = vector.load %arg2[%c504, %c0_107] : memref<4944x128xf32, #tpu.memory_space<vmem>>, vector<10x20xf32>
    %cst_108 = arith.constant dense<0.000000e+00> : vector<16x20xf32>
    %196 = tpu.matmul %194, %195, %cst_108 {dimension_numbers = #tpu.dot_dimension_numbers<[1], [0], [0], [1], [0, 0, 1, 1], [], []>} : vector<16x10xf32>, vector<10x20xf32>, vector<16x20xf32> -> vector<16x20xf32>
    %cst_109 = arith.constant dense<0.000000e+00> : vector<16x10xf32>
    %197 = tpu.matmul %2, %194, %cst_109 {dimension_numbers = #tpu.dot_dimension_numbers<[1], [0], [0], [1], [0, 0, 1, 1], [], []>} : vector<16x16xf32>, vector<16x10xf32>, vector<16x10xf32> -> vector<16x10xf32>
    %c488 = arith.constant 488 : index
    %c0_110 = arith.constant 0 : index
    %198 = vector.load %arg2[%c488, %c0_110] : memref<4944x128xf32, #tpu.memory_space<vmem>>, vector<10x20xf32>
    %cst_111 = arith.constant dense<0.000000e+00> : vector<16x20xf32>
    %199 = tpu.matmul %197, %198, %cst_111 {dimension_numbers = #tpu.dot_dimension_numbers<[1], [0], [0], [1], [0, 0, 1, 1], [], []>} : vector<16x10xf32>, vector<10x20xf32>, vector<16x20xf32> -> vector<16x20xf32>
    %200 = arith.addf %196, %199 : vector<16x20xf32>
    %cst_112 = arith.constant dense<0.000000e+00> : vector<16x10xf32>
    %201 = tpu.matmul %3, %194, %cst_112 {dimension_numbers = #tpu.dot_dimension_numbers<[1], [0], [0], [1], [0, 0, 1, 1], [], []>} : vector<16x16xf32>, vector<16x10xf32>, vector<16x10xf32> -> vector<16x10xf32>
    %c520 = arith.constant 520 : index
    %c0_113 = arith.constant 0 : index
    %202 = vector.load %arg2[%c520, %c0_113] : memref<4944x128xf32, #tpu.memory_space<vmem>>, vector<10x20xf32>
    %cst_114 = arith.constant dense<0.000000e+00> : vector<16x20xf32>
    %203 = tpu.matmul %201, %202, %cst_114 {dimension_numbers = #tpu.dot_dimension_numbers<[1], [0], [0], [1], [0, 0, 1, 1], [], []>} : vector<16x10xf32>, vector<10x20xf32>, vector<16x20xf32> -> vector<16x20xf32>
    %204 = arith.addf %200, %203 : vector<16x20xf32>
    %c536 = arith.constant 536 : index
    %c0_115 = arith.constant 0 : index
    %205 = vector.load %arg2[%c536, %c0_115] : memref<4944x128xf32, #tpu.memory_space<vmem>>, vector<1x20xf32>
    %206 = vector.broadcast %205 : vector<1x20xf32> to vector<16x20xf32>
    %207 = arith.addf %204, %206 : vector<16x20xf32>
    %cst_116 = arith.constant 0.000000e+00 : f32
    %208 = vector.broadcast %cst_116 : f32 to vector<16x20xf32>
    %209 = arith.maximumf %207, %208 : vector<16x20xf32>
    %c568 = arith.constant 568 : index
    %c0_117 = arith.constant 0 : index
    %210 = vector.load %arg2[%c568, %c0_117] : memref<4944x128xf32, #tpu.memory_space<vmem>>, vector<20x20xf32>
    %cst_118 = arith.constant dense<0.000000e+00> : vector<16x20xf32>
    %211 = tpu.matmul %209, %210, %cst_118 {dimension_numbers = #tpu.dot_dimension_numbers<[1], [0], [0], [1], [0, 0, 1, 1], [], []>} : vector<16x20xf32>, vector<20x20xf32>, vector<16x20xf32> -> vector<16x20xf32>
    %cst_119 = arith.constant dense<0.000000e+00> : vector<16x20xf32>
    %212 = tpu.matmul %2, %209, %cst_119 {dimension_numbers = #tpu.dot_dimension_numbers<[1], [0], [0], [1], [0, 0, 1, 1], [], []>} : vector<16x16xf32>, vector<16x20xf32>, vector<16x20xf32> -> vector<16x20xf32>
    %c544 = arith.constant 544 : index
    %c0_120 = arith.constant 0 : index
    %213 = vector.load %arg2[%c544, %c0_120] : memref<4944x128xf32, #tpu.memory_space<vmem>>, vector<20x20xf32>
    %cst_121 = arith.constant dense<0.000000e+00> : vector<16x20xf32>
    %214 = tpu.matmul %212, %213, %cst_121 {dimension_numbers = #tpu.dot_dimension_numbers<[1], [0], [0], [1], [0, 0, 1, 1], [], []>} : vector<16x20xf32>, vector<20x20xf32>, vector<16x20xf32> -> vector<16x20xf32>
    %215 = arith.addf %211, %214 : vector<16x20xf32>
    %cst_122 = arith.constant dense<0.000000e+00> : vector<16x20xf32>
    %216 = tpu.matmul %3, %209, %cst_122 {dimension_numbers = #tpu.dot_dimension_numbers<[1], [0], [0], [1], [0, 0, 1, 1], [], []>} : vector<16x16xf32>, vector<16x20xf32>, vector<16x20xf32> -> vector<16x20xf32>
    %c592 = arith.constant 592 : index
    %c0_123 = arith.constant 0 : index
    %217 = vector.load %arg2[%c592, %c0_123] : memref<4944x128xf32, #tpu.memory_space<vmem>>, vector<20x20xf32>
    %cst_124 = arith.constant dense<0.000000e+00> : vector<16x20xf32>
    %218 = tpu.matmul %216, %217, %cst_124 {dimension_numbers = #tpu.dot_dimension_numbers<[1], [0], [0], [1], [0, 0, 1, 1], [], []>} : vector<16x20xf32>, vector<20x20xf32>, vector<16x20xf32> -> vector<16x20xf32>
    %219 = arith.addf %215, %218 : vector<16x20xf32>
    %c616 = arith.constant 616 : index
    %c0_125 = arith.constant 0 : index
    %220 = vector.load %arg2[%c616, %c0_125] : memref<4944x128xf32, #tpu.memory_space<vmem>>, vector<1x20xf32>
    %221 = vector.broadcast %220 : vector<1x20xf32> to vector<16x20xf32>
    %222 = arith.addf %219, %221 : vector<16x20xf32>
    %cst_126 = arith.constant 0.000000e+00 : f32
    %223 = vector.broadcast %cst_126 : f32 to vector<16x20xf32>
    %224 = arith.maximumf %222, %223 : vector<16x20xf32>
    %cst_127 = arith.constant dense<0.000000e+00> : vector<16xf32>
    %225 = vector.multi_reduction <add>, %224, %cst_127 [1] : vector<16x20xf32> to vector<16xf32>
    %226 = vector.shape_cast %225 : vector<16xf32> to vector<16x1xf32>
    %cst_128 = arith.constant dense<0.000000e+00> : vector<16x1xf32>
    %227 = tpu.matmul %9, %226, %cst_128 {dimension_numbers = #tpu.dot_dimension_numbers<[1], [0], [0], [1], [0, 0, 1, 1], [], []>} : vector<16x16xf32>, vector<16x1xf32>, vector<16x1xf32> -> vector<16x1xf32>
    %cst_129 = arith.constant 6.250000e-03 : f32
    %228 = vector.broadcast %cst_129 : f32 to vector<16x1xf32>
    %229 = arith.mulf %227, %228 : vector<16x1xf32>
    %230 = arith.mulf %224, %224 : vector<16x20xf32>
    %cst_130 = arith.constant dense<0.000000e+00> : vector<16xf32>
    %231 = vector.multi_reduction <add>, %230, %cst_130 [1] : vector<16x20xf32> to vector<16xf32>
    %232 = vector.shape_cast %231 : vector<16xf32> to vector<16x1xf32>
    %cst_131 = arith.constant dense<0.000000e+00> : vector<16x1xf32>
    %233 = tpu.matmul %9, %232, %cst_131 {dimension_numbers = #tpu.dot_dimension_numbers<[1], [0], [0], [1], [0, 0, 1, 1], [], []>} : vector<16x16xf32>, vector<16x1xf32>, vector<16x1xf32> -> vector<16x1xf32>
    %cst_132 = arith.constant 6.250000e-03 : f32
    %234 = vector.broadcast %cst_132 : f32 to vector<16x1xf32>
    %235 = arith.mulf %233, %234 : vector<16x1xf32>
    %236 = vector.broadcast %229 : vector<16x1xf32> to vector<16x20xf32>
    %237 = arith.subf %224, %236 : vector<16x20xf32>
    %238 = arith.mulf %229, %229 : vector<16x1xf32>
    %239 = arith.subf %235, %238 : vector<16x1xf32>
    %cst_133 = arith.constant 9.99999974E-6 : f32
    %240 = vector.broadcast %cst_133 : f32 to vector<16x1xf32>
    %241 = arith.addf %239, %240 : vector<16x1xf32>
    %242 = math.rsqrt %241 : vector<16x1xf32>
    %243 = vector.broadcast %242 : vector<16x1xf32> to vector<16x20xf32>
    %244 = arith.mulf %237, %243 : vector<16x20xf32>
    %c624 = arith.constant 624 : index
    %c0_134 = arith.constant 0 : index
    %245 = vector.load %arg2[%c624, %c0_134] : memref<4944x128xf32, #tpu.memory_space<vmem>>, vector<16x20xf32>
    %246 = arith.mulf %244, %245 : vector<16x20xf32>
    %c640 = arith.constant 640 : index
    %c0_135 = arith.constant 0 : index
    %247 = vector.load %arg2[%c640, %c0_135] : memref<4944x128xf32, #tpu.memory_space<vmem>>, vector<16x20xf32>
    %248 = arith.addf %246, %247 : vector<16x20xf32>
    %c680 = arith.constant 680 : index
    %c0_136 = arith.constant 0 : index
    %249 = vector.load %arg2[%c680, %c0_136] : memref<4944x128xf32, #tpu.memory_space<vmem>>, vector<20x20xf32>
    %cst_137 = arith.constant dense<0.000000e+00> : vector<16x20xf32>
    %250 = tpu.matmul %248, %249, %cst_137 {dimension_numbers = #tpu.dot_dimension_numbers<[1], [0], [0], [1], [0, 0, 1, 1], [], []>} : vector<16x20xf32>, vector<20x20xf32>, vector<16x20xf32> -> vector<16x20xf32>
    %cst_138 = arith.constant dense<0.000000e+00> : vector<16x20xf32>
    %251 = tpu.matmul %2, %248, %cst_138 {dimension_numbers = #tpu.dot_dimension_numbers<[1], [0], [0], [1], [0, 0, 1, 1], [], []>} : vector<16x16xf32>, vector<16x20xf32>, vector<16x20xf32> -> vector<16x20xf32>
    %c656 = arith.constant 656 : index
    %c0_139 = arith.constant 0 : index
    %252 = vector.load %arg2[%c656, %c0_139] : memref<4944x128xf32, #tpu.memory_space<vmem>>, vector<20x20xf32>
    %cst_140 = arith.constant dense<0.000000e+00> : vector<16x20xf32>
    %253 = tpu.matmul %251, %252, %cst_140 {dimension_numbers = #tpu.dot_dimension_numbers<[1], [0], [0], [1], [0, 0, 1, 1], [], []>} : vector<16x20xf32>, vector<20x20xf32>, vector<16x20xf32> -> vector<16x20xf32>
    %254 = arith.addf %250, %253 : vector<16x20xf32>
    %cst_141 = arith.constant dense<0.000000e+00> : vector<16x20xf32>
    %255 = tpu.matmul %3, %248, %cst_141 {dimension_numbers = #tpu.dot_dimension_numbers<[1], [0], [0], [1], [0, 0, 1, 1], [], []>} : vector<16x16xf32>, vector<16x20xf32>, vector<16x20xf32> -> vector<16x20xf32>
    %c704 = arith.constant 704 : index
    %c0_142 = arith.constant 0 : index
    %256 = vector.load %arg2[%c704, %c0_142] : memref<4944x128xf32, #tpu.memory_space<vmem>>, vector<20x20xf32>
    %cst_143 = arith.constant dense<0.000000e+00> : vector<16x20xf32>
    %257 = tpu.matmul %255, %256, %cst_143 {dimension_numbers = #tpu.dot_dimension_numbers<[1], [0], [0], [1], [0, 0, 1, 1], [], []>} : vector<16x20xf32>, vector<20x20xf32>, vector<16x20xf32> -> vector<16x20xf32>
    %258 = arith.addf %254, %257 : vector<16x20xf32>
    %c728 = arith.constant 728 : index
    %c0_144 = arith.constant 0 : index
    %259 = vector.load %arg2[%c728, %c0_144] : memref<4944x128xf32, #tpu.memory_space<vmem>>, vector<1x20xf32>
    %260 = vector.broadcast %259 : vector<1x20xf32> to vector<16x20xf32>
    %261 = arith.addf %258, %260 : vector<16x20xf32>
    %cst_145 = arith.constant 0.000000e+00 : f32
    %262 = vector.broadcast %cst_145 : f32 to vector<16x20xf32>
    %263 = arith.maximumf %261, %262 : vector<16x20xf32>
    %c760 = arith.constant 760 : index
    %c0_146 = arith.constant 0 : index
    %264 = vector.load %arg2[%c760, %c0_146] : memref<4944x128xf32, #tpu.memory_space<vmem>>, vector<20x20xf32>
    %cst_147 = arith.constant dense<0.000000e+00> : vector<16x20xf32>
    %265 = tpu.matmul %263, %264, %cst_147 {dimension_numbers = #tpu.dot_dimension_numbers<[1], [0], [0], [1], [0, 0, 1, 1], [], []>} : vector<16x20xf32>, vector<20x20xf32>, vector<16x20xf32> -> vector<16x20xf32>
    %cst_148 = arith.constant dense<0.000000e+00> : vector<16x20xf32>
    %266 = tpu.matmul %2, %263, %cst_148 {dimension_numbers = #tpu.dot_dimension_numbers<[1], [0], [0], [1], [0, 0, 1, 1], [], []>} : vector<16x16xf32>, vector<16x20xf32>, vector<16x20xf32> -> vector<16x20xf32>
    %c736 = arith.constant 736 : index
    %c0_149 = arith.constant 0 : index
    %267 = vector.load %arg2[%c736, %c0_149] : memref<4944x128xf32, #tpu.memory_space<vmem>>, vector<20x20xf32>
    %cst_150 = arith.constant dense<0.000000e+00> : vector<16x20xf32>
    %268 = tpu.matmul %266, %267, %cst_150 {dimension_numbers = #tpu.dot_dimension_numbers<[1], [0], [0], [1], [0, 0, 1, 1], [], []>} : vector<16x20xf32>, vector<20x20xf32>, vector<16x20xf32> -> vector<16x20xf32>
    %269 = arith.addf %265, %268 : vector<16x20xf32>
    %cst_151 = arith.constant dense<0.000000e+00> : vector<16x20xf32>
    %270 = tpu.matmul %3, %263, %cst_151 {dimension_numbers = #tpu.dot_dimension_numbers<[1], [0], [0], [1], [0, 0, 1, 1], [], []>} : vector<16x16xf32>, vector<16x20xf32>, vector<16x20xf32> -> vector<16x20xf32>
    %c784 = arith.constant 784 : index
    %c0_152 = arith.constant 0 : index
    %271 = vector.load %arg2[%c784, %c0_152] : memref<4944x128xf32, #tpu.memory_space<vmem>>, vector<20x20xf32>
    %cst_153 = arith.constant dense<0.000000e+00> : vector<16x20xf32>
    %272 = tpu.matmul %270, %271, %cst_153 {dimension_numbers = #tpu.dot_dimension_numbers<[1], [0], [0], [1], [0, 0, 1, 1], [], []>} : vector<16x20xf32>, vector<20x20xf32>, vector<16x20xf32> -> vector<16x20xf32>
    %273 = arith.addf %269, %272 : vector<16x20xf32>
    %c808 = arith.constant 808 : index
    %c0_154 = arith.constant 0 : index
    %274 = vector.load %arg2[%c808, %c0_154] : memref<4944x128xf32, #tpu.memory_space<vmem>>, vector<1x20xf32>
    %275 = vector.broadcast %274 : vector<1x20xf32> to vector<16x20xf32>
    %276 = arith.addf %273, %275 : vector<16x20xf32>
    %cst_155 = arith.constant 0.000000e+00 : f32
    %277 = vector.broadcast %cst_155 : f32 to vector<16x20xf32>
    %278 = arith.maximumf %276, %277 : vector<16x20xf32>
    %c4640 = arith.constant 4640 : index
    %c0_156 = arith.constant 0 : index
    %279 = vector.load %arg2[%c4640, %c0_156] : memref<4944x128xf32, #tpu.memory_space<vmem>>, vector<8x16xf32>
    %c4648 = arith.constant 4648 : index
    %c0_157 = arith.constant 0 : index
    %280 = vector.load %arg2[%c4648, %c0_157] : memref<4944x128xf32, #tpu.memory_space<vmem>>, vector<8x16xf32>
    %cst_158 = arith.constant dense<0.000000e+00> : vector<8x20xf32>
    %281 = tpu.matmul %279, %278, %cst_158 {dimension_numbers = #tpu.dot_dimension_numbers<[1], [0], [0], [1], [0, 0, 1, 1], [], []>} : vector<8x16xf32>, vector<16x20xf32>, vector<8x20xf32> -> vector<8x20xf32>
    %c816 = arith.constant 816 : index
    %c0_159 = arith.constant 0 : index
    %282 = vector.load %arg2[%c816, %c0_159] : memref<4944x128xf32, #tpu.memory_space<vmem>>, vector<20x20xf32>
    %cst_160 = arith.constant dense<0.000000e+00> : vector<8x20xf32>
    %283 = tpu.matmul %281, %282, %cst_160 {dimension_numbers = #tpu.dot_dimension_numbers<[1], [0], [0], [1], [0, 0, 1, 1], [], []>} : vector<8x20xf32>, vector<20x20xf32>, vector<8x20xf32> -> vector<8x20xf32>
    %cst_161 = arith.constant dense<0.000000e+00> : vector<8x20xf32>
    %284 = tpu.matmul %280, %278, %cst_161 {dimension_numbers = #tpu.dot_dimension_numbers<[1], [0], [0], [1], [0, 0, 1, 1], [], []>} : vector<8x16xf32>, vector<16x20xf32>, vector<8x20xf32> -> vector<8x20xf32>
    %c840 = arith.constant 840 : index
    %c0_162 = arith.constant 0 : index
    %285 = vector.load %arg2[%c840, %c0_162] : memref<4944x128xf32, #tpu.memory_space<vmem>>, vector<20x20xf32>
    %cst_163 = arith.constant dense<0.000000e+00> : vector<8x20xf32>
    %286 = tpu.matmul %284, %285, %cst_163 {dimension_numbers = #tpu.dot_dimension_numbers<[1], [0], [0], [1], [0, 0, 1, 1], [], []>} : vector<8x20xf32>, vector<20x20xf32>, vector<8x20xf32> -> vector<8x20xf32>
    %287 = arith.addf %283, %286 : vector<8x20xf32>
    %c864 = arith.constant 864 : index
    %c0_164 = arith.constant 0 : index
    %288 = vector.load %arg2[%c864, %c0_164] : memref<4944x128xf32, #tpu.memory_space<vmem>>, vector<1x20xf32>
    %289 = vector.broadcast %288 : vector<1x20xf32> to vector<8x20xf32>
    %290 = arith.addf %287, %289 : vector<8x20xf32>
    %c872 = arith.constant 872 : index
    %c0_165 = arith.constant 0 : index
    %291 = vector.load %arg2[%c872, %c0_165] : memref<4944x128xf32, #tpu.memory_space<vmem>>, vector<10x20xf32>
    %cst_166 = arith.constant dense<0.000000e+00> : vector<2x20xf32>
    %292 = tpu.matmul %16, %291, %cst_166 {dimension_numbers = #tpu.dot_dimension_numbers<[1], [0], [0], [1], [0, 0, 1, 1], [], []>} : vector<2x10xf32>, vector<10x20xf32>, vector<2x20xf32> -> vector<2x20xf32>
    %c888 = arith.constant 888 : index
    %c0_167 = arith.constant 0 : index
    %293 = vector.load %arg2[%c888, %c0_167] : memref<4944x128xf32, #tpu.memory_space<vmem>>, vector<1x20xf32>
    %294 = vector.broadcast %293 : vector<1x20xf32> to vector<2x20xf32>
    %295 = arith.addf %292, %294 : vector<2x20xf32>
    %cst_168 = arith.constant 0.000000e+00 : f32
    %296 = vector.broadcast %cst_168 : f32 to vector<2x20xf32>
    %297 = arith.maximumf %295, %296 : vector<2x20xf32>
    %c896 = arith.constant 896 : index
    %c0_169 = arith.constant 0 : index
    %298 = vector.load %arg2[%c896, %c0_169] : memref<4944x128xf32, #tpu.memory_space<vmem>>, vector<20x20xf32>
    %cst_170 = arith.constant dense<0.000000e+00> : vector<2x20xf32>
    %299 = tpu.matmul %297, %298, %cst_170 {dimension_numbers = #tpu.dot_dimension_numbers<[1], [0], [0], [1], [0, 0, 1, 1], [], []>} : vector<2x20xf32>, vector<20x20xf32>, vector<2x20xf32> -> vector<2x20xf32>
    %c920 = arith.constant 920 : index
    %c0_171 = arith.constant 0 : index
    %300 = vector.load %arg2[%c920, %c0_171] : memref<4944x128xf32, #tpu.memory_space<vmem>>, vector<1x20xf32>
    %301 = vector.broadcast %300 : vector<1x20xf32> to vector<2x20xf32>
    %302 = arith.addf %299, %301 : vector<2x20xf32>
    %cst_172 = arith.constant dense<0.000000e+00> : vector<8x20xf32>
    %303 = tpu.matmul %15, %302, %cst_172 {dimension_numbers = #tpu.dot_dimension_numbers<[1], [0], [0], [1], [0, 0, 1, 1], [], []>} : vector<8x2xf32>, vector<2x20xf32>, vector<8x20xf32> -> vector<8x20xf32>
    %304 = arith.addf %290, %303 : vector<8x20xf32>
    %cst_173 = arith.constant dense<0.000000e+00> : vector<8xf32>
    %305 = vector.multi_reduction <add>, %304, %cst_173 [1] : vector<8x20xf32> to vector<8xf32>
    %306 = vector.shape_cast %305 : vector<8xf32> to vector<8x1xf32>
    %cst_174 = arith.constant dense<0.000000e+00> : vector<8x1xf32>
    %307 = tpu.matmul %11, %306, %cst_174 {dimension_numbers = #tpu.dot_dimension_numbers<[1], [0], [0], [1], [0, 0, 1, 1], [], []>} : vector<8x8xf32>, vector<8x1xf32>, vector<8x1xf32> -> vector<8x1xf32>
    %cst_175 = arith.constant 1.250000e-02 : f32
    %308 = vector.broadcast %cst_175 : f32 to vector<8x1xf32>
    %309 = arith.mulf %307, %308 : vector<8x1xf32>
    %310 = arith.mulf %304, %304 : vector<8x20xf32>
    %cst_176 = arith.constant dense<0.000000e+00> : vector<8xf32>
    %311 = vector.multi_reduction <add>, %310, %cst_176 [1] : vector<8x20xf32> to vector<8xf32>
    %312 = vector.shape_cast %311 : vector<8xf32> to vector<8x1xf32>
    %cst_177 = arith.constant dense<0.000000e+00> : vector<8x1xf32>
    %313 = tpu.matmul %11, %312, %cst_177 {dimension_numbers = #tpu.dot_dimension_numbers<[1], [0], [0], [1], [0, 0, 1, 1], [], []>} : vector<8x8xf32>, vector<8x1xf32>, vector<8x1xf32> -> vector<8x1xf32>
    %cst_178 = arith.constant 1.250000e-02 : f32
    %314 = vector.broadcast %cst_178 : f32 to vector<8x1xf32>
    %315 = arith.mulf %313, %314 : vector<8x1xf32>
    %316 = vector.broadcast %309 : vector<8x1xf32> to vector<8x20xf32>
    %317 = arith.subf %304, %316 : vector<8x20xf32>
    %318 = arith.mulf %309, %309 : vector<8x1xf32>
    %319 = arith.subf %315, %318 : vector<8x1xf32>
    %cst_179 = arith.constant 9.99999974E-6 : f32
    %320 = vector.broadcast %cst_179 : f32 to vector<8x1xf32>
    %321 = arith.addf %319, %320 : vector<8x1xf32>
    %322 = math.rsqrt %321 : vector<8x1xf32>
    %323 = vector.broadcast %322 : vector<8x1xf32> to vector<8x20xf32>
    %324 = arith.mulf %317, %323 : vector<8x20xf32>
    %c928 = arith.constant 928 : index
    %c0_180 = arith.constant 0 : index
    %325 = vector.load %arg2[%c928, %c0_180] : memref<4944x128xf32, #tpu.memory_space<vmem>>, vector<8x20xf32>
    %326 = arith.mulf %324, %325 : vector<8x20xf32>
    %c936 = arith.constant 936 : index
    %c0_181 = arith.constant 0 : index
    %327 = vector.load %arg2[%c936, %c0_181] : memref<4944x128xf32, #tpu.memory_space<vmem>>, vector<8x20xf32>
    %328 = arith.addf %326, %327 : vector<8x20xf32>
    %c968 = arith.constant 968 : index
    %c0_182 = arith.constant 0 : index
    %329 = vector.load %arg2[%c968, %c0_182] : memref<4944x128xf32, #tpu.memory_space<vmem>>, vector<20x40xf32>
    %cst_183 = arith.constant dense<0.000000e+00> : vector<8x40xf32>
    %330 = tpu.matmul %328, %329, %cst_183 {dimension_numbers = #tpu.dot_dimension_numbers<[1], [0], [0], [1], [0, 0, 1, 1], [], []>} : vector<8x20xf32>, vector<20x40xf32>, vector<8x40xf32> -> vector<8x40xf32>
    %cst_184 = arith.constant dense<0.000000e+00> : vector<8x20xf32>
    %331 = tpu.matmul %6, %328, %cst_184 {dimension_numbers = #tpu.dot_dimension_numbers<[1], [0], [0], [1], [0, 0, 1, 1], [], []>} : vector<8x8xf32>, vector<8x20xf32>, vector<8x20xf32> -> vector<8x20xf32>
    %c944 = arith.constant 944 : index
    %c0_185 = arith.constant 0 : index
    %332 = vector.load %arg2[%c944, %c0_185] : memref<4944x128xf32, #tpu.memory_space<vmem>>, vector<20x40xf32>
    %cst_186 = arith.constant dense<0.000000e+00> : vector<8x40xf32>
    %333 = tpu.matmul %331, %332, %cst_186 {dimension_numbers = #tpu.dot_dimension_numbers<[1], [0], [0], [1], [0, 0, 1, 1], [], []>} : vector<8x20xf32>, vector<20x40xf32>, vector<8x40xf32> -> vector<8x40xf32>
    %334 = arith.addf %330, %333 : vector<8x40xf32>
    %cst_187 = arith.constant dense<0.000000e+00> : vector<8x20xf32>
    %335 = tpu.matmul %7, %328, %cst_187 {dimension_numbers = #tpu.dot_dimension_numbers<[1], [0], [0], [1], [0, 0, 1, 1], [], []>} : vector<8x8xf32>, vector<8x20xf32>, vector<8x20xf32> -> vector<8x20xf32>
    %c992 = arith.constant 992 : index
    %c0_188 = arith.constant 0 : index
    %336 = vector.load %arg2[%c992, %c0_188] : memref<4944x128xf32, #tpu.memory_space<vmem>>, vector<20x40xf32>
    %cst_189 = arith.constant dense<0.000000e+00> : vector<8x40xf32>
    %337 = tpu.matmul %335, %336, %cst_189 {dimension_numbers = #tpu.dot_dimension_numbers<[1], [0], [0], [1], [0, 0, 1, 1], [], []>} : vector<8x20xf32>, vector<20x40xf32>, vector<8x40xf32> -> vector<8x40xf32>
    %338 = arith.addf %334, %337 : vector<8x40xf32>
    %c1016 = arith.constant 1016 : index
    %c0_190 = arith.constant 0 : index
    %339 = vector.load %arg2[%c1016, %c0_190] : memref<4944x128xf32, #tpu.memory_space<vmem>>, vector<1x40xf32>
    %340 = vector.broadcast %339 : vector<1x40xf32> to vector<8x40xf32>
    %341 = arith.addf %338, %340 : vector<8x40xf32>
    %cst_191 = arith.constant 0.000000e+00 : f32
    %342 = vector.broadcast %cst_191 : f32 to vector<8x40xf32>
    %343 = arith.maximumf %341, %342 : vector<8x40xf32>
    %c1064 = arith.constant 1064 : index
    %c0_192 = arith.constant 0 : index
    %344 = vector.load %arg2[%c1064, %c0_192] : memref<4944x128xf32, #tpu.memory_space<vmem>>, vector<40x40xf32>
    %cst_193 = arith.constant dense<0.000000e+00> : vector<8x40xf32>
    %345 = tpu.matmul %343, %344, %cst_193 {dimension_numbers = #tpu.dot_dimension_numbers<[1], [0], [0], [1], [0, 0, 1, 1], [], []>} : vector<8x40xf32>, vector<40x40xf32>, vector<8x40xf32> -> vector<8x40xf32>
    %cst_194 = arith.constant dense<0.000000e+00> : vector<8x40xf32>
    %346 = tpu.matmul %6, %343, %cst_194 {dimension_numbers = #tpu.dot_dimension_numbers<[1], [0], [0], [1], [0, 0, 1, 1], [], []>} : vector<8x8xf32>, vector<8x40xf32>, vector<8x40xf32> -> vector<8x40xf32>
    %c1024 = arith.constant 1024 : index
    %c0_195 = arith.constant 0 : index
    %347 = vector.load %arg2[%c1024, %c0_195] : memref<4944x128xf32, #tpu.memory_space<vmem>>, vector<40x40xf32>
    %cst_196 = arith.constant dense<0.000000e+00> : vector<8x40xf32>
    %348 = tpu.matmul %346, %347, %cst_196 {dimension_numbers = #tpu.dot_dimension_numbers<[1], [0], [0], [1], [0, 0, 1, 1], [], []>} : vector<8x40xf32>, vector<40x40xf32>, vector<8x40xf32> -> vector<8x40xf32>
    %349 = arith.addf %345, %348 : vector<8x40xf32>
    %cst_197 = arith.constant dense<0.000000e+00> : vector<8x40xf32>
    %350 = tpu.matmul %7, %343, %cst_197 {dimension_numbers = #tpu.dot_dimension_numbers<[1], [0], [0], [1], [0, 0, 1, 1], [], []>} : vector<8x8xf32>, vector<8x40xf32>, vector<8x40xf32> -> vector<8x40xf32>
    %c1104 = arith.constant 1104 : index
    %c0_198 = arith.constant 0 : index
    %351 = vector.load %arg2[%c1104, %c0_198] : memref<4944x128xf32, #tpu.memory_space<vmem>>, vector<40x40xf32>
    %cst_199 = arith.constant dense<0.000000e+00> : vector<8x40xf32>
    %352 = tpu.matmul %350, %351, %cst_199 {dimension_numbers = #tpu.dot_dimension_numbers<[1], [0], [0], [1], [0, 0, 1, 1], [], []>} : vector<8x40xf32>, vector<40x40xf32>, vector<8x40xf32> -> vector<8x40xf32>
    %353 = arith.addf %349, %352 : vector<8x40xf32>
    %c1144 = arith.constant 1144 : index
    %c0_200 = arith.constant 0 : index
    %354 = vector.load %arg2[%c1144, %c0_200] : memref<4944x128xf32, #tpu.memory_space<vmem>>, vector<1x40xf32>
    %355 = vector.broadcast %354 : vector<1x40xf32> to vector<8x40xf32>
    %356 = arith.addf %353, %355 : vector<8x40xf32>
    %cst_201 = arith.constant 0.000000e+00 : f32
    %357 = vector.broadcast %cst_201 : f32 to vector<8x40xf32>
    %358 = arith.maximumf %356, %357 : vector<8x40xf32>
    %cst_202 = arith.constant dense<0.000000e+00> : vector<8xf32>
    %359 = vector.multi_reduction <add>, %358, %cst_202 [1] : vector<8x40xf32> to vector<8xf32>
    %360 = vector.shape_cast %359 : vector<8xf32> to vector<8x1xf32>
    %cst_203 = arith.constant dense<0.000000e+00> : vector<8x1xf32>
    %361 = tpu.matmul %11, %360, %cst_203 {dimension_numbers = #tpu.dot_dimension_numbers<[1], [0], [0], [1], [0, 0, 1, 1], [], []>} : vector<8x8xf32>, vector<8x1xf32>, vector<8x1xf32> -> vector<8x1xf32>
    %cst_204 = arith.constant 6.250000e-03 : f32
    %362 = vector.broadcast %cst_204 : f32 to vector<8x1xf32>
    %363 = arith.mulf %361, %362 : vector<8x1xf32>
    %364 = arith.mulf %358, %358 : vector<8x40xf32>
    %cst_205 = arith.constant dense<0.000000e+00> : vector<8xf32>
    %365 = vector.multi_reduction <add>, %364, %cst_205 [1] : vector<8x40xf32> to vector<8xf32>
    %366 = vector.shape_cast %365 : vector<8xf32> to vector<8x1xf32>
    %cst_206 = arith.constant dense<0.000000e+00> : vector<8x1xf32>
    %367 = tpu.matmul %11, %366, %cst_206 {dimension_numbers = #tpu.dot_dimension_numbers<[1], [0], [0], [1], [0, 0, 1, 1], [], []>} : vector<8x8xf32>, vector<8x1xf32>, vector<8x1xf32> -> vector<8x1xf32>
    %cst_207 = arith.constant 6.250000e-03 : f32
    %368 = vector.broadcast %cst_207 : f32 to vector<8x1xf32>
    %369 = arith.mulf %367, %368 : vector<8x1xf32>
    %370 = vector.broadcast %363 : vector<8x1xf32> to vector<8x40xf32>
    %371 = arith.subf %358, %370 : vector<8x40xf32>
    %372 = arith.mulf %363, %363 : vector<8x1xf32>
    %373 = arith.subf %369, %372 : vector<8x1xf32>
    %cst_208 = arith.constant 9.99999974E-6 : f32
    %374 = vector.broadcast %cst_208 : f32 to vector<8x1xf32>
    %375 = arith.addf %373, %374 : vector<8x1xf32>
    %376 = math.rsqrt %375 : vector<8x1xf32>
    %377 = vector.broadcast %376 : vector<8x1xf32> to vector<8x40xf32>
    %378 = arith.mulf %371, %377 : vector<8x40xf32>
    %c1152 = arith.constant 1152 : index
    %c0_209 = arith.constant 0 : index
    %379 = vector.load %arg2[%c1152, %c0_209] : memref<4944x128xf32, #tpu.memory_space<vmem>>, vector<8x40xf32>
    %380 = arith.mulf %378, %379 : vector<8x40xf32>
    %c1160 = arith.constant 1160 : index
    %c0_210 = arith.constant 0 : index
    %381 = vector.load %arg2[%c1160, %c0_210] : memref<4944x128xf32, #tpu.memory_space<vmem>>, vector<8x40xf32>
    %382 = arith.addf %380, %381 : vector<8x40xf32>
    %c1208 = arith.constant 1208 : index
    %c0_211 = arith.constant 0 : index
    %383 = vector.load %arg2[%c1208, %c0_211] : memref<4944x128xf32, #tpu.memory_space<vmem>>, vector<40x40xf32>
    %cst_212 = arith.constant dense<0.000000e+00> : vector<8x40xf32>
    %384 = tpu.matmul %382, %383, %cst_212 {dimension_numbers = #tpu.dot_dimension_numbers<[1], [0], [0], [1], [0, 0, 1, 1], [], []>} : vector<8x40xf32>, vector<40x40xf32>, vector<8x40xf32> -> vector<8x40xf32>
    %cst_213 = arith.constant dense<0.000000e+00> : vector<8x40xf32>
    %385 = tpu.matmul %6, %382, %cst_213 {dimension_numbers = #tpu.dot_dimension_numbers<[1], [0], [0], [1], [0, 0, 1, 1], [], []>} : vector<8x8xf32>, vector<8x40xf32>, vector<8x40xf32> -> vector<8x40xf32>
    %c1168 = arith.constant 1168 : index
    %c0_214 = arith.constant 0 : index
    %386 = vector.load %arg2[%c1168, %c0_214] : memref<4944x128xf32, #tpu.memory_space<vmem>>, vector<40x40xf32>
    %cst_215 = arith.constant dense<0.000000e+00> : vector<8x40xf32>
    %387 = tpu.matmul %385, %386, %cst_215 {dimension_numbers = #tpu.dot_dimension_numbers<[1], [0], [0], [1], [0, 0, 1, 1], [], []>} : vector<8x40xf32>, vector<40x40xf32>, vector<8x40xf32> -> vector<8x40xf32>
    %388 = arith.addf %384, %387 : vector<8x40xf32>
    %cst_216 = arith.constant dense<0.000000e+00> : vector<8x40xf32>
    %389 = tpu.matmul %7, %382, %cst_216 {dimension_numbers = #tpu.dot_dimension_numbers<[1], [0], [0], [1], [0, 0, 1, 1], [], []>} : vector<8x8xf32>, vector<8x40xf32>, vector<8x40xf32> -> vector<8x40xf32>
    %c1248 = arith.constant 1248 : index
    %c0_217 = arith.constant 0 : index
    %390 = vector.load %arg2[%c1248, %c0_217] : memref<4944x128xf32, #tpu.memory_space<vmem>>, vector<40x40xf32>
    %cst_218 = arith.constant dense<0.000000e+00> : vector<8x40xf32>
    %391 = tpu.matmul %389, %390, %cst_218 {dimension_numbers = #tpu.dot_dimension_numbers<[1], [0], [0], [1], [0, 0, 1, 1], [], []>} : vector<8x40xf32>, vector<40x40xf32>, vector<8x40xf32> -> vector<8x40xf32>
    %392 = arith.addf %388, %391 : vector<8x40xf32>
    %c1288 = arith.constant 1288 : index
    %c0_219 = arith.constant 0 : index
    %393 = vector.load %arg2[%c1288, %c0_219] : memref<4944x128xf32, #tpu.memory_space<vmem>>, vector<1x40xf32>
    %394 = vector.broadcast %393 : vector<1x40xf32> to vector<8x40xf32>
    %395 = arith.addf %392, %394 : vector<8x40xf32>
    %cst_220 = arith.constant 0.000000e+00 : f32
    %396 = vector.broadcast %cst_220 : f32 to vector<8x40xf32>
    %397 = arith.maximumf %395, %396 : vector<8x40xf32>
    %c1336 = arith.constant 1336 : index
    %c0_221 = arith.constant 0 : index
    %398 = vector.load %arg2[%c1336, %c0_221] : memref<4944x128xf32, #tpu.memory_space<vmem>>, vector<40x40xf32>
    %cst_222 = arith.constant dense<0.000000e+00> : vector<8x40xf32>
    %399 = tpu.matmul %397, %398, %cst_222 {dimension_numbers = #tpu.dot_dimension_numbers<[1], [0], [0], [1], [0, 0, 1, 1], [], []>} : vector<8x40xf32>, vector<40x40xf32>, vector<8x40xf32> -> vector<8x40xf32>
    %cst_223 = arith.constant dense<0.000000e+00> : vector<8x40xf32>
    %400 = tpu.matmul %6, %397, %cst_223 {dimension_numbers = #tpu.dot_dimension_numbers<[1], [0], [0], [1], [0, 0, 1, 1], [], []>} : vector<8x8xf32>, vector<8x40xf32>, vector<8x40xf32> -> vector<8x40xf32>
    %c1296 = arith.constant 1296 : index
    %c0_224 = arith.constant 0 : index
    %401 = vector.load %arg2[%c1296, %c0_224] : memref<4944x128xf32, #tpu.memory_space<vmem>>, vector<40x40xf32>
    %cst_225 = arith.constant dense<0.000000e+00> : vector<8x40xf32>
    %402 = tpu.matmul %400, %401, %cst_225 {dimension_numbers = #tpu.dot_dimension_numbers<[1], [0], [0], [1], [0, 0, 1, 1], [], []>} : vector<8x40xf32>, vector<40x40xf32>, vector<8x40xf32> -> vector<8x40xf32>
    %403 = arith.addf %399, %402 : vector<8x40xf32>
    %cst_226 = arith.constant dense<0.000000e+00> : vector<8x40xf32>
    %404 = tpu.matmul %7, %397, %cst_226 {dimension_numbers = #tpu.dot_dimension_numbers<[1], [0], [0], [1], [0, 0, 1, 1], [], []>} : vector<8x8xf32>, vector<8x40xf32>, vector<8x40xf32> -> vector<8x40xf32>
    %c1376 = arith.constant 1376 : index
    %c0_227 = arith.constant 0 : index
    %405 = vector.load %arg2[%c1376, %c0_227] : memref<4944x128xf32, #tpu.memory_space<vmem>>, vector<40x40xf32>
    %cst_228 = arith.constant dense<0.000000e+00> : vector<8x40xf32>
    %406 = tpu.matmul %404, %405, %cst_228 {dimension_numbers = #tpu.dot_dimension_numbers<[1], [0], [0], [1], [0, 0, 1, 1], [], []>} : vector<8x40xf32>, vector<40x40xf32>, vector<8x40xf32> -> vector<8x40xf32>
    %407 = arith.addf %403, %406 : vector<8x40xf32>
    %c1416 = arith.constant 1416 : index
    %c0_229 = arith.constant 0 : index
    %408 = vector.load %arg2[%c1416, %c0_229] : memref<4944x128xf32, #tpu.memory_space<vmem>>, vector<1x40xf32>
    %409 = vector.broadcast %408 : vector<1x40xf32> to vector<8x40xf32>
    %410 = arith.addf %407, %409 : vector<8x40xf32>
    %cst_230 = arith.constant 0.000000e+00 : f32
    %411 = vector.broadcast %cst_230 : f32 to vector<8x40xf32>
    %412 = arith.maximumf %410, %411 : vector<8x40xf32>
    %c4656 = arith.constant 4656 : index
    %c0_231 = arith.constant 0 : index
    %413 = vector.load %arg2[%c4656, %c0_231] : memref<4944x128xf32, #tpu.memory_space<vmem>>, vector<4x8xf32>
    %c4664 = arith.constant 4664 : index
    %c0_232 = arith.constant 0 : index
    %414 = vector.load %arg2[%c4664, %c0_232] : memref<4944x128xf32, #tpu.memory_space<vmem>>, vector<4x8xf32>
    %cst_233 = arith.constant dense<0.000000e+00> : vector<4x40xf32>
    %415 = tpu.matmul %413, %412, %cst_233 {dimension_numbers = #tpu.dot_dimension_numbers<[1], [0], [0], [1], [0, 0, 1, 1], [], []>} : vector<4x8xf32>, vector<8x40xf32>, vector<4x40xf32> -> vector<4x40xf32>
    %c1424 = arith.constant 1424 : index
    %c0_234 = arith.constant 0 : index
    %416 = vector.load %arg2[%c1424, %c0_234] : memref<4944x128xf32, #tpu.memory_space<vmem>>, vector<40x40xf32>
    %cst_235 = arith.constant dense<0.000000e+00> : vector<4x40xf32>
    %417 = tpu.matmul %415, %416, %cst_235 {dimension_numbers = #tpu.dot_dimension_numbers<[1], [0], [0], [1], [0, 0, 1, 1], [], []>} : vector<4x40xf32>, vector<40x40xf32>, vector<4x40xf32> -> vector<4x40xf32>
    %cst_236 = arith.constant dense<0.000000e+00> : vector<4x40xf32>
    %418 = tpu.matmul %414, %412, %cst_236 {dimension_numbers = #tpu.dot_dimension_numbers<[1], [0], [0], [1], [0, 0, 1, 1], [], []>} : vector<4x8xf32>, vector<8x40xf32>, vector<4x40xf32> -> vector<4x40xf32>
    %c1464 = arith.constant 1464 : index
    %c0_237 = arith.constant 0 : index
    %419 = vector.load %arg2[%c1464, %c0_237] : memref<4944x128xf32, #tpu.memory_space<vmem>>, vector<40x40xf32>
    %cst_238 = arith.constant dense<0.000000e+00> : vector<4x40xf32>
    %420 = tpu.matmul %418, %419, %cst_238 {dimension_numbers = #tpu.dot_dimension_numbers<[1], [0], [0], [1], [0, 0, 1, 1], [], []>} : vector<4x40xf32>, vector<40x40xf32>, vector<4x40xf32> -> vector<4x40xf32>
    %421 = arith.addf %417, %420 : vector<4x40xf32>
    %c1504 = arith.constant 1504 : index
    %c0_239 = arith.constant 0 : index
    %422 = vector.load %arg2[%c1504, %c0_239] : memref<4944x128xf32, #tpu.memory_space<vmem>>, vector<1x40xf32>
    %423 = vector.broadcast %422 : vector<1x40xf32> to vector<4x40xf32>
    %424 = arith.addf %421, %423 : vector<4x40xf32>
    %c1512 = arith.constant 1512 : index
    %c0_240 = arith.constant 0 : index
    %425 = vector.load %arg2[%c1512, %c0_240] : memref<4944x128xf32, #tpu.memory_space<vmem>>, vector<10x40xf32>
    %cst_241 = arith.constant dense<0.000000e+00> : vector<2x40xf32>
    %426 = tpu.matmul %16, %425, %cst_241 {dimension_numbers = #tpu.dot_dimension_numbers<[1], [0], [0], [1], [0, 0, 1, 1], [], []>} : vector<2x10xf32>, vector<10x40xf32>, vector<2x40xf32> -> vector<2x40xf32>
    %c1528 = arith.constant 1528 : index
    %c0_242 = arith.constant 0 : index
    %427 = vector.load %arg2[%c1528, %c0_242] : memref<4944x128xf32, #tpu.memory_space<vmem>>, vector<1x40xf32>
    %428 = vector.broadcast %427 : vector<1x40xf32> to vector<2x40xf32>
    %429 = arith.addf %426, %428 : vector<2x40xf32>
    %cst_243 = arith.constant dense<0.000000e+00> : vector<4x40xf32>
    %430 = tpu.matmul %14, %429, %cst_243 {dimension_numbers = #tpu.dot_dimension_numbers<[1], [0], [0], [1], [0, 0, 1, 1], [], []>} : vector<4x2xf32>, vector<2x40xf32>, vector<4x40xf32> -> vector<4x40xf32>
    %431 = arith.addf %424, %430 : vector<4x40xf32>
    %cst_244 = arith.constant dense<0.000000e+00> : vector<4xf32>
    %432 = vector.multi_reduction <add>, %431, %cst_244 [1] : vector<4x40xf32> to vector<4xf32>
    %433 = vector.shape_cast %432 : vector<4xf32> to vector<4x1xf32>
    %cst_245 = arith.constant dense<0.000000e+00> : vector<4x1xf32>
    %434 = tpu.matmul %10, %433, %cst_245 {dimension_numbers = #tpu.dot_dimension_numbers<[1], [0], [0], [1], [0, 0, 1, 1], [], []>} : vector<4x4xf32>, vector<4x1xf32>, vector<4x1xf32> -> vector<4x1xf32>
    %cst_246 = arith.constant 1.250000e-02 : f32
    %435 = vector.broadcast %cst_246 : f32 to vector<4x1xf32>
    %436 = arith.mulf %434, %435 : vector<4x1xf32>
    %437 = arith.mulf %431, %431 : vector<4x40xf32>
    %cst_247 = arith.constant dense<0.000000e+00> : vector<4xf32>
    %438 = vector.multi_reduction <add>, %437, %cst_247 [1] : vector<4x40xf32> to vector<4xf32>
    %439 = vector.shape_cast %438 : vector<4xf32> to vector<4x1xf32>
    %cst_248 = arith.constant dense<0.000000e+00> : vector<4x1xf32>
    %440 = tpu.matmul %10, %439, %cst_248 {dimension_numbers = #tpu.dot_dimension_numbers<[1], [0], [0], [1], [0, 0, 1, 1], [], []>} : vector<4x4xf32>, vector<4x1xf32>, vector<4x1xf32> -> vector<4x1xf32>
    %cst_249 = arith.constant 1.250000e-02 : f32
    %441 = vector.broadcast %cst_249 : f32 to vector<4x1xf32>
    %442 = arith.mulf %440, %441 : vector<4x1xf32>
    %443 = vector.broadcast %436 : vector<4x1xf32> to vector<4x40xf32>
    %444 = arith.subf %431, %443 : vector<4x40xf32>
    %445 = arith.mulf %436, %436 : vector<4x1xf32>
    %446 = arith.subf %442, %445 : vector<4x1xf32>
    %cst_250 = arith.constant 9.99999974E-6 : f32
    %447 = vector.broadcast %cst_250 : f32 to vector<4x1xf32>
    %448 = arith.addf %446, %447 : vector<4x1xf32>
    %449 = math.rsqrt %448 : vector<4x1xf32>
    %450 = vector.broadcast %449 : vector<4x1xf32> to vector<4x40xf32>
    %451 = arith.mulf %444, %450 : vector<4x40xf32>
    %c1536 = arith.constant 1536 : index
    %c0_251 = arith.constant 0 : index
    %452 = vector.load %arg2[%c1536, %c0_251] : memref<4944x128xf32, #tpu.memory_space<vmem>>, vector<4x40xf32>
    %453 = arith.mulf %451, %452 : vector<4x40xf32>
    %c1544 = arith.constant 1544 : index
    %c0_252 = arith.constant 0 : index
    %454 = vector.load %arg2[%c1544, %c0_252] : memref<4944x128xf32, #tpu.memory_space<vmem>>, vector<4x40xf32>
    %455 = arith.addf %453, %454 : vector<4x40xf32>
    %c1592 = arith.constant 1592 : index
    %c0_253 = arith.constant 0 : index
    %456 = vector.load %arg2[%c1592, %c0_253] : memref<4944x128xf32, #tpu.memory_space<vmem>>, vector<40x80xf32>
    %cst_254 = arith.constant dense<0.000000e+00> : vector<4x80xf32>
    %457 = tpu.matmul %455, %456, %cst_254 {dimension_numbers = #tpu.dot_dimension_numbers<[1], [0], [0], [1], [0, 0, 1, 1], [], []>} : vector<4x40xf32>, vector<40x80xf32>, vector<4x80xf32> -> vector<4x80xf32>
    %cst_255 = arith.constant dense<0.000000e+00> : vector<4x40xf32>
    %458 = tpu.matmul %4, %455, %cst_255 {dimension_numbers = #tpu.dot_dimension_numbers<[1], [0], [0], [1], [0, 0, 1, 1], [], []>} : vector<4x4xf32>, vector<4x40xf32>, vector<4x40xf32> -> vector<4x40xf32>
    %c1552 = arith.constant 1552 : index
    %c0_256 = arith.constant 0 : index
    %459 = vector.load %arg2[%c1552, %c0_256] : memref<4944x128xf32, #tpu.memory_space<vmem>>, vector<40x80xf32>
    %cst_257 = arith.constant dense<0.000000e+00> : vector<4x80xf32>
    %460 = tpu.matmul %458, %459, %cst_257 {dimension_numbers = #tpu.dot_dimension_numbers<[1], [0], [0], [1], [0, 0, 1, 1], [], []>} : vector<4x40xf32>, vector<40x80xf32>, vector<4x80xf32> -> vector<4x80xf32>
    %461 = arith.addf %457, %460 : vector<4x80xf32>
    %cst_258 = arith.constant dense<0.000000e+00> : vector<4x40xf32>
    %462 = tpu.matmul %5, %455, %cst_258 {dimension_numbers = #tpu.dot_dimension_numbers<[1], [0], [0], [1], [0, 0, 1, 1], [], []>} : vector<4x4xf32>, vector<4x40xf32>, vector<4x40xf32> -> vector<4x40xf32>
    %c1632 = arith.constant 1632 : index
    %c0_259 = arith.constant 0 : index
    %463 = vector.load %arg2[%c1632, %c0_259] : memref<4944x128xf32, #tpu.memory_space<vmem>>, vector<40x80xf32>
    %cst_260 = arith.constant dense<0.000000e+00> : vector<4x80xf32>
    %464 = tpu.matmul %462, %463, %cst_260 {dimension_numbers = #tpu.dot_dimension_numbers<[1], [0], [0], [1], [0, 0, 1, 1], [], []>} : vector<4x40xf32>, vector<40x80xf32>, vector<4x80xf32> -> vector<4x80xf32>
    %465 = arith.addf %461, %464 : vector<4x80xf32>
    %c1672 = arith.constant 1672 : index
    %c0_261 = arith.constant 0 : index
    %466 = vector.load %arg2[%c1672, %c0_261] : memref<4944x128xf32, #tpu.memory_space<vmem>>, vector<1x80xf32>
    %467 = vector.broadcast %466 : vector<1x80xf32> to vector<4x80xf32>
    %468 = arith.addf %465, %467 : vector<4x80xf32>
    %cst_262 = arith.constant 0.000000e+00 : f32
    %469 = vector.broadcast %cst_262 : f32 to vector<4x80xf32>
    %470 = arith.maximumf %468, %469 : vector<4x80xf32>
    %c1760 = arith.constant 1760 : index
    %c0_263 = arith.constant 0 : index
    %471 = vector.load %arg2[%c1760, %c0_263] : memref<4944x128xf32, #tpu.memory_space<vmem>>, vector<80x80xf32>
    %cst_264 = arith.constant dense<0.000000e+00> : vector<4x80xf32>
    %472 = tpu.matmul %470, %471, %cst_264 {dimension_numbers = #tpu.dot_dimension_numbers<[1], [0], [0], [1], [0, 0, 1, 1], [], []>} : vector<4x80xf32>, vector<80x80xf32>, vector<4x80xf32> -> vector<4x80xf32>
    %cst_265 = arith.constant dense<0.000000e+00> : vector<4x80xf32>
    %473 = tpu.matmul %4, %470, %cst_265 {dimension_numbers = #tpu.dot_dimension_numbers<[1], [0], [0], [1], [0, 0, 1, 1], [], []>} : vector<4x4xf32>, vector<4x80xf32>, vector<4x80xf32> -> vector<4x80xf32>
    %c1680 = arith.constant 1680 : index
    %c0_266 = arith.constant 0 : index
    %474 = vector.load %arg2[%c1680, %c0_266] : memref<4944x128xf32, #tpu.memory_space<vmem>>, vector<80x80xf32>
    %cst_267 = arith.constant dense<0.000000e+00> : vector<4x80xf32>
    %475 = tpu.matmul %473, %474, %cst_267 {dimension_numbers = #tpu.dot_dimension_numbers<[1], [0], [0], [1], [0, 0, 1, 1], [], []>} : vector<4x80xf32>, vector<80x80xf32>, vector<4x80xf32> -> vector<4x80xf32>
    %476 = arith.addf %472, %475 : vector<4x80xf32>
    %cst_268 = arith.constant dense<0.000000e+00> : vector<4x80xf32>
    %477 = tpu.matmul %5, %470, %cst_268 {dimension_numbers = #tpu.dot_dimension_numbers<[1], [0], [0], [1], [0, 0, 1, 1], [], []>} : vector<4x4xf32>, vector<4x80xf32>, vector<4x80xf32> -> vector<4x80xf32>
    %c1840 = arith.constant 1840 : index
    %c0_269 = arith.constant 0 : index
    %478 = vector.load %arg2[%c1840, %c0_269] : memref<4944x128xf32, #tpu.memory_space<vmem>>, vector<80x80xf32>
    %cst_270 = arith.constant dense<0.000000e+00> : vector<4x80xf32>
    %479 = tpu.matmul %477, %478, %cst_270 {dimension_numbers = #tpu.dot_dimension_numbers<[1], [0], [0], [1], [0, 0, 1, 1], [], []>} : vector<4x80xf32>, vector<80x80xf32>, vector<4x80xf32> -> vector<4x80xf32>
    %480 = arith.addf %476, %479 : vector<4x80xf32>
    %c1920 = arith.constant 1920 : index
    %c0_271 = arith.constant 0 : index
    %481 = vector.load %arg2[%c1920, %c0_271] : memref<4944x128xf32, #tpu.memory_space<vmem>>, vector<1x80xf32>
    %482 = vector.broadcast %481 : vector<1x80xf32> to vector<4x80xf32>
    %483 = arith.addf %480, %482 : vector<4x80xf32>
    %cst_272 = arith.constant 0.000000e+00 : f32
    %484 = vector.broadcast %cst_272 : f32 to vector<4x80xf32>
    %485 = arith.maximumf %483, %484 : vector<4x80xf32>
    %cst_273 = arith.constant dense<0.000000e+00> : vector<4xf32>
    %486 = vector.multi_reduction <add>, %485, %cst_273 [1] : vector<4x80xf32> to vector<4xf32>
    %487 = vector.shape_cast %486 : vector<4xf32> to vector<4x1xf32>
    %cst_274 = arith.constant dense<0.000000e+00> : vector<4x1xf32>
    %488 = tpu.matmul %10, %487, %cst_274 {dimension_numbers = #tpu.dot_dimension_numbers<[1], [0], [0], [1], [0, 0, 1, 1], [], []>} : vector<4x4xf32>, vector<4x1xf32>, vector<4x1xf32> -> vector<4x1xf32>
    %cst_275 = arith.constant 6.250000e-03 : f32
    %489 = vector.broadcast %cst_275 : f32 to vector<4x1xf32>
    %490 = arith.mulf %488, %489 : vector<4x1xf32>
    %491 = arith.mulf %485, %485 : vector<4x80xf32>
    %cst_276 = arith.constant dense<0.000000e+00> : vector<4xf32>
    %492 = vector.multi_reduction <add>, %491, %cst_276 [1] : vector<4x80xf32> to vector<4xf32>
    %493 = vector.shape_cast %492 : vector<4xf32> to vector<4x1xf32>
    %cst_277 = arith.constant dense<0.000000e+00> : vector<4x1xf32>
    %494 = tpu.matmul %10, %493, %cst_277 {dimension_numbers = #tpu.dot_dimension_numbers<[1], [0], [0], [1], [0, 0, 1, 1], [], []>} : vector<4x4xf32>, vector<4x1xf32>, vector<4x1xf32> -> vector<4x1xf32>
    %cst_278 = arith.constant 6.250000e-03 : f32
    %495 = vector.broadcast %cst_278 : f32 to vector<4x1xf32>
    %496 = arith.mulf %494, %495 : vector<4x1xf32>
    %497 = vector.broadcast %490 : vector<4x1xf32> to vector<4x80xf32>
    %498 = arith.subf %485, %497 : vector<4x80xf32>
    %499 = arith.mulf %490, %490 : vector<4x1xf32>
    %500 = arith.subf %496, %499 : vector<4x1xf32>
    %cst_279 = arith.constant 9.99999974E-6 : f32
    %501 = vector.broadcast %cst_279 : f32 to vector<4x1xf32>
    %502 = arith.addf %500, %501 : vector<4x1xf32>
    %503 = math.rsqrt %502 : vector<4x1xf32>
    %504 = vector.broadcast %503 : vector<4x1xf32> to vector<4x80xf32>
    %505 = arith.mulf %498, %504 : vector<4x80xf32>
    %c1928 = arith.constant 1928 : index
    %c0_280 = arith.constant 0 : index
    %506 = vector.load %arg2[%c1928, %c0_280] : memref<4944x128xf32, #tpu.memory_space<vmem>>, vector<4x80xf32>
    %507 = arith.mulf %505, %506 : vector<4x80xf32>
    %c1936 = arith.constant 1936 : index
    %c0_281 = arith.constant 0 : index
    %508 = vector.load %arg2[%c1936, %c0_281] : memref<4944x128xf32, #tpu.memory_space<vmem>>, vector<4x80xf32>
    %509 = arith.addf %507, %508 : vector<4x80xf32>
    %c2024 = arith.constant 2024 : index
    %c0_282 = arith.constant 0 : index
    %510 = vector.load %arg2[%c2024, %c0_282] : memref<4944x128xf32, #tpu.memory_space<vmem>>, vector<80x80xf32>
    %cst_283 = arith.constant dense<0.000000e+00> : vector<4x80xf32>
    %511 = tpu.matmul %509, %510, %cst_283 {dimension_numbers = #tpu.dot_dimension_numbers<[1], [0], [0], [1], [0, 0, 1, 1], [], []>} : vector<4x80xf32>, vector<80x80xf32>, vector<4x80xf32> -> vector<4x80xf32>
    %cst_284 = arith.constant dense<0.000000e+00> : vector<4x80xf32>
    %512 = tpu.matmul %4, %509, %cst_284 {dimension_numbers = #tpu.dot_dimension_numbers<[1], [0], [0], [1], [0, 0, 1, 1], [], []>} : vector<4x4xf32>, vector<4x80xf32>, vector<4x80xf32> -> vector<4x80xf32>
    %c1944 = arith.constant 1944 : index
    %c0_285 = arith.constant 0 : index
    %513 = vector.load %arg2[%c1944, %c0_285] : memref<4944x128xf32, #tpu.memory_space<vmem>>, vector<80x80xf32>
    %cst_286 = arith.constant dense<0.000000e+00> : vector<4x80xf32>
    %514 = tpu.matmul %512, %513, %cst_286 {dimension_numbers = #tpu.dot_dimension_numbers<[1], [0], [0], [1], [0, 0, 1, 1], [], []>} : vector<4x80xf32>, vector<80x80xf32>, vector<4x80xf32> -> vector<4x80xf32>
    %515 = arith.addf %511, %514 : vector<4x80xf32>
    %cst_287 = arith.constant dense<0.000000e+00> : vector<4x80xf32>
    %516 = tpu.matmul %5, %509, %cst_287 {dimension_numbers = #tpu.dot_dimension_numbers<[1], [0], [0], [1], [0, 0, 1, 1], [], []>} : vector<4x4xf32>, vector<4x80xf32>, vector<4x80xf32> -> vector<4x80xf32>
    %c2104 = arith.constant 2104 : index
    %c0_288 = arith.constant 0 : index
    %517 = vector.load %arg2[%c2104, %c0_288] : memref<4944x128xf32, #tpu.memory_space<vmem>>, vector<80x80xf32>
    %cst_289 = arith.constant dense<0.000000e+00> : vector<4x80xf32>
    %518 = tpu.matmul %516, %517, %cst_289 {dimension_numbers = #tpu.dot_dimension_numbers<[1], [0], [0], [1], [0, 0, 1, 1], [], []>} : vector<4x80xf32>, vector<80x80xf32>, vector<4x80xf32> -> vector<4x80xf32>
    %519 = arith.addf %515, %518 : vector<4x80xf32>
    %c2184 = arith.constant 2184 : index
    %c0_290 = arith.constant 0 : index
    %520 = vector.load %arg2[%c2184, %c0_290] : memref<4944x128xf32, #tpu.memory_space<vmem>>, vector<1x80xf32>
    %521 = vector.broadcast %520 : vector<1x80xf32> to vector<4x80xf32>
    %522 = arith.addf %519, %521 : vector<4x80xf32>
    %cst_291 = arith.constant 0.000000e+00 : f32
    %523 = vector.broadcast %cst_291 : f32 to vector<4x80xf32>
    %524 = arith.maximumf %522, %523 : vector<4x80xf32>
    %c2272 = arith.constant 2272 : index
    %c0_292 = arith.constant 0 : index
    %525 = vector.load %arg2[%c2272, %c0_292] : memref<4944x128xf32, #tpu.memory_space<vmem>>, vector<80x80xf32>
    %cst_293 = arith.constant dense<0.000000e+00> : vector<4x80xf32>
    %526 = tpu.matmul %524, %525, %cst_293 {dimension_numbers = #tpu.dot_dimension_numbers<[1], [0], [0], [1], [0, 0, 1, 1], [], []>} : vector<4x80xf32>, vector<80x80xf32>, vector<4x80xf32> -> vector<4x80xf32>
    %cst_294 = arith.constant dense<0.000000e+00> : vector<4x80xf32>
    %527 = tpu.matmul %4, %524, %cst_294 {dimension_numbers = #tpu.dot_dimension_numbers<[1], [0], [0], [1], [0, 0, 1, 1], [], []>} : vector<4x4xf32>, vector<4x80xf32>, vector<4x80xf32> -> vector<4x80xf32>
    %c2192 = arith.constant 2192 : index
    %c0_295 = arith.constant 0 : index
    %528 = vector.load %arg2[%c2192, %c0_295] : memref<4944x128xf32, #tpu.memory_space<vmem>>, vector<80x80xf32>
    %cst_296 = arith.constant dense<0.000000e+00> : vector<4x80xf32>
    %529 = tpu.matmul %527, %528, %cst_296 {dimension_numbers = #tpu.dot_dimension_numbers<[1], [0], [0], [1], [0, 0, 1, 1], [], []>} : vector<4x80xf32>, vector<80x80xf32>, vector<4x80xf32> -> vector<4x80xf32>
    %530 = arith.addf %526, %529 : vector<4x80xf32>
    %cst_297 = arith.constant dense<0.000000e+00> : vector<4x80xf32>
    %531 = tpu.matmul %5, %524, %cst_297 {dimension_numbers = #tpu.dot_dimension_numbers<[1], [0], [0], [1], [0, 0, 1, 1], [], []>} : vector<4x4xf32>, vector<4x80xf32>, vector<4x80xf32> -> vector<4x80xf32>
    %c2352 = arith.constant 2352 : index
    %c0_298 = arith.constant 0 : index
    %532 = vector.load %arg2[%c2352, %c0_298] : memref<4944x128xf32, #tpu.memory_space<vmem>>, vector<80x80xf32>
    %cst_299 = arith.constant dense<0.000000e+00> : vector<4x80xf32>
    %533 = tpu.matmul %531, %532, %cst_299 {dimension_numbers = #tpu.dot_dimension_numbers<[1], [0], [0], [1], [0, 0, 1, 1], [], []>} : vector<4x80xf32>, vector<80x80xf32>, vector<4x80xf32> -> vector<4x80xf32>
    %534 = arith.addf %530, %533 : vector<4x80xf32>
    %c2432 = arith.constant 2432 : index
    %c0_300 = arith.constant 0 : index
    %535 = vector.load %arg2[%c2432, %c0_300] : memref<4944x128xf32, #tpu.memory_space<vmem>>, vector<1x80xf32>
    %536 = vector.broadcast %535 : vector<1x80xf32> to vector<4x80xf32>
    %537 = arith.addf %534, %536 : vector<4x80xf32>
    %cst_301 = arith.constant 0.000000e+00 : f32
    %538 = vector.broadcast %cst_301 : f32 to vector<4x80xf32>
    %539 = arith.maximumf %537, %538 : vector<4x80xf32>
    %c2440 = arith.constant 2440 : index
    %c0_302 = arith.constant 0 : index
    %540 = vector.load %arg2[%c2440, %c0_302] : memref<4944x128xf32, #tpu.memory_space<vmem>>, vector<10x80xf32>
    %cst_303 = arith.constant dense<0.000000e+00> : vector<2x80xf32>
    %541 = tpu.matmul %16, %540, %cst_303 {dimension_numbers = #tpu.dot_dimension_numbers<[1], [0], [0], [1], [0, 0, 1, 1], [], []>} : vector<2x10xf32>, vector<10x80xf32>, vector<2x80xf32> -> vector<2x80xf32>
    %c2456 = arith.constant 2456 : index
    %c0_304 = arith.constant 0 : index
    %542 = vector.load %arg2[%c2456, %c0_304] : memref<4944x128xf32, #tpu.memory_space<vmem>>, vector<1x80xf32>
    %543 = vector.broadcast %542 : vector<1x80xf32> to vector<2x80xf32>
    %544 = arith.addf %541, %543 : vector<2x80xf32>
    %c4768 = arith.constant 4768 : index
    %c0_305 = arith.constant 0 : index
    %545 = vector.load %arg2[%c4768, %c0_305] : memref<4944x128xf32, #tpu.memory_space<vmem>>, vector<8x4xf32>
    %c4776 = arith.constant 4776 : index
    %c0_306 = arith.constant 0 : index
    %546 = vector.load %arg2[%c4776, %c0_306] : memref<4944x128xf32, #tpu.memory_space<vmem>>, vector<8x4xf32>
    %c2464 = arith.constant 2464 : index
    %c0_307 = arith.constant 0 : index
    %547 = vector.load %arg2[%c2464, %c0_307] : memref<4944x128xf32, #tpu.memory_space<vmem>>, vector<80x40xf32>
    %cst_308 = arith.constant dense<0.000000e+00> : vector<4x40xf32>
    %548 = tpu.matmul %539, %547, %cst_308 {dimension_numbers = #tpu.dot_dimension_numbers<[1], [0], [0], [1], [0, 0, 1, 1], [], []>} : vector<4x80xf32>, vector<80x40xf32>, vector<4x40xf32> -> vector<4x40xf32>
    %cst_309 = arith.constant dense<0.000000e+00> : vector<8x40xf32>
    %549 = tpu.matmul %545, %548, %cst_309 {dimension_numbers = #tpu.dot_dimension_numbers<[1], [0], [0], [1], [0, 0, 1, 1], [], []>} : vector<8x4xf32>, vector<4x40xf32>, vector<8x40xf32> -> vector<8x40xf32>
    %c2544 = arith.constant 2544 : index
    %c0_310 = arith.constant 0 : index
    %550 = vector.load %arg2[%c2544, %c0_310] : memref<4944x128xf32, #tpu.memory_space<vmem>>, vector<80x40xf32>
    %cst_311 = arith.constant dense<0.000000e+00> : vector<4x40xf32>
    %551 = tpu.matmul %539, %550, %cst_311 {dimension_numbers = #tpu.dot_dimension_numbers<[1], [0], [0], [1], [0, 0, 1, 1], [], []>} : vector<4x80xf32>, vector<80x40xf32>, vector<4x40xf32> -> vector<4x40xf32>
    %cst_312 = arith.constant dense<0.000000e+00> : vector<8x40xf32>
    %552 = tpu.matmul %546, %551, %cst_312 {dimension_numbers = #tpu.dot_dimension_numbers<[1], [0], [0], [1], [0, 0, 1, 1], [], []>} : vector<8x4xf32>, vector<4x40xf32>, vector<8x40xf32> -> vector<8x40xf32>
    %553 = arith.addf %549, %552 : vector<8x40xf32>
    %c2624 = arith.constant 2624 : index
    %c0_313 = arith.constant 0 : index
    %554 = vector.load %arg2[%c2624, %c0_313] : memref<4944x128xf32, #tpu.memory_space<vmem>>, vector<1x40xf32>
    %555 = vector.broadcast %554 : vector<1x40xf32> to vector<8x40xf32>
    %556 = arith.addf %553, %555 : vector<8x40xf32>
    %c4864 = arith.constant 4864 : index
    %c0_314 = arith.constant 0 : index
    %557 = vector.load %arg2[%c4864, %c0_314] : memref<4944x128xf32, #tpu.memory_space<vmem>>, vector<40x80xf32>
    %cst_315 = arith.constant dense<0.000000e+00> : vector<8x80xf32>
    %558 = tpu.matmul %412, %557, %cst_315 {dimension_numbers = #tpu.dot_dimension_numbers<[1], [0], [0], [1], [0, 0, 1, 1], [], []>} : vector<8x40xf32>, vector<40x80xf32>, vector<8x80xf32> -> vector<8x80xf32>
    %c4904 = arith.constant 4904 : index
    %c0_316 = arith.constant 0 : index
    %559 = vector.load %arg2[%c4904, %c0_316] : memref<4944x128xf32, #tpu.memory_space<vmem>>, vector<40x80xf32>
    %cst_317 = arith.constant dense<0.000000e+00> : vector<8x80xf32>
    %560 = tpu.matmul %556, %559, %cst_317 {dimension_numbers = #tpu.dot_dimension_numbers<[1], [0], [0], [1], [0, 0, 1, 1], [], []>} : vector<8x40xf32>, vector<40x80xf32>, vector<8x80xf32> -> vector<8x80xf32>
    %561 = arith.addf %558, %560 : vector<8x80xf32>
    %cst_318 = arith.constant dense<0.000000e+00> : vector<8x80xf32>
    %562 = tpu.matmul %15, %544, %cst_318 {dimension_numbers = #tpu.dot_dimension_numbers<[1], [0], [0], [1], [0, 0, 1, 1], [], []>} : vector<8x2xf32>, vector<2x80xf32>, vector<8x80xf32> -> vector<8x80xf32>
    %563 = arith.addf %561, %562 : vector<8x80xf32>
    %cst_319 = arith.constant dense<0.000000e+00> : vector<8xf32>
    %564 = vector.multi_reduction <add>, %563, %cst_319 [1] : vector<8x80xf32> to vector<8xf32>
    %565 = vector.shape_cast %564 : vector<8xf32> to vector<8x1xf32>
    %cst_320 = arith.constant dense<0.000000e+00> : vector<8x1xf32>
    %566 = tpu.matmul %11, %565, %cst_320 {dimension_numbers = #tpu.dot_dimension_numbers<[1], [0], [0], [1], [0, 0, 1, 1], [], []>} : vector<8x8xf32>, vector<8x1xf32>, vector<8x1xf32> -> vector<8x1xf32>
    %cst_321 = arith.constant 3.125000e-03 : f32
    %567 = vector.broadcast %cst_321 : f32 to vector<8x1xf32>
    %568 = arith.mulf %566, %567 : vector<8x1xf32>
    %569 = arith.mulf %563, %563 : vector<8x80xf32>
    %cst_322 = arith.constant dense<0.000000e+00> : vector<8xf32>
    %570 = vector.multi_reduction <add>, %569, %cst_322 [1] : vector<8x80xf32> to vector<8xf32>
    %571 = vector.shape_cast %570 : vector<8xf32> to vector<8x1xf32>
    %cst_323 = arith.constant dense<0.000000e+00> : vector<8x1xf32>
    %572 = tpu.matmul %11, %571, %cst_323 {dimension_numbers = #tpu.dot_dimension_numbers<[1], [0], [0], [1], [0, 0, 1, 1], [], []>} : vector<8x8xf32>, vector<8x1xf32>, vector<8x1xf32> -> vector<8x1xf32>
    %cst_324 = arith.constant 3.125000e-03 : f32
    %573 = vector.broadcast %cst_324 : f32 to vector<8x1xf32>
    %574 = arith.mulf %572, %573 : vector<8x1xf32>
    %575 = vector.broadcast %568 : vector<8x1xf32> to vector<8x80xf32>
    %576 = arith.subf %563, %575 : vector<8x80xf32>
    %577 = arith.mulf %568, %568 : vector<8x1xf32>
    %578 = arith.subf %574, %577 : vector<8x1xf32>
    %cst_325 = arith.constant 9.99999974E-6 : f32
    %579 = vector.broadcast %cst_325 : f32 to vector<8x1xf32>
    %580 = arith.addf %578, %579 : vector<8x1xf32>
    %581 = math.rsqrt %580 : vector<8x1xf32>
    %582 = vector.broadcast %581 : vector<8x1xf32> to vector<8x80xf32>
    %583 = arith.mulf %576, %582 : vector<8x80xf32>
    %c2632 = arith.constant 2632 : index
    %c0_326 = arith.constant 0 : index
    %584 = vector.load %arg2[%c2632, %c0_326] : memref<4944x128xf32, #tpu.memory_space<vmem>>, vector<8x80xf32>
    %585 = arith.mulf %583, %584 : vector<8x80xf32>
    %c2640 = arith.constant 2640 : index
    %c0_327 = arith.constant 0 : index
    %586 = vector.load %arg2[%c2640, %c0_327] : memref<4944x128xf32, #tpu.memory_space<vmem>>, vector<8x80xf32>
    %587 = arith.addf %585, %586 : vector<8x80xf32>
    %c2728 = arith.constant 2728 : index
    %c0_328 = arith.constant 0 : index
    %588 = vector.load %arg2[%c2728, %c0_328] : memref<4944x128xf32, #tpu.memory_space<vmem>>, vector<80x40xf32>
    %cst_329 = arith.constant dense<0.000000e+00> : vector<8x40xf32>
    %589 = tpu.matmul %587, %588, %cst_329 {dimension_numbers = #tpu.dot_dimension_numbers<[1], [0], [0], [1], [0, 0, 1, 1], [], []>} : vector<8x80xf32>, vector<80x40xf32>, vector<8x40xf32> -> vector<8x40xf32>
    %cst_330 = arith.constant dense<0.000000e+00> : vector<8x80xf32>
    %590 = tpu.matmul %6, %587, %cst_330 {dimension_numbers = #tpu.dot_dimension_numbers<[1], [0], [0], [1], [0, 0, 1, 1], [], []>} : vector<8x8xf32>, vector<8x80xf32>, vector<8x80xf32> -> vector<8x80xf32>
    %c2648 = arith.constant 2648 : index
    %c0_331 = arith.constant 0 : index
    %591 = vector.load %arg2[%c2648, %c0_331] : memref<4944x128xf32, #tpu.memory_space<vmem>>, vector<80x40xf32>
    %cst_332 = arith.constant dense<0.000000e+00> : vector<8x40xf32>
    %592 = tpu.matmul %590, %591, %cst_332 {dimension_numbers = #tpu.dot_dimension_numbers<[1], [0], [0], [1], [0, 0, 1, 1], [], []>} : vector<8x80xf32>, vector<80x40xf32>, vector<8x40xf32> -> vector<8x40xf32>
    %593 = arith.addf %589, %592 : vector<8x40xf32>
    %cst_333 = arith.constant dense<0.000000e+00> : vector<8x80xf32>
    %594 = tpu.matmul %7, %587, %cst_333 {dimension_numbers = #tpu.dot_dimension_numbers<[1], [0], [0], [1], [0, 0, 1, 1], [], []>} : vector<8x8xf32>, vector<8x80xf32>, vector<8x80xf32> -> vector<8x80xf32>
    %c2808 = arith.constant 2808 : index
    %c0_334 = arith.constant 0 : index
    %595 = vector.load %arg2[%c2808, %c0_334] : memref<4944x128xf32, #tpu.memory_space<vmem>>, vector<80x40xf32>
    %cst_335 = arith.constant dense<0.000000e+00> : vector<8x40xf32>
    %596 = tpu.matmul %594, %595, %cst_335 {dimension_numbers = #tpu.dot_dimension_numbers<[1], [0], [0], [1], [0, 0, 1, 1], [], []>} : vector<8x80xf32>, vector<80x40xf32>, vector<8x40xf32> -> vector<8x40xf32>
    %597 = arith.addf %593, %596 : vector<8x40xf32>
    %c2888 = arith.constant 2888 : index
    %c0_336 = arith.constant 0 : index
    %598 = vector.load %arg2[%c2888, %c0_336] : memref<4944x128xf32, #tpu.memory_space<vmem>>, vector<1x40xf32>
    %599 = vector.broadcast %598 : vector<1x40xf32> to vector<8x40xf32>
    %600 = arith.addf %597, %599 : vector<8x40xf32>
    %cst_337 = arith.constant 0.000000e+00 : f32
    %601 = vector.broadcast %cst_337 : f32 to vector<8x40xf32>
    %602 = arith.maximumf %600, %601 : vector<8x40xf32>
    %c2936 = arith.constant 2936 : index
    %c0_338 = arith.constant 0 : index
    %603 = vector.load %arg2[%c2936, %c0_338] : memref<4944x128xf32, #tpu.memory_space<vmem>>, vector<40x40xf32>
    %cst_339 = arith.constant dense<0.000000e+00> : vector<8x40xf32>
    %604 = tpu.matmul %602, %603, %cst_339 {dimension_numbers = #tpu.dot_dimension_numbers<[1], [0], [0], [1], [0, 0, 1, 1], [], []>} : vector<8x40xf32>, vector<40x40xf32>, vector<8x40xf32> -> vector<8x40xf32>
    %cst_340 = arith.constant dense<0.000000e+00> : vector<8x40xf32>
    %605 = tpu.matmul %6, %602, %cst_340 {dimension_numbers = #tpu.dot_dimension_numbers<[1], [0], [0], [1], [0, 0, 1, 1], [], []>} : vector<8x8xf32>, vector<8x40xf32>, vector<8x40xf32> -> vector<8x40xf32>
    %c2896 = arith.constant 2896 : index
    %c0_341 = arith.constant 0 : index
    %606 = vector.load %arg2[%c2896, %c0_341] : memref<4944x128xf32, #tpu.memory_space<vmem>>, vector<40x40xf32>
    %cst_342 = arith.constant dense<0.000000e+00> : vector<8x40xf32>
    %607 = tpu.matmul %605, %606, %cst_342 {dimension_numbers = #tpu.dot_dimension_numbers<[1], [0], [0], [1], [0, 0, 1, 1], [], []>} : vector<8x40xf32>, vector<40x40xf32>, vector<8x40xf32> -> vector<8x40xf32>
    %608 = arith.addf %604, %607 : vector<8x40xf32>
    %cst_343 = arith.constant dense<0.000000e+00> : vector<8x40xf32>
    %609 = tpu.matmul %7, %602, %cst_343 {dimension_numbers = #tpu.dot_dimension_numbers<[1], [0], [0], [1], [0, 0, 1, 1], [], []>} : vector<8x8xf32>, vector<8x40xf32>, vector<8x40xf32> -> vector<8x40xf32>
    %c2976 = arith.constant 2976 : index
    %c0_344 = arith.constant 0 : index
    %610 = vector.load %arg2[%c2976, %c0_344] : memref<4944x128xf32, #tpu.memory_space<vmem>>, vector<40x40xf32>
    %cst_345 = arith.constant dense<0.000000e+00> : vector<8x40xf32>
    %611 = tpu.matmul %609, %610, %cst_345 {dimension_numbers = #tpu.dot_dimension_numbers<[1], [0], [0], [1], [0, 0, 1, 1], [], []>} : vector<8x40xf32>, vector<40x40xf32>, vector<8x40xf32> -> vector<8x40xf32>
    %612 = arith.addf %608, %611 : vector<8x40xf32>
    %c3016 = arith.constant 3016 : index
    %c0_346 = arith.constant 0 : index
    %613 = vector.load %arg2[%c3016, %c0_346] : memref<4944x128xf32, #tpu.memory_space<vmem>>, vector<1x40xf32>
    %614 = vector.broadcast %613 : vector<1x40xf32> to vector<8x40xf32>
    %615 = arith.addf %612, %614 : vector<8x40xf32>
    %cst_347 = arith.constant 0.000000e+00 : f32
    %616 = vector.broadcast %cst_347 : f32 to vector<8x40xf32>
    %617 = arith.maximumf %615, %616 : vector<8x40xf32>
    %cst_348 = arith.constant dense<0.000000e+00> : vector<8xf32>
    %618 = vector.multi_reduction <add>, %617, %cst_348 [1] : vector<8x40xf32> to vector<8xf32>
    %619 = vector.shape_cast %618 : vector<8xf32> to vector<8x1xf32>
    %cst_349 = arith.constant dense<0.000000e+00> : vector<8x1xf32>
    %620 = tpu.matmul %11, %619, %cst_349 {dimension_numbers = #tpu.dot_dimension_numbers<[1], [0], [0], [1], [0, 0, 1, 1], [], []>} : vector<8x8xf32>, vector<8x1xf32>, vector<8x1xf32> -> vector<8x1xf32>
    %cst_350 = arith.constant 6.250000e-03 : f32
    %621 = vector.broadcast %cst_350 : f32 to vector<8x1xf32>
    %622 = arith.mulf %620, %621 : vector<8x1xf32>
    %623 = arith.mulf %617, %617 : vector<8x40xf32>
    %cst_351 = arith.constant dense<0.000000e+00> : vector<8xf32>
    %624 = vector.multi_reduction <add>, %623, %cst_351 [1] : vector<8x40xf32> to vector<8xf32>
    %625 = vector.shape_cast %624 : vector<8xf32> to vector<8x1xf32>
    %cst_352 = arith.constant dense<0.000000e+00> : vector<8x1xf32>
    %626 = tpu.matmul %11, %625, %cst_352 {dimension_numbers = #tpu.dot_dimension_numbers<[1], [0], [0], [1], [0, 0, 1, 1], [], []>} : vector<8x8xf32>, vector<8x1xf32>, vector<8x1xf32> -> vector<8x1xf32>
    %cst_353 = arith.constant 6.250000e-03 : f32
    %627 = vector.broadcast %cst_353 : f32 to vector<8x1xf32>
    %628 = arith.mulf %626, %627 : vector<8x1xf32>
    %629 = vector.broadcast %622 : vector<8x1xf32> to vector<8x40xf32>
    %630 = arith.subf %617, %629 : vector<8x40xf32>
    %631 = arith.mulf %622, %622 : vector<8x1xf32>
    %632 = arith.subf %628, %631 : vector<8x1xf32>
    %cst_354 = arith.constant 9.99999974E-6 : f32
    %633 = vector.broadcast %cst_354 : f32 to vector<8x1xf32>
    %634 = arith.addf %632, %633 : vector<8x1xf32>
    %635 = math.rsqrt %634 : vector<8x1xf32>
    %636 = vector.broadcast %635 : vector<8x1xf32> to vector<8x40xf32>
    %637 = arith.mulf %630, %636 : vector<8x40xf32>
    %c3024 = arith.constant 3024 : index
    %c0_355 = arith.constant 0 : index
    %638 = vector.load %arg2[%c3024, %c0_355] : memref<4944x128xf32, #tpu.memory_space<vmem>>, vector<8x40xf32>
    %639 = arith.mulf %637, %638 : vector<8x40xf32>
    %c3032 = arith.constant 3032 : index
    %c0_356 = arith.constant 0 : index
    %640 = vector.load %arg2[%c3032, %c0_356] : memref<4944x128xf32, #tpu.memory_space<vmem>>, vector<8x40xf32>
    %641 = arith.addf %639, %640 : vector<8x40xf32>
    %c3080 = arith.constant 3080 : index
    %c0_357 = arith.constant 0 : index
    %642 = vector.load %arg2[%c3080, %c0_357] : memref<4944x128xf32, #tpu.memory_space<vmem>>, vector<40x40xf32>
    %cst_358 = arith.constant dense<0.000000e+00> : vector<8x40xf32>
    %643 = tpu.matmul %641, %642, %cst_358 {dimension_numbers = #tpu.dot_dimension_numbers<[1], [0], [0], [1], [0, 0, 1, 1], [], []>} : vector<8x40xf32>, vector<40x40xf32>, vector<8x40xf32> -> vector<8x40xf32>
    %cst_359 = arith.constant dense<0.000000e+00> : vector<8x40xf32>
    %644 = tpu.matmul %6, %641, %cst_359 {dimension_numbers = #tpu.dot_dimension_numbers<[1], [0], [0], [1], [0, 0, 1, 1], [], []>} : vector<8x8xf32>, vector<8x40xf32>, vector<8x40xf32> -> vector<8x40xf32>
    %c3040 = arith.constant 3040 : index
    %c0_360 = arith.constant 0 : index
    %645 = vector.load %arg2[%c3040, %c0_360] : memref<4944x128xf32, #tpu.memory_space<vmem>>, vector<40x40xf32>
    %cst_361 = arith.constant dense<0.000000e+00> : vector<8x40xf32>
    %646 = tpu.matmul %644, %645, %cst_361 {dimension_numbers = #tpu.dot_dimension_numbers<[1], [0], [0], [1], [0, 0, 1, 1], [], []>} : vector<8x40xf32>, vector<40x40xf32>, vector<8x40xf32> -> vector<8x40xf32>
    %647 = arith.addf %643, %646 : vector<8x40xf32>
    %cst_362 = arith.constant dense<0.000000e+00> : vector<8x40xf32>
    %648 = tpu.matmul %7, %641, %cst_362 {dimension_numbers = #tpu.dot_dimension_numbers<[1], [0], [0], [1], [0, 0, 1, 1], [], []>} : vector<8x8xf32>, vector<8x40xf32>, vector<8x40xf32> -> vector<8x40xf32>
    %c3120 = arith.constant 3120 : index
    %c0_363 = arith.constant 0 : index
    %649 = vector.load %arg2[%c3120, %c0_363] : memref<4944x128xf32, #tpu.memory_space<vmem>>, vector<40x40xf32>
    %cst_364 = arith.constant dense<0.000000e+00> : vector<8x40xf32>
    %650 = tpu.matmul %648, %649, %cst_364 {dimension_numbers = #tpu.dot_dimension_numbers<[1], [0], [0], [1], [0, 0, 1, 1], [], []>} : vector<8x40xf32>, vector<40x40xf32>, vector<8x40xf32> -> vector<8x40xf32>
    %651 = arith.addf %647, %650 : vector<8x40xf32>
    %c3160 = arith.constant 3160 : index
    %c0_365 = arith.constant 0 : index
    %652 = vector.load %arg2[%c3160, %c0_365] : memref<4944x128xf32, #tpu.memory_space<vmem>>, vector<1x40xf32>
    %653 = vector.broadcast %652 : vector<1x40xf32> to vector<8x40xf32>
    %654 = arith.addf %651, %653 : vector<8x40xf32>
    %cst_366 = arith.constant 0.000000e+00 : f32
    %655 = vector.broadcast %cst_366 : f32 to vector<8x40xf32>
    %656 = arith.maximumf %654, %655 : vector<8x40xf32>
    %c3208 = arith.constant 3208 : index
    %c0_367 = arith.constant 0 : index
    %657 = vector.load %arg2[%c3208, %c0_367] : memref<4944x128xf32, #tpu.memory_space<vmem>>, vector<40x40xf32>
    %cst_368 = arith.constant dense<0.000000e+00> : vector<8x40xf32>
    %658 = tpu.matmul %656, %657, %cst_368 {dimension_numbers = #tpu.dot_dimension_numbers<[1], [0], [0], [1], [0, 0, 1, 1], [], []>} : vector<8x40xf32>, vector<40x40xf32>, vector<8x40xf32> -> vector<8x40xf32>
    %cst_369 = arith.constant dense<0.000000e+00> : vector<8x40xf32>
    %659 = tpu.matmul %6, %656, %cst_369 {dimension_numbers = #tpu.dot_dimension_numbers<[1], [0], [0], [1], [0, 0, 1, 1], [], []>} : vector<8x8xf32>, vector<8x40xf32>, vector<8x40xf32> -> vector<8x40xf32>
    %c3168 = arith.constant 3168 : index
    %c0_370 = arith.constant 0 : index
    %660 = vector.load %arg2[%c3168, %c0_370] : memref<4944x128xf32, #tpu.memory_space<vmem>>, vector<40x40xf32>
    %cst_371 = arith.constant dense<0.000000e+00> : vector<8x40xf32>
    %661 = tpu.matmul %659, %660, %cst_371 {dimension_numbers = #tpu.dot_dimension_numbers<[1], [0], [0], [1], [0, 0, 1, 1], [], []>} : vector<8x40xf32>, vector<40x40xf32>, vector<8x40xf32> -> vector<8x40xf32>
    %662 = arith.addf %658, %661 : vector<8x40xf32>
    %cst_372 = arith.constant dense<0.000000e+00> : vector<8x40xf32>
    %663 = tpu.matmul %7, %656, %cst_372 {dimension_numbers = #tpu.dot_dimension_numbers<[1], [0], [0], [1], [0, 0, 1, 1], [], []>} : vector<8x8xf32>, vector<8x40xf32>, vector<8x40xf32> -> vector<8x40xf32>
    %c3248 = arith.constant 3248 : index
    %c0_373 = arith.constant 0 : index
    %664 = vector.load %arg2[%c3248, %c0_373] : memref<4944x128xf32, #tpu.memory_space<vmem>>, vector<40x40xf32>
    %cst_374 = arith.constant dense<0.000000e+00> : vector<8x40xf32>
    %665 = tpu.matmul %663, %664, %cst_374 {dimension_numbers = #tpu.dot_dimension_numbers<[1], [0], [0], [1], [0, 0, 1, 1], [], []>} : vector<8x40xf32>, vector<40x40xf32>, vector<8x40xf32> -> vector<8x40xf32>
    %666 = arith.addf %662, %665 : vector<8x40xf32>
    %c3288 = arith.constant 3288 : index
    %c0_375 = arith.constant 0 : index
    %667 = vector.load %arg2[%c3288, %c0_375] : memref<4944x128xf32, #tpu.memory_space<vmem>>, vector<1x40xf32>
    %668 = vector.broadcast %667 : vector<1x40xf32> to vector<8x40xf32>
    %669 = arith.addf %666, %668 : vector<8x40xf32>
    %cst_376 = arith.constant 0.000000e+00 : f32
    %670 = vector.broadcast %cst_376 : f32 to vector<8x40xf32>
    %671 = arith.maximumf %669, %670 : vector<8x40xf32>
    %c3296 = arith.constant 3296 : index
    %c0_377 = arith.constant 0 : index
    %672 = vector.load %arg2[%c3296, %c0_377] : memref<4944x128xf32, #tpu.memory_space<vmem>>, vector<10x40xf32>
    %cst_378 = arith.constant dense<0.000000e+00> : vector<2x40xf32>
    %673 = tpu.matmul %16, %672, %cst_378 {dimension_numbers = #tpu.dot_dimension_numbers<[1], [0], [0], [1], [0, 0, 1, 1], [], []>} : vector<2x10xf32>, vector<10x40xf32>, vector<2x40xf32> -> vector<2x40xf32>
    %c3312 = arith.constant 3312 : index
    %c0_379 = arith.constant 0 : index
    %674 = vector.load %arg2[%c3312, %c0_379] : memref<4944x128xf32, #tpu.memory_space<vmem>>, vector<1x40xf32>
    %675 = vector.broadcast %674 : vector<1x40xf32> to vector<2x40xf32>
    %676 = arith.addf %673, %675 : vector<2x40xf32>
    %c4736 = arith.constant 4736 : index
    %c0_380 = arith.constant 0 : index
    %677 = vector.load %arg2[%c4736, %c0_380] : memref<4944x128xf32, #tpu.memory_space<vmem>>, vector<16x8xf32>
    %c4752 = arith.constant 4752 : index
    %c0_381 = arith.constant 0 : index
    %678 = vector.load %arg2[%c4752, %c0_381] : memref<4944x128xf32, #tpu.memory_space<vmem>>, vector<16x8xf32>
    %c3320 = arith.constant 3320 : index
    %c0_382 = arith.constant 0 : index
    %679 = vector.load %arg2[%c3320, %c0_382] : memref<4944x128xf32, #tpu.memory_space<vmem>>, vector<40x20xf32>
    %cst_383 = arith.constant dense<0.000000e+00> : vector<8x20xf32>
    %680 = tpu.matmul %671, %679, %cst_383 {dimension_numbers = #tpu.dot_dimension_numbers<[1], [0], [0], [1], [0, 0, 1, 1], [], []>} : vector<8x40xf32>, vector<40x20xf32>, vector<8x20xf32> -> vector<8x20xf32>
    %cst_384 = arith.constant dense<0.000000e+00> : vector<16x20xf32>
    %681 = tpu.matmul %677, %680, %cst_384 {dimension_numbers = #tpu.dot_dimension_numbers<[1], [0], [0], [1], [0, 0, 1, 1], [], []>} : vector<16x8xf32>, vector<8x20xf32>, vector<16x20xf32> -> vector<16x20xf32>
    %c3360 = arith.constant 3360 : index
    %c0_385 = arith.constant 0 : index
    %682 = vector.load %arg2[%c3360, %c0_385] : memref<4944x128xf32, #tpu.memory_space<vmem>>, vector<40x20xf32>
    %cst_386 = arith.constant dense<0.000000e+00> : vector<8x20xf32>
    %683 = tpu.matmul %671, %682, %cst_386 {dimension_numbers = #tpu.dot_dimension_numbers<[1], [0], [0], [1], [0, 0, 1, 1], [], []>} : vector<8x40xf32>, vector<40x20xf32>, vector<8x20xf32> -> vector<8x20xf32>
    %cst_387 = arith.constant dense<0.000000e+00> : vector<16x20xf32>
    %684 = tpu.matmul %678, %683, %cst_387 {dimension_numbers = #tpu.dot_dimension_numbers<[1], [0], [0], [1], [0, 0, 1, 1], [], []>} : vector<16x8xf32>, vector<8x20xf32>, vector<16x20xf32> -> vector<16x20xf32>
    %685 = arith.addf %681, %684 : vector<16x20xf32>
    %c3400 = arith.constant 3400 : index
    %c0_388 = arith.constant 0 : index
    %686 = vector.load %arg2[%c3400, %c0_388] : memref<4944x128xf32, #tpu.memory_space<vmem>>, vector<1x20xf32>
    %687 = vector.broadcast %686 : vector<1x20xf32> to vector<16x20xf32>
    %688 = arith.addf %685, %687 : vector<16x20xf32>
    %c4816 = arith.constant 4816 : index
    %c0_389 = arith.constant 0 : index
    %689 = vector.load %arg2[%c4816, %c0_389] : memref<4944x128xf32, #tpu.memory_space<vmem>>, vector<20x40xf32>
    %cst_390 = arith.constant dense<0.000000e+00> : vector<16x40xf32>
    %690 = tpu.matmul %278, %689, %cst_390 {dimension_numbers = #tpu.dot_dimension_numbers<[1], [0], [0], [1], [0, 0, 1, 1], [], []>} : vector<16x20xf32>, vector<20x40xf32>, vector<16x40xf32> -> vector<16x40xf32>
    %c4840 = arith.constant 4840 : index
    %c0_391 = arith.constant 0 : index
    %691 = vector.load %arg2[%c4840, %c0_391] : memref<4944x128xf32, #tpu.memory_space<vmem>>, vector<20x40xf32>
    %cst_392 = arith.constant dense<0.000000e+00> : vector<16x40xf32>
    %692 = tpu.matmul %688, %691, %cst_392 {dimension_numbers = #tpu.dot_dimension_numbers<[1], [0], [0], [1], [0, 0, 1, 1], [], []>} : vector<16x20xf32>, vector<20x40xf32>, vector<16x40xf32> -> vector<16x40xf32>
    %693 = arith.addf %690, %692 : vector<16x40xf32>
    %cst_393 = arith.constant dense<0.000000e+00> : vector<16x40xf32>
    %694 = tpu.matmul %13, %676, %cst_393 {dimension_numbers = #tpu.dot_dimension_numbers<[1], [0], [0], [1], [0, 0, 1, 1], [], []>} : vector<16x2xf32>, vector<2x40xf32>, vector<16x40xf32> -> vector<16x40xf32>
    %695 = arith.addf %693, %694 : vector<16x40xf32>
    %cst_394 = arith.constant dense<0.000000e+00> : vector<16xf32>
    %696 = vector.multi_reduction <add>, %695, %cst_394 [1] : vector<16x40xf32> to vector<16xf32>
    %697 = vector.shape_cast %696 : vector<16xf32> to vector<16x1xf32>
    %cst_395 = arith.constant dense<0.000000e+00> : vector<16x1xf32>
    %698 = tpu.matmul %9, %697, %cst_395 {dimension_numbers = #tpu.dot_dimension_numbers<[1], [0], [0], [1], [0, 0, 1, 1], [], []>} : vector<16x16xf32>, vector<16x1xf32>, vector<16x1xf32> -> vector<16x1xf32>
    %cst_396 = arith.constant 3.125000e-03 : f32
    %699 = vector.broadcast %cst_396 : f32 to vector<16x1xf32>
    %700 = arith.mulf %698, %699 : vector<16x1xf32>
    %701 = arith.mulf %695, %695 : vector<16x40xf32>
    %cst_397 = arith.constant dense<0.000000e+00> : vector<16xf32>
    %702 = vector.multi_reduction <add>, %701, %cst_397 [1] : vector<16x40xf32> to vector<16xf32>
    %703 = vector.shape_cast %702 : vector<16xf32> to vector<16x1xf32>
    %cst_398 = arith.constant dense<0.000000e+00> : vector<16x1xf32>
    %704 = tpu.matmul %9, %703, %cst_398 {dimension_numbers = #tpu.dot_dimension_numbers<[1], [0], [0], [1], [0, 0, 1, 1], [], []>} : vector<16x16xf32>, vector<16x1xf32>, vector<16x1xf32> -> vector<16x1xf32>
    %cst_399 = arith.constant 3.125000e-03 : f32
    %705 = vector.broadcast %cst_399 : f32 to vector<16x1xf32>
    %706 = arith.mulf %704, %705 : vector<16x1xf32>
    %707 = vector.broadcast %700 : vector<16x1xf32> to vector<16x40xf32>
    %708 = arith.subf %695, %707 : vector<16x40xf32>
    %709 = arith.mulf %700, %700 : vector<16x1xf32>
    %710 = arith.subf %706, %709 : vector<16x1xf32>
    %cst_400 = arith.constant 9.99999974E-6 : f32
    %711 = vector.broadcast %cst_400 : f32 to vector<16x1xf32>
    %712 = arith.addf %710, %711 : vector<16x1xf32>
    %713 = math.rsqrt %712 : vector<16x1xf32>
    %714 = vector.broadcast %713 : vector<16x1xf32> to vector<16x40xf32>
    %715 = arith.mulf %708, %714 : vector<16x40xf32>
    %c3408 = arith.constant 3408 : index
    %c0_401 = arith.constant 0 : index
    %716 = vector.load %arg2[%c3408, %c0_401] : memref<4944x128xf32, #tpu.memory_space<vmem>>, vector<16x40xf32>
    %717 = arith.mulf %715, %716 : vector<16x40xf32>
    %c3424 = arith.constant 3424 : index
    %c0_402 = arith.constant 0 : index
    %718 = vector.load %arg2[%c3424, %c0_402] : memref<4944x128xf32, #tpu.memory_space<vmem>>, vector<16x40xf32>
    %719 = arith.addf %717, %718 : vector<16x40xf32>
    %c3480 = arith.constant 3480 : index
    %c0_403 = arith.constant 0 : index
    %720 = vector.load %arg2[%c3480, %c0_403] : memref<4944x128xf32, #tpu.memory_space<vmem>>, vector<40x20xf32>
    %cst_404 = arith.constant dense<0.000000e+00> : vector<16x20xf32>
    %721 = tpu.matmul %719, %720, %cst_404 {dimension_numbers = #tpu.dot_dimension_numbers<[1], [0], [0], [1], [0, 0, 1, 1], [], []>} : vector<16x40xf32>, vector<40x20xf32>, vector<16x20xf32> -> vector<16x20xf32>
    %cst_405 = arith.constant dense<0.000000e+00> : vector<16x40xf32>
    %722 = tpu.matmul %2, %719, %cst_405 {dimension_numbers = #tpu.dot_dimension_numbers<[1], [0], [0], [1], [0, 0, 1, 1], [], []>} : vector<16x16xf32>, vector<16x40xf32>, vector<16x40xf32> -> vector<16x40xf32>
    %c3440 = arith.constant 3440 : index
    %c0_406 = arith.constant 0 : index
    %723 = vector.load %arg2[%c3440, %c0_406] : memref<4944x128xf32, #tpu.memory_space<vmem>>, vector<40x20xf32>
    %cst_407 = arith.constant dense<0.000000e+00> : vector<16x20xf32>
    %724 = tpu.matmul %722, %723, %cst_407 {dimension_numbers = #tpu.dot_dimension_numbers<[1], [0], [0], [1], [0, 0, 1, 1], [], []>} : vector<16x40xf32>, vector<40x20xf32>, vector<16x20xf32> -> vector<16x20xf32>
    %725 = arith.addf %721, %724 : vector<16x20xf32>
    %cst_408 = arith.constant dense<0.000000e+00> : vector<16x40xf32>
    %726 = tpu.matmul %3, %719, %cst_408 {dimension_numbers = #tpu.dot_dimension_numbers<[1], [0], [0], [1], [0, 0, 1, 1], [], []>} : vector<16x16xf32>, vector<16x40xf32>, vector<16x40xf32> -> vector<16x40xf32>
    %c3520 = arith.constant 3520 : index
    %c0_409 = arith.constant 0 : index
    %727 = vector.load %arg2[%c3520, %c0_409] : memref<4944x128xf32, #tpu.memory_space<vmem>>, vector<40x20xf32>
    %cst_410 = arith.constant dense<0.000000e+00> : vector<16x20xf32>
    %728 = tpu.matmul %726, %727, %cst_410 {dimension_numbers = #tpu.dot_dimension_numbers<[1], [0], [0], [1], [0, 0, 1, 1], [], []>} : vector<16x40xf32>, vector<40x20xf32>, vector<16x20xf32> -> vector<16x20xf32>
    %729 = arith.addf %725, %728 : vector<16x20xf32>
    %c3560 = arith.constant 3560 : index
    %c0_411 = arith.constant 0 : index
    %730 = vector.load %arg2[%c3560, %c0_411] : memref<4944x128xf32, #tpu.memory_space<vmem>>, vector<1x20xf32>
    %731 = vector.broadcast %730 : vector<1x20xf32> to vector<16x20xf32>
    %732 = arith.addf %729, %731 : vector<16x20xf32>
    %cst_412 = arith.constant 0.000000e+00 : f32
    %733 = vector.broadcast %cst_412 : f32 to vector<16x20xf32>
    %734 = arith.maximumf %732, %733 : vector<16x20xf32>
    %c3592 = arith.constant 3592 : index
    %c0_413 = arith.constant 0 : index
    %735 = vector.load %arg2[%c3592, %c0_413] : memref<4944x128xf32, #tpu.memory_space<vmem>>, vector<20x20xf32>
    %cst_414 = arith.constant dense<0.000000e+00> : vector<16x20xf32>
    %736 = tpu.matmul %734, %735, %cst_414 {dimension_numbers = #tpu.dot_dimension_numbers<[1], [0], [0], [1], [0, 0, 1, 1], [], []>} : vector<16x20xf32>, vector<20x20xf32>, vector<16x20xf32> -> vector<16x20xf32>
    %cst_415 = arith.constant dense<0.000000e+00> : vector<16x20xf32>
    %737 = tpu.matmul %2, %734, %cst_415 {dimension_numbers = #tpu.dot_dimension_numbers<[1], [0], [0], [1], [0, 0, 1, 1], [], []>} : vector<16x16xf32>, vector<16x20xf32>, vector<16x20xf32> -> vector<16x20xf32>
    %c3568 = arith.constant 3568 : index
    %c0_416 = arith.constant 0 : index
    %738 = vector.load %arg2[%c3568, %c0_416] : memref<4944x128xf32, #tpu.memory_space<vmem>>, vector<20x20xf32>
    %cst_417 = arith.constant dense<0.000000e+00> : vector<16x20xf32>
    %739 = tpu.matmul %737, %738, %cst_417 {dimension_numbers = #tpu.dot_dimension_numbers<[1], [0], [0], [1], [0, 0, 1, 1], [], []>} : vector<16x20xf32>, vector<20x20xf32>, vector<16x20xf32> -> vector<16x20xf32>
    %740 = arith.addf %736, %739 : vector<16x20xf32>
    %cst_418 = arith.constant dense<0.000000e+00> : vector<16x20xf32>
    %741 = tpu.matmul %3, %734, %cst_418 {dimension_numbers = #tpu.dot_dimension_numbers<[1], [0], [0], [1], [0, 0, 1, 1], [], []>} : vector<16x16xf32>, vector<16x20xf32>, vector<16x20xf32> -> vector<16x20xf32>
    %c3616 = arith.constant 3616 : index
    %c0_419 = arith.constant 0 : index
    %742 = vector.load %arg2[%c3616, %c0_419] : memref<4944x128xf32, #tpu.memory_space<vmem>>, vector<20x20xf32>
    %cst_420 = arith.constant dense<0.000000e+00> : vector<16x20xf32>
    %743 = tpu.matmul %741, %742, %cst_420 {dimension_numbers = #tpu.dot_dimension_numbers<[1], [0], [0], [1], [0, 0, 1, 1], [], []>} : vector<16x20xf32>, vector<20x20xf32>, vector<16x20xf32> -> vector<16x20xf32>
    %744 = arith.addf %740, %743 : vector<16x20xf32>
    %c3640 = arith.constant 3640 : index
    %c0_421 = arith.constant 0 : index
    %745 = vector.load %arg2[%c3640, %c0_421] : memref<4944x128xf32, #tpu.memory_space<vmem>>, vector<1x20xf32>
    %746 = vector.broadcast %745 : vector<1x20xf32> to vector<16x20xf32>
    %747 = arith.addf %744, %746 : vector<16x20xf32>
    %cst_422 = arith.constant 0.000000e+00 : f32
    %748 = vector.broadcast %cst_422 : f32 to vector<16x20xf32>
    %749 = arith.maximumf %747, %748 : vector<16x20xf32>
    %cst_423 = arith.constant dense<0.000000e+00> : vector<16xf32>
    %750 = vector.multi_reduction <add>, %749, %cst_423 [1] : vector<16x20xf32> to vector<16xf32>
    %751 = vector.shape_cast %750 : vector<16xf32> to vector<16x1xf32>
    %cst_424 = arith.constant dense<0.000000e+00> : vector<16x1xf32>
    %752 = tpu.matmul %9, %751, %cst_424 {dimension_numbers = #tpu.dot_dimension_numbers<[1], [0], [0], [1], [0, 0, 1, 1], [], []>} : vector<16x16xf32>, vector<16x1xf32>, vector<16x1xf32> -> vector<16x1xf32>
    %cst_425 = arith.constant 6.250000e-03 : f32
    %753 = vector.broadcast %cst_425 : f32 to vector<16x1xf32>
    %754 = arith.mulf %752, %753 : vector<16x1xf32>
    %755 = arith.mulf %749, %749 : vector<16x20xf32>
    %cst_426 = arith.constant dense<0.000000e+00> : vector<16xf32>
    %756 = vector.multi_reduction <add>, %755, %cst_426 [1] : vector<16x20xf32> to vector<16xf32>
    %757 = vector.shape_cast %756 : vector<16xf32> to vector<16x1xf32>
    %cst_427 = arith.constant dense<0.000000e+00> : vector<16x1xf32>
    %758 = tpu.matmul %9, %757, %cst_427 {dimension_numbers = #tpu.dot_dimension_numbers<[1], [0], [0], [1], [0, 0, 1, 1], [], []>} : vector<16x16xf32>, vector<16x1xf32>, vector<16x1xf32> -> vector<16x1xf32>
    %cst_428 = arith.constant 6.250000e-03 : f32
    %759 = vector.broadcast %cst_428 : f32 to vector<16x1xf32>
    %760 = arith.mulf %758, %759 : vector<16x1xf32>
    %761 = vector.broadcast %754 : vector<16x1xf32> to vector<16x20xf32>
    %762 = arith.subf %749, %761 : vector<16x20xf32>
    %763 = arith.mulf %754, %754 : vector<16x1xf32>
    %764 = arith.subf %760, %763 : vector<16x1xf32>
    %cst_429 = arith.constant 9.99999974E-6 : f32
    %765 = vector.broadcast %cst_429 : f32 to vector<16x1xf32>
    %766 = arith.addf %764, %765 : vector<16x1xf32>
    %767 = math.rsqrt %766 : vector<16x1xf32>
    %768 = vector.broadcast %767 : vector<16x1xf32> to vector<16x20xf32>
    %769 = arith.mulf %762, %768 : vector<16x20xf32>
    %c3648 = arith.constant 3648 : index
    %c0_430 = arith.constant 0 : index
    %770 = vector.load %arg2[%c3648, %c0_430] : memref<4944x128xf32, #tpu.memory_space<vmem>>, vector<16x20xf32>
    %771 = arith.mulf %769, %770 : vector<16x20xf32>
    %c3664 = arith.constant 3664 : index
    %c0_431 = arith.constant 0 : index
    %772 = vector.load %arg2[%c3664, %c0_431] : memref<4944x128xf32, #tpu.memory_space<vmem>>, vector<16x20xf32>
    %773 = arith.addf %771, %772 : vector<16x20xf32>
    %c3704 = arith.constant 3704 : index
    %c0_432 = arith.constant 0 : index
    %774 = vector.load %arg2[%c3704, %c0_432] : memref<4944x128xf32, #tpu.memory_space<vmem>>, vector<20x20xf32>
    %cst_433 = arith.constant dense<0.000000e+00> : vector<16x20xf32>
    %775 = tpu.matmul %773, %774, %cst_433 {dimension_numbers = #tpu.dot_dimension_numbers<[1], [0], [0], [1], [0, 0, 1, 1], [], []>} : vector<16x20xf32>, vector<20x20xf32>, vector<16x20xf32> -> vector<16x20xf32>
    %cst_434 = arith.constant dense<0.000000e+00> : vector<16x20xf32>
    %776 = tpu.matmul %2, %773, %cst_434 {dimension_numbers = #tpu.dot_dimension_numbers<[1], [0], [0], [1], [0, 0, 1, 1], [], []>} : vector<16x16xf32>, vector<16x20xf32>, vector<16x20xf32> -> vector<16x20xf32>
    %c3680 = arith.constant 3680 : index
    %c0_435 = arith.constant 0 : index
    %777 = vector.load %arg2[%c3680, %c0_435] : memref<4944x128xf32, #tpu.memory_space<vmem>>, vector<20x20xf32>
    %cst_436 = arith.constant dense<0.000000e+00> : vector<16x20xf32>
    %778 = tpu.matmul %776, %777, %cst_436 {dimension_numbers = #tpu.dot_dimension_numbers<[1], [0], [0], [1], [0, 0, 1, 1], [], []>} : vector<16x20xf32>, vector<20x20xf32>, vector<16x20xf32> -> vector<16x20xf32>
    %779 = arith.addf %775, %778 : vector<16x20xf32>
    %cst_437 = arith.constant dense<0.000000e+00> : vector<16x20xf32>
    %780 = tpu.matmul %3, %773, %cst_437 {dimension_numbers = #tpu.dot_dimension_numbers<[1], [0], [0], [1], [0, 0, 1, 1], [], []>} : vector<16x16xf32>, vector<16x20xf32>, vector<16x20xf32> -> vector<16x20xf32>
    %c3728 = arith.constant 3728 : index
    %c0_438 = arith.constant 0 : index
    %781 = vector.load %arg2[%c3728, %c0_438] : memref<4944x128xf32, #tpu.memory_space<vmem>>, vector<20x20xf32>
    %cst_439 = arith.constant dense<0.000000e+00> : vector<16x20xf32>
    %782 = tpu.matmul %780, %781, %cst_439 {dimension_numbers = #tpu.dot_dimension_numbers<[1], [0], [0], [1], [0, 0, 1, 1], [], []>} : vector<16x20xf32>, vector<20x20xf32>, vector<16x20xf32> -> vector<16x20xf32>
    %783 = arith.addf %779, %782 : vector<16x20xf32>
    %c3752 = arith.constant 3752 : index
    %c0_440 = arith.constant 0 : index
    %784 = vector.load %arg2[%c3752, %c0_440] : memref<4944x128xf32, #tpu.memory_space<vmem>>, vector<1x20xf32>
    %785 = vector.broadcast %784 : vector<1x20xf32> to vector<16x20xf32>
    %786 = arith.addf %783, %785 : vector<16x20xf32>
    %cst_441 = arith.constant 0.000000e+00 : f32
    %787 = vector.broadcast %cst_441 : f32 to vector<16x20xf32>
    %788 = arith.maximumf %786, %787 : vector<16x20xf32>
    %c3784 = arith.constant 3784 : index
    %c0_442 = arith.constant 0 : index
    %789 = vector.load %arg2[%c3784, %c0_442] : memref<4944x128xf32, #tpu.memory_space<vmem>>, vector<20x20xf32>
    %cst_443 = arith.constant dense<0.000000e+00> : vector<16x20xf32>
    %790 = tpu.matmul %788, %789, %cst_443 {dimension_numbers = #tpu.dot_dimension_numbers<[1], [0], [0], [1], [0, 0, 1, 1], [], []>} : vector<16x20xf32>, vector<20x20xf32>, vector<16x20xf32> -> vector<16x20xf32>
    %cst_444 = arith.constant dense<0.000000e+00> : vector<16x20xf32>
    %791 = tpu.matmul %2, %788, %cst_444 {dimension_numbers = #tpu.dot_dimension_numbers<[1], [0], [0], [1], [0, 0, 1, 1], [], []>} : vector<16x16xf32>, vector<16x20xf32>, vector<16x20xf32> -> vector<16x20xf32>
    %c3760 = arith.constant 3760 : index
    %c0_445 = arith.constant 0 : index
    %792 = vector.load %arg2[%c3760, %c0_445] : memref<4944x128xf32, #tpu.memory_space<vmem>>, vector<20x20xf32>
    %cst_446 = arith.constant dense<0.000000e+00> : vector<16x20xf32>
    %793 = tpu.matmul %791, %792, %cst_446 {dimension_numbers = #tpu.dot_dimension_numbers<[1], [0], [0], [1], [0, 0, 1, 1], [], []>} : vector<16x20xf32>, vector<20x20xf32>, vector<16x20xf32> -> vector<16x20xf32>
    %794 = arith.addf %790, %793 : vector<16x20xf32>
    %cst_447 = arith.constant dense<0.000000e+00> : vector<16x20xf32>
    %795 = tpu.matmul %3, %788, %cst_447 {dimension_numbers = #tpu.dot_dimension_numbers<[1], [0], [0], [1], [0, 0, 1, 1], [], []>} : vector<16x16xf32>, vector<16x20xf32>, vector<16x20xf32> -> vector<16x20xf32>
    %c3808 = arith.constant 3808 : index
    %c0_448 = arith.constant 0 : index
    %796 = vector.load %arg2[%c3808, %c0_448] : memref<4944x128xf32, #tpu.memory_space<vmem>>, vector<20x20xf32>
    %cst_449 = arith.constant dense<0.000000e+00> : vector<16x20xf32>
    %797 = tpu.matmul %795, %796, %cst_449 {dimension_numbers = #tpu.dot_dimension_numbers<[1], [0], [0], [1], [0, 0, 1, 1], [], []>} : vector<16x20xf32>, vector<20x20xf32>, vector<16x20xf32> -> vector<16x20xf32>
    %798 = arith.addf %794, %797 : vector<16x20xf32>
    %c3832 = arith.constant 3832 : index
    %c0_450 = arith.constant 0 : index
    %799 = vector.load %arg2[%c3832, %c0_450] : memref<4944x128xf32, #tpu.memory_space<vmem>>, vector<1x20xf32>
    %800 = vector.broadcast %799 : vector<1x20xf32> to vector<16x20xf32>
    %801 = arith.addf %798, %800 : vector<16x20xf32>
    %cst_451 = arith.constant 0.000000e+00 : f32
    %802 = vector.broadcast %cst_451 : f32 to vector<16x20xf32>
    %803 = arith.maximumf %801, %802 : vector<16x20xf32>
    %c3840 = arith.constant 3840 : index
    %c0_452 = arith.constant 0 : index
    %804 = vector.load %arg2[%c3840, %c0_452] : memref<4944x128xf32, #tpu.memory_space<vmem>>, vector<10x20xf32>
    %cst_453 = arith.constant dense<0.000000e+00> : vector<2x20xf32>
    %805 = tpu.matmul %16, %804, %cst_453 {dimension_numbers = #tpu.dot_dimension_numbers<[1], [0], [0], [1], [0, 0, 1, 1], [], []>} : vector<2x10xf32>, vector<10x20xf32>, vector<2x20xf32> -> vector<2x20xf32>
    %c3856 = arith.constant 3856 : index
    %c0_454 = arith.constant 0 : index
    %806 = vector.load %arg2[%c3856, %c0_454] : memref<4944x128xf32, #tpu.memory_space<vmem>>, vector<1x20xf32>
    %807 = vector.broadcast %806 : vector<1x20xf32> to vector<2x20xf32>
    %808 = arith.addf %805, %807 : vector<2x20xf32>
    %c4672 = arith.constant 4672 : index
    %c0_455 = arith.constant 0 : index
    %809 = vector.load %arg2[%c4672, %c0_455] : memref<4944x128xf32, #tpu.memory_space<vmem>>, vector<32x16xf32>
    %c4704 = arith.constant 4704 : index
    %c0_456 = arith.constant 0 : index
    %810 = vector.load %arg2[%c4704, %c0_456] : memref<4944x128xf32, #tpu.memory_space<vmem>>, vector<32x16xf32>
    %c3864 = arith.constant 3864 : index
    %c0_457 = arith.constant 0 : index
    %811 = vector.load %arg2[%c3864, %c0_457] : memref<4944x128xf32, #tpu.memory_space<vmem>>, vector<20x10xf32>
    %cst_458 = arith.constant dense<0.000000e+00> : vector<16x10xf32>
    %812 = tpu.matmul %803, %811, %cst_458 {dimension_numbers = #tpu.dot_dimension_numbers<[1], [0], [0], [1], [0, 0, 1, 1], [], []>} : vector<16x20xf32>, vector<20x10xf32>, vector<16x10xf32> -> vector<16x10xf32>
    %cst_459 = arith.constant dense<0.000000e+00> : vector<32x10xf32>
    %813 = tpu.matmul %809, %812, %cst_459 {dimension_numbers = #tpu.dot_dimension_numbers<[1], [0], [0], [1], [0, 0, 1, 1], [], []>} : vector<32x16xf32>, vector<16x10xf32>, vector<32x10xf32> -> vector<32x10xf32>
    %c3888 = arith.constant 3888 : index
    %c0_460 = arith.constant 0 : index
    %814 = vector.load %arg2[%c3888, %c0_460] : memref<4944x128xf32, #tpu.memory_space<vmem>>, vector<20x10xf32>
    %cst_461 = arith.constant dense<0.000000e+00> : vector<16x10xf32>
    %815 = tpu.matmul %803, %814, %cst_461 {dimension_numbers = #tpu.dot_dimension_numbers<[1], [0], [0], [1], [0, 0, 1, 1], [], []>} : vector<16x20xf32>, vector<20x10xf32>, vector<16x10xf32> -> vector<16x10xf32>
    %cst_462 = arith.constant dense<0.000000e+00> : vector<32x10xf32>
    %816 = tpu.matmul %810, %815, %cst_462 {dimension_numbers = #tpu.dot_dimension_numbers<[1], [0], [0], [1], [0, 0, 1, 1], [], []>} : vector<32x16xf32>, vector<16x10xf32>, vector<32x10xf32> -> vector<32x10xf32>
    %817 = arith.addf %813, %816 : vector<32x10xf32>
    %c3912 = arith.constant 3912 : index
    %c0_463 = arith.constant 0 : index
    %818 = vector.load %arg2[%c3912, %c0_463] : memref<4944x128xf32, #tpu.memory_space<vmem>>, vector<1x10xf32>
    %819 = vector.broadcast %818 : vector<1x10xf32> to vector<32x10xf32>
    %820 = arith.addf %817, %819 : vector<32x10xf32>
    %c4784 = arith.constant 4784 : index
    %c0_464 = arith.constant 0 : index
    %821 = vector.load %arg2[%c4784, %c0_464] : memref<4944x128xf32, #tpu.memory_space<vmem>>, vector<10x20xf32>
    %cst_465 = arith.constant dense<0.000000e+00> : vector<32x20xf32>
    %822 = tpu.matmul %144, %821, %cst_465 {dimension_numbers = #tpu.dot_dimension_numbers<[1], [0], [0], [1], [0, 0, 1, 1], [], []>} : vector<32x10xf32>, vector<10x20xf32>, vector<32x20xf32> -> vector<32x20xf32>
    %c4800 = arith.constant 4800 : index
    %c0_466 = arith.constant 0 : index
    %823 = vector.load %arg2[%c4800, %c0_466] : memref<4944x128xf32, #tpu.memory_space<vmem>>, vector<10x20xf32>
    %cst_467 = arith.constant dense<0.000000e+00> : vector<32x20xf32>
    %824 = tpu.matmul %820, %823, %cst_467 {dimension_numbers = #tpu.dot_dimension_numbers<[1], [0], [0], [1], [0, 0, 1, 1], [], []>} : vector<32x10xf32>, vector<10x20xf32>, vector<32x20xf32> -> vector<32x20xf32>
    %825 = arith.addf %822, %824 : vector<32x20xf32>
    %cst_468 = arith.constant dense<0.000000e+00> : vector<32x20xf32>
    %826 = tpu.matmul %12, %808, %cst_468 {dimension_numbers = #tpu.dot_dimension_numbers<[1], [0], [0], [1], [0, 0, 1, 1], [], []>} : vector<32x2xf32>, vector<2x20xf32>, vector<32x20xf32> -> vector<32x20xf32>
    %827 = arith.addf %825, %826 : vector<32x20xf32>
    %cst_469 = arith.constant dense<0.000000e+00> : vector<32xf32>
    %828 = vector.multi_reduction <add>, %827, %cst_469 [1] : vector<32x20xf32> to vector<32xf32>
    %829 = vector.shape_cast %828 : vector<32xf32> to vector<32x1xf32>
    %cst_470 = arith.constant dense<0.000000e+00> : vector<32x1xf32>
    %830 = tpu.matmul %8, %829, %cst_470 {dimension_numbers = #tpu.dot_dimension_numbers<[1], [0], [0], [1], [0, 0, 1, 1], [], []>} : vector<32x32xf32>, vector<32x1xf32>, vector<32x1xf32> -> vector<32x1xf32>
    %cst_471 = arith.constant 3.125000e-03 : f32
    %831 = vector.broadcast %cst_471 : f32 to vector<32x1xf32>
    %832 = arith.mulf %830, %831 : vector<32x1xf32>
    %833 = arith.mulf %827, %827 : vector<32x20xf32>
    %cst_472 = arith.constant dense<0.000000e+00> : vector<32xf32>
    %834 = vector.multi_reduction <add>, %833, %cst_472 [1] : vector<32x20xf32> to vector<32xf32>
    %835 = vector.shape_cast %834 : vector<32xf32> to vector<32x1xf32>
    %cst_473 = arith.constant dense<0.000000e+00> : vector<32x1xf32>
    %836 = tpu.matmul %8, %835, %cst_473 {dimension_numbers = #tpu.dot_dimension_numbers<[1], [0], [0], [1], [0, 0, 1, 1], [], []>} : vector<32x32xf32>, vector<32x1xf32>, vector<32x1xf32> -> vector<32x1xf32>
    %cst_474 = arith.constant 3.125000e-03 : f32
    %837 = vector.broadcast %cst_474 : f32 to vector<32x1xf32>
    %838 = arith.mulf %836, %837 : vector<32x1xf32>
    %839 = vector.broadcast %832 : vector<32x1xf32> to vector<32x20xf32>
    %840 = arith.subf %827, %839 : vector<32x20xf32>
    %841 = arith.mulf %832, %832 : vector<32x1xf32>
    %842 = arith.subf %838, %841 : vector<32x1xf32>
    %cst_475 = arith.constant 9.99999974E-6 : f32
    %843 = vector.broadcast %cst_475 : f32 to vector<32x1xf32>
    %844 = arith.addf %842, %843 : vector<32x1xf32>
    %845 = math.rsqrt %844 : vector<32x1xf32>
    %846 = vector.broadcast %845 : vector<32x1xf32> to vector<32x20xf32>
    %847 = arith.mulf %840, %846 : vector<32x20xf32>
    %c3920 = arith.constant 3920 : index
    %c0_476 = arith.constant 0 : index
    %848 = vector.load %arg2[%c3920, %c0_476] : memref<4944x128xf32, #tpu.memory_space<vmem>>, vector<32x20xf32>
    %849 = arith.mulf %847, %848 : vector<32x20xf32>
    %c3952 = arith.constant 3952 : index
    %c0_477 = arith.constant 0 : index
    %850 = vector.load %arg2[%c3952, %c0_477] : memref<4944x128xf32, #tpu.memory_space<vmem>>, vector<32x20xf32>
    %851 = arith.addf %849, %850 : vector<32x20xf32>
    %c4008 = arith.constant 4008 : index
    %c0_478 = arith.constant 0 : index
    %852 = vector.load %arg2[%c4008, %c0_478] : memref<4944x128xf32, #tpu.memory_space<vmem>>, vector<20x10xf32>
    %cst_479 = arith.constant dense<0.000000e+00> : vector<32x10xf32>
    %853 = tpu.matmul %851, %852, %cst_479 {dimension_numbers = #tpu.dot_dimension_numbers<[1], [0], [0], [1], [0, 0, 1, 1], [], []>} : vector<32x20xf32>, vector<20x10xf32>, vector<32x10xf32> -> vector<32x10xf32>
    %cst_480 = arith.constant dense<0.000000e+00> : vector<32x20xf32>
    %854 = tpu.matmul %0, %851, %cst_480 {dimension_numbers = #tpu.dot_dimension_numbers<[1], [0], [0], [1], [0, 0, 1, 1], [], []>} : vector<32x32xf32>, vector<32x20xf32>, vector<32x20xf32> -> vector<32x20xf32>
    %c3984 = arith.constant 3984 : index
    %c0_481 = arith.constant 0 : index
    %855 = vector.load %arg2[%c3984, %c0_481] : memref<4944x128xf32, #tpu.memory_space<vmem>>, vector<20x10xf32>
    %cst_482 = arith.constant dense<0.000000e+00> : vector<32x10xf32>
    %856 = tpu.matmul %854, %855, %cst_482 {dimension_numbers = #tpu.dot_dimension_numbers<[1], [0], [0], [1], [0, 0, 1, 1], [], []>} : vector<32x20xf32>, vector<20x10xf32>, vector<32x10xf32> -> vector<32x10xf32>
    %857 = arith.addf %853, %856 : vector<32x10xf32>
    %cst_483 = arith.constant dense<0.000000e+00> : vector<32x20xf32>
    %858 = tpu.matmul %1, %851, %cst_483 {dimension_numbers = #tpu.dot_dimension_numbers<[1], [0], [0], [1], [0, 0, 1, 1], [], []>} : vector<32x32xf32>, vector<32x20xf32>, vector<32x20xf32> -> vector<32x20xf32>
    %c4032 = arith.constant 4032 : index
    %c0_484 = arith.constant 0 : index
    %859 = vector.load %arg2[%c4032, %c0_484] : memref<4944x128xf32, #tpu.memory_space<vmem>>, vector<20x10xf32>
    %cst_485 = arith.constant dense<0.000000e+00> : vector<32x10xf32>
    %860 = tpu.matmul %858, %859, %cst_485 {dimension_numbers = #tpu.dot_dimension_numbers<[1], [0], [0], [1], [0, 0, 1, 1], [], []>} : vector<32x20xf32>, vector<20x10xf32>, vector<32x10xf32> -> vector<32x10xf32>
    %861 = arith.addf %857, %860 : vector<32x10xf32>
    %c4056 = arith.constant 4056 : index
    %c0_486 = arith.constant 0 : index
    %862 = vector.load %arg2[%c4056, %c0_486] : memref<4944x128xf32, #tpu.memory_space<vmem>>, vector<1x10xf32>
    %863 = vector.broadcast %862 : vector<1x10xf32> to vector<32x10xf32>
    %864 = arith.addf %861, %863 : vector<32x10xf32>
    %cst_487 = arith.constant 0.000000e+00 : f32
    %865 = vector.broadcast %cst_487 : f32 to vector<32x10xf32>
    %866 = arith.maximumf %864, %865 : vector<32x10xf32>
    %c4080 = arith.constant 4080 : index
    %c0_488 = arith.constant 0 : index
    %867 = vector.load %arg2[%c4080, %c0_488] : memref<4944x128xf32, #tpu.memory_space<vmem>>, vector<10x10xf32>
    %cst_489 = arith.constant dense<0.000000e+00> : vector<32x10xf32>
    %868 = tpu.matmul %866, %867, %cst_489 {dimension_numbers = #tpu.dot_dimension_numbers<[1], [0], [0], [1], [0, 0, 1, 1], [], []>} : vector<32x10xf32>, vector<10x10xf32>, vector<32x10xf32> -> vector<32x10xf32>
    %cst_490 = arith.constant dense<0.000000e+00> : vector<32x10xf32>
    %869 = tpu.matmul %0, %866, %cst_490 {dimension_numbers = #tpu.dot_dimension_numbers<[1], [0], [0], [1], [0, 0, 1, 1], [], []>} : vector<32x32xf32>, vector<32x10xf32>, vector<32x10xf32> -> vector<32x10xf32>
    %c4064 = arith.constant 4064 : index
    %c0_491 = arith.constant 0 : index
    %870 = vector.load %arg2[%c4064, %c0_491] : memref<4944x128xf32, #tpu.memory_space<vmem>>, vector<10x10xf32>
    %cst_492 = arith.constant dense<0.000000e+00> : vector<32x10xf32>
    %871 = tpu.matmul %869, %870, %cst_492 {dimension_numbers = #tpu.dot_dimension_numbers<[1], [0], [0], [1], [0, 0, 1, 1], [], []>} : vector<32x10xf32>, vector<10x10xf32>, vector<32x10xf32> -> vector<32x10xf32>
    %872 = arith.addf %868, %871 : vector<32x10xf32>
    %cst_493 = arith.constant dense<0.000000e+00> : vector<32x10xf32>
    %873 = tpu.matmul %1, %866, %cst_493 {dimension_numbers = #tpu.dot_dimension_numbers<[1], [0], [0], [1], [0, 0, 1, 1], [], []>} : vector<32x32xf32>, vector<32x10xf32>, vector<32x10xf32> -> vector<32x10xf32>
    %c4096 = arith.constant 4096 : index
    %c0_494 = arith.constant 0 : index
    %874 = vector.load %arg2[%c4096, %c0_494] : memref<4944x128xf32, #tpu.memory_space<vmem>>, vector<10x10xf32>
    %cst_495 = arith.constant dense<0.000000e+00> : vector<32x10xf32>
    %875 = tpu.matmul %873, %874, %cst_495 {dimension_numbers = #tpu.dot_dimension_numbers<[1], [0], [0], [1], [0, 0, 1, 1], [], []>} : vector<32x10xf32>, vector<10x10xf32>, vector<32x10xf32> -> vector<32x10xf32>
    %876 = arith.addf %872, %875 : vector<32x10xf32>
    %c4112 = arith.constant 4112 : index
    %c0_496 = arith.constant 0 : index
    %877 = vector.load %arg2[%c4112, %c0_496] : memref<4944x128xf32, #tpu.memory_space<vmem>>, vector<1x10xf32>
    %878 = vector.broadcast %877 : vector<1x10xf32> to vector<32x10xf32>
    %879 = arith.addf %876, %878 : vector<32x10xf32>
    %cst_497 = arith.constant 0.000000e+00 : f32
    %880 = vector.broadcast %cst_497 : f32 to vector<32x10xf32>
    %881 = arith.maximumf %879, %880 : vector<32x10xf32>
    %cst_498 = arith.constant dense<0.000000e+00> : vector<32xf32>
    %882 = vector.multi_reduction <add>, %881, %cst_498 [1] : vector<32x10xf32> to vector<32xf32>
    %883 = vector.shape_cast %882 : vector<32xf32> to vector<32x1xf32>
    %cst_499 = arith.constant dense<0.000000e+00> : vector<32x1xf32>
    %884 = tpu.matmul %8, %883, %cst_499 {dimension_numbers = #tpu.dot_dimension_numbers<[1], [0], [0], [1], [0, 0, 1, 1], [], []>} : vector<32x32xf32>, vector<32x1xf32>, vector<32x1xf32> -> vector<32x1xf32>
    %cst_500 = arith.constant 6.250000e-03 : f32
    %885 = vector.broadcast %cst_500 : f32 to vector<32x1xf32>
    %886 = arith.mulf %884, %885 : vector<32x1xf32>
    %887 = arith.mulf %881, %881 : vector<32x10xf32>
    %cst_501 = arith.constant dense<0.000000e+00> : vector<32xf32>
    %888 = vector.multi_reduction <add>, %887, %cst_501 [1] : vector<32x10xf32> to vector<32xf32>
    %889 = vector.shape_cast %888 : vector<32xf32> to vector<32x1xf32>
    %cst_502 = arith.constant dense<0.000000e+00> : vector<32x1xf32>
    %890 = tpu.matmul %8, %889, %cst_502 {dimension_numbers = #tpu.dot_dimension_numbers<[1], [0], [0], [1], [0, 0, 1, 1], [], []>} : vector<32x32xf32>, vector<32x1xf32>, vector<32x1xf32> -> vector<32x1xf32>
    %cst_503 = arith.constant 6.250000e-03 : f32
    %891 = vector.broadcast %cst_503 : f32 to vector<32x1xf32>
    %892 = arith.mulf %890, %891 : vector<32x1xf32>
    %893 = vector.broadcast %886 : vector<32x1xf32> to vector<32x10xf32>
    %894 = arith.subf %881, %893 : vector<32x10xf32>
    %895 = arith.mulf %886, %886 : vector<32x1xf32>
    %896 = arith.subf %892, %895 : vector<32x1xf32>
    %cst_504 = arith.constant 9.99999974E-6 : f32
    %897 = vector.broadcast %cst_504 : f32 to vector<32x1xf32>
    %898 = arith.addf %896, %897 : vector<32x1xf32>
    %899 = math.rsqrt %898 : vector<32x1xf32>
    %900 = vector.broadcast %899 : vector<32x1xf32> to vector<32x10xf32>
    %901 = arith.mulf %894, %900 : vector<32x10xf32>
    %c4120 = arith.constant 4120 : index
    %c0_505 = arith.constant 0 : index
    %902 = vector.load %arg2[%c4120, %c0_505] : memref<4944x128xf32, #tpu.memory_space<vmem>>, vector<32x10xf32>
    %903 = arith.mulf %901, %902 : vector<32x10xf32>
    %c4152 = arith.constant 4152 : index
    %c0_506 = arith.constant 0 : index
    %904 = vector.load %arg2[%c4152, %c0_506] : memref<4944x128xf32, #tpu.memory_space<vmem>>, vector<32x10xf32>
    %905 = arith.addf %903, %904 : vector<32x10xf32>
    %c4200 = arith.constant 4200 : index
    %c0_507 = arith.constant 0 : index
    %906 = vector.load %arg2[%c4200, %c0_507] : memref<4944x128xf32, #tpu.memory_space<vmem>>, vector<10x10xf32>
    %cst_508 = arith.constant dense<0.000000e+00> : vector<32x10xf32>
    %907 = tpu.matmul %905, %906, %cst_508 {dimension_numbers = #tpu.dot_dimension_numbers<[1], [0], [0], [1], [0, 0, 1, 1], [], []>} : vector<32x10xf32>, vector<10x10xf32>, vector<32x10xf32> -> vector<32x10xf32>
    %cst_509 = arith.constant dense<0.000000e+00> : vector<32x10xf32>
    %908 = tpu.matmul %0, %905, %cst_509 {dimension_numbers = #tpu.dot_dimension_numbers<[1], [0], [0], [1], [0, 0, 1, 1], [], []>} : vector<32x32xf32>, vector<32x10xf32>, vector<32x10xf32> -> vector<32x10xf32>
    %c4184 = arith.constant 4184 : index
    %c0_510 = arith.constant 0 : index
    %909 = vector.load %arg2[%c4184, %c0_510] : memref<4944x128xf32, #tpu.memory_space<vmem>>, vector<10x10xf32>
    %cst_511 = arith.constant dense<0.000000e+00> : vector<32x10xf32>
    %910 = tpu.matmul %908, %909, %cst_511 {dimension_numbers = #tpu.dot_dimension_numbers<[1], [0], [0], [1], [0, 0, 1, 1], [], []>} : vector<32x10xf32>, vector<10x10xf32>, vector<32x10xf32> -> vector<32x10xf32>
    %911 = arith.addf %907, %910 : vector<32x10xf32>
    %cst_512 = arith.constant dense<0.000000e+00> : vector<32x10xf32>
    %912 = tpu.matmul %1, %905, %cst_512 {dimension_numbers = #tpu.dot_dimension_numbers<[1], [0], [0], [1], [0, 0, 1, 1], [], []>} : vector<32x32xf32>, vector<32x10xf32>, vector<32x10xf32> -> vector<32x10xf32>
    %c4216 = arith.constant 4216 : index
    %c0_513 = arith.constant 0 : index
    %913 = vector.load %arg2[%c4216, %c0_513] : memref<4944x128xf32, #tpu.memory_space<vmem>>, vector<10x10xf32>
    %cst_514 = arith.constant dense<0.000000e+00> : vector<32x10xf32>
    %914 = tpu.matmul %912, %913, %cst_514 {dimension_numbers = #tpu.dot_dimension_numbers<[1], [0], [0], [1], [0, 0, 1, 1], [], []>} : vector<32x10xf32>, vector<10x10xf32>, vector<32x10xf32> -> vector<32x10xf32>
    %915 = arith.addf %911, %914 : vector<32x10xf32>
    %c4232 = arith.constant 4232 : index
    %c0_515 = arith.constant 0 : index
    %916 = vector.load %arg2[%c4232, %c0_515] : memref<4944x128xf32, #tpu.memory_space<vmem>>, vector<1x10xf32>
    %917 = vector.broadcast %916 : vector<1x10xf32> to vector<32x10xf32>
    %918 = arith.addf %915, %917 : vector<32x10xf32>
    %cst_516 = arith.constant 0.000000e+00 : f32
    %919 = vector.broadcast %cst_516 : f32 to vector<32x10xf32>
    %920 = arith.maximumf %918, %919 : vector<32x10xf32>
    %c4256 = arith.constant 4256 : index
    %c0_517 = arith.constant 0 : index
    %921 = vector.load %arg2[%c4256, %c0_517] : memref<4944x128xf32, #tpu.memory_space<vmem>>, vector<10x10xf32>
    %cst_518 = arith.constant dense<0.000000e+00> : vector<32x10xf32>
    %922 = tpu.matmul %920, %921, %cst_518 {dimension_numbers = #tpu.dot_dimension_numbers<[1], [0], [0], [1], [0, 0, 1, 1], [], []>} : vector<32x10xf32>, vector<10x10xf32>, vector<32x10xf32> -> vector<32x10xf32>
    %cst_519 = arith.constant dense<0.000000e+00> : vector<32x10xf32>
    %923 = tpu.matmul %0, %920, %cst_519 {dimension_numbers = #tpu.dot_dimension_numbers<[1], [0], [0], [1], [0, 0, 1, 1], [], []>} : vector<32x32xf32>, vector<32x10xf32>, vector<32x10xf32> -> vector<32x10xf32>
    %c4240 = arith.constant 4240 : index
    %c0_520 = arith.constant 0 : index
    %924 = vector.load %arg2[%c4240, %c0_520] : memref<4944x128xf32, #tpu.memory_space<vmem>>, vector<10x10xf32>
    %cst_521 = arith.constant dense<0.000000e+00> : vector<32x10xf32>
    %925 = tpu.matmul %923, %924, %cst_521 {dimension_numbers = #tpu.dot_dimension_numbers<[1], [0], [0], [1], [0, 0, 1, 1], [], []>} : vector<32x10xf32>, vector<10x10xf32>, vector<32x10xf32> -> vector<32x10xf32>
    %926 = arith.addf %922, %925 : vector<32x10xf32>
    %cst_522 = arith.constant dense<0.000000e+00> : vector<32x10xf32>
    %927 = tpu.matmul %1, %920, %cst_522 {dimension_numbers = #tpu.dot_dimension_numbers<[1], [0], [0], [1], [0, 0, 1, 1], [], []>} : vector<32x32xf32>, vector<32x10xf32>, vector<32x10xf32> -> vector<32x10xf32>
    %c4272 = arith.constant 4272 : index
    %c0_523 = arith.constant 0 : index
    %928 = vector.load %arg2[%c4272, %c0_523] : memref<4944x128xf32, #tpu.memory_space<vmem>>, vector<10x10xf32>
    %cst_524 = arith.constant dense<0.000000e+00> : vector<32x10xf32>
    %929 = tpu.matmul %927, %928, %cst_524 {dimension_numbers = #tpu.dot_dimension_numbers<[1], [0], [0], [1], [0, 0, 1, 1], [], []>} : vector<32x10xf32>, vector<10x10xf32>, vector<32x10xf32> -> vector<32x10xf32>
    %930 = arith.addf %926, %929 : vector<32x10xf32>
    %c4288 = arith.constant 4288 : index
    %c0_525 = arith.constant 0 : index
    %931 = vector.load %arg2[%c4288, %c0_525] : memref<4944x128xf32, #tpu.memory_space<vmem>>, vector<1x10xf32>
    %932 = vector.broadcast %931 : vector<1x10xf32> to vector<32x10xf32>
    %933 = arith.addf %930, %932 : vector<32x10xf32>
    %cst_526 = arith.constant 0.000000e+00 : f32
    %934 = vector.broadcast %cst_526 : f32 to vector<32x10xf32>
    %935 = arith.maximumf %933, %934 : vector<32x10xf32>
    %c4312 = arith.constant 4312 : index
    %c0_527 = arith.constant 0 : index
    %936 = vector.load %arg2[%c4312, %c0_527] : memref<4944x128xf32, #tpu.memory_space<vmem>>, vector<10x128xf32>
    %cst_528 = arith.constant dense<0.000000e+00> : vector<32x128xf32>
    %937 = tpu.matmul %935, %936, %cst_528 {dimension_numbers = #tpu.dot_dimension_numbers<[1], [0], [0], [1], [0, 0, 1, 1], [], []>} : vector<32x10xf32>, vector<10x128xf32>, vector<32x128xf32> -> vector<32x128xf32>
    %cst_529 = arith.constant dense<0.000000e+00> : vector<32x10xf32>
    %938 = tpu.matmul %0, %935, %cst_529 {dimension_numbers = #tpu.dot_dimension_numbers<[1], [0], [0], [1], [0, 0, 1, 1], [], []>} : vector<32x32xf32>, vector<32x10xf32>, vector<32x10xf32> -> vector<32x10xf32>
    %c4296 = arith.constant 4296 : index
    %c0_530 = arith.constant 0 : index
    %939 = vector.load %arg2[%c4296, %c0_530] : memref<4944x128xf32, #tpu.memory_space<vmem>>, vector<10x128xf32>
    %cst_531 = arith.constant dense<0.000000e+00> : vector<32x128xf32>
    %940 = tpu.matmul %938, %939, %cst_531 {dimension_numbers = #tpu.dot_dimension_numbers<[1], [0], [0], [1], [0, 0, 1, 1], [], []>} : vector<32x10xf32>, vector<10x128xf32>, vector<32x128xf32> -> vector<32x128xf32>
    %941 = arith.addf %937, %940 : vector<32x128xf32>
    %cst_532 = arith.constant dense<0.000000e+00> : vector<32x10xf32>
    %942 = tpu.matmul %1, %935, %cst_532 {dimension_numbers = #tpu.dot_dimension_numbers<[1], [0], [0], [1], [0, 0, 1, 1], [], []>} : vector<32x32xf32>, vector<32x10xf32>, vector<32x10xf32> -> vector<32x10xf32>
    %c4328 = arith.constant 4328 : index
    %c0_533 = arith.constant 0 : index
    %943 = vector.load %arg2[%c4328, %c0_533] : memref<4944x128xf32, #tpu.memory_space<vmem>>, vector<10x128xf32>
    %cst_534 = arith.constant dense<0.000000e+00> : vector<32x128xf32>
    %944 = tpu.matmul %942, %943, %cst_534 {dimension_numbers = #tpu.dot_dimension_numbers<[1], [0], [0], [1], [0, 0, 1, 1], [], []>} : vector<32x10xf32>, vector<10x128xf32>, vector<32x128xf32> -> vector<32x128xf32>
    %945 = arith.addf %941, %944 : vector<32x128xf32>
    %c4344 = arith.constant 4344 : index
    %c0_535 = arith.constant 0 : index
    %946 = vector.load %arg2[%c4344, %c0_535] : memref<4944x128xf32, #tpu.memory_space<vmem>>, vector<1x128xf32>
    %947 = vector.broadcast %946 : vector<1x128xf32> to vector<32x128xf32>
    %948 = arith.addf %945, %947 : vector<32x128xf32>
    %c0_536 = arith.constant 0 : index
    %c0_537 = arith.constant 0 : index
    %949 = vector.load %arg3[%c0_536, %c0_537] : memref<32x128xf32, #tpu.memory_space<vmem>>, vector<32x128xf32>
    tpu.vector_store %arg3[%c0_536, %c0_537], %948 {strides = array<i32>} : memref<32x128xf32, #tpu.memory_space<vmem>>, vector<32x128xf32>,
    return
  }
}

</mosaic_0001>

<bundles_post_ra>
// kernel: forward.1
= control target key start
LH: loop header
LB: loop body
LE: loop exit
PB: predicated region body
PF: predicated region fallthrough
CT: control target
= control target key end

     0   :  { %8 = vsyncpa [#allocation3], 0  ;;  %s8793_s15 = smov [#allocation2]   ;;  %s8794_s17 = smov 128   ;;  %s9922_s0 = inlined_call_operand.vmem [shape: f32[32,1], index: 0, kind: input, shape index: {}]   ;;  %s9923_s1 = inlined_call_operand.vmem [shape: f32[2,10], index: 1, kind: input, shape index: {}]   ;;  %s9924_s2 = inlined_call_operand.hbm [shape: f32[4944,128], index: 2, kind: input, shape index: {}]   ;;  %s9925_s3 = inlined_call_operand.vmem [shape: f32[32,128], index: 3, kind: output, shape index: {}]  }
   0x1   :  { %s17_s14 = sshll.u32 %s9924_s2, 4  ;;  %s19_s16 = sshll.u32 %s8793_s15, 4  ;;  %s18_s14 = int_to_ptr.hbm [resolvable:$true] %s17_s14  ;;  %s20_s16 = int_to_ptr.vmem [resolvable:$true] %s19_s16 }
   0x2   :  { %s8795_s18 = smov 8  }
   0x3   :  { %25 = dma.hbm_to_vmem [thread:$0]  %s18_s14, 79104, %s20_s16, [#allocation3], %s8794_s17, %s8794_s17, %s8795_s18  }
   0x4   :  { %8791 = dma.done.wait [#allocation3], 79104  }
   0x5   :  { %8792 = vsyncadd [#allocation3], 4294888192  ;;  %vm75_vm0 = vcmask 1041408   ;;  %v68_v0 = vld [vmem:[#allocation2 + $0x8] sm:$0x3]  ;;  %v67_v1 = vld [vmem:[#allocation2] sm:$0xff] }
   0x6   :  { %vm71_vm1 = vcmask 80896   ;;  %8084 = vmatpush.msk.msra.mxu0 %vm75_vm0, %v68_v0  ;;  %v62_v2 = vld [vmem:[%s9923_s1] sm:$0x3]  ;;  %v8627_v3 = vld [vmem:[#allocation2 + $0x10] ss:$0 sm:$0xff]  ;;  %vm106_vm2 = vcmask 15360  }
   0x7   :  { %v8628_v6 = vld [vmem:[#allocation2 + $0x18] ss:$0 sm:$0xff]  ;;  %v8629_v8 = vld [vmem:[#allocation2 + $0x20] ss:$0 sm:$0xff]  ;;  %v55_v12 = vld [vmem:[#allocation2 + $0x11e8] sm:$0xff]  ;;  %vm159_vm3 = vcmask 261120  }
   0x8   :  { %94 = vmatpush.msra.mxu0 %v67_v1  ;;  %v54_v11 = vld [vmem:[#allocation2 + $0x11e0] sm:$0xff]  ;;  %v56_v13 = vld [vmem:[#allocation2 + $0x11f0] sm:$0xff]  ;;  %v57_v14 = vld [vmem:[#allocation2 + $0x11f8] sm:$0xff]  ;;  %v8796_v36 = vmov 0  }
   0x9   :  { %8085 = vmatmul.msk.f32.vlgmr.msra.gmra.mxu0 %vm71_vm1, %v62_v2  ;;  %v65_v18 = vld [vmem:[%s9922_s0 + $0x10] sm:$0xff]  ;;  %v66_v19 = vld [vmem:[%s9922_s0 + $0x18] sm:$0xff]  ;;  %v64_v20 = vld [vmem:[%s9922_s0 + $0x8] sm:$0xff]  ;;  %8624 = vset.pattern.permute.xlu2 %v8796_v36 }
   0xa   :  { %v63_v24 = vld [vmem:[%s9922_s0] sm:$0xff]  ;;  %v8868_v32 = vld [vmem:[#allocation2 + $0x11c8] sm:$0xff]  ;;  %v8874_v33 = vld [vmem:[#allocation2 + $0x11d0] sm:$0xff]  ;;  %8625 = vset.pattern.permute.xlu1 %v8796_v36  ;;  %8626 = vset.pattern.permute.xlu0 %v8796_v36 }
   0xb   :  { %v8859_v30 = vld [vmem:[#allocation2 + $0x11c0] sm:$0xff]  ;;  %v8880_v34 = vld [vmem:[#allocation2 + $0x11d8] sm:$0xff] }
  0x86   :  { %v96_v4 = vpop.f32.mrf.mxu0 }
  0x87   :  { %v97_v5 = vadd.f32 %v8627_v3, %v96_v4 }
  0x89   :  { %v99_v7 = vmax.f32 %v97_v5, 0.0 }
  0x8b   :  { %v102_v9 = vmul.f32 %v8628_v6, %v99_v7  ;;  %v306_v7 = vld [vmem:[#allocation2 + $0x28] sm:$0xff] }
  0x8d   :  { %v105_v10 = vadd.f32 %v8629_v8, %v102_v9 }
  0x8f   :  { %8086 = vmatpush.msk.msra.mxu1 %vm75_vm0, %v105_v10 }
  0x90   :  { %8087 = vmatmul.msk.f32.vlgmr.msra.gmra.mxu1 %vm106_vm2, %v54_v11 }
  0x98   :  { %8088 = vmatmul.msk.f32.gmra.mxu1 %vm106_vm2, %v55_v12  ;;  %v314_v12 = vld [vmem:[#allocation2 + $0x48] sm:$0xff] }
  0xa0   :  { %8089 = vmatmul.msk.f32.gmra.mxu1 %vm106_vm2, %v56_v13 }
  0xa8   :  { %8090 = vmatmul.msk.f32.gmra.mxu1 %vm106_vm2, %v57_v14 }
 0x10d   :  { %v139_v15 = vpop.f32.mrf.mxu1 }
 0x10e   :  { %v8851_v27 = vadd.f32 %v139_v15, %v63_v24 }
 0x110   :  { %v205_v31 = vmul.f32 %v8851_v27, %v8851_v27 }
 0x115   :  { %v142_v16 = vpop.f32.mrf.mxu1 }
 0x116   :  { %v8846_v25 = vadd.f32 %v142_v16, %v64_v20 }
 0x118   :  { %v206_v29 = vmul.f32 %v8846_v25, %v8846_v25 }
 0x11d   :  { %v145_v17 = vpop.f32.mrf.mxu1 }
 0x11e   :  { %v8839_v22 = vadd.f32 %v145_v17, %v65_v18 }
 0x120   :  { %v207_v28 = vmul.f32 %v8839_v22, %v8839_v22 }
 0x125   :  { %v148_v21 = vpop.f32.mrf.mxu1 }
 0x126   :  { %v8841_v23 = vadd.f32 %v148_v21, %v66_v19 }
 0x128   :  { %184 = vmatpush.msra.mxu2 %v8841_v23  ;;  %v208_v26 = vmul.f32 %v8841_v23, %v8841_v23 }
 0x12a   :  { %185 = vmatpush.msra.mxu2 %v8839_v22  ;;  %225 = vmatpush.msra.mxu3 %v208_v26 }
 0x12c   :  { %186 = vmatpush.msra.mxu2 %v8846_v25  ;;  %226 = vmatpush.msra.mxu3 %v207_v28 }
 0x12e   :  { %187 = vmatpush.msra.mxu2 %v8851_v27  ;;  %227 = vmatpush.msra.mxu3 %v206_v29 }
 0x12f   :  { %8091 = vmatmul.msk.f32.vlgmr.msra.gmra.mxu2 %vm159_vm3, %v8859_v30 }
 0x130   :  { %228 = vmatpush.msra.mxu3 %v205_v31  ;;  %v315_v31 = vld [vmem:[#allocation2 + $0x50] sm:$0xff] }
 0x131   :  { %8095 = vmatmul.msk.f32.vlgmr.msra.gmra.mxu3 %vm159_vm3, %v8859_v30 }
 0x137   :  { %8092 = vmatmul.msk.f32.gmra.mxu2 %vm159_vm3, %v8868_v32 }
 0x139   :  { %8096 = vmatmul.msk.f32.gmra.mxu3 %vm159_vm3, %v8868_v32 }
 0x13f   :  { %8093 = vmatmul.msk.f32.gmra.mxu2 %vm159_vm3, %v8874_v33 }
 0x141   :  { %8097 = vmatmul.msk.f32.gmra.mxu3 %vm159_vm3, %v8874_v33 }
 0x147   :  { %8094 = vmatmul.msk.f32.gmra.mxu2 %vm159_vm3, %v8880_v34 }
 0x149   :  { %8098 = vmatmul.msk.f32.gmra.mxu3 %vm159_vm3, %v8880_v34 }
 0x1b2   :  { %v189_v35 = vpop.f32.mrf.mxu2 }
 0x1b3   :  { %v201_v37 = vmul.f32 0.0625, %v189_v35 }
 0x1b4   :  { %v230_v38 = vpop.f32.mrf.mxu3 }
 0x1b5   :  { %v250_v39 = vmul.f32 %v201_v37, %v201_v37  ;;  %v242_v40 = vmul.f32 0.0625, %v230_v38  ;;  %v246_v2 = vsub.f32 %v8851_v27, %v201_v37  ;;  %v307_v27 = vld [vmem:[#allocation2 + $0x30] sm:$0xff] }
 0x1b7   :  { %v254_v41 = vsub.f32 %v242_v40, %v250_v39 }
 0x1b9   :  { %v258_v42 = vadd.f32 1e-05, %v254_v41 }
 0x1ba   :  { %v192_v43 = vpop.f32.mrf.mxu2 }
 0x1bb   :  { %8676 = vrsqrt.f32 %v258_v42  ;;  %v202_v44 = vmul.f32 0.0625, %v192_v43  ;;  %vm268_vm5 = vweird.f32 %v258_v42  ;;  %v308_v43 = vld [vmem:[#allocation2 + $0x38] sm:$0xff] }
 0x1bc   :  { %v233_v45 = vpop.f32.mrf.mxu3 }
 0x1bd   :  { %v251_v46 = vmul.f32 %v202_v44, %v202_v44  ;;  %v243_v47 = vmul.f32 0.0625, %v233_v45  ;;  %v247_v21 = vsub.f32 %v8846_v25, %v202_v44 }
 0x1bf   :  { %v255_v48 = vsub.f32 %v243_v47, %v251_v46  ;;  %v316_v46 = vld [vmem:[#allocation2 + $0x58] sm:$0xff] }
 0x1c1   :  { %v8677_v49 = vpop.eup %8676  ;;  %v259_v50 = vadd.f32 1e-05, %v255_v48 }
 0x1c2   :  { %v263_v51 = vmul.f32 %v8677_v49, %v258_v42  ;;  %v195_v52 = vpop.f32.mrf.mxu2  ;;  %vm269_vm4 = vweird.f32 %v8677_v49 }
 0x1c3   :  { %8678 = vrsqrt.f32 %v259_v50  ;;  %v8886_v53 = vmul.f32 0.0625, %v195_v52  ;;  %vm270_vm6 = vmor %vm268_vm5, %vm269_vm4  ;;  %vm278_vm8 = vweird.f32 %v259_v50 }
 0x1c4   :  { %v264_v54 = vmul.f32 %v8677_v49, %v263_v51  ;;  %v236_v55 = vpop.f32.mrf.mxu3 }
 0x1c5   :  { %v252_v56 = vmul.f32 %v8886_v53, %v8886_v53  ;;  %v244_v57 = vmul.f32 0.0625, %v236_v55  ;;  %v248_v25 = vsub.f32 %v8839_v22, %v8886_v53  ;;  %v309_v22 = vld [vmem:[#allocation2 + $0x40] sm:$0xff] }
 0x1c6   :  { %v265_v58 = vmul.f32 0.5, %v264_v54  ;;  %v317_v54 = vld [vmem:[#allocation2 + $0x60] sm:$0xff] }
 0x1c7   :  { %v256_v59 = vsub.f32 %v244_v57, %v252_v56  ;;  %v8895_v57 = vld [vmem:[#allocation2 + $0x1180] sm:$0xff] }
 0x1c8   :  { %v266_v60 = vsub.f32 1.5, %v265_v58  ;;  %v8899_v58 = vld [vmem:[#allocation2 + $0x11a0] sm:$0xff] }
 0x1c9   :  { %v8679_v61 = vpop.eup %8678  ;;  %v260_v62 = vadd.f32 1e-05, %v256_v59  ;;  %v8907_v59 = vld [vmem:[#allocation2 + $0x1188] sm:$0xff] }
 0x1ca   :  { %v267_v63 = vmul.f32 %v8677_v49, %v266_v60  ;;  %v273_v0 = vmul.f32 %v8679_v61, %v259_v50  ;;  %v198_v1 = vpop.f32.mrf.mxu2  ;;  %vm279_vm7 = vweird.f32 %v8679_v61  ;;  %v8909_v60 = vld [vmem:[#allocation2 + $0x1198] sm:$0xff] }
 0x1cb   :  { %8680 = vrsqrt.f32 %v260_v62  ;;  %v204_v3 = vmul.f32 0.0625, %v198_v1  ;;  %vm280_vm9 = vmor %vm278_vm8, %vm279_vm7  ;;  %vm288_vm11 = vweird.f32 %v260_v62 }
 0x1cc   :  { %v271_v4 = vsel %vm270_vm6, %v8677_v49, %v267_v63  ;;  %v274_v5 = vmul.f32 %v8679_v61, %v273_v0  ;;  %v239_v6 = vpop.f32.mrf.mxu3  ;;  %v8923_v63 = vld [vmem:[#allocation2 + $0x11b8] sm:$0xff] }
 0x1cd   :  { %v253_v8 = vmul.f32 %v204_v3, %v204_v3  ;;  %v245_v9 = vmul.f32 0.0625, %v239_v6  ;;  %v302_v10 = vmul.f32 %v271_v4, %v246_v2  ;;  %v249_v51 = vsub.f32 %v8841_v23, %v204_v3  ;;  %v8897_v23 = vld [vmem:[#allocation2 + $0x1190] sm:$0xff] }
 0x1ce   :  { %v275_v11 = vmul.f32 0.5, %v274_v5 }
 0x1cf   :  { %v257_v13 = vsub.f32 %v245_v9, %v253_v8  ;;  %v310_v14 = vmul.f32 %v306_v7, %v302_v10  ;;  %v501_v9 = vld [vmem:[#allocation2 + $0xa0] sm:$0x3] }
 0x1d0   :  { %v276_v15 = vsub.f32 1.5, %v275_v11 }
 0x1d1   :  { %v8681_v16 = vpop.eup %8680  ;;  %v261_v17 = vadd.f32 1e-05, %v257_v13  ;;  %v318_v18 = vadd.f32 %v314_v12, %v310_v14  ;;  %v500_v12 = vld [vmem:[#allocation2 + $0x98] sm:$0xff] }
 0x1d2   :  { %v277_v19 = vmul.f32 %v8679_v61, %v276_v15  ;;  %v283_v20 = vmul.f32 %v8681_v16, %v260_v62  ;;  %vm289_vm10 = vweird.f32 %v8681_v16  ;;  %v8919_v62 = vld [vmem:[#allocation2 + $0x11b0] sm:$0xff] }
 0x1d3   :  { %8682 = vrsqrt.f32 %v261_v17  ;;  %325 = vperm.xlu2 %8624, %v318_v18   ;;  %vm290_vm12 = vmor %vm288_vm11, %vm289_vm10  ;;  %vm298_vm14 = vweird.f32 %v261_v17 }
 0x1d4   :  { %v281_v24 = vsel %vm280_vm9, %v8679_v61, %v277_v19  ;;  %v284_v26 = vmul.f32 %v8681_v16, %v283_v20  ;;  %v8911_v61 = vld [vmem:[#allocation2 + $0x11a8] sm:$0xff]  ;;  %v8631_v20 = vld [vmem:[#allocation2 + $0x78] ss:$0 sm:$0xff] }
 0x1d5   :  { %v303_v28 = vmul.f32 %v281_v24, %v247_v21 }
 0x1d6   :  { %v285_v29 = vmul.f32 0.5, %v284_v26 }
 0x1d7   :  { %v311_v35 = vmul.f32 %v307_v27, %v303_v28 }
 0x1d8   :  { %v286_v36 = vsub.f32 1.5, %v285_v29 }
 0x1d9   :  { %v8683_v37 = vpop.eup %8682  ;;  %v319_v38 = vadd.f32 %v315_v31, %v311_v35 }
 0x1da   :  { %v287_v39 = vmul.f32 %v8681_v16, %v286_v36  ;;  %v293_v40 = vmul.f32 %v8683_v37, %v261_v17  ;;  %vm299_vm13 = vweird.f32 %v8683_v37  ;;  %v8630_v17 = vld [vmem:[#allocation2 + $0x70] ss:$0 sm:$0xff]  ;;  %v8633_v36 = vld [vmem:[#allocation2 + $0x80] ss:$0 sm:$0xff] }
 0x1db   :  { %330 = vperm.xlu2 %8624, %v319_v38   ;;  %vm300_vm15 = vmor %vm298_vm14, %vm299_vm13 }
 0x1dc   :  { %v291_v41 = vsel %vm290_vm12, %v8681_v16, %v287_v39  ;;  %v294_v42 = vmul.f32 %v8683_v37, %v293_v40  ;;  %v8632_v16 = vld [vmem:[#allocation2 + $0x68] ss:$0 sm:$0xff] }
 0x1dd   :  { %v304_v44 = vmul.f32 %v291_v41, %v248_v25 }
 0x1de   :  { %v295_v45 = vmul.f32 0.5, %v294_v42 }
 0x1df   :  { %v312_v47 = vmul.f32 %v308_v43, %v304_v44 }
 0x1e0   :  { %v296_v48 = vsub.f32 1.5, %v295_v45 }
 0x1e1   :  { %v320_v49 = vadd.f32 %v316_v46, %v312_v47 }
 0x1e2   :  { %v297_v50 = vmul.f32 %v8683_v37, %v296_v48 }
 0x1e3   :  { %335 = vperm.xlu1 %8625, %v320_v49  }
 0x1e4   :  { %v301_v52 = vsel %vm300_vm15, %v8683_v37, %v297_v50 }
 0x1e5   :  { %v305_v53 = vmul.f32 %v301_v52, %v249_v51 }
 0x1e7   :  { %v313_v55 = vmul.f32 %v309_v22, %v305_v53 }
 0x1e9   :  { %v321_v56 = vadd.f32 %v317_v54, %v313_v55 }
 0x1eb   :  { %340 = vperm.xlu0 %8626, %v321_v56   ;;  %372 = vmatpush.msrb.mxu0 %v321_v56 }
 0x1ec   :  { %8616 = vmatpush.msrb.mxu2 %v321_v56  ;;  %443 = vmatpush.msrb.mxu1 %v321_v56 }
 0x1ed   :  { %373 = vmatpush.msrb.mxu0 %v320_v49 }
 0x1ee   :  { %8617 = vmatpush.msrb.mxu2 %v320_v49  ;;  %444 = vmatpush.msrb.mxu1 %v320_v49 }
 0x1ef   :  { %374 = vmatpush.msrb.mxu0 %v319_v38 }
 0x1f0   :  { %8618 = vmatpush.msrb.mxu2 %v319_v38  ;;  %445 = vmatpush.msrb.mxu1 %v319_v38 }
 0x1f1   :  { %375 = vmatpush.msrb.mxu0 %v318_v18 }
 0x1f2   :  { %8619 = vmatpush.msrb.mxu2 %v318_v18  ;;  %446 = vmatpush.msrb.mxu1 %v318_v18 }
 0x1f3   :  { %8099 = vmatmul.msk.f32.vlgmr.msrb.gmra.mxu0 %vm159_vm3, %v8895_v57  ;;  %8101 = vmatmul.msk.f32.vlgmr.msrb.gmra.mxu2 %vm159_vm3, %v8897_v23 }
 0x1f4   :  { %8103 = vmatmul.msk.f32.vlgmr.msrb.gmra.mxu1 %vm159_vm3, %v8899_v58  ;;  %8116 = vmatpush.msk.msra.mxu0 %vm75_vm0, %v501_v9 }
 0x1f6   :  { %607 = vmatpush.msra.mxu0 %v500_v12 }
 0x1fb   :  { %8100 = vmatmul.msk.f32.gmra.mxu0 %vm159_vm3, %v8907_v59  ;;  %8102 = vmatmul.msk.f32.gmra.mxu2 %vm159_vm3, %v8909_v60 }
 0x1fc   :  { %8104 = vmatmul.msk.f32.gmra.mxu1 %vm159_vm3, %v8911_v61 }
 0x204   :  { %8105 = vmatmul.msk.f32.gmra.mxu1 %vm159_vm3, %v8919_v62 }
 0x20c   :  { %8106 = vmatmul.msk.f32.gmra.mxu1 %vm159_vm3, %v8923_v63 }
 0x22d   :  { %v326_v8 = vpop.permute.xlu2 %325 }
 0x22e   :  { %v344_v45 = vmul.f32 %v8630_v17, %v326_v8 }
 0x235   :  { %v331_v13 = vpop.permute.xlu2 %330 }
 0x236   :  { %v345_v42 = vmul.f32 %v8630_v17, %v331_v13 }
 0x255   :  { %v336_v11 = vpop.permute.xlu1 %335 }
 0x256   :  { %v346_v21 = vmul.f32 %v8630_v17, %v336_v11 }
 0x25d   :  { %v341_v10 = vpop.permute.xlu0 %340 }
 0x25e   :  { %v347_v26 = vmul.f32 %v8630_v17, %v341_v10 }
 0x270   :  { %v377_v0 = vpop.f32.mrf.mxu0 }
 0x271   :  { %v448_v1 = vpop.f32.mrf.mxu1 }
 0x276   :  { %v383_v2 = vpop.f32.mrf.mxu2 }
 0x277   :  { %402 = vperm.xlu1 %8625, %v383_v2   ;;  %v532_v2 = vld [vmem:[#allocation2 + $0x90] sm:$0x3] }
 0x278   :  { %v380_v3 = vpop.f32.mrf.mxu0  ;;  %8111 = vmatpush.msk.msrb.mxu3 %vm75_vm0, %v532_v2 }
 0x279   :  { %v451_v4 = vpop.f32.mrf.mxu1  ;;  %397 = vperm.xlu0 %8626, %v380_v3   ;;  %v651_v3 = vld [vmem:[#allocation2 + $0xb0] sm:$0x3] }
 0x27e   :  { %v386_v5 = vpop.f32.mrf.mxu2 }
 0x281   :  { %v454_v6 = vpop.f32.mrf.mxu1  ;;  %407 = vperm.xlu0 %8626, %v386_v5   ;;  %v650_v5 = vld [vmem:[#allocation2 + $0xa8] sm:$0xff] }
 0x282   :  { %473 = vperm.xlu1 %8625, %v454_v6  }
 0x289   :  { %v457_v7 = vpop.f32.mrf.mxu1  ;;  %392 = vperm.xlu0 %8626, %v377_v0  }
 0x28a   :  { %478 = vperm.xlu2 %8624, %v457_v7   ;;  %468 = vperm.xlu1 %8625, %v451_v4   ;;  %v531_v4 = vld [vmem:[#allocation2 + $0x88] sm:$0xff] }
 0x28b   :  { %563 = vmatpush.msrb.mxu3 %v531_v4 }
 0x292   :  { %463 = vperm.xlu2 %8624, %v448_v1  }
 0x2e4   :  { %v479_v18 = vpop.permute.xlu2 %478 }
 0x2e5   :  { %v485_v35 = vmul.f32 %v8631_v20, %v479_v18  ;;  %v8634_v18 = vld [vmem:[#allocation2 + $0xb8] ss:$0 sm:$0xff] }
 0x2e9   :  { %v403_v15 = vpop.permute.xlu1 %402 }
 0x2ea   :  { %v413_v19 = vmul.f32 %v8632_v16, %v403_v15 }
 0x2eb   :  { %v398_v14 = vpop.permute.xlu0 %397 }
 0x2ec   :  { %v417_v29 = vadd.f32 %v413_v19, %v346_v21  ;;  %v412_v40 = vmul.f32 %v8632_v16, %v398_v14  ;;  %v464_v43 = vpop.permute.xlu2 %463 }
 0x2ed   :  { %v482_v51 = vmul.f32 %v8631_v20, %v464_v43 }
 0x2ee   :  { %v416_v49 = vadd.f32 %v412_v40, %v345_v42 }
 0x2f3   :  { %v408_v24 = vpop.permute.xlu0 %407 }
 0x2f4   :  { %v474_v27 = vpop.permute.xlu1 %473  ;;  %v414_v28 = vmul.f32 %v8632_v16, %v408_v24 }
 0x2f5   :  { %v484_v31 = vmul.f32 %v8631_v20, %v474_v27 }
 0x2f6   :  { %v418_v37 = vadd.f32 %v414_v28, %v347_v26 }
 0x2f7   :  { %v488_v38 = vadd.f32 %v484_v31, %v417_v29 }
 0x2f8   :  { %v489_v39 = vadd.f32 %v485_v35, %v418_v37 }
 0x2f9   :  { %v494_v41 = vadd.f32 %v8633_v36, %v488_v38 }
 0x2fa   :  { %v495_v25 = vadd.f32 %v8633_v36, %v489_v39 }
 0x2fb   :  { %v393_v44 = vpop.permute.xlu0 %392  ;;  %v498_v22 = vmax.f32 %v494_v41, 0.0 }
 0x2fc   :  { %v499_v46 = vmax.f32 %v495_v25, 0.0  ;;  %v469_v47 = vpop.permute.xlu1 %468  ;;  %v411_v48 = vmul.f32 %v8632_v16, %v393_v44 }
 0x2fd   :  { %v483_v50 = vmul.f32 %v8631_v20, %v469_v47 }
 0x2fe   :  { %v415_v52 = vadd.f32 %v411_v48, %v344_v45  ;;  %514 = vmatpush.msra.mxu2 %v499_v46  ;;  %633 = vmatpush.msra.mxu1 %v499_v46 }
 0x2ff   :  { %v487_v53 = vadd.f32 %v483_v50, %v416_v49 }
 0x300   :  { %v486_v54 = vadd.f32 %v482_v51, %v415_v52  ;;  %515 = vmatpush.msra.mxu2 %v498_v22  ;;  %634 = vmatpush.msra.mxu1 %v498_v22 }
 0x301   :  { %v493_v55 = vadd.f32 %v8633_v36, %v487_v53 }
 0x302   :  { %v492_v56 = vadd.f32 %v8633_v36, %v486_v54 }
 0x303   :  { %v497_v0 = vmax.f32 %v493_v55, 0.0 }
 0x304   :  { %v496_v1 = vmax.f32 %v492_v56, 0.0 }
 0x305   :  { %516 = vmatpush.msra.mxu2 %v497_v0  ;;  %635 = vmatpush.msra.mxu1 %v497_v0 }
 0x306   :  { %8117 = vmatmul.msk.f32.vlgmr.msra.gmra.mxu0 %vm71_vm1, %v496_v1 }
 0x307   :  { %517 = vmatpush.msra.mxu2 %v496_v1  ;;  %636 = vmatpush.msra.mxu1 %v496_v1 }
 0x308   :  { %8107 = vmatmul.msk.f32.vlgmr.msra.gmra.mxu2 %vm159_vm3, %v8895_v57  ;;  %8121 = vmatmul.msk.f32.vlgmr.msra.gmra.mxu1 %vm159_vm3, %v8899_v58 }
 0x309   :  { %8125 = vmatpush.msk.msrb.mxu2 %vm75_vm0, %v651_v3 }
 0x30b   :  { %682 = vmatpush.msrb.mxu2 %v650_v5 }
 0x30e   :  { %8118 = vmatmul.msk.f32.gmra.mxu0 %vm71_vm1, %v497_v0 }
 0x310   :  { %8108 = vmatmul.msk.f32.gmra.mxu2 %vm159_vm3, %v8907_v59  ;;  %8122 = vmatmul.msk.f32.gmra.mxu1 %vm159_vm3, %v8911_v61 }
 0x316   :  { %8119 = vmatmul.msk.f32.gmra.mxu0 %vm71_vm1, %v498_v22 }
 0x318   :  { %8109 = vmatmul.msk.f32.gmra.mxu2 %vm159_vm3, %v8897_v23  ;;  %8123 = vmatmul.msk.f32.gmra.mxu1 %vm159_vm3, %v8919_v62 }
 0x31e   :  { %8120 = vmatmul.msk.f32.gmra.mxu0 %vm71_vm1, %v499_v46 }
 0x320   :  { %8110 = vmatmul.msk.f32.gmra.mxu2 %vm159_vm3, %v8909_v60  ;;  %8124 = vmatmul.msk.f32.gmra.mxu1 %vm159_vm3, %v8923_v63 }
 0x383   :  { %v609_v14 = vpop.f32.mrf.mxu0 }
 0x385   :  { %v638_v6 = vpop.f32.mrf.mxu1 }
 0x386   :  { %8126 = vmatmul.msk.f32.vlgmr.msrb.gmra.mxu2 %vm71_vm1, %v638_v6 }
 0x38b   :  { %v519_v7 = vpop.f32.mrf.mxu2  ;;  %v612_v19 = vpop.f32.mrf.mxu0 }
 0x38c   :  { %8112 = vmatmul.msk.f32.vlgmr.msrb.gmra.mxu3 %vm71_vm1, %v519_v7 }
 0x38d   :  { %v641_v8 = vpop.f32.mrf.mxu1 }
 0x38e   :  { %8127 = vmatmul.msk.f32.gmra.mxu2 %vm71_vm1, %v641_v8 }
 0x393   :  { %v522_v9 = vpop.f32.mrf.mxu2  ;;  %v615_v35 = vpop.f32.mrf.mxu0 }
 0x394   :  { %8113 = vmatmul.msk.f32.gmra.mxu3 %vm71_vm1, %v522_v9 }
 0x395   :  { %v644_v10 = vpop.f32.mrf.mxu1 }
 0x396   :  { %8128 = vmatmul.msk.f32.gmra.mxu2 %vm71_vm1, %v644_v10 }
 0x39b   :  { %v525_v11 = vpop.f32.mrf.mxu2  ;;  %v618_v44 = vpop.f32.mrf.mxu0 }
 0x39c   :  { %8114 = vmatmul.msk.f32.gmra.mxu3 %vm71_vm1, %v525_v11 }
 0x39d   :  { %v647_v12 = vpop.f32.mrf.mxu1 }
 0x39e   :  { %8129 = vmatmul.msk.f32.gmra.mxu2 %vm71_vm1, %v647_v12 }
 0x3a3   :  { %v528_v13 = vpop.f32.mrf.mxu2 }
 0x3a4   :  { %8115 = vmatmul.msk.f32.gmra.mxu3 %vm71_vm1, %v528_v13 }
 0x409   :  { %v684_v15 = vpop.f32.mrf.mxu2 }
 0x40f   :  { %v565_v16 = vpop.f32.mrf.mxu3 }
 0x410   :  { %v610_v17 = vadd.f32 %v609_v14, %v565_v16 }
 0x411   :  { %v687_v21 = vpop.f32.mrf.mxu2 }
 0x412   :  { %v696_v20 = vadd.f32 %v684_v15, %v610_v17 }
 0x414   :  { %v702_v24 = vadd.f32 %v8634_v18, %v696_v20 }
 0x416   :  { %v8958_v26 = vmax.f32 %v702_v24, 0.0 }
 0x417   :  { %v568_v27 = vpop.f32.mrf.mxu3 }
 0x418   :  { %v613_v28 = vadd.f32 %v612_v19, %v568_v27  ;;  %v710_v29 = vsel %vm71_vm1, %v8958_v26, 0.0  ;;  %v755_v1 = vmul.f32 %v8958_v26, %v8958_v26 }
 0x419   :  { %711 = vadd.xlane.f32.xlu2 %v710_v29  ;;  %v690_v37 = vpop.f32.mrf.mxu2 }
 0x41a   :  { %v697_v31 = vadd.f32 %v687_v21, %v613_v28  ;;  %v759_v2 = vsel %vm71_vm1, %v755_v1, 0.0 }
 0x41c   :  { %v703_v36 = vadd.f32 %v8634_v18, %v697_v31 }
 0x41e   :  { %v8962_v38 = vmax.f32 %v703_v36, 0.0 }
 0x41f   :  { %v571_v39 = vpop.f32.mrf.mxu3 }
 0x420   :  { %v616_v40 = vadd.f32 %v615_v35, %v571_v39  ;;  %v713_v25 = vsel %vm71_vm1, %v8962_v38, 0.0  ;;  %v756_v43 = vmul.f32 %v8962_v38, %v8962_v38 }
 0x421   :  { %714 = vadd.xlane.f32.xlu2 %v713_v25  ;;  %v693_v47 = vpop.f32.mrf.mxu2 }
 0x422   :  { %v698_v41 = vadd.f32 %v690_v37, %v616_v40  ;;  %v762_v49 = vsel %vm71_vm1, %v756_v43, 0.0 }
 0x424   :  { %v704_v42 = vadd.f32 %v8634_v18, %v698_v41 }
 0x426   :  { %v8968_v45 = vmax.f32 %v704_v42, 0.0 }
 0x427   :  { %v574_v46 = vpop.f32.mrf.mxu3 }
 0x428   :  { %v619_v48 = vadd.f32 %v618_v44, %v574_v46  ;;  %v716_v50 = vsel %vm71_vm1, %v8968_v45, 0.0  ;;  %v757_v22 = vmul.f32 %v8968_v45, %v8968_v45 }
 0x429   :  { %763 = vadd.xlane.f32.xlu2 %v762_v49  ;;  %717 = vadd.xlane.f32.xlu1 %v716_v50 }
 0x42a   :  { %v699_v51 = vadd.f32 %v693_v47, %v619_v48  ;;  %v765_v54 = vsel %vm71_vm1, %v757_v22, 0.0 }
 0x42c   :  { %v705_v52 = vadd.f32 %v8634_v18, %v699_v51 }
 0x42e   :  { %v8975_v53 = vmax.f32 %v705_v52, 0.0 }
 0x430   :  { %v719_v55 = vsel %vm71_vm1, %v8975_v53, 0.0  ;;  %v758_v56 = vmul.f32 %v8975_v53, %v8975_v53 }
 0x431   :  { %766 = vadd.xlane.f32.xlu1 %v765_v54  ;;  %720 = vadd.xlane.f32.xlu0 %v719_v55 }
 0x432   :  { %v768_v0 = vsel %vm71_vm1, %v758_v56, 0.0 }
 0x439   :  { %769 = vadd.xlane.f32.xlu0 %v768_v0 }
 0x441   :  { %760 = vadd.xlane.f32.xlu0 %v759_v2 }
 0x48c   :  { %v712_v3 = vpop.xlane.xlu2 %711 }
 0x494   :  { %v715_v6 = vpop.xlane.xlu2 %714 }
 0x49c   :  { %v718_v4 = vpop.xlane.xlu1 %717  ;;  %v764_v9 = vpop.xlane.xlu2 %763 }
 0x4a4   :  { %v721_v5 = vpop.xlane.xlu0 %720  ;;  %v767_v8 = vpop.xlane.xlu1 %766 }
 0x4a5   :  { %734 = vmatpush.msra.mxu3 %v721_v5 }
 0x4a7   :  { %735 = vmatpush.msra.mxu3 %v718_v4 }
 0x4a9   :  { %736 = vmatpush.msra.mxu3 %v715_v6 }
 0x4ab   :  { %737 = vmatpush.msra.mxu3 %v712_v3 }
 0x4ac   :  { %8130 = vmatmul.msk.f32.vlgmr.msra.gmra.mxu3 %vm159_vm3, %v8859_v30  ;;  %v770_v7 = vpop.xlane.xlu0 %769 }
 0x4ad   :  { %783 = vmatpush.msrb.mxu0 %v770_v7 }
 0x4af   :  { %784 = vmatpush.msrb.mxu0 %v767_v8 }
 0x4b1   :  { %785 = vmatpush.msrb.mxu0 %v764_v9 }
 0x4b4   :  { %8131 = vmatmul.msk.f32.gmra.mxu3 %vm159_vm3, %v8868_v32  ;;  %v761_v10 = vpop.xlane.xlu0 %760 }
 0x4b5   :  { %786 = vmatpush.msrb.mxu0 %v761_v10 }
 0x4b6   :  { %8134 = vmatmul.msk.f32.vlgmr.msrb.gmra.mxu0 %vm159_vm3, %v8859_v30 }
 0x4bc   :  { %8132 = vmatmul.msk.f32.gmra.mxu3 %vm159_vm3, %v8874_v33 }
 0x4be   :  { %8135 = vmatmul.msk.f32.gmra.mxu0 %vm159_vm3, %v8868_v32 }
 0x4c4   :  { %8133 = vmatmul.msk.f32.gmra.mxu3 %vm159_vm3, %v8880_v34 }
 0x4c6   :  { %8136 = vmatmul.msk.f32.gmra.mxu0 %vm159_vm3, %v8874_v33 }
 0x4ce   :  { %8137 = vmatmul.msk.f32.gmra.mxu0 %vm159_vm3, %v8880_v34 }
 0x52f   :  { %v739_v11 = vpop.f32.mrf.mxu3 }
 0x530   :  { %v751_v17 = vmul.f32 0.00625, %v739_v11 }
 0x532   :  { %v828_v21 = vmul.f32 %v751_v17, %v751_v17 }
 0x533   :  { %v788_v12 = vpop.f32.mrf.mxu0 }
 0x534   :  { %v800_v24 = vmul.f32 0.00625, %v788_v12 }
 0x536   :  { %v832_v28 = vsub.f32 %v800_v24, %v828_v21 }
 0x537   :  { %v742_v13 = vpop.f32.mrf.mxu3 }
 0x538   :  { %v752_v14 = vmul.f32 0.00625, %v742_v13  ;;  %v836_v40 = vadd.f32 1e-05, %v832_v28 }
 0x53a   :  { %v829_v30 = vmul.f32 %v752_v14, %v752_v14  ;;  %811 = vperm.xlu1 %8625, %v752_v14   ;;  %vm846_vm14 = vweird.f32 %v836_v40 }
 0x53b   :  { %v791_v15 = vpop.f32.mrf.mxu0 }
 0x53c   :  { %v801_v16 = vmul.f32 0.00625, %v791_v15  ;;  %v920_v15 = vld [vmem:[#allocation2 + $0x110] sm:$0xff] }
 0x53e   :  { %v833_v18 = vsub.f32 %v801_v16, %v829_v30  ;;  %v921_v30 = vld [vmem:[#allocation2 + $0x118] sm:$0x3] }
 0x53f   :  { %v745_v32 = vpop.f32.mrf.mxu3  ;;  %8147 = vmatpush.msk.msrb.mxu3 %vm75_vm0, %v921_v30 }
 0x540   :  { %v837_v19 = vadd.f32 1e-05, %v833_v18  ;;  %v753_v20 = vmul.f32 0.00625, %v745_v32 }
 0x541   :  { %1027 = vmatpush.msrb.mxu3 %v920_v15 }
 0x542   :  { %8684 = vrsqrt.f32 %v837_v19  ;;  %v830_v33 = vmul.f32 %v753_v20, %v753_v20  ;;  %816 = vperm.xlu2 %8624, %v753_v20   ;;  %vm856_vm5 = vweird.f32 %v837_v19 }
 0x543   :  { %v794_v27 = vpop.f32.mrf.mxu0 }
 0x544   :  { %v802_v34 = vmul.f32 0.00625, %v794_v27  ;;  %v906_v27 = vld [vmem:[#allocation2 + $0xd0] sm:$0xff] }
 0x546   :  { %v834_v29 = vsub.f32 %v802_v34, %v830_v33  ;;  %v907_v34 = vld [vmem:[#allocation2 + $0xd8] sm:$0xff] }
 0x547   :  { %v748_v31 = vpop.f32.mrf.mxu3 }
 0x548   :  { %v8685_v35 = vpop.eup %8684  ;;  %v838_v36 = vadd.f32 1e-05, %v834_v29  ;;  %v754_v37 = vmul.f32 0.00625, %v748_v31 }
 0x549   :  { %v851_v39 = vmul.f32 %v8685_v35, %v837_v19  ;;  %vm857_vm4 = vweird.f32 %v8685_v35 }
 0x54a   :  { %8686 = vrsqrt.f32 %v838_v36  ;;  %v831_v25 = vmul.f32 %v754_v37, %v754_v37  ;;  %806 = vperm.xlu2 %8624, %v751_v17   ;;  %821 = vperm.xlu1 %8625, %v754_v37   ;;  %vm858_vm6 = vmor %vm856_vm5, %vm857_vm4  ;;  %vm866_vm8 = vweird.f32 %v838_v36  ;;  %vm1572_vm4 = vcmask 130048  }
 0x54b   :  { %v797_v41 = vpop.f32.mrf.mxu0  ;;  %v852_v42 = vmul.f32 %v8685_v35, %v851_v39  ;;  %8688 = vrsqrt.f32 %v836_v40 }
 0x54c   :  { %v803_v43 = vmul.f32 0.00625, %v797_v41 }
 0x54d   :  { %v853_v44 = vmul.f32 0.5, %v852_v42 }
 0x54e   :  { %v835_v46 = vsub.f32 %v803_v43, %v831_v25  ;;  %v914_v25 = vld [vmem:[#allocation2 + $0xf0] sm:$0xff] }
 0x54f   :  { %v854_v47 = vsub.f32 1.5, %v853_v44 }
 0x550   :  { %v8687_v48 = vpop.eup %8686  ;;  %v839_v49 = vadd.f32 1e-05, %v835_v46 }
 0x551   :  { %v861_v50 = vmul.f32 %v8687_v48, %v838_v36  ;;  %v855_v51 = vmul.f32 %v8685_v35, %v854_v47  ;;  %v8689_v54 = vpop.eup %8688  ;;  %vm867_vm7 = vweird.f32 %v8687_v48  ;;  %v915_v36 = vld [vmem:[#allocation2 + $0xf8] sm:$0xff] }
 0x552   :  { %8690 = vrsqrt.f32 %v839_v49  ;;  %v841_v56 = vmul.f32 %v8689_v54, %v836_v40  ;;  %vm868_vm9 = vmor %vm866_vm8, %vm867_vm7  ;;  %vm876_vm11 = vweird.f32 %v839_v49  ;;  %vm847_vm13 = vweird.f32 %v8689_v54 }
 0x553   :  { %v859_v52 = vsel %vm858_vm6, %v8685_v35, %v855_v51  ;;  %v862_v22 = vmul.f32 %v8687_v48, %v861_v50  ;;  %vm848_vm15 = vmor %vm846_vm14, %vm847_vm13  ;;  %v905_v35 = vld [vmem:[#allocation2 + $0xc8] sm:$0xff] }
 0x554   :  { %887 = vperm.xlu1 %8625, %v859_v52   ;;  %v842_v6 = vmul.f32 %v8689_v54, %v841_v56  ;;  %v1071_v52 = vld [vmem:[#allocation2 + $0x128] sm:$0x3] }
 0x555   :  { %v863_v55 = vmul.f32 0.5, %v862_v22  ;;  %v1070_v22 = vld [vmem:[#allocation2 + $0x120] sm:$0xff] }
 0x556   :  { %v843_v9 = vmul.f32 0.5, %v842_v6  ;;  %v1130_v6 = vld [vmem:[#allocation2 + $0x148] sm:$0xff] }
 0x557   :  { %v864_v0 = vsub.f32 1.5, %v863_v55 }
 0x558   :  { %v8691_v1 = vpop.eup %8690  ;;  %v844_v12 = vsub.f32 1.5, %v843_v9 }
 0x559   :  { %v871_v2 = vmul.f32 %v8691_v1, %v839_v49  ;;  %v865_v3 = vmul.f32 %v8687_v48, %v864_v0  ;;  %vm877_vm10 = vweird.f32 %v8691_v1  ;;  %v912_v49 = vld [vmem:[#allocation2 + $0xe0] sm:$0xff] }
 0x55a   :  { %vm878_vm12 = vmor %vm876_vm11, %vm877_vm10  ;;  %v845_v13 = vmul.f32 %v8689_v54, %v844_v12  ;;  %vm1899_vm11 = vcmask 1043456  }
 0x55b   :  { %v869_v4 = vsel %vm868_vm9, %v8687_v48, %v865_v3  ;;  %v872_v5 = vmul.f32 %v8691_v1, %v871_v2  ;;  %v952_v48 = vld [vmem:[#allocation2 + $0x108] sm:$0x3] }
 0x55c   :  { %892 = vperm.xlu0 %8626, %v869_v4   ;;  %v849_v14 = vsel %vm848_vm15, %v8689_v54, %v845_v13  ;;  %8142 = vmatpush.msk.msra.mxu2 %vm75_vm0, %v952_v48 }
 0x55d   :  { %v873_v7 = vmul.f32 0.5, %v872_v5  ;;  %v1131_v5 = vld [vmem:[#allocation2 + $0x150] sm:$0x3] }
 0x55f   :  { %v874_v8 = vsub.f32 1.5, %v873_v7 }
 0x561   :  { %v875_v10 = vmul.f32 %v8691_v1, %v874_v8 }
 0x563   :  { %v879_v11 = vsel %vm878_vm12, %v8691_v1, %v875_v10  ;;  %vm1892_vm12 = vcmask 162816  }
 0x564   :  { %897 = vperm.xlu0 %8626, %v879_v11   ;;  %v8635_v11 = vld [vmem:[#allocation2 + $0x130] ss:$0 sm:$0xff] }
 0x56c   :  { %882 = vperm.xlu0 %8626, %v849_v14  }
 0x59c   :  { %v817_v32 = vpop.permute.xlu2 %816 }
 0x59d   :  { %v826_v19 = vsub.f32 %v8968_v45, %v817_v32  ;;  %v913_v45 = vld [vmem:[#allocation2 + $0xe8] sm:$0xff] }
 0x5a4   :  { %v807_v40 = vpop.permute.xlu2 %806 }
 0x5a5   :  { %v824_v43 = vsub.f32 %v8958_v26, %v807_v40  ;;  %v951_v26 = vld [vmem:[#allocation2 + $0x100] sm:$0xff] }
 0x5a6   :  { %983 = vmatpush.msra.mxu2 %v951_v26  ;;  %v8637_v26 = vld [vmem:[#allocation2 + $0x1a8] ss:$0 sm:$0xff] }
 0x5ac   :  { %v812_v16 = vpop.permute.xlu1 %811 }
 0x5ad   :  { %v825_v21 = vsub.f32 %v8962_v38, %v812_v16 }
 0x5bc   :  { %v822_v17 = vpop.permute.xlu1 %821 }
 0x5bd   :  { %v827_v24 = vsub.f32 %v8975_v53, %v822_v17  ;;  %v904_v53 = vld [vmem:[#allocation2 + $0xc0] sm:$0xff] }
 0x5c6   :  { %v888_v20 = vpop.permute.xlu1 %887 }
 0x5c7   :  { %v901_v29 = vmul.f32 %v888_v20, %v825_v21 }
 0x5c9   :  { %v909_v41 = vmul.f32 %v905_v35, %v901_v29 }
 0x5cb   :  { %v917_v47 = vadd.f32 %v913_v45, %v909_v41 }
 0x5ce   :  { %v893_v18 = vpop.permute.xlu0 %892 }
 0x5cf   :  { %v902_v33 = vmul.f32 %v893_v18, %v826_v19 }
 0x5d1   :  { %v910_v37 = vmul.f32 %v906_v27, %v902_v33 }
 0x5d3   :  { %v918_v38 = vadd.f32 %v914_v25, %v910_v37  ;;  %v1474_v25 = vld [vmem:[#allocation2 + $0x198] sm:$0xff] }
 0x5d6   :  { %v898_v28 = vpop.permute.xlu0 %897 }
 0x5d7   :  { %v903_v31 = vmul.f32 %v898_v28, %v827_v24 }
 0x5d9   :  { %v911_v39 = vmul.f32 %v907_v34, %v903_v31 }
 0x5db   :  { %v919_v42 = vadd.f32 %v915_v36, %v911_v39 }
 0x5dd   :  { %934 = vmatpush.msrb.mxu1 %v919_v42  ;;  %1053 = vmatpush.msra.mxu0 %v919_v42 }
 0x5de   :  { %v883_v44 = vpop.permute.xlu0 %882 }
 0x5df   :  { %v900_v46 = vmul.f32 %v883_v44, %v824_v43  ;;  %935 = vmatpush.msrb.mxu1 %v918_v38  ;;  %1054 = vmatpush.msra.mxu0 %v918_v38 }
 0x5e1   :  { %v908_v50 = vmul.f32 %v904_v53, %v900_v46  ;;  %936 = vmatpush.msrb.mxu1 %v917_v47  ;;  %1055 = vmatpush.msra.mxu0 %v917_v47 }
 0x5e3   :  { %v916_v51 = vadd.f32 %v912_v49, %v908_v50 }
 0x5e5   :  { %937 = vmatpush.msrb.mxu1 %v916_v51  ;;  %8148 = vmatmul.msk.f32.vlgmr.msrb.gmra.mxu3 %vm71_vm1, %v916_v51 }
 0x5e6   :  { %1056 = vmatpush.msra.mxu0 %v916_v51  ;;  %8138 = vmatmul.msk.f32.vlgmr.msrb.gmra.mxu1 %vm159_vm3, %v8895_v57  ;;  %v1503_v51 = vld [vmem:[#allocation2 + $0x1b8] sm:$0x3] }
 0x5e7   :  { %8152 = vmatmul.msk.f32.vlgmr.msra.gmra.mxu0 %vm159_vm3, %v8899_v58  ;;  %8156 = vmatpush.msk.msra.mxu1 %vm75_vm0, %v1071_v52 }
 0x5e8   :  { %8170 = vmatpush.msk.msrb.mxu0 %vm75_vm0, %v1131_v5 }
 0x5e9   :  { %1102 = vmatpush.msra.mxu1 %v1070_v22  ;;  %v1502_v22 = vld [vmem:[#allocation2 + $0x1b0] sm:$0xff] }
 0x5ea   :  { %1237 = vmatpush.msrb.mxu0 %v1130_v6 }
 0x5ed   :  { %8149 = vmatmul.msk.f32.gmra.mxu3 %vm71_vm1, %v917_v47 }
 0x5ee   :  { %8139 = vmatmul.msk.f32.gmra.mxu1 %vm159_vm3, %v8907_v59 }
 0x5ef   :  { %8153 = vmatmul.msk.f32.gmra.mxu0 %vm159_vm3, %v8911_v61 }
 0x5f5   :  { %8150 = vmatmul.msk.f32.gmra.mxu3 %vm71_vm1, %v918_v38 }
 0x5f6   :  { %8140 = vmatmul.msk.f32.gmra.mxu1 %vm159_vm3, %v8897_v23 }
 0x5f7   :  { %8154 = vmatmul.msk.f32.gmra.mxu0 %vm159_vm3, %v8919_v62 }
 0x5fd   :  { %8151 = vmatmul.msk.f32.gmra.mxu3 %vm71_vm1, %v919_v42 }
 0x5fe   :  { %8141 = vmatmul.msk.f32.gmra.mxu1 %vm159_vm3, %v8909_v60 }
 0x5ff   :  { %8155 = vmatmul.msk.f32.gmra.mxu0 %vm159_vm3, %v8923_v63 }
 0x663   :  { %v939_v54 = vpop.f32.mrf.mxu1 }
 0x664   :  { %8143 = vmatmul.msk.f32.vlgmr.msra.gmra.mxu2 %vm71_vm1, %v939_v54  ;;  %v1058_v55 = vpop.f32.mrf.mxu0 }
 0x665   :  { %8157 = vmatmul.msk.f32.vlgmr.msra.gmra.mxu1 %vm71_vm1, %v1058_v55 }
 0x668   :  { %v1029_v7 = vpop.f32.mrf.mxu3 }
 0x66b   :  { %v942_v56 = vpop.f32.mrf.mxu1 }
 0x66c   :  { %8144 = vmatmul.msk.f32.gmra.mxu2 %vm71_vm1, %v942_v56  ;;  %v1061_v0 = vpop.f32.mrf.mxu0 }
 0x66d   :  { %8158 = vmatmul.msk.f32.gmra.mxu1 %vm71_vm1, %v1061_v0 }
 0x670   :  { %v1032_v12 = vpop.f32.mrf.mxu3 }
 0x673   :  { %v945_v1 = vpop.f32.mrf.mxu1 }
 0x674   :  { %8145 = vmatmul.msk.f32.gmra.mxu2 %vm71_vm1, %v945_v1  ;;  %v1064_v2 = vpop.f32.mrf.mxu0 }
 0x675   :  { %8159 = vmatmul.msk.f32.gmra.mxu1 %vm71_vm1, %v1064_v2 }
 0x678   :  { %v1035_v32 = vpop.f32.mrf.mxu3 }
 0x67b   :  { %v948_v3 = vpop.f32.mrf.mxu1 }
 0x67c   :  { %8146 = vmatmul.msk.f32.gmra.mxu2 %vm71_vm1, %v948_v3  ;;  %v1067_v4 = vpop.f32.mrf.mxu0 }
 0x67d   :  { %8160 = vmatmul.msk.f32.gmra.mxu1 %vm71_vm1, %v1067_v4 }
 0x680   :  { %v1038_v28 = vpop.f32.mrf.mxu3 }
 0x6e2   :  { %v1104_v8 = vpop.f32.mrf.mxu1 }
 0x6e7   :  { %v985_v9 = vpop.f32.mrf.mxu2 }
 0x6e8   :  { %v1030_v10 = vadd.f32 %v1029_v7, %v985_v9 }
 0x6ea   :  { %v1116_v13 = vadd.f32 %v1104_v8, %v1030_v10  ;;  %v1107_v14 = vpop.f32.mrf.mxu1  ;;  %v8636_v10 = vld [vmem:[#allocation2 + $0x168] ss:$0 sm:$0xff] }
 0x6ec   :  { %v1122_v30 = vadd.f32 %v8635_v11, %v1116_v13 }
 0x6ee   :  { %v1126_v15 = vmax.f32 %v1122_v30, 0.0 }
 0x6ef   :  { %v988_v16 = vpop.f32.mrf.mxu2 }
 0x6f0   :  { %v1033_v17 = vadd.f32 %v1032_v12, %v988_v16  ;;  %8171 = vmatmul.msk.f32.vlgmr.msrb.gmra.mxu0 %vm71_vm1, %v1126_v15 }
 0x6f2   :  { %v1117_v18 = vadd.f32 %v1107_v14, %v1033_v17  ;;  %v1110_v20 = vpop.f32.mrf.mxu1 }
 0x6f4   :  { %v1123_v19 = vadd.f32 %v8635_v11, %v1117_v18 }
 0x6f6   :  { %v1127_v21 = vmax.f32 %v1123_v19, 0.0 }
 0x6f7   :  { %v991_v24 = vpop.f32.mrf.mxu2 }
 0x6f8   :  { %v1036_v33 = vadd.f32 %v1035_v32, %v991_v24  ;;  %8172 = vmatmul.msk.f32.gmra.mxu0 %vm71_vm1, %v1127_v21  ;;  %v1405_v24 = vld [vmem:[#allocation2 + $0x188] sm:$0x3] }
 0x6fa   :  { %v1118_v27 = vadd.f32 %v1110_v20, %v1036_v33  ;;  %v1113_v35 = vpop.f32.mrf.mxu1  ;;  %v1340_v20 = vld [vmem:[#allocation2 + $0x1200] sm:$0xff]  ;;  %v1341_v33 = vld [vmem:[#allocation2 + $0x1208] sm:$0xff] }
 0x6fc   :  { %v1124_v34 = vadd.f32 %v8635_v11, %v1118_v27  ;;  %v1343_v27 = vld [vmem:[#allocation2 + $0x1218] sm:$0xff] }
 0x6fe   :  { %v1128_v29 = vmax.f32 %v1124_v34, 0.0  ;;  %v1404_v34 = vld [vmem:[#allocation2 + $0x180] sm:$0xff] }
 0x6ff   :  { %v994_v31 = vpop.f32.mrf.mxu2 }
 0x700   :  { %v1039_v36 = vadd.f32 %v1038_v28, %v994_v31  ;;  %8173 = vmatmul.msk.f32.gmra.mxu0 %vm71_vm1, %v1128_v29  ;;  %v1374_v28 = vld [vmem:[#allocation2 + $0x178] sm:$0x3]  ;;  %v8638_v31 = vld [vmem:[#allocation2 + $0x1c0] ss:$0 sm:$0xff] }
 0x702   :  { %v1119_v37 = vadd.f32 %v1113_v35, %v1039_v36 }
 0x704   :  { %v1125_v39 = vadd.f32 %v8635_v11, %v1119_v37 }
 0x706   :  { %v1129_v40 = vmax.f32 %v1125_v39, 0.0 }
 0x708   :  { %1144 = vmatpush.msrb.mxu2 %v1129_v40  ;;  %8174 = vmatmul.msk.f32.gmra.mxu0 %vm71_vm1, %v1129_v40 }
 0x709   :  { %1263 = vmatpush.msrb.mxu1 %v1129_v40 }
 0x70a   :  { %1145 = vmatpush.msrb.mxu2 %v1128_v29 }
 0x70b   :  { %1264 = vmatpush.msrb.mxu1 %v1128_v29  ;;  %v1373_v29 = vld [vmem:[#allocation2 + $0x170] sm:$0xff] }
 0x70c   :  { %1146 = vmatpush.msrb.mxu2 %v1127_v21 }
 0x70d   :  { %1265 = vmatpush.msrb.mxu1 %v1127_v21  ;;  %v1342_v21 = vld [vmem:[#allocation2 + $0x1210] sm:$0xff] }
 0x70e   :  { %1147 = vmatpush.msrb.mxu2 %v1126_v15 }
 0x70f   :  { %1266 = vmatpush.msrb.mxu1 %v1126_v15  ;;  %8161 = vmatmul.msk.f32.vlgmr.msrb.gmra.mxu2 %vm159_vm3, %v8895_v57  ;;  %v1162_v57 = vld [vmem:[#allocation2 + $0x140] sm:$0x3] }
 0x710   :  { %8175 = vmatmul.msk.f32.vlgmr.msrb.gmra.mxu1 %vm159_vm3, %v8899_v58  ;;  %v1281_v58 = vld [vmem:[#allocation2 + $0x160] sm:$0x3]  ;;  %8165 = vmatpush.msk.msra.mxu3 %vm75_vm0, %v1162_v57 }
 0x711   :  { %8179 = vmatpush.msk.msra.mxu2 %vm75_vm0, %v1281_v58  ;;  %v58_v58 = vld [vmem:[#allocation2 + $0x1170] sm:$0xff] }
 0x717   :  { %8162 = vmatmul.msk.f32.gmra.mxu2 %vm159_vm3, %v8907_v59  ;;  %v1161_v59 = vld [vmem:[#allocation2 + $0x138] sm:$0xff] }
 0x718   :  { %8176 = vmatmul.msk.f32.gmra.mxu1 %vm159_vm3, %v8911_v61  ;;  %1193 = vmatpush.msra.mxu3 %v1161_v59  ;;  %v1280_v61 = vld [vmem:[#allocation2 + $0x158] sm:$0xff] }
 0x719   :  { %1312 = vmatpush.msra.mxu2 %v1280_v61  ;;  %v59_v59 = vld [vmem:[#allocation2 + $0x1178] sm:$0xff] }
 0x71b   :  { %8196 = vmatpush.msk.msrb.mxu2 %vm75_vm0, %v1503_v51 }
 0x71d   :  { %1527 = vmatpush.msrb.mxu2 %v1502_v22  ;;  %v9121_v22 = vld [vmem:[#allocation2 + $0x1160] sm:$0xff] }
 0x71f   :  { %8163 = vmatmul.msk.f32.gmra.mxu2 %vm159_vm3, %v8897_v23  ;;  %v1475_v23 = vld [vmem:[#allocation2 + $0x1a0] sm:$0x3] }
 0x720   :  { %8177 = vmatmul.msk.f32.gmra.mxu1 %vm159_vm3, %v8919_v62 }
 0x721   :  { %8194 = vmatpush.msk.msra.mxu1 %vm75_vm0, %v1475_v23 }
 0x723   :  { %1496 = vmatpush.msra.mxu1 %v1474_v25 }
 0x727   :  { %8164 = vmatmul.msk.f32.gmra.mxu2 %vm159_vm3, %v8909_v60  ;;  %v9065_v60 = vld [vmem:[%s9923_s1] sm:$0x3] }
 0x728   :  { %8178 = vmatmul.msk.f32.gmra.mxu1 %vm159_vm3, %v8923_v63 }
 0x730   :  { %8195 = vmatmul.msk.f32.vlgmr.msra.gmra.mxu1 %vm71_vm1, %v9065_v60 }
 0x76d   :  { %v1239_v44 = vpop.f32.mrf.mxu0 }
 0x775   :  { %v1242_v48 = vpop.f32.mrf.mxu0 }
 0x77d   :  { %v1245_v56 = vpop.f32.mrf.mxu0 }
 0x785   :  { %v1248_v3 = vpop.f32.mrf.mxu0 }
 0x78d   :  { %v1268_v62 = vpop.f32.mrf.mxu1 }
 0x78e   :  { %8180 = vmatmul.msk.f32.vlgmr.msra.gmra.mxu2 %vm71_vm1, %v1268_v62 }
 0x792   :  { %v1149_v63 = vpop.f32.mrf.mxu2 }
 0x793   :  { %8166 = vmatmul.msk.f32.vlgmr.msra.gmra.mxu3 %vm71_vm1, %v1149_v63  ;;  %v8639_v63 = vld [vmem:[#allocation2 + $0x190] ss:$0 sm:$0xff] }
 0x795   :  { %v1271_v41 = vpop.f32.mrf.mxu1 }
 0x796   :  { %8181 = vmatmul.msk.f32.gmra.mxu2 %vm71_vm1, %v1271_v41 }
 0x79a   :  { %v1152_v42 = vpop.f32.mrf.mxu2 }
 0x79b   :  { %8167 = vmatmul.msk.f32.gmra.mxu3 %vm71_vm1, %v1152_v42 }
 0x79d   :  { %v1274_v45 = vpop.f32.mrf.mxu1 }
 0x79e   :  { %8182 = vmatmul.msk.f32.gmra.mxu2 %vm71_vm1, %v1274_v45 }
 0x7a2   :  { %v1155_v43 = vpop.f32.mrf.mxu2 }
 0x7a3   :  { %8168 = vmatmul.msk.f32.gmra.mxu3 %vm71_vm1, %v1155_v43 }
 0x7a5   :  { %v1277_v38 = vpop.f32.mrf.mxu1 }
 0x7a6   :  { %8183 = vmatmul.msk.f32.gmra.mxu2 %vm71_vm1, %v1277_v38 }
 0x7aa   :  { %v1158_v53 = vpop.f32.mrf.mxu2 }
 0x7ab   :  { %8169 = vmatmul.msk.f32.gmra.mxu3 %vm71_vm1, %v1158_v53 }
 0x7ad   :  { %v1498_v52 = vpop.f32.mrf.mxu1 }
 0x7ae   :  { %v1499_v54 = vadd.f32 %v8637_v26, %v1498_v52 }
 0x7b0   :  { %v1501_v55 = vmax.f32 %v1499_v54, 0.0 }
 0x7b2   :  { %8197 = vmatmul.msk.f32.vlgmr.msrb.gmra.mxu2 %vm71_vm1, %v1501_v55 }
 0x811   :  { %v1314_v46 = vpop.f32.mrf.mxu2 }
 0x816   :  { %v1195_v47 = vpop.f32.mrf.mxu3 }
 0x817   :  { %v1240_v7 = vadd.f32 %v1239_v44, %v1195_v47 }
 0x819   :  { %v1317_v49 = vpop.f32.mrf.mxu2  ;;  %v1326_v13 = vadd.f32 %v1314_v46, %v1240_v7 }
 0x81b   :  { %v1332_v17 = vadd.f32 %v8636_v10, %v1326_v13 }
 0x81d   :  { %v9090_v19 = vmax.f32 %v1332_v17, 0.0 }
 0x81e   :  { %v1198_v50 = vpop.f32.mrf.mxu3 }
 0x81f   :  { %v1243_v4 = vadd.f32 %v1242_v48, %v1198_v50 }
 0x821   :  { %v1320_v0 = vpop.f32.mrf.mxu2  ;;  %v1327_v11 = vadd.f32 %v1317_v49, %v1243_v4 }
 0x823   :  { %v1333_v15 = vadd.f32 %v8636_v10, %v1327_v11 }
 0x825   :  { %v9086_v32 = vmax.f32 %v1333_v15, 0.0 }
 0x826   :  { %v1201_v1 = vpop.f32.mrf.mxu3 }
 0x827   :  { %v1246_v2 = vadd.f32 %v1245_v56, %v1201_v1 }
 0x829   :  { %v1323_v6 = vpop.f32.mrf.mxu2  ;;  %v1328_v8 = vadd.f32 %v1320_v0, %v1246_v2  ;;  %v9125_v0 = vld [vmem:[#allocation2 + $0x1168] sm:$0xff] }
 0x82b   :  { %v1334_v14 = vadd.f32 %v8636_v10, %v1328_v8 }
 0x82d   :  { %v9082_v18 = vmax.f32 %v1334_v14, 0.0 }
 0x82e   :  { %v1204_v5 = vpop.f32.mrf.mxu3 }
 0x82f   :  { %v1249_v9 = vadd.f32 %v1248_v3, %v1204_v5 }
 0x831   :  { %v1329_v12 = vadd.f32 %v1323_v6, %v1249_v9 }
 0x833   :  { %v1335_v30 = vadd.f32 %v8636_v10, %v1329_v12 }
 0x835   :  { %v9078_v16 = vmax.f32 %v1335_v30, 0.0  ;;  %v1529_v35 = vpop.f32.mrf.mxu2 }
 0x836   :  { %v1530_v36 = vadd.f32 %v8638_v31, %v1529_v35 }
 0x837   :  { %1362 = vmatpush.msrb.mxu3 %v9078_v16  ;;  %1393 = vmatpush.msra.mxu0 %v9078_v16 }
 0x839   :  { %1363 = vmatpush.msrb.mxu3 %v9082_v18  ;;  %1394 = vmatpush.msra.mxu0 %v9082_v18 }
 0x83b   :  { %1364 = vmatpush.msrb.mxu3 %v9086_v32  ;;  %1395 = vmatpush.msra.mxu0 %v9086_v32 }
 0x83d   :  { %1365 = vmatpush.msrb.mxu3 %v9090_v19  ;;  %1396 = vmatpush.msra.mxu0 %v9090_v19 }
 0x83e   :  { %8184 = vmatmul.msk.f32.vlgmr.msrb.gmra.mxu3 %vm159_vm3, %v1340_v20  ;;  %8186 = vmatmul.msk.f32.vlgmr.msra.gmra.mxu0 %vm159_vm3, %v1342_v21 }
 0x83f   :  { %8188 = vmatpush.msk.msra.mxu3 %vm75_vm0, %v1405_v24  ;;  %8191 = vmatpush.msk.msrb.mxu0 %vm75_vm0, %v1374_v28 }
 0x841   :  { %1430 = vmatpush.msra.mxu3 %v1404_v34  ;;  %1462 = vmatpush.msrb.mxu0 %v1373_v29 }
 0x843   :  { %8198 = vmatpush.msk.msrb.mxu3 %vm75_vm0, %v1530_v36 }
 0x846   :  { %8185 = vmatmul.msk.f32.gmra.mxu3 %vm159_vm3, %v1341_v33  ;;  %8187 = vmatmul.msk.f32.gmra.mxu0 %vm159_vm3, %v1343_v27 }
 0x8bb   :  { %v1398_v37 = vpop.f32.mrf.mxu0 }
 0x8bc   :  { %8189 = vmatmul.msk.f32.vlgmr.msra.gmra.mxu3 %vm71_vm1, %v1398_v37  ;;  %v1696_v37 = vld [vmem:[#allocation2 + $0x200] sm:$0x3] }
 0x8c1   :  { %v1367_v39 = vpop.f32.mrf.mxu3 }
 0x8c2   :  { %8192 = vmatmul.msk.f32.vlgmr.msrb.gmra.mxu0 %vm71_vm1, %v1367_v39  ;;  %v1695_v39 = vld [vmem:[#allocation2 + $0x1f8] sm:$0xff] }
 0x8c3   :  { %v1401_v40 = vpop.f32.mrf.mxu0 }
 0x8c4   :  { %8190 = vmatmul.msk.f32.gmra.mxu3 %vm71_vm1, %v1401_v40 }
 0x8c9   :  { %v1370_v57 = vpop.f32.mrf.mxu3 }
 0x8ca   :  { %8193 = vmatmul.msk.f32.gmra.mxu0 %vm71_vm1, %v1370_v57 }
 0x8cc   :  { %8199 = vmatmul.msk.f32.vlgmr.msrb.gmra.mxu3 %vm106_vm2, %v58_v58  ;;  %v1688_v58 = vld [vmem:[#allocation2 + $0x1d0] sm:$0xff] }
 0x8d4   :  { %8200 = vmatmul.msk.f32.gmra.mxu3 %vm106_vm2, %v59_v59 }
 0x93f   :  { %v1432_v61 = vpop.f32.mrf.mxu3  ;;  %v1464_v23 = vpop.f32.mrf.mxu0 }
 0x940   :  { %v1465_v62 = vadd.f32 %v1464_v23, %v1432_v61  ;;  %v1692_v23 = vld [vmem:[#allocation2 + $0x1e0] sm:$0xff] }
 0x942   :  { %v1472_v41 = vadd.f32 %v8639_v63, %v1465_v62 }
 0x947   :  { %v1435_v25 = vpop.f32.mrf.mxu3  ;;  %v1467_v42 = vpop.f32.mrf.mxu0 }
 0x948   :  { %v1468_v38 = vadd.f32 %v1467_v42, %v1435_v25  ;;  %v1687_v42 = vld [vmem:[#allocation2 + $0x1c8] sm:$0xff] }
 0x94a   :  { %v1473_v44 = vadd.f32 %v8639_v63, %v1468_v38 }
 0x94f   :  { %v1558_v45 = vpop.f32.mrf.mxu3 }
 0x950   :  { %v9107_v43 = vadd.f32 %v1558_v45, %v1472_v41 }
 0x952   :  { %v1566_v53 = vsel %vm71_vm1, %v9107_v43, 0.0  ;;  %v1604_v51 = vmul.f32 %v9107_v43, %v9107_v43 }
 0x953   :  { %1567 = vadd.xlane.f32.xlu1 %v1566_v53  ;;  %v1691_v53 = vld [vmem:[#allocation2 + $0x1d8] sm:$0xff] }
 0x954   :  { %v1606_v26 = vsel %vm71_vm1, %v1604_v51, 0.0  ;;  %v1726_v51 = vld [vmem:[#allocation2 + $0x1e8] sm:$0xff] }
 0x957   :  { %v1561_v46 = vpop.f32.mrf.mxu3 }
 0x958   :  { %v9111_v47 = vadd.f32 %v1561_v46, %v1473_v44 }
 0x95a   :  { %v1569_v48 = vsel %vm71_vm1, %v9111_v47, 0.0  ;;  %v1605_v49 = vmul.f32 %v9111_v47, %v9111_v47 }
 0x95b   :  { %1570 = vadd.xlane.f32.xlu2 %v1569_v48  ;;  %v9136_v48 = vld [vmem:[#allocation2 + $0x1140] sm:$0xff] }
 0x95c   :  { %v1609_v50 = vsel %vm71_vm1, %v1605_v49, 0.0  ;;  %v9147_v49 = vld [vmem:[#allocation2 + $0x1158] sm:$0xff] }
 0x95d   :  { %1610 = vadd.xlane.f32.xlu0 %v1609_v50  ;;  %v1727_v50 = vld [vmem:[#allocation2 + $0x1f0] sm:$0x3] }
 0x95e   :  { %8207 = vmatpush.msk.msra.mxu3 %vm75_vm0, %v1727_v50 }
 0x960   :  { %1752 = vmatpush.msra.mxu3 %v1726_v51 }
 0x963   :  { %1607 = vadd.xlane.f32.xlu2 %v1606_v26  ;;  %v1822_v26 = vld [vmem:[#allocation2 + $0x210] sm:$0x3] }
 0x9c6   :  { %v1568_v54 = vpop.xlane.xlu1 %1567 }
 0x9ce   :  { %v1571_v52 = vpop.xlane.xlu2 %1570 }
 0x9cf   :  { %1593 = vmatpush.msrb.mxu1 %v1571_v52  ;;  %v1821_v52 = vld [vmem:[#allocation2 + $0x208] sm:$0xff] }
 0x9d0   :  { %v1611_v55 = vpop.xlane.xlu0 %1610 }
 0x9d1   :  { %1594 = vmatpush.msrb.mxu1 %v1568_v54  ;;  %1626 = vmatpush.msra.mxu0 %v1611_v55 }
 0x9d2   :  { %8201 = vmatmul.msk.f32.vlgmr.msrb.gmra.mxu1 %vm1572_vm4, %v9121_v22 }
 0x9d3   :  { %8210 = vmatpush.msk.msra.mxu1 %vm75_vm0, %v1696_v37 }
 0x9d5   :  { %1784 = vmatpush.msra.mxu1 %v1695_v39 }
 0x9d6   :  { %v1608_v56 = vpop.xlane.xlu2 %1607 }
 0x9d7   :  { %1627 = vmatpush.msra.mxu0 %v1608_v56 }
 0x9d8   :  { %8203 = vmatmul.msk.f32.vlgmr.msra.gmra.mxu0 %vm1572_vm4, %v9121_v22 }
 0x9da   :  { %8202 = vmatmul.msk.f32.gmra.mxu1 %vm1572_vm4, %v9125_v0 }
 0x9e0   :  { %8204 = vmatmul.msk.f32.gmra.mxu0 %vm1572_vm4, %v9125_v0 }
 0xa4f   :  { %v1596_v1 = vpop.f32.mrf.mxu1 }
 0xa50   :  { %v1602_v2 = vmul.f32 0.0125, %v1596_v1 }
 0xa52   :  { %1639 = vperm.xlu0 %8626, %v1602_v2   ;;  %v1649_v3 = vmul.f32 %v1602_v2, %v1602_v2  ;;  %v1865_v2 = vld [vmem:[#allocation2 + $0x248] sm:$0xf] }
 0xa55   :  { %v1629_v4 = vpop.f32.mrf.mxu0 }
 0xa56   :  { %v1635_v5 = vmul.f32 0.0125, %v1629_v4  ;;  %v1863_v4 = vld [vmem:[#allocation2 + $0x238] sm:$0xff] }
 0xa57   :  { %v1599_v6 = vpop.f32.mrf.mxu1 }
 0xa58   :  { %v1651_v7 = vsub.f32 %v1635_v5, %v1649_v3  ;;  %v1603_v8 = vmul.f32 0.0125, %v1599_v6  ;;  %v1864_v3 = vld [vmem:[#allocation2 + $0x240] sm:$0xff] }
 0xa5a   :  { %v1653_v9 = vadd.f32 1e-05, %v1651_v7  ;;  %1644 = vperm.xlu1 %8625, %v1603_v8   ;;  %v1650_v10 = vmul.f32 %v1603_v8, %v1603_v8 }
 0xa5c   :  { %8692 = vrsqrt.f32 %v1653_v9  ;;  %vm1661_vm6 = vweird.f32 %v1653_v9 }
 0xa5d   :  { %v1632_v11 = vpop.f32.mrf.mxu0 }
 0xa5e   :  { %v1636_v12 = vmul.f32 0.0125, %v1632_v11 }
 0xa60   :  { %v1652_v13 = vsub.f32 %v1636_v12, %v1650_v10 }
 0xa62   :  { %v8693_v14 = vpop.eup %8692  ;;  %v1654_v30 = vadd.f32 1e-05, %v1652_v13 }
 0xa63   :  { %v1656_v15 = vmul.f32 %v8693_v14, %v1653_v9  ;;  %vm1662_vm5 = vweird.f32 %v8693_v14  ;;  %v8640_v9 = vld [vmem:[#allocation2 + $0x218] ss:$0 sm:$0xff] }
 0xa64   :  { %8694 = vrsqrt.f32 %v1654_v30  ;;  %vm1663_vm7 = vmor %vm1661_vm6, %vm1662_vm5  ;;  %vm1671_vm8 = vweird.f32 %v1654_v30 }
 0xa65   :  { %v1657_v17 = vmul.f32 %v8693_v14, %v1656_v15 }
 0xa67   :  { %v1658_v20 = vmul.f32 0.5, %v1657_v17 }
 0xa69   :  { %v1659_v21 = vsub.f32 1.5, %v1658_v20 }
 0xa6a   :  { %v8695_v24 = vpop.eup %8694 }
 0xa6b   :  { %v1666_v33 = vmul.f32 %v8695_v24, %v1654_v30  ;;  %v1660_v27 = vmul.f32 %v8693_v14, %v1659_v21  ;;  %vm1672_vm9 = vweird.f32 %v8695_v24 }
 0xa6c   :  { %vm1673_vm10 = vmor %vm1671_vm8, %vm1672_vm9  ;;  %vm2662_vm8 = vcmask 64512  }
 0xa6d   :  { %v1664_v34 = vsel %vm1663_vm7, %v8693_v14, %v1660_v27  ;;  %v1667_v28 = vmul.f32 %v8695_v24, %v1666_v33  ;;  %v1983_v33 = vld [vmem:[#allocation2 + $0x260] sm:$0xf]  ;;  %v1890_v27 = vld [vmem:[#allocation2 + $0x228] sm:$0xff] }
 0xa6e   :  { %1677 = vperm.xlu0 %8626, %v1664_v34   ;;  %v1982_v34 = vld [vmem:[#allocation2 + $0x258] sm:$0xff] }
 0xa6f   :  { %v1668_v29 = vmul.f32 0.5, %v1667_v28  ;;  %v1889_v28 = vld [vmem:[#allocation2 + $0x220] sm:$0xff] }
 0xa71   :  { %v1669_v31 = vsub.f32 1.5, %v1668_v29  ;;  %v1981_v29 = vld [vmem:[#allocation2 + $0x250] sm:$0xff] }
 0xa73   :  { %v1670_v35 = vmul.f32 %v8695_v24, %v1669_v31 }
 0xa75   :  { %v1674_v36 = vsel %vm1673_vm10, %v8695_v24, %v1670_v35  ;;  %v1891_v24 = vld [vmem:[#allocation2 + $0x230] sm:$0xf] }
 0xa76   :  { %1682 = vperm.xlu2 %8624, %v1674_v36   ;;  %8220 = vmatpush.msk.msrb.mxu1 %vm1899_vm11, %v1891_v24 }
 0xa78   :  { %1917 = vmatpush.msrb.mxu1 %v1890_v27 }
 0xa7a   :  { %1918 = vmatpush.msrb.mxu1 %v1889_v28 }
 0xac4   :  { %v1640_v63 = vpop.permute.xlu0 %1639 }
 0xac5   :  { %v1647_v41 = vsub.f32 %v9107_v43, %v1640_v63  ;;  %v9145_v43 = vld [vmem:[#allocation2 + $0x1148] sm:$0xff] }
 0xacc   :  { %v1645_v40 = vpop.permute.xlu1 %1644 }
 0xacd   :  { %v1648_v57 = vsub.f32 %v9111_v47, %v1645_v40  ;;  %v9138_v47 = vld [vmem:[#allocation2 + $0x1150] sm:$0xff] }
 0xad0   :  { %v1683_v59 = vpop.permute.xlu2 %1682 }
 0xad1   :  { %v1686_v61 = vmul.f32 %v1683_v59, %v1648_v57 }
 0xad3   :  { %v1690_v25 = vmul.f32 %v1688_v58, %v1686_v61  ;;  %v8641_v58 = vld [vmem:[#allocation2 + $0x268] ss:$0 sm:$0xff] }
 0xad5   :  { %v1694_v62 = vadd.f32 %v1692_v23, %v1690_v25 }
 0xad7   :  { %1717 = vmatpush.msra.mxu2 %v1694_v62  ;;  %1812 = vmatpush.msrb.mxu0 %v1694_v62 }
 0xae0   :  { %v1678_v45 = vpop.permute.xlu0 %1677 }
 0xae1   :  { %v1685_v38 = vmul.f32 %v1678_v45, %v1647_v41 }
 0xae3   :  { %v1689_v44 = vmul.f32 %v1687_v42, %v1685_v38 }
 0xae5   :  { %v1693_v46 = vadd.f32 %v1691_v53, %v1689_v44 }
 0xae7   :  { %1718 = vmatpush.msra.mxu2 %v1693_v46  ;;  %8211 = vmatmul.msk.f32.vlgmr.msra.gmra.mxu1 %vm71_vm1, %v1693_v46 }
 0xae8   :  { %1813 = vmatpush.msrb.mxu0 %v1693_v46  ;;  %8205 = vmatmul.msk.f32.vlgmr.msra.gmra.mxu2 %vm1572_vm4, %v9136_v48 }
 0xae9   :  { %8213 = vmatmul.msk.f32.vlgmr.msrb.gmra.mxu0 %vm1572_vm4, %v9138_v47  ;;  %8215 = vmatpush.msk.msrb.mxu2 %vm75_vm0, %v1822_v26 }
 0xaea   :  { %8223 = vmatpush.msk.msra.mxu0 %vm1899_vm11, %v1865_v2 }
 0xaeb   :  { %1847 = vmatpush.msrb.mxu2 %v1821_v52 }
 0xaec   :  { %1949 = vmatpush.msra.mxu0 %v1864_v3 }
 0xaee   :  { %1950 = vmatpush.msra.mxu0 %v1863_v4 }
 0xaef   :  { %8212 = vmatmul.msk.f32.gmra.mxu1 %vm71_vm1, %v1694_v62 }
 0xaf0   :  { %8206 = vmatmul.msk.f32.gmra.mxu2 %vm1572_vm4, %v9145_v43 }
 0xaf1   :  { %8214 = vmatmul.msk.f32.gmra.mxu0 %vm1572_vm4, %v9147_v49 }
 0xb64   :  { %v1786_v5 = vpop.f32.mrf.mxu1 }
 0xb66   :  { %v1815_v54 = vpop.f32.mrf.mxu0 }
 0xb67   :  { %8216 = vmatmul.msk.f32.vlgmr.msrb.gmra.mxu2 %vm71_vm1, %v1815_v54 }
 0xb6b   :  { %v1720_v55 = vpop.f32.mrf.mxu2 }
 0xb6c   :  { %8208 = vmatmul.msk.f32.vlgmr.msra.gmra.mxu3 %vm71_vm1, %v1720_v55  ;;  %v1789_v12 = vpop.f32.mrf.mxu1 }
 0xb6e   :  { %v1818_v56 = vpop.f32.mrf.mxu0 }
 0xb6f   :  { %8217 = vmatmul.msk.f32.gmra.mxu2 %vm71_vm1, %v1818_v56 }
 0xb73   :  { %v1723_v1 = vpop.f32.mrf.mxu2 }
 0xb74   :  { %8209 = vmatmul.msk.f32.gmra.mxu3 %vm71_vm1, %v1723_v1 }
 0xbea   :  { %v1849_v6 = vpop.f32.mrf.mxu2 }
 0xbef   :  { %v1754_v7 = vpop.f32.mrf.mxu3 }
 0xbf0   :  { %v1787_v8 = vadd.f32 %v1786_v5, %v1754_v7 }
 0xbf2   :  { %v1855_v10 = vadd.f32 %v1849_v6, %v1787_v8  ;;  %v1852_v30 = vpop.f32.mrf.mxu2 }
 0xbf4   :  { %v1859_v11 = vadd.f32 %v8640_v9, %v1855_v10 }
 0xbf6   :  { %v1861_v13 = vmax.f32 %v1859_v11, 0.0 }
 0xbf7   :  { %v1757_v14 = vpop.f32.mrf.mxu3 }
 0xbf8   :  { %v1790_v15 = vadd.f32 %v1789_v12, %v1757_v14  ;;  %8224 = vmatmul.msk.f32.vlgmr.msra.gmra.mxu0 %vm1892_vm12, %v1861_v13 }
 0xbfa   :  { %v1856_v17 = vadd.f32 %v1852_v30, %v1790_v15 }
 0xbfc   :  { %v1860_v20 = vadd.f32 %v8640_v9, %v1856_v17 }
 0xbfe   :  { %v1862_v21 = vmax.f32 %v1860_v20, 0.0 }
 0xc00   :  { %1880 = vmatpush.msrb.mxu3 %v1862_v21  ;;  %8225 = vmatmul.msk.f32.gmra.mxu0 %vm1892_vm12, %v1862_v21 }
 0xc01   :  { %1972 = vmatpush.msra.mxu2 %v1862_v21 }
 0xc02   :  { %1881 = vmatpush.msrb.mxu3 %v1861_v13 }
 0xc03   :  { %1973 = vmatpush.msra.mxu2 %v1861_v13  ;;  %8218 = vmatmul.msk.f32.vlgmr.msrb.gmra.mxu3 %vm1572_vm4, %v9136_v48 }
 0xc04   :  { %8226 = vmatmul.msk.f32.vlgmr.msra.gmra.mxu2 %vm1572_vm4, %v9138_v47  ;;  %8228 = vmatpush.msk.msra.mxu3 %vm1899_vm11, %v1983_v33 }
 0xc06   :  { %2007 = vmatpush.msra.mxu3 %v1982_v34 }
 0xc08   :  { %2008 = vmatpush.msra.mxu3 %v1981_v29 }
 0xc0b   :  { %8219 = vmatmul.msk.f32.gmra.mxu3 %vm1572_vm4, %v9145_v43 }
 0xc0c   :  { %8227 = vmatmul.msk.f32.gmra.mxu2 %vm1572_vm4, %v9147_v49 }
 0xc75   :  { %v1952_v40 = vpop.f32.mrf.mxu0 }
 0xc7d   :  { %v1955_v63 = vpop.f32.mrf.mxu0 }
 0xc86   :  { %v1883_v31 = vpop.f32.mrf.mxu3 }
 0xc87   :  { %v1975_v35 = vpop.f32.mrf.mxu2  ;;  %8221 = vmatmul.msk.f32.vlgmr.msrb.gmra.mxu1 %vm1892_vm12, %v1883_v31 }
 0xc88   :  { %8229 = vmatmul.msk.f32.vlgmr.msra.gmra.mxu3 %vm1892_vm12, %v1975_v35 }
 0xc8e   :  { %v1886_v36 = vpop.f32.mrf.mxu3 }
 0xc8f   :  { %v1978_v37 = vpop.f32.mrf.mxu2  ;;  %8222 = vmatmul.msk.f32.gmra.mxu1 %vm1892_vm12, %v1886_v36  ;;  %v2148_v36 = vld [vmem:[#allocation2 + $0x2b8] sm:$0xf] }
 0xc90   :  { %8230 = vmatmul.msk.f32.gmra.mxu3 %vm1892_vm12, %v1978_v37  ;;  %v2147_v37 = vld [vmem:[#allocation2 + $0x2b0] sm:$0xff] }
 0xd04   :  { %v1920_v39 = vpop.f32.mrf.mxu1 }
 0xd05   :  { %v1953_v57 = vadd.f32 %v1952_v40, %v1920_v39  ;;  %v2146_v39 = vld [vmem:[#allocation2 + $0x2a8] sm:$0xff] }
 0xd0b   :  { %v2010_v59 = vpop.f32.mrf.mxu3 }
 0xd0c   :  { %v2016_v61 = vadd.f32 %v2010_v59, %v1953_v57  ;;  %v1923_v25 = vpop.f32.mrf.mxu1 }
 0xd0d   :  { %v1956_v41 = vadd.f32 %v1955_v63, %v1923_v25 }
 0xd0e   :  { %v2020_v23 = vadd.f32 %v8641_v58, %v2016_v61 }
 0xd10   :  { %v9177_v62 = vmax.f32 %v2020_v23, 0.0  ;;  %v2142_v23 = vld [vmem:[#allocation2 + $0x280] sm:$0xff] }
 0xd12   :  { %v2024_v42 = vsel %vm1892_vm12, %v9177_v62, 0.0  ;;  %v2055_v26 = vmul.f32 %v9177_v62, %v9177_v62 }
 0xd13   :  { %2025 = vadd.xlane.f32.xlu2 %v2024_v42  ;;  %v2013_v45 = vpop.f32.mrf.mxu3 }
 0xd14   :  { %v2017_v38 = vadd.f32 %v2013_v45, %v1956_v41  ;;  %v2057_v52 = vsel %vm1892_vm12, %v2055_v26, 0.0  ;;  %v2139_v45 = vld [vmem:[#allocation2 + $0x278] sm:$0xff]  ;;  %v2264_v26 = vld [vmem:[#allocation2 + $0x2d0] sm:$0xf] }
 0xd16   :  { %v2021_v53 = vadd.f32 %v8641_v58, %v2017_v38  ;;  %v2138_v58 = vld [vmem:[#allocation2 + $0x270] sm:$0xff] }
 0xd18   :  { %v9181_v44 = vmax.f32 %v2021_v53, 0.0 }
 0xd1a   :  { %v2027_v46 = vsel %vm1892_vm12, %v9181_v44, 0.0  ;;  %v2056_v50 = vmul.f32 %v9181_v44, %v9181_v44 }
 0xd1b   :  { %2028 = vadd.xlane.f32.xlu1 %v2027_v46  ;;  %v2143_v46 = vld [vmem:[#allocation2 + $0x288] sm:$0xff] }
 0xd1c   :  { %v2060_v51 = vsel %vm1892_vm12, %v2056_v50, 0.0 }
 0xd1d   :  { %2061 = vadd.xlane.f32.xlu0 %v2060_v51 }
 0xd23   :  { %2058 = vadd.xlane.f32.xlu1 %v2057_v52  ;;  %v2172_v52 = vld [vmem:[#allocation2 + $0x290] sm:$0xff] }
 0xd86   :  { %v2026_v55 = vpop.xlane.xlu2 %2025 }
 0xd8e   :  { %v2029_v54 = vpop.xlane.xlu1 %2028 }
 0xd8f   :  { %2044 = vmatpush.msra.mxu1 %v2029_v54  ;;  %v2263_v54 = vld [vmem:[#allocation2 + $0x2c8] sm:$0xff] }
 0xd90   :  { %v2062_v56 = vpop.xlane.xlu0 %2061 }
 0xd91   :  { %2045 = vmatpush.msra.mxu1 %v2026_v55  ;;  %2077 = vmatpush.msrb.mxu0 %v2062_v56  ;;  %v2262_v55 = vld [vmem:[#allocation2 + $0x2c0] sm:$0xff] }
 0xd92   :  { %8231 = vmatmul.msk.f32.vlgmr.msra.gmra.mxu1 %vm1572_vm4, %v9121_v22 }
 0xd93   :  { %8240 = vmatpush.msk.msrb.mxu1 %vm1899_vm11, %v2148_v36  ;;  %v2516_v36 = vld [vmem:[#allocation2 + $0x350] sm:$0xff] }
 0xd95   :  { %2230 = vmatpush.msrb.mxu1 %v2147_v37 }
 0xd96   :  { %v2059_v1 = vpop.xlane.xlu1 %2058 }
 0xd97   :  { %2078 = vmatpush.msrb.mxu0 %v2059_v1  ;;  %2231 = vmatpush.msrb.mxu1 %v2146_v39 }
 0xd98   :  { %8233 = vmatmul.msk.f32.vlgmr.msrb.gmra.mxu0 %vm1572_vm4, %v9121_v22 }
 0xd9a   :  { %8232 = vmatmul.msk.f32.gmra.mxu1 %vm1572_vm4, %v9125_v0 }
 0xda0   :  { %8234 = vmatmul.msk.f32.gmra.mxu0 %vm1572_vm4, %v9125_v0 }
 0xe0f   :  { %v2047_v2 = vpop.f32.mrf.mxu1 }
 0xe10   :  { %v2053_v3 = vmul.f32 0.00625, %v2047_v2 }
 0xe12   :  { %2090 = vperm.xlu0 %8626, %v2053_v3   ;;  %v2100_v4 = vmul.f32 %v2053_v3, %v2053_v3 }
 0xe15   :  { %v2080_v5 = vpop.f32.mrf.mxu0 }
 0xe16   :  { %v2086_v6 = vmul.f32 0.00625, %v2080_v5  ;;  %v2306_v5 = vld [vmem:[#allocation2 + $0x300] sm:$0xff] }
 0xe17   :  { %v2050_v7 = vpop.f32.mrf.mxu1 }
 0xe18   :  { %v2102_v8 = vsub.f32 %v2086_v6, %v2100_v4  ;;  %v2054_v9 = vmul.f32 0.00625, %v2050_v7  ;;  %v2307_v4 = vld [vmem:[#allocation2 + $0x308] sm:$0xf]  ;;  %v2305_v6 = vld [vmem:[#allocation2 + $0x2f8] sm:$0xff] }
 0xe1a   :  { %v2104_v10 = vadd.f32 1e-05, %v2102_v8  ;;  %2095 = vperm.xlu2 %8624, %v2054_v9   ;;  %v2101_v11 = vmul.f32 %v2054_v9, %v2054_v9 }
 0xe1c   :  { %8696 = vrsqrt.f32 %v2104_v10  ;;  %vm2112_vm14 = vweird.f32 %v2104_v10 }
 0xe1d   :  { %v2083_v22 = vpop.f32.mrf.mxu0 }
 0xe1e   :  { %v2087_v12 = vmul.f32 0.00625, %v2083_v22 }
 0xe20   :  { %v2103_v13 = vsub.f32 %v2087_v12, %v2101_v11  ;;  %v8642_v11 = vld [vmem:[#allocation2 + $0x2d8] ss:$0 sm:$0xff] }
 0xe22   :  { %v8697_v14 = vpop.eup %8696  ;;  %v2105_v30 = vadd.f32 1e-05, %v2103_v13 }
 0xe23   :  { %v2107_v15 = vmul.f32 %v8697_v14, %v2104_v10  ;;  %vm2113_vm13 = vweird.f32 %v8697_v14 }
 0xe24   :  { %8698 = vrsqrt.f32 %v2105_v30  ;;  %vm2114_vm15 = vmor %vm2112_vm14, %vm2113_vm13  ;;  %vm2122_vm6 = vweird.f32 %v2105_v30  ;;  %vm2909_vm14 = vcmask 326656  }
 0xe25   :  { %v2108_v0 = vmul.f32 %v8697_v14, %v2107_v15 }
 0xe27   :  { %v2109_v17 = vmul.f32 0.5, %v2108_v0 }
 0xe29   :  { %v2110_v20 = vsub.f32 1.5, %v2109_v17 }
 0xe2a   :  { %v8699_v21 = vpop.eup %8698 }
 0xe2b   :  { %v2117_v24 = vmul.f32 %v8699_v21, %v2105_v30  ;;  %v2111_v33 = vmul.f32 %v8697_v14, %v2110_v20  ;;  %vm2123_vm5 = vweird.f32 %v8699_v21 }
 0xe2c   :  { %vm2124_vm7 = vmor %vm2122_vm6, %vm2123_vm5 }
 0xe2d   :  { %v2115_v27 = vsel %vm2114_vm15, %v8697_v14, %v2111_v33  ;;  %v2118_v34 = vmul.f32 %v8699_v21, %v2117_v24  ;;  %v2333_v24 = vld [vmem:[#allocation2 + $0x2f0] sm:$0xf]  ;;  %v2423_v33 = vld [vmem:[#allocation2 + $0x320] sm:$0xf] }
 0xe2e   :  { %2128 = vperm.xlu0 %8626, %v2115_v27   ;;  %v2332_v27 = vld [vmem:[#allocation2 + $0x2e8] sm:$0xff]  ;;  %8250 = vmatpush.msk.msra.mxu1 %vm1899_vm11, %v2333_v24 }
 0xe2f   :  { %v2119_v28 = vmul.f32 0.5, %v2118_v34  ;;  %v2422_v34 = vld [vmem:[#allocation2 + $0x318] sm:$0xff] }
 0xe30   :  { %2357 = vmatpush.msra.mxu1 %v2332_v27 }
 0xe31   :  { %v2120_v29 = vsub.f32 1.5, %v2119_v28  ;;  %v2421_v28 = vld [vmem:[#allocation2 + $0x310] sm:$0xff] }
 0xe33   :  { %v2121_v31 = vmul.f32 %v8699_v21, %v2120_v29 }
 0xe35   :  { %v2125_v35 = vsel %vm2124_vm7, %v8699_v21, %v2121_v31  ;;  %vm3506_vm7 = vcmask 322560  }
 0xe36   :  { %2133 = vperm.xlu1 %8625, %v2125_v35   ;;  %v2517_v35 = vld [vmem:[#allocation2 + $0x358] sm:$0xf] }
 0xe74   :  { %v2096_v63 = vpop.permute.xlu2 %2095 }
 0xe75   :  { %v2099_v42 = vsub.f32 %v9181_v44, %v2096_v63  ;;  %v2173_v44 = vld [vmem:[#allocation2 + $0x298] sm:$0xff] }
 0xe84   :  { %v2091_v40 = vpop.permute.xlu0 %2090 }
 0xe85   :  { %v2098_v57 = vsub.f32 %v9177_v62, %v2091_v40  ;;  %v2174_v62 = vld [vmem:[#allocation2 + $0x2a0] sm:$0xf] }
 0xe86   :  { %8237 = vmatpush.msk.msrb.mxu3 %vm1899_vm11, %v2174_v62  ;;  %v2515_v62 = vld [vmem:[#allocation2 + $0x348] sm:$0xff] }
 0xe88   :  { %2198 = vmatpush.msrb.mxu3 %v2173_v44  ;;  %v2491_v44 = vld [vmem:[#allocation2 + $0x340] sm:$0xf] }
 0xe8a   :  { %2199 = vmatpush.msrb.mxu3 %v2172_v52  ;;  %v2489_v52 = vld [vmem:[#allocation2 + $0x330] sm:$0xff] }
 0xea0   :  { %v2129_v59 = vpop.permute.xlu0 %2128 }
 0xea1   :  { %v2136_v61 = vmul.f32 %v2129_v59, %v2098_v57 }
 0xea3   :  { %v2140_v25 = vmul.f32 %v2138_v58, %v2136_v61  ;;  %v8643_v61 = vld [vmem:[#allocation2 + $0x328] ss:$0 sm:$0xff] }
 0xea5   :  { %v2144_v41 = vadd.f32 %v2142_v23, %v2140_v25 }
 0xea7   :  { %8241 = vmatmul.msk.f32.vlgmr.msrb.gmra.mxu1 %vm1892_vm12, %v2144_v41 }
 0xea8   :  { %v2134_v38 = vpop.permute.xlu1 %2133 }
 0xea9   :  { %v2137_v53 = vmul.f32 %v2134_v38, %v2099_v42 }
 0xeab   :  { %v2141_v50 = vmul.f32 %v2139_v45, %v2137_v53  ;;  %v2465_v53 = vld [vmem:[#allocation2 + $0x1228] sm:$0xff] }
 0xead   :  { %v2145_v51 = vadd.f32 %v2143_v46, %v2141_v50  ;;  %v2464_v46 = vld [vmem:[#allocation2 + $0x1220] sm:$0xff]  ;;  %v2574_v50 = vld [vmem:[#allocation2 + $0x370] sm:$0x3] }
 0xeaf   :  { %2163 = vmatpush.msrb.mxu2 %v2145_v51  ;;  %8242 = vmatmul.msk.f32.gmra.mxu1 %vm1892_vm12, %v2145_v51 }
 0xeb0   :  { %2253 = vmatpush.msra.mxu0 %v2145_v51  ;;  %v2573_v51 = vld [vmem:[#allocation2 + $0x368] sm:$0xff] }
 0xeb1   :  { %2164 = vmatpush.msrb.mxu2 %v2144_v41 }
 0xeb2   :  { %2254 = vmatpush.msra.mxu0 %v2144_v41  ;;  %8235 = vmatmul.msk.f32.vlgmr.msrb.gmra.mxu2 %vm1572_vm4, %v9136_v48 }
 0xeb3   :  { %8243 = vmatmul.msk.f32.vlgmr.msra.gmra.mxu0 %vm1572_vm4, %v9138_v47  ;;  %8245 = vmatpush.msk.msra.mxu2 %vm1899_vm11, %v2264_v26  ;;  %v2490_v26 = vld [vmem:[#allocation2 + $0x338] sm:$0xff] }
 0xeb4   :  { %8253 = vmatpush.msk.msrb.mxu0 %vm1899_vm11, %v2307_v4 }
 0xeb5   :  { %2288 = vmatpush.msra.mxu2 %v2263_v54  ;;  %v2603_v54 = vld [vmem:[#allocation2 + $0x390] sm:$0xf] }
 0xeb6   :  { %2389 = vmatpush.msrb.mxu0 %v2306_v5 }
 0xeb7   :  { %2289 = vmatpush.msra.mxu2 %v2262_v55  ;;  %v2602_v55 = vld [vmem:[#allocation2 + $0x388] sm:$0xff] }
 0xeb8   :  { %2390 = vmatpush.msrb.mxu0 %v2305_v6 }
 0xeba   :  { %8236 = vmatmul.msk.f32.gmra.mxu2 %vm1572_vm4, %v9145_v43 }
 0xebb   :  { %8244 = vmatmul.msk.f32.gmra.mxu0 %vm1572_vm4, %v9147_v49 }
 0xf24   :  { %v2233_v7 = vpop.f32.mrf.mxu1 }
 0xf2c   :  { %v2236_v13 = vpop.f32.mrf.mxu1 }
 0xf30   :  { %v2256_v56 = vpop.f32.mrf.mxu0 }
 0xf31   :  { %8246 = vmatmul.msk.f32.vlgmr.msra.gmra.mxu2 %vm1892_vm12, %v2256_v56  ;;  %v2601_v56 = vld [vmem:[#allocation2 + $0x380] sm:$0xff] }
 0xf35   :  { %v2166_v1 = vpop.f32.mrf.mxu2 }
 0xf36   :  { %8238 = vmatmul.msk.f32.vlgmr.msrb.gmra.mxu3 %vm1892_vm12, %v2166_v1 }
 0xf38   :  { %v2259_v2 = vpop.f32.mrf.mxu0 }
 0xf39   :  { %8247 = vmatmul.msk.f32.gmra.mxu2 %vm1892_vm12, %v2259_v2 }
 0xf3d   :  { %v2169_v3 = vpop.f32.mrf.mxu2 }
 0xf3e   :  { %8239 = vmatmul.msk.f32.gmra.mxu3 %vm1892_vm12, %v2169_v3 }
 0xfb4   :  { %v2291_v8 = vpop.f32.mrf.mxu2 }
 0xfb9   :  { %v2201_v9 = vpop.f32.mrf.mxu3 }
 0xfba   :  { %v2234_v10 = vadd.f32 %v2233_v7, %v2201_v9  ;;  %v8645_v7 = vld [vmem:[#allocation2 + $0x398] ss:$0 sm:$0xff] }
 0xfbc   :  { %v2297_v22 = vadd.f32 %v2291_v8, %v2234_v10  ;;  %v2294_v15 = vpop.f32.mrf.mxu2  ;;  %v61_v10 = vld [vmem:[#allocation2 + $0x1138] sm:$0xff] }
 0xfbe   :  { %v2301_v12 = vadd.f32 %v8642_v11, %v2297_v22 }
 0xfc0   :  { %v2303_v14 = vmax.f32 %v2301_v12, 0.0  ;;  %v8646_v12 = vld [vmem:[#allocation2 + $0x360] ss:$0 sm:$0xff] }
 0xfc1   :  { %v2204_v30 = vpop.f32.mrf.mxu3 }
 0xfc2   :  { %v2237_v0 = vadd.f32 %v2236_v13, %v2204_v30  ;;  %8254 = vmatmul.msk.f32.vlgmr.msrb.gmra.mxu0 %vm1892_vm12, %v2303_v14 }
 0xfc4   :  { %v2298_v17 = vadd.f32 %v2294_v15, %v2237_v0 }
 0xfc6   :  { %v2302_v20 = vadd.f32 %v8642_v11, %v2298_v17 }
 0xfc8   :  { %v2304_v21 = vmax.f32 %v2302_v20, 0.0  ;;  %v9258_v20 = vld [vmem:[#allocation2 + $0x1130] sm:$0xff] }
 0xfca   :  { %2322 = vmatpush.msra.mxu3 %v2304_v21  ;;  %8255 = vmatmul.msk.f32.gmra.mxu0 %vm1892_vm12, %v2304_v21 }
 0xfcb   :  { %2412 = vmatpush.msrb.mxu2 %v2304_v21 }
 0xfcc   :  { %2323 = vmatpush.msra.mxu3 %v2303_v14 }
 0xfcd   :  { %2413 = vmatpush.msrb.mxu2 %v2303_v14  ;;  %8248 = vmatmul.msk.f32.vlgmr.msra.gmra.mxu3 %vm1572_vm4, %v9136_v48  ;;  %v2331_v48 = vld [vmem:[#allocation2 + $0x2e0] sm:$0xff] }
 0xfce   :  { %8256 = vmatmul.msk.f32.vlgmr.msrb.gmra.mxu2 %vm1572_vm4, %v9138_v47  ;;  %8258 = vmatpush.msk.msrb.mxu3 %vm1899_vm11, %v2423_v33 }
 0xfcf   :  { %2358 = vmatpush.msra.mxu1 %v2331_v48  ;;  %8263 = vmatpush.msk.msra.mxu2 %vm1899_vm11, %v2517_v35 }
 0xfd0   :  { %2447 = vmatpush.msrb.mxu3 %v2422_v34 }
 0xfd1   :  { %2538 = vmatpush.msra.mxu2 %v2516_v36 }
 0xfd2   :  { %2448 = vmatpush.msrb.mxu3 %v2421_v28 }
 0xfd3   :  { %2539 = vmatpush.msra.mxu2 %v2515_v62  ;;  %v2768_v62 = vld [vmem:[#allocation2 + $0x3b8] sm:$0xff] }
 0xfd5   :  { %8249 = vmatmul.msk.f32.gmra.mxu3 %vm1572_vm4, %v9145_v43  ;;  %8269 = vmatpush.msk.msrb.mxu2 %vm1899_vm11, %v2603_v54  ;;  %v2845_v54 = vld [vmem:[#allocation2 + $0x3e0] sm:$0xff] }
 0xfd6   :  { %8257 = vmatmul.msk.f32.gmra.mxu2 %vm1572_vm4, %v9147_v49 }
 0xfd7   :  { %2626 = vmatpush.msrb.mxu2 %v2602_v55 }
 0xfd9   :  { %2627 = vmatpush.msrb.mxu2 %v2601_v56 }
0x103f   :  { %v2392_v37 = vpop.f32.mrf.mxu0 }
0x1047   :  { %v2395_v58 = vpop.f32.mrf.mxu0 }
0x1050   :  { %v2325_v47 = vpop.f32.mrf.mxu3 }
0x1051   :  { %v2415_v29 = vpop.f32.mrf.mxu2  ;;  %8251 = vmatmul.msk.f32.vlgmr.msra.gmra.mxu1 %vm1892_vm12, %v2325_v47 }
0x1052   :  { %8259 = vmatmul.msk.f32.vlgmr.msrb.gmra.mxu3 %vm1892_vm12, %v2415_v29 }
0x1058   :  { %v2328_v43 = vpop.f32.mrf.mxu3 }
0x1059   :  { %v2418_v49 = vpop.f32.mrf.mxu2  ;;  %8252 = vmatmul.msk.f32.gmra.mxu1 %vm1892_vm12, %v2328_v43 }
0x105a   :  { %8260 = vmatmul.msk.f32.gmra.mxu3 %vm1892_vm12, %v2418_v49 }
0x10ce   :  { %v2360_v31 = vpop.f32.mrf.mxu1 }
0x10cf   :  { %v2393_v57 = vadd.f32 %v2392_v37, %v2360_v31 }
0x10d5   :  { %v2450_v39 = vpop.f32.mrf.mxu3 }
0x10d6   :  { %v2363_v40 = vpop.f32.mrf.mxu1  ;;  %v2456_v59 = vadd.f32 %v2450_v39, %v2393_v57  ;;  %v2742_v57 = vld [vmem:[#allocation2 + $0x3d0] sm:$0xff] }
0x10d7   :  { %v2396_v23 = vadd.f32 %v2395_v58, %v2363_v40  ;;  %v2743_v40 = vld [vmem:[#allocation2 + $0x3d8] sm:$0xf]  ;;  %v2741_v58 = vld [vmem:[#allocation2 + $0x3c8] sm:$0xff] }
0x10d8   :  { %v2460_v41 = vadd.f32 %v8643_v61, %v2456_v59 }
0x10da   :  { %v9240_v38 = vmax.f32 %v2460_v41, 0.0  ;;  %v2739_v41 = vld [vmem:[#allocation2 + $0x3a8] sm:$0xff] }
0x10dd   :  { %v2453_v25 = vpop.f32.mrf.mxu3 }
0x10de   :  { %v2457_v63 = vadd.f32 %v2453_v25, %v2396_v23  ;;  %v2737_v23 = vld [vmem:[#allocation2 + $0x3a0] sm:$0xff] }
0x10e0   :  { %v2461_v42 = vadd.f32 %v8643_v61, %v2457_v63 }
0x10e2   :  { %v9236_v45 = vmax.f32 %v2461_v42, 0.0 }
0x10e4   :  { %2483 = vmatpush.msrb.mxu1 %v9236_v45  ;;  %2509 = vmatpush.msra.mxu0 %v9236_v45 }
0x10e6   :  { %2484 = vmatpush.msrb.mxu1 %v9240_v38  ;;  %2510 = vmatpush.msra.mxu0 %v9240_v38 }
0x10e7   :  { %8262 = vmatmul.msk.f32.vlgmr.msra.gmra.mxu0 %vm1572_vm4, %v2465_v53  ;;  %8261 = vmatmul.msk.f32.vlgmr.msrb.gmra.mxu1 %vm1572_vm4, %v2464_v46  ;;  %v9265_v46 = vld [vmem:[#allocation2 + $0x1120] sm:$0xff] }
0x10e8   :  { %8267 = vmatpush.msk.msrb.mxu0 %vm75_vm0, %v2574_v50  ;;  %8265 = vmatpush.msk.msra.mxu1 %vm1899_vm11, %v2491_v44  ;;  %v9267_v50 = vld [vmem:[#allocation2 + $0x1128] sm:$0xff]  ;;  %v2847_v44 = vld [vmem:[#allocation2 + $0x3f0] sm:$0xf] }
0x10ea   :  { %2595 = vmatpush.msrb.mxu0 %v2573_v51  ;;  %2564 = vmatpush.msra.mxu1 %v2490_v26  ;;  %v2769_v51 = vld [vmem:[#allocation2 + $0x3c0] sm:$0xf]  ;;  %v2767_v26 = vld [vmem:[#allocation2 + $0x3b0] sm:$0xff] }
0x10ec   :  { %2565 = vmatpush.msra.mxu1 %v2489_v52  ;;  %v2846_v52 = vld [vmem:[#allocation2 + $0x3e8] sm:$0xff] }
0x10ef   :  { %8268 = vmatmul.msk.f32.vlgmr.msrb.gmra.mxu0 %vm71_vm1, %v9065_v60  ;;  %v8644_v60 = vld [vmem:[#allocation2 + $0x378] ss:$0 sm:$0xff] }
0x1164   :  { %v2512_v1 = vpop.f32.mrf.mxu0  ;;  %v2486_v2 = vpop.f32.mrf.mxu1 }
0x1165   :  { %8264 = vmatmul.msk.f32.vlgmr.msra.gmra.mxu2 %vm1892_vm12, %v2512_v1  ;;  %8266 = vmatmul.msk.f32.vlgmr.msra.gmra.mxu1 %vm1892_vm12, %v2486_v2  ;;  %v2883_v1 = vld [vmem:[#allocation2 + $0x448] sm:$0xff]  ;;  %v2882_v2 = vld [vmem:[#allocation2 + $0x440] sm:$0xff] }
0x116c   :  { %v2597_v3 = vpop.f32.mrf.mxu0 }
0x116d   :  { %v2598_v4 = vadd.f32 %v8644_v60, %v2597_v3  ;;  %v2881_v60 = vld [vmem:[#allocation2 + $0x438] sm:$0xff]  ;;  %v2880_v3 = vld [vmem:[#allocation2 + $0x430] sm:$0xff] }
0x116f   :  { %v2600_v5 = vmax.f32 %v2598_v4, 0.0  ;;  %v2879_v4 = vld [vmem:[#allocation2 + $0x428] sm:$0xff] }
0x1171   :  { %8270 = vmatmul.msk.f32.vlgmr.msrb.gmra.mxu2 %vm1892_vm12, %v2600_v5 }
0x11e2   :  { %v2567_v11 = vpop.f32.mrf.mxu1 }
0x11e8   :  { %v2541_v6 = vpop.f32.mrf.mxu2 }
0x11e9   :  { %v2568_v22 = vadd.f32 %v2567_v11, %v2541_v6 }
0x11eb   :  { %v2572_v13 = vadd.f32 %v8646_v12, %v2568_v22  ;;  %v2908_v12 = vld [vmem:[#allocation2 + $0x420] sm:$0xff] }
0x11f4   :  { %v2629_v8 = vpop.f32.mrf.mxu2 }
0x11f5   :  { %v2630_v9 = vadd.f32 %v8645_v7, %v2629_v8 }
0x11f7   :  { %8271 = vmatpush.msk.msra.mxu3 %vm75_vm0, %v2630_v9  ;;  %v8647_v9 = vld [vmem:[#allocation2 + $0x3f8] ss:$0 sm:$0xff] }
0x11f8   :  { %8272 = vmatmul.msk.f32.vlgmr.msra.gmra.mxu3 %vm106_vm2, %v61_v10 }
0x11f9   :  { %8276 = vmatpush.msk.msrb.mxu3 %vm1899_vm11, %v2769_v51 }
0x11fb   :  { %2790 = vmatpush.msrb.mxu3 %v2768_v62 }
0x11fd   :  { %2791 = vmatpush.msrb.mxu3 %v2767_v26 }
0x127b   :  { %v2655_v14 = vpop.f32.mrf.mxu3 }
0x127c   :  { %v2658_v30 = vadd.f32 %v2655_v14, %v2572_v13  ;;  %v2907_v13 = vld [vmem:[#allocation2 + $0x418] sm:$0xff]  ;;  %v2906_v14 = vld [vmem:[#allocation2 + $0x410] sm:$0xff] }
0x127e   :  { %v2659_v15 = vsel %vm1892_vm12, %v2658_v30, 0.0  ;;  %v2687_v0 = vmul.f32 %v2658_v30, %v2658_v30 }
0x127f   :  { %2660 = vadd.xlane.f32.xlu2 %v2659_v15  ;;  %v2904_v15 = vld [vmem:[#allocation2 + $0x400] sm:$0xff] }
0x1280   :  { %v2688_v17 = vsel %vm1892_vm12, %v2687_v0, 0.0  ;;  %v2980_v0 = vld [vmem:[#allocation2 + $0x470] sm:$0xff] }
0x1281   :  { %2689 = vadd.xlane.f32.xlu1 %v2688_v17  ;;  %v2979_v17 = vld [vmem:[#allocation2 + $0x468] sm:$0xff] }
0x12f2   :  { %v2661_v21 = vpop.xlane.xlu2 %2660 }
0x12f3   :  { %2681 = vmatpush.msrb.mxu1 %v2661_v21  ;;  %v2978_v21 = vld [vmem:[#allocation2 + $0x460] sm:$0xff] }
0x12f4   :  { %v2690_v24 = vpop.xlane.xlu1 %2689  ;;  %8273 = vmatmul.msk.f32.vlgmr.msrb.gmra.mxu1 %vm2662_vm8, %v9258_v20 }
0x12f5   :  { %2706 = vmatpush.msra.mxu0 %v2690_v24  ;;  %8278 = vmatpush.msk.msra.mxu1 %vm1899_vm11, %v2743_v40  ;;  %v2977_v24 = vld [vmem:[#allocation2 + $0x458] sm:$0xff] }
0x12f6   :  { %8274 = vmatmul.msk.f32.vlgmr.msra.gmra.mxu0 %vm2662_vm8, %v9258_v20 }
0x12f7   :  { %2816 = vmatpush.msra.mxu1 %v2742_v57 }
0x12f9   :  { %2817 = vmatpush.msra.mxu1 %v2741_v58  ;;  %v3091_v58 = vld [vmem:[#allocation2 + $0x4d8] sm:$0xff] }
0x1371   :  { %v2683_v33 = vpop.f32.mrf.mxu1 }
0x1372   :  { %v2686_v27 = vmul.f32 0.0125, %v2683_v33  ;;  %v2976_v33 = vld [vmem:[#allocation2 + $0x450] sm:$0xff] }
0x1373   :  { %v2708_v34 = vpop.f32.mrf.mxu0 }
0x1374   :  { %v2718_v48 = vmul.f32 %v2686_v27, %v2686_v27  ;;  %v2711_v28 = vmul.f32 0.0125, %v2708_v34  ;;  %2714 = vperm.xlu0 %8626, %v2686_v27  }
0x1376   :  { %v2719_v47 = vsub.f32 %v2711_v28, %v2718_v48 }
0x1378   :  { %v2720_v29 = vadd.f32 1e-05, %v2719_v47 }
0x137a   :  { %8700 = vrsqrt.f32 %v2720_v29  ;;  %vm2727_vm10 = vweird.f32 %v2720_v29 }
0x1380   :  { %v8701_v43 = vpop.eup %8700 }
0x1381   :  { %v2722_v49 = vmul.f32 %v8701_v43, %v2720_v29  ;;  %vm2728_vm9 = vweird.f32 %v8701_v43  ;;  %v8648_v29 = vld [vmem:[#allocation2 + $0x478] ss:$0 sm:$0xff] }
0x1382   :  { %vm2729_vm13 = vmor %vm2727_vm10, %vm2728_vm9  ;;  %vm3510_vm9 = vcmask 31744  }
0x1383   :  { %v2723_v31 = vmul.f32 %v8701_v43, %v2722_v49 }
0x1385   :  { %v2724_v35 = vmul.f32 0.5, %v2723_v31 }
0x1387   :  { %v2725_v36 = vsub.f32 1.5, %v2724_v35 }
0x1389   :  { %v2726_v37 = vmul.f32 %v8701_v43, %v2725_v36 }
0x138b   :  { %v2730_v39 = vsel %vm2729_vm13, %v8701_v43, %v2726_v37 }
0x138c   :  { %2733 = vperm.xlu0 %8626, %v2730_v39  }
0x13e6   :  { %v2715_v59 = vpop.permute.xlu0 %2714 }
0x13e7   :  { %v2717_v61 = vsub.f32 %v2658_v30, %v2715_v59  ;;  %v2905_v30 = vld [vmem:[#allocation2 + $0x408] sm:$0xff] }
0x13fe   :  { %v2734_v25 = vpop.permute.xlu0 %2733 }
0x13ff   :  { %v2736_v63 = vmul.f32 %v2734_v25, %v2717_v61 }
0x1401   :  { %v2738_v42 = vmul.f32 %v2737_v23, %v2736_v63 }
0x1403   :  { %v2740_v53 = vadd.f32 %v2739_v41, %v2738_v42 }
0x1405   :  { %2762 = vmatpush.msra.mxu2 %v2740_v53  ;;  %8279 = vmatmul.msk.f32.vlgmr.msra.gmra.mxu1 %vm1892_vm12, %v2740_v53 }
0x1406   :  { %2840 = vmatpush.msrb.mxu0 %v2740_v53  ;;  %8275 = vmatmul.msk.f32.vlgmr.msra.gmra.mxu2 %vm2662_vm8, %v9265_v46 }
0x1407   :  { %8280 = vmatmul.msk.f32.vlgmr.msrb.gmra.mxu0 %vm2662_vm8, %v9267_v50  ;;  %8281 = vmatpush.msk.msrb.mxu2 %vm1899_vm11, %v2847_v44 }
0x1408   :  { %2947 = vmatpush.msra.mxu0 %v2883_v1  ;;  %v3087_v1 = vld [vmem:[#allocation2 + $0x4b8] sm:$0xff] }
0x1409   :  { %2868 = vmatpush.msrb.mxu2 %v2846_v52 }
0x140a   :  { %2948 = vmatpush.msra.mxu0 %v2882_v2  ;;  %v3116_v2 = vld [vmem:[#allocation2 + $0x4b0] sm:$0xff] }
0x140b   :  { %2869 = vmatpush.msrb.mxu2 %v2845_v54  ;;  %v3090_v54 = vld [vmem:[#allocation2 + $0x4d0] sm:$0xff] }
0x140c   :  { %2949 = vmatpush.msra.mxu0 %v2881_v60 }
0x140e   :  { %2950 = vmatpush.msra.mxu0 %v2880_v3 }
0x1410   :  { %2951 = vmatpush.msra.mxu0 %v2879_v4  ;;  %v3083_v4 = vld [vmem:[#allocation2 + $0x480] sm:$0xff] }
0x1482   :  { %v2819_v5 = vpop.f32.mrf.mxu1 }
0x1484   :  { %v2842_v55 = vpop.f32.mrf.mxu0 }
0x1485   :  { %8282 = vmatmul.msk.f32.vlgmr.msrb.gmra.mxu2 %vm1892_vm12, %v2842_v55  ;;  %v3089_v55 = vld [vmem:[#allocation2 + $0x4c8] sm:$0xff] }
0x1489   :  { %v2764_v56 = vpop.f32.mrf.mxu2 }
0x148a   :  { %8277 = vmatmul.msk.f32.vlgmr.msrb.gmra.mxu3 %vm1892_vm12, %v2764_v56  ;;  %v3088_v56 = vld [vmem:[#allocation2 + $0x4c0] sm:$0xff] }
0x1508   :  { %v2871_v7 = vpop.f32.mrf.mxu2 }
0x150d   :  { %v2793_v6 = vpop.f32.mrf.mxu3 }
0x150e   :  { %v2820_v8 = vadd.f32 %v2819_v5, %v2793_v6 }
0x1510   :  { %v2874_v10 = vadd.f32 %v2871_v7, %v2820_v8  ;;  %v3085_v7 = vld [vmem:[#allocation2 + $0x488] sm:$0xff] }
0x1512   :  { %v2877_v11 = vadd.f32 %v8647_v9, %v2874_v10  ;;  %v3115_v10 = vld [vmem:[#allocation2 + $0x4a8] sm:$0xff] }
0x1514   :  { %v2878_v22 = vmax.f32 %v2877_v11, 0.0  ;;  %v3187_v11 = vld [vmem:[#allocation2 + $0x500] sm:$0xff] }
0x1516   :  { %2899 = vmatpush.msra.mxu3 %v2878_v22  ;;  %8285 = vmatmul.msk.f32.vlgmr.msra.gmra.mxu0 %vm2909_vm14, %v2878_v22 }
0x1517   :  { %2971 = vmatpush.msra.mxu2 %v2878_v22  ;;  %8283 = vmatmul.msk.f32.vlgmr.msra.gmra.mxu3 %vm2662_vm8, %v9265_v46  ;;  %v3114_v22 = vld [vmem:[#allocation2 + $0x4a0] sm:$0xff] }
0x1518   :  { %8286 = vmatmul.msk.f32.vlgmr.msra.gmra.mxu2 %vm2662_vm8, %v9267_v50  ;;  %2924 = vmatpush.msrb.mxu3 %v2908_v12  ;;  %v3186_v12 = vld [vmem:[#allocation2 + $0x4f8] sm:$0xff] }
0x151a   :  { %2925 = vmatpush.msrb.mxu3 %v2907_v13  ;;  %v3113_v13 = vld [vmem:[#allocation2 + $0x498] sm:$0xff] }
0x151c   :  { %2926 = vmatpush.msrb.mxu3 %v2906_v14  ;;  %v3185_v14 = vld [vmem:[#allocation2 + $0x4f0] sm:$0xff] }
0x151e   :  { %2927 = vmatpush.msrb.mxu3 %v2905_v30  ;;  %v3112_v30 = vld [vmem:[#allocation2 + $0x490] sm:$0xff] }
0x1520   :  { %2928 = vmatpush.msrb.mxu3 %v2904_v15  ;;  %v3184_v15 = vld [vmem:[#allocation2 + $0x4e8] sm:$0xff] }
0x1522   :  { %2995 = vmatpush.msra.mxu3 %v2980_v0  ;;  %v3183_v0 = vld [vmem:[#allocation2 + $0x4e0] sm:$0xff] }
0x1524   :  { %2996 = vmatpush.msra.mxu3 %v2979_v17 }
0x1526   :  { %2997 = vmatpush.msra.mxu3 %v2978_v21 }
0x1528   :  { %2998 = vmatpush.msra.mxu3 %v2977_v24  ;;  %v3220_v24 = vld [vmem:[#allocation2 + $0x558] sm:$0xff] }
0x152a   :  { %2999 = vmatpush.msra.mxu3 %v2976_v33  ;;  %v3219_v33 = vld [vmem:[#allocation2 + $0x550] sm:$0xff] }
0x1593   :  { %v2953_v28 = vpop.f32.mrf.mxu0 }
0x159a   :  { %v2901_v27 = vpop.f32.mrf.mxu3 }
0x159b   :  { %8284 = vmatmul.msk.f32.vlgmr.msrb.gmra.mxu3 %vm2909_vm14, %v2901_v27  ;;  %v2973_v34 = vpop.f32.mrf.mxu2  ;;  %v3218_v27 = vld [vmem:[#allocation2 + $0x548] sm:$0xff] }
0x159c   :  { %3131 = vmatpush.msrb.mxu3 %v3116_v2 }
0x159e   :  { %3132 = vmatpush.msrb.mxu3 %v3115_v10  ;;  %v3370_v10 = vld [vmem:[#allocation2 + $0x590] sm:$0xff] }
0x15a0   :  { %3133 = vmatpush.msrb.mxu3 %v3114_v22 }
0x15a2   :  { %3134 = vmatpush.msrb.mxu3 %v3113_v13 }
0x15a3   :  { %8287 = vmatmul.msk.f32.vlgmr.msra.gmra.mxu3 %vm2909_vm14, %v2973_v34  ;;  %v3217_v34 = vld [vmem:[#allocation2 + $0x540] sm:$0xff] }
0x15a4   :  { %3135 = vmatpush.msrb.mxu3 %v3112_v30  ;;  %v60_v30 = vld [vmem:[#allocation2 + $0x1118] sm:$0xf] }
0x161e   :  { %v2930_v48 = vpop.f32.mrf.mxu3 }
0x161f   :  { %v2954_v47 = vadd.f32 %v2953_v28, %v2930_v48  ;;  %v3216_v48 = vld [vmem:[#allocation2 + $0x538] sm:$0xff]  ;;  %v3245_v28 = vld [vmem:[#allocation2 + $0x530] sm:$0xff] }
0x1626   :  { %v3001_v43 = vpop.f32.mrf.mxu3 }
0x1627   :  { %v3004_v49 = vadd.f32 %v3001_v43, %v2954_v47 }
0x1629   :  { %v3007_v31 = vadd.f32 %v8648_v29, %v3004_v49 }
0x162b   :  { %v3008_v35 = vmax.f32 %v3007_v31, 0.0  ;;  %v8649_v31 = vld [vmem:[#allocation2 + $0x508] ss:$0 sm:$0xff] }
0x162d   :  { %v3009_v36 = vsel %vm2909_vm14, %v3008_v35, 0.0  ;;  %v3033_v37 = vmul.f32 %v3008_v35, %v3008_v35 }
0x162e   :  { %3010 = vadd.xlane.f32.xlu0 %v3009_v36 }
0x162f   :  { %v3034_v39 = vsel %vm2909_vm14, %v3033_v37, 0.0 }
0x1630   :  { %3035 = vadd.xlane.f32.xlu2 %v3034_v39  ;;  %v3316_v39 = vld [vmem:[#allocation2 + $0x580] sm:$0xff] }
0x16a1   :  { %v3011_v40 = vpop.xlane.xlu0 %3010 }
0x16a2   :  { %3027 = vmatpush.msrb.mxu1 %v3011_v40  ;;  %v3244_v40 = vld [vmem:[#allocation2 + $0x528] sm:$0xff] }
0x16a3   :  { %v3036_v57 = vpop.xlane.xlu2 %3035  ;;  %8288 = vmatmul.msk.f32.vlgmr.msrb.gmra.mxu1 %vm2662_vm8, %v9258_v20 }
0x16a4   :  { %3052 = vmatpush.msrb.mxu0 %v3036_v57  ;;  %3154 = vmatpush.msra.mxu1 %v3091_v58  ;;  %v3315_v57 = vld [vmem:[#allocation2 + $0x578] sm:$0xff]  ;;  %v3243_v58 = vld [vmem:[#allocation2 + $0x520] sm:$0xff] }
0x16a5   :  { %8289 = vmatmul.msk.f32.vlgmr.msrb.gmra.mxu0 %vm2662_vm8, %v9258_v20 }
0x16a6   :  { %3155 = vmatpush.msra.mxu1 %v3090_v54 }
0x16a8   :  { %3156 = vmatpush.msra.mxu1 %v3089_v55 }
0x16aa   :  { %3157 = vmatpush.msra.mxu1 %v3088_v56  ;;  %v8650_v56 = vld [vmem:[#allocation2 + $0x588] ss:$0 sm:$0xff] }
0x16ac   :  { %3158 = vmatpush.msra.mxu1 %v3087_v1 }
0x16ae   :  { %3283 = vmatpush.msrb.mxu1 %v3220_v24 }
0x16b0   :  { %3284 = vmatpush.msrb.mxu1 %v3219_v33 }
0x16b2   :  { %3285 = vmatpush.msrb.mxu1 %v3218_v27 }
0x16b4   :  { %3286 = vmatpush.msrb.mxu1 %v3217_v34 }
0x16b6   :  { %3287 = vmatpush.msrb.mxu1 %v3216_v48 }
0x1720   :  { %v3029_v59 = vpop.f32.mrf.mxu1 }
0x1721   :  { %v3032_v61 = vmul.f32 0.00625, %v3029_v59  ;;  %v3314_v59 = vld [vmem:[#allocation2 + $0x570] sm:$0xff] }
0x1722   :  { %v3054_v23 = vpop.f32.mrf.mxu0 }
0x1723   :  { %v3064_v25 = vmul.f32 %v3032_v61, %v3032_v61  ;;  %v3057_v63 = vmul.f32 0.00625, %v3054_v23  ;;  %3060 = vperm.xlu1 %8625, %v3032_v61   ;;  %v3242_v61 = vld [vmem:[#allocation2 + $0x518] sm:$0xff]  ;;  %v3313_v23 = vld [vmem:[#allocation2 + $0x568] sm:$0xff] }
0x1725   :  { %v3065_v41 = vsub.f32 %v3057_v63, %v3064_v25  ;;  %v3241_v25 = vld [vmem:[#allocation2 + $0x510] sm:$0xff]  ;;  %v3312_v63 = vld [vmem:[#allocation2 + $0x560] sm:$0xff] }
0x1727   :  { %v3066_v42 = vadd.f32 1e-05, %v3065_v41 }
0x1729   :  { %8702 = vrsqrt.f32 %v3066_v42  ;;  %vm3073_vm5 = vweird.f32 %v3066_v42 }
0x172f   :  { %v8703_v53 = vpop.eup %8702 }
0x1730   :  { %v3068_v51 = vmul.f32 %v8703_v53, %v3066_v42  ;;  %vm3074_vm15 = vweird.f32 %v8703_v53  ;;  %v3374_v42 = vld [vmem:[#allocation2 + $0x5b0] sm:$0xff] }
0x1731   :  { %vm3075_vm6 = vmor %vm3073_vm5, %vm3074_vm15  ;;  %vm3775_vm5 = vcmask 654336  }
0x1732   :  { %v3069_v62 = vmul.f32 %v8703_v53, %v3068_v51  ;;  %v3373_v51 = vld [vmem:[#allocation2 + $0x5a8] sm:$0xff] }
0x1734   :  { %v3070_v44 = vmul.f32 0.5, %v3069_v62  ;;  %v3400_v62 = vld [vmem:[#allocation2 + $0x5c8] sm:$0xff] }
0x1736   :  { %v3071_v26 = vsub.f32 1.5, %v3070_v44  ;;  %v3372_v44 = vld [vmem:[#allocation2 + $0x5a0] sm:$0xff] }
0x1738   :  { %v3072_v52 = vmul.f32 %v8703_v53, %v3071_v26  ;;  %v3399_v26 = vld [vmem:[#allocation2 + $0x5c0] sm:$0xff] }
0x173a   :  { %v3076_v20 = vsel %vm3075_vm6, %v8703_v53, %v3072_v52  ;;  %v3401_v53 = vld [vmem:[#allocation2 + $0x5d0] sm:$0xff]  ;;  %v3371_v52 = vld [vmem:[#allocation2 + $0x598] sm:$0xff]  ;;  %vm3879_vm6 = vcmask 650240  }
0x173b   :  { %3079 = vperm.xlu2 %8624, %v3076_v20  }
0x1795   :  { %v3061_v60 = vpop.permute.xlu1 %3060  ;;  %v3080_v5 = vpop.permute.xlu2 %3079 }
0x1796   :  { %v3063_v3 = vsub.f32 %v3008_v35, %v3061_v60 }
0x1798   :  { %v3082_v6 = vmul.f32 %v3080_v5, %v3063_v3  ;;  %v3346_v5 = vld [vmem:[#allocation2 + $0x1238] sm:$0xf] }
0x179a   :  { %v3084_v8 = vmul.f32 %v3083_v4, %v3082_v6  ;;  %v3345_v4 = vld [vmem:[#allocation2 + $0x1230] sm:$0xf] }
0x179b   :  { %v3453_v6 = vld [vmem:[#allocation2 + $0x5f0] sm:$0x3] }
0x179c   :  { %v3086_v9 = vadd.f32 %v3085_v7, %v3084_v8  ;;  %v3452_v7 = vld [vmem:[#allocation2 + $0x5e8] sm:$0xff]  ;;  %v9315_v8 = vld [vmem:[%s9923_s1] sm:$0x3] }
0x179e   :  { %3107 = vmatpush.msrb.mxu2 %v3086_v9  ;;  %8292 = vmatmul.msk.f32.vlgmr.msra.gmra.mxu1 %vm2909_vm14, %v3086_v9 }
0x179f   :  { %3178 = vmatpush.msra.mxu0 %v3086_v9  ;;  %8290 = vmatmul.msk.f32.vlgmr.msrb.gmra.mxu2 %vm2662_vm8, %v9265_v46  ;;  %v3398_v9 = vld [vmem:[#allocation2 + $0x5b8] sm:$0xff] }
0x17a0   :  { %8293 = vmatmul.msk.f32.vlgmr.msra.gmra.mxu0 %vm2662_vm8, %v9267_v50  ;;  %3202 = vmatpush.msra.mxu2 %v3187_v11 }
0x17a1   :  { %3260 = vmatpush.msrb.mxu0 %v3245_v28 }
0x17a2   :  { %3203 = vmatpush.msra.mxu2 %v3186_v12  ;;  %v8651_v12 = vld [vmem:[#allocation2 + $0x5f8] ss:$0 sm:$0xff] }
0x17a3   :  { %3261 = vmatpush.msrb.mxu0 %v3244_v40 }
0x17a4   :  { %3204 = vmatpush.msra.mxu2 %v3185_v14 }
0x17a5   :  { %3262 = vmatpush.msrb.mxu0 %v3243_v58 }
0x17a6   :  { %3205 = vmatpush.msra.mxu2 %v3184_v15  ;;  %v8652_v15 = vld [vmem:[#allocation2 + $0x5e0] ss:$0 sm:$0xff] }
0x17a7   :  { %3263 = vmatpush.msrb.mxu0 %v3242_v61 }
0x17a8   :  { %3206 = vmatpush.msra.mxu2 %v3183_v0 }
0x17a9   :  { %3264 = vmatpush.msrb.mxu0 %v3241_v25 }
0x181b   :  { %v3160_v47 = vpop.f32.mrf.mxu1 }
0x181d   :  { %v3180_v17 = vpop.f32.mrf.mxu0 }
0x181e   :  { %8294 = vmatmul.msk.f32.vlgmr.msra.gmra.mxu2 %vm2909_vm14, %v3180_v17 }
0x1822   :  { %v3109_v21 = vpop.f32.mrf.mxu2 }
0x1823   :  { %8291 = vmatmul.msk.f32.vlgmr.msrb.gmra.mxu3 %vm2909_vm14, %v3109_v21 }
0x18a1   :  { %v3208_v43 = vpop.f32.mrf.mxu2 }
0x18a6   :  { %v3137_v29 = vpop.f32.mrf.mxu3 }
0x18a7   :  { %v3161_v49 = vadd.f32 %v3160_v47, %v3137_v29  ;;  %v9323_v47 = vld [vmem:[#allocation2 + $0x1110] sm:$0xf] }
0x18a9   :  { %v3211_v35 = vadd.f32 %v3208_v43, %v3161_v49  ;;  %v3599_v49 = vld [vmem:[#allocation2 + $0x658] sm:$0xff] }
0x18ab   :  { %v3214_v36 = vadd.f32 %v8649_v31, %v3211_v35 }
0x18ad   :  { %v3215_v37 = vmax.f32 %v3214_v36, 0.0 }
0x18af   :  { %3236 = vmatpush.msra.mxu3 %v3215_v37  ;;  %8297 = vmatmul.msk.f32.vlgmr.msrb.gmra.mxu1 %vm2909_vm14, %v3215_v37 }
0x18b0   :  { %3307 = vmatpush.msrb.mxu2 %v3215_v37  ;;  %8295 = vmatmul.msk.f32.vlgmr.msra.gmra.mxu3 %vm2662_vm8, %v9265_v46 }
0x18b1   :  { %8298 = vmatmul.msk.f32.vlgmr.msrb.gmra.mxu2 %vm2662_vm8, %v9267_v50  ;;  %3331 = vmatpush.msrb.mxu3 %v3316_v39  ;;  %v3402_v50 = vld [vmem:[#allocation2 + $0x5d8] sm:$0xff] }
0x18b2   :  { %3417 = vmatpush.msra.mxu2 %v3402_v50  ;;  %v3597_v50 = vld [vmem:[#allocation2 + $0x648] sm:$0xff] }
0x18b3   :  { %3332 = vmatpush.msrb.mxu3 %v3315_v57 }
0x18b4   :  { %3418 = vmatpush.msra.mxu2 %v3401_v53  ;;  %v3595_v53 = vld [vmem:[#allocation2 + $0x638] sm:$0xff] }
0x18b5   :  { %3333 = vmatpush.msrb.mxu3 %v3314_v59 }
0x18b6   :  { %3419 = vmatpush.msra.mxu2 %v3400_v62  ;;  %v3629_v62 = vld [vmem:[#allocation2 + $0x628] sm:$0xff] }
0x18b7   :  { %3334 = vmatpush.msrb.mxu3 %v3313_v23 }
0x18b8   :  { %3420 = vmatpush.msra.mxu2 %v3399_v26  ;;  %v3627_v26 = vld [vmem:[#allocation2 + $0x618] sm:$0xff] }
0x18b9   :  { %3335 = vmatpush.msrb.mxu3 %v3312_v63 }
0x18ba   :  { %3421 = vmatpush.msra.mxu2 %v3398_v9  ;;  %v3702_v9 = vld [vmem:[#allocation2 + $0x678] sm:$0xff] }
0x18bb   :  { %3440 = vmatpush.msra.mxu3 %v3374_v42  ;;  %v3596_v42 = vld [vmem:[#allocation2 + $0x640] sm:$0xff] }
0x18bd   :  { %3441 = vmatpush.msra.mxu3 %v3373_v51  ;;  %v3630_v51 = vld [vmem:[#allocation2 + $0x630] sm:$0xff] }
0x18bf   :  { %3442 = vmatpush.msra.mxu3 %v3372_v44  ;;  %v3628_v44 = vld [vmem:[#allocation2 + $0x620] sm:$0xff] }
0x18c1   :  { %3443 = vmatpush.msra.mxu3 %v3371_v52 }
0x18c3   :  { %3444 = vmatpush.msra.mxu3 %v3370_v10  ;;  %v3701_v10 = vld [vmem:[#allocation2 + $0x670] sm:$0xff] }
0x192c   :  { %v3289_v54 = vpop.f32.mrf.mxu1 }
0x1933   :  { %v3238_v46 = vpop.f32.mrf.mxu3 }
0x1934   :  { %v3309_v41 = vpop.f32.mrf.mxu2  ;;  %8296 = vmatmul.msk.f32.vlgmr.msrb.gmra.mxu0 %vm2909_vm14, %v3238_v46 }
0x1935   :  { %8299 = vmatmul.msk.f32.vlgmr.msrb.gmra.mxu3 %vm2909_vm14, %v3309_v41  ;;  %v3598_v41 = vld [vmem:[#allocation2 + $0x650] sm:$0xff] }
0x1936   :  { %3645 = vmatpush.msrb.mxu3 %v3630_v51  ;;  %v3766_v51 = vld [vmem:[#allocation2 + $0x698] sm:$0xff] }
0x1938   :  { %3646 = vmatpush.msrb.mxu3 %v3629_v62  ;;  %v3843_v62 = vld [vmem:[#allocation2 + $0x740] sm:$0xff] }
0x193a   :  { %3647 = vmatpush.msrb.mxu3 %v3628_v44  ;;  %v3765_v44 = vld [vmem:[#allocation2 + $0x690] sm:$0xff] }
0x193c   :  { %3648 = vmatpush.msrb.mxu3 %v3627_v26  ;;  %v3842_v26 = vld [vmem:[#allocation2 + $0x738] sm:$0xff] }
0x19b1   :  { %v3266_v20 = vpop.f32.mrf.mxu0 }
0x19b2   :  { %v3290_v55 = vadd.f32 %v3289_v54, %v3266_v20  ;;  %v3591_v54 = vld [vmem:[#allocation2 + $0x600] sm:$0xf] }
0x19b8   :  { %v3337_v1 = vpop.f32.mrf.mxu3 }
0x19b9   :  { %v3340_v2 = vadd.f32 %v3337_v1, %v3290_v55  ;;  %v3593_v1 = vld [vmem:[#allocation2 + $0x608] sm:$0xf] }
0x19bb   :  { %v3343_v60 = vadd.f32 %v8650_v56, %v3340_v2 }
0x19bd   :  { %v9305_v3 = vmax.f32 %v3343_v60, 0.0 }
0x19bf   :  { %3365 = vmatpush.msra.mxu0 %v9305_v3  ;;  %3393 = vmatpush.msra.mxu1 %v9305_v3 }
0x19c0   :  { %8300 = vmatmul.msk.f32.vlgmr.msra.gmra.mxu0 %vm2662_vm8, %v3345_v4  ;;  %8301 = vmatmul.msk.f32.vlgmr.msra.gmra.mxu1 %vm2662_vm8, %v3346_v5  ;;  %v9331_v4 = vld [vmem:[#allocation2 + $0x1100] sm:$0xf]  ;;  %v9333_v5 = vld [vmem:[#allocation2 + $0x1108] sm:$0xf] }
0x19c1   :  { %8304 = vmatpush.msk.msrb.mxu0 %vm75_vm0, %v3453_v6  ;;  %v3626_v6 = vld [vmem:[#allocation2 + $0x610] sm:$0xff] }
0x19c2   :  { %3649 = vmatpush.msrb.mxu3 %v3626_v6 }
0x19c3   :  { %3474 = vmatpush.msrb.mxu0 %v3452_v7  ;;  %v3703_v7 = vld [vmem:[#allocation2 + $0x680] sm:$0xff] }
0x19c8   :  { %8305 = vmatmul.msk.f32.vlgmr.msrb.gmra.mxu0 %vm71_vm1, %v9315_v8 }
0x1a3d   :  { %v3367_v11 = vpop.f32.mrf.mxu0  ;;  %v3395_v22 = vpop.f32.mrf.mxu1 }
0x1a3e   :  { %8302 = vmatmul.msk.f32.vlgmr.msra.gmra.mxu2 %vm2909_vm14, %v3395_v22  ;;  %8303 = vmatmul.msk.f32.vlgmr.msra.gmra.mxu3 %vm2909_vm14, %v3367_v11  ;;  %v3700_v11 = vld [vmem:[#allocation2 + $0x668] sm:$0xff] }
0x1a3f   :  { %v3741_v22 = vld [vmem:[#allocation2 + $0x728] sm:$0xff] }
0x1a45   :  { %v3476_v13 = vpop.f32.mrf.mxu0 }
0x1a46   :  { %v3477_v14 = vadd.f32 %v8651_v12, %v3476_v13  ;;  %v3699_v12 = vld [vmem:[#allocation2 + $0x660] sm:$0xff] }
0x1a47   :  { %v3740_v13 = vld [vmem:[#allocation2 + $0x720] sm:$0xff] }
0x1a48   :  { %8306 = vmatpush.msk.msrb.mxu1 %vm75_vm0, %v3477_v14  ;;  %v3739_v14 = vld [vmem:[#allocation2 + $0x718] sm:$0xff] }
0x1a49   :  { %8307 = vmatmul.msk.f32.vlgmr.msrb.gmra.mxu1 %vm106_vm2, %v60_v30  ;;  %v3738_v30 = vld [vmem:[#allocation2 + $0x710] sm:$0xff] }
0x1ac1   :  { %v3423_v0 = vpop.f32.mrf.mxu2  ;;  %v3446_v17 = vpop.f32.mrf.mxu3 }
0x1ac2   :  { %v3447_v21 = vadd.f32 %v3446_v17, %v3423_v0 }
0x1ac4   :  { %v3451_v24 = vadd.f32 %v8652_v15, %v3447_v21  ;;  %v3737_v15 = vld [vmem:[#allocation2 + $0x708] sm:$0xff]  ;;  %v3736_v21 = vld [vmem:[#allocation2 + $0x700] sm:$0xff] }
0x1ac6   :  { %v3502_v33 = vpop.f32.mrf.mxu1 }
0x1ac7   :  { %v3505_v27 = vadd.f32 %v3502_v33, %v3451_v24  ;;  %v3735_v24 = vld [vmem:[#allocation2 + $0x6f8] sm:$0xff]  ;;  %v3734_v33 = vld [vmem:[#allocation2 + $0x6f0] sm:$0xff] }
0x1ac9   :  { %v3507_v34 = vsel %vm3506_vm7, %v3505_v27, 0.0  ;;  %v3538_v48 = vmul.f32 %v3505_v27, %v3505_v27 }
0x1aca   :  { %3508 = vadd.xlane.f32.xlu0 %v3507_v34  ;;  %v3732_v34 = vld [vmem:[#allocation2 + $0x6e0] sm:$0xff] }
0x1acb   :  { %v3539_v28 = vsel %vm3506_vm7, %v3538_v48, 0.0  ;;  %v3774_v48 = vld [vmem:[#allocation2 + $0x6d8] sm:$0xff] }
0x1ad2   :  { %3540 = vadd.xlane.f32.xlu0 %v3539_v28  ;;  %v3773_v28 = vld [vmem:[#allocation2 + $0x6d0] sm:$0xff] }
0x1b3d   :  { %v3509_v29 = vpop.xlane.xlu0 %3508 }
0x1b3e   :  { %8308 = vmatpush.msk.msrb.mxu2 %vm1899_vm11, %v3509_v29  ;;  %v3772_v29 = vld [vmem:[#allocation2 + $0x6c8] sm:$0xff] }
0x1b3f   :  { %8309 = vmatmul.msk.f32.vlgmr.msrb.gmra.mxu2 %vm3510_vm9, %v9323_v47 }
0x1b40   :  { %3667 = vmatpush.msra.mxu2 %v3599_v49  ;;  %v3770_v49 = vld [vmem:[#allocation2 + $0x6b8] sm:$0xff] }
0x1b42   :  { %3668 = vmatpush.msra.mxu2 %v3598_v41  ;;  %v3768_v41 = vld [vmem:[#allocation2 + $0x6a8] sm:$0xff] }
0x1b44   :  { %3669 = vmatpush.msra.mxu2 %v3597_v50  ;;  %v3845_v50 = vld [vmem:[#allocation2 + $0x750] sm:$0xff] }
0x1b45   :  { %v3541_v43 = vpop.xlane.xlu0 %3540 }
0x1b46   :  { %8310 = vmatpush.msk.msra.mxu0 %vm1899_vm11, %v3541_v43  ;;  %3670 = vmatpush.msra.mxu2 %v3596_v42  ;;  %v3771_v43 = vld [vmem:[#allocation2 + $0x6c0] sm:$0xff] }
0x1b47   :  { %8311 = vmatmul.msk.f32.vlgmr.msra.gmra.mxu0 %vm3510_vm9, %v9323_v47  ;;  %v3767_v42 = vld [vmem:[#allocation2 + $0x6a0] sm:$0xff] }
0x1b48   :  { %3671 = vmatpush.msra.mxu2 %v3595_v53  ;;  %v3844_v53 = vld [vmem:[#allocation2 + $0x748] sm:$0xff] }
0x1b4a   :  { %3785 = vmatpush.msrb.mxu2 %v3774_v48 }
0x1b4c   :  { %3786 = vmatpush.msrb.mxu2 %v3773_v28 }
0x1b4e   :  { %3787 = vmatpush.msrb.mxu2 %v3772_v29 }
0x1b50   :  { %3788 = vmatpush.msrb.mxu2 %v3771_v43 }
0x1b52   :  { %3789 = vmatpush.msrb.mxu2 %v3770_v49  ;;  %v3972_v49 = vld [vmem:[#allocation2 + $0x828] sm:$0xff] }
0x1bc2   :  { %v3534_v31 = vpop.f32.mrf.mxu2 }
0x1bc3   :  { %v3537_v35 = vmul.f32 0.0125, %v3534_v31  ;;  %v3769_v31 = vld [vmem:[#allocation2 + $0x6b0] sm:$0xff] }
0x1bc4   :  { %v3562_v36 = vpop.f32.mrf.mxu0  ;;  %3790 = vmatpush.msrb.mxu2 %v3769_v31  ;;  %v3971_v31 = vld [vmem:[#allocation2 + $0x820] sm:$0xff] }
0x1bc5   :  { %v3572_v37 = vmul.f32 %v3537_v35, %v3537_v35  ;;  %v3565_v39 = vmul.f32 0.0125, %v3562_v36  ;;  %3568 = vperm.xlu1 %8625, %v3537_v35  }
0x1bc6   :  { %3791 = vmatpush.msrb.mxu2 %v3768_v41  ;;  %v4000_v41 = vld [vmem:[#allocation2 + $0x7b0] sm:$0xff] }
0x1bc7   :  { %v3573_v40 = vsub.f32 %v3565_v39, %v3572_v37 }
0x1bc8   :  { %3792 = vmatpush.msrb.mxu2 %v3767_v42 }
0x1bc9   :  { %v3574_v57 = vadd.f32 1e-05, %v3573_v40  ;;  %v8653_v40 = vld [vmem:[#allocation2 + $0x688] ss:$0 sm:$0xff] }
0x1bca   :  { %3793 = vmatpush.msrb.mxu2 %v3766_v51  ;;  %v3960_v51 = vld [vmem:[#allocation2 + $0x788] sm:$0xf] }
0x1bcb   :  { %8704 = vrsqrt.f32 %v3574_v57  ;;  %vm3581_vm13 = vweird.f32 %v3574_v57 }
0x1bcc   :  { %3794 = vmatpush.msrb.mxu2 %v3765_v44 }
0x1bd1   :  { %v8705_v58 = vpop.eup %8704 }
0x1bd2   :  { %v3576_v59 = vmul.f32 %v8705_v58, %v3574_v57  ;;  %vm3582_vm10 = vweird.f32 %v8705_v58 }
0x1bd3   :  { %vm3583_vm15 = vmor %vm3581_vm13, %vm3582_vm10 }
0x1bd4   :  { %v3577_v61 = vmul.f32 %v8705_v58, %v3576_v59 }
0x1bd6   :  { %v3578_v23 = vmul.f32 0.5, %v3577_v61  ;;  %v3850_v61 = vld [vmem:[#allocation2 + $0x778] sm:$0xff] }
0x1bd8   :  { %v3579_v25 = vsub.f32 1.5, %v3578_v23  ;;  %v3849_v23 = vld [vmem:[#allocation2 + $0x770] sm:$0xff] }
0x1bda   :  { %v3580_v63 = vmul.f32 %v8705_v58, %v3579_v25  ;;  %v3848_v25 = vld [vmem:[#allocation2 + $0x768] sm:$0xff] }
0x1bdc   :  { %v3584_v46 = vsel %vm3583_vm15, %v8705_v58, %v3580_v63  ;;  %v3847_v63 = vld [vmem:[#allocation2 + $0x760] sm:$0xff] }
0x1bdd   :  { %3587 = vperm.xlu2 %8624, %v3584_v46   ;;  %v3846_v46 = vld [vmem:[#allocation2 + $0x758] sm:$0xff] }
0x1c37   :  { %v3569_v52 = vpop.permute.xlu1 %3568  ;;  %v3588_v55 = vpop.permute.xlu2 %3587 }
0x1c38   :  { %v3571_v20 = vsub.f32 %v3505_v27, %v3569_v52  ;;  %v3733_v27 = vld [vmem:[#allocation2 + $0x6e8] sm:$0xff]  ;;  %v3841_v52 = vld [vmem:[#allocation2 + $0x730] sm:$0xff] }
0x1c3a   :  { %v3590_v56 = vmul.f32 %v3588_v55, %v3571_v20 }
0x1c3c   :  { %v3592_v2 = vmul.f32 %v3591_v54, %v3590_v56 }
0x1c3e   :  { %v3594_v60 = vadd.f32 %v3593_v1, %v3592_v2 }
0x1c40   :  { %8312 = vmatpush.msk.msra.mxu1 %vm1899_vm11, %v3594_v60  ;;  %8315 = vmatmul.msk.f32.vlgmr.msra.gmra.mxu2 %vm2909_vm14, %v3594_v60 }
0x1c41   :  { %8316 = vmatpush.msk.msrb.mxu0 %vm1899_vm11, %v3594_v60  ;;  %8313 = vmatmul.msk.f32.vlgmr.msra.gmra.mxu1 %vm3510_vm9, %v9331_v4  ;;  %v8654_v60 = vld [vmem:[#allocation2 + $0x780] ss:$0 sm:$0xff] }
0x1c42   :  { %8317 = vmatmul.msk.f32.vlgmr.msrb.gmra.mxu0 %vm3510_vm9, %v9333_v5  ;;  %3718 = vmatpush.msrb.mxu1 %v3703_v7 }
0x1c43   :  { %3807 = vmatpush.msra.mxu0 %v3741_v22 }
0x1c44   :  { %3719 = vmatpush.msrb.mxu1 %v3702_v9 }
0x1c45   :  { %3808 = vmatpush.msra.mxu0 %v3740_v13 }
0x1c46   :  { %3720 = vmatpush.msrb.mxu1 %v3701_v10 }
0x1c47   :  { %3809 = vmatpush.msra.mxu0 %v3739_v14 }
0x1c48   :  { %3721 = vmatpush.msrb.mxu1 %v3700_v11 }
0x1c49   :  { %3810 = vmatpush.msra.mxu0 %v3738_v30 }
0x1c4a   :  { %3722 = vmatpush.msrb.mxu1 %v3699_v12 }
0x1c4b   :  { %3811 = vmatpush.msra.mxu0 %v3737_v15 }
0x1c4d   :  { %3812 = vmatpush.msra.mxu0 %v3736_v21 }
0x1c4f   :  { %3813 = vmatpush.msra.mxu0 %v3735_v24 }
0x1c51   :  { %3814 = vmatpush.msra.mxu0 %v3734_v33 }
0x1c53   :  { %3815 = vmatpush.msra.mxu0 %v3733_v27 }
0x1c55   :  { %3816 = vmatpush.msra.mxu0 %v3732_v34 }
0x1cbe   :  { %v3623_v0 = vpop.f32.mrf.mxu1 }
0x1cbf   :  { %8314 = vmatmul.msk.f32.vlgmr.msrb.gmra.mxu3 %vm2909_vm14, %v3623_v0  ;;  %v3696_v17 = vpop.f32.mrf.mxu0 }
0x1cc0   :  { %8318 = vmatmul.msk.f32.vlgmr.msrb.gmra.mxu1 %vm2909_vm14, %v3696_v17 }
0x1cc3   :  { %v3673_v35 = vpop.f32.mrf.mxu2 }
0x1d3d   :  { %v3724_v37 = vpop.f32.mrf.mxu1 }
0x1d42   :  { %v3651_v36 = vpop.f32.mrf.mxu3 }
0x1d43   :  { %v3674_v39 = vadd.f32 %v3673_v35, %v3651_v36  ;;  %v3970_v35 = vld [vmem:[#allocation2 + $0x818] sm:$0xff]  ;;  %v3969_v36 = vld [vmem:[#allocation2 + $0x810] sm:$0xff] }
0x1d45   :  { %v3727_v57 = vadd.f32 %v3724_v37, %v3674_v39  ;;  %v3968_v37 = vld [vmem:[#allocation2 + $0x808] sm:$0xff]  ;;  %v3967_v39 = vld [vmem:[#allocation2 + $0x800] sm:$0xff] }
0x1d47   :  { %v3730_v58 = vadd.f32 %v8653_v40, %v3727_v57  ;;  %v3966_v40 = vld [vmem:[#allocation2 + $0x7f8] sm:$0xff]  ;;  %v3965_v57 = vld [vmem:[#allocation2 + $0x7f0] sm:$0xff] }
0x1d49   :  { %v3731_v59 = vmax.f32 %v3730_v58, 0.0  ;;  %v3964_v58 = vld [vmem:[#allocation2 + $0x7e8] sm:$0xff] }
0x1d4b   :  { %8319 = vmatpush.msk.msra.mxu3 %vm1899_vm11, %v3731_v59  ;;  %8322 = vmatmul.msk.f32.vlgmr.msra.gmra.mxu0 %vm3775_vm5, %v3731_v59 }
0x1d4c   :  { %8323 = vmatpush.msk.msra.mxu1 %vm1899_vm11, %v3731_v59  ;;  %8320 = vmatmul.msk.f32.vlgmr.msra.gmra.mxu3 %vm3510_vm9, %v9331_v4  ;;  %v4006_v59 = vld [vmem:[#allocation2 + $0x7e0] sm:$0xff] }
0x1d4d   :  { %8324 = vmatmul.msk.f32.vlgmr.msra.gmra.mxu1 %vm3510_vm9, %v9333_v5  ;;  %3860 = vmatpush.msrb.mxu3 %v3850_v61  ;;  %v4005_v61 = vld [vmem:[#allocation2 + $0x7d8] sm:$0xff] }
0x1d4e   :  { %4016 = vmatpush.msrb.mxu0 %v4006_v59  ;;  %v4145_v59 = vld [vmem:[#allocation2 + $0x8a0] sm:$0xff] }
0x1d4f   :  { %3861 = vmatpush.msrb.mxu3 %v3849_v23  ;;  %v4004_v23 = vld [vmem:[#allocation2 + $0x7d0] sm:$0xff] }
0x1d50   :  { %4017 = vmatpush.msrb.mxu0 %v4005_v61  ;;  %v4116_v61 = vld [vmem:[#allocation2 + $0x910] sm:$0xff] }
0x1d51   :  { %3862 = vmatpush.msrb.mxu3 %v3848_v25  ;;  %v4003_v25 = vld [vmem:[#allocation2 + $0x7c8] sm:$0xff] }
0x1d52   :  { %4018 = vmatpush.msrb.mxu0 %v4004_v23  ;;  %v4144_v23 = vld [vmem:[#allocation2 + $0x898] sm:$0xff] }
0x1d53   :  { %3863 = vmatpush.msrb.mxu3 %v3847_v63  ;;  %v4002_v63 = vld [vmem:[#allocation2 + $0x7c0] sm:$0xff] }
0x1d54   :  { %4019 = vmatpush.msrb.mxu0 %v4003_v25  ;;  %v4115_v25 = vld [vmem:[#allocation2 + $0x908] sm:$0xff] }
0x1d55   :  { %3864 = vmatpush.msrb.mxu3 %v3846_v46  ;;  %v4001_v46 = vld [vmem:[#allocation2 + $0x7b8] sm:$0xff] }
0x1d56   :  { %4020 = vmatpush.msrb.mxu0 %v4002_v63  ;;  %v4113_v63 = vld [vmem:[#allocation2 + $0x8f8] sm:$0xff] }
0x1d57   :  { %3865 = vmatpush.msrb.mxu3 %v3845_v50  ;;  %v3999_v50 = vld [vmem:[#allocation2 + $0x7a8] sm:$0xff] }
0x1d58   :  { %4021 = vmatpush.msrb.mxu0 %v4001_v46  ;;  %v4111_v46 = vld [vmem:[#allocation2 + $0x8e8] sm:$0xff] }
0x1d59   :  { %3866 = vmatpush.msrb.mxu3 %v3844_v53 }
0x1d5a   :  { %4022 = vmatpush.msrb.mxu0 %v4000_v41  ;;  %v4110_v41 = vld [vmem:[#allocation2 + $0x8e0] sm:$0xff] }
0x1d5b   :  { %3867 = vmatpush.msrb.mxu3 %v3843_v62 }
0x1d5c   :  { %4023 = vmatpush.msrb.mxu0 %v3999_v50  ;;  %v4143_v50 = vld [vmem:[#allocation2 + $0x890] sm:$0xff] }
0x1d5d   :  { %3868 = vmatpush.msrb.mxu3 %v3842_v26  ;;  %v3962_v26 = vld [vmem:[#allocation2 + $0x790] sm:$0xf] }
0x1d5f   :  { %3869 = vmatpush.msrb.mxu3 %v3841_v52 }
0x1dc8   :  { %v3818_v55 = vpop.f32.mrf.mxu0 }
0x1dca   :  { %v3838_v20 = vpop.f32.mrf.mxu1 }
0x1dcb   :  { %8325 = vmatmul.msk.f32.vlgmr.msrb.gmra.mxu3 %vm3775_vm5, %v3838_v20 }
0x1dcf   :  { %v3762_v54 = vpop.f32.mrf.mxu3 }
0x1dd0   :  { %8321 = vmatmul.msk.f32.vlgmr.msrb.gmra.mxu2 %vm3775_vm5, %v3762_v54  ;;  %v4081_v54 = vld [vmem:[#allocation2 + $0x880] sm:$0xff] }
0x1e4e   :  { %v3871_v1 = vpop.f32.mrf.mxu3 }
0x1e53   :  { %v3796_v56 = vpop.f32.mrf.mxu2 }
0x1e54   :  { %v3819_v2 = vadd.f32 %v3818_v55, %v3796_v56  ;;  %v4080_v55 = vld [vmem:[#allocation2 + $0x878] sm:$0xff]  ;;  %v4079_v56 = vld [vmem:[#allocation2 + $0x870] sm:$0xff] }
0x1e56   :  { %v3874_v6 = vadd.f32 %v3871_v1, %v3819_v2  ;;  %v4078_v1 = vld [vmem:[#allocation2 + $0x868] sm:$0xff]  ;;  %v4077_v2 = vld [vmem:[#allocation2 + $0x860] sm:$0xff] }
0x1e58   :  { %v3877_v7 = vadd.f32 %v8654_v60, %v3874_v6  ;;  %v4076_v60 = vld [vmem:[#allocation2 + $0x858] sm:$0xff]  ;;  %v4075_v6 = vld [vmem:[#allocation2 + $0x850] sm:$0xff] }
0x1e5a   :  { %v9353_v9 = vmax.f32 %v3877_v7, 0.0  ;;  %v4074_v7 = vld [vmem:[#allocation2 + $0x848] sm:$0xff] }
0x1e5c   :  { %v3880_v10 = vsel %vm3879_vm6, %v9353_v9, 0.0  ;;  %v3907_v11 = vmul.f32 %v9353_v9, %v9353_v9 }
0x1e5d   :  { %3881 = vadd.xlane.f32.xlu0 %v3880_v10  ;;  %v4072_v10 = vld [vmem:[#allocation2 + $0x838] sm:$0xff] }
0x1e5e   :  { %v3908_v22 = vsel %vm3879_vm6, %v3907_v11, 0.0  ;;  %v3998_v11 = vld [vmem:[#allocation2 + $0x7a0] sm:$0xff] }
0x1e5f   :  { %3909 = vadd.xlane.f32.xlu1 %v3908_v22  ;;  %4024 = vmatpush.msrb.mxu0 %v3998_v11  ;;  %v3997_v22 = vld [vmem:[#allocation2 + $0x798] sm:$0xff]  ;;  %v4322_v11 = vld [vmem:[#allocation2 + $0xa10] sm:$0xff] }
0x1e61   :  { %4025 = vmatpush.msrb.mxu0 %v3997_v22  ;;  %v4288_v22 = vld [vmem:[#allocation2 + $0x9b8] sm:$0xff] }
0x1ed0   :  { %v3882_v12 = vpop.xlane.xlu0 %3881 }
0x1ed1   :  { %8326 = vmatpush.msk.msrb.mxu1 %vm1899_vm11, %v3882_v12 }
0x1ed2   :  { %v3910_v13 = vpop.xlane.xlu1 %3909  ;;  %8327 = vmatmul.msk.f32.vlgmr.msrb.gmra.mxu1 %vm3510_vm9, %v9323_v47 }
0x1ed3   :  { %8328 = vmatpush.msk.msra.mxu1 %vm1899_vm11, %v3910_v13 }
0x1eda   :  { %8329 = vmatmul.msk.f32.vlgmr.msra.gmra.mxu1 %vm3510_vm9, %v9323_v47  ;;  %v3973_v47 = vld [vmem:[#allocation2 + $0x830] sm:$0xff] }
0x1edb   :  { %4038 = vmatpush.msra.mxu3 %v3973_v47  ;;  %v4148_v47 = vld [vmem:[#allocation2 + $0x8b8] sm:$0xff] }
0x1edd   :  { %4039 = vmatpush.msra.mxu3 %v3972_v49 }
0x1edf   :  { %4040 = vmatpush.msra.mxu3 %v3971_v31  ;;  %v4223_v31 = vld [vmem:[#allocation2 + $0x958] sm:$0xff] }
0x1ee1   :  { %4041 = vmatpush.msra.mxu3 %v3970_v35 }
0x1ee3   :  { %4042 = vmatpush.msra.mxu3 %v3969_v36  ;;  %v4119_v36 = vld [vmem:[#allocation2 + $0x928] sm:$0xff] }
0x1ee5   :  { %4043 = vmatpush.msra.mxu3 %v3968_v37  ;;  %v4147_v37 = vld [vmem:[#allocation2 + $0x8b0] sm:$0xff] }
0x1ee7   :  { %4044 = vmatpush.msra.mxu3 %v3967_v39  ;;  %v4222_v39 = vld [vmem:[#allocation2 + $0x950] sm:$0xff] }
0x1ee9   :  { %4045 = vmatpush.msra.mxu3 %v3966_v40  ;;  %v4118_v40 = vld [vmem:[#allocation2 + $0x920] sm:$0xff] }
0x1eeb   :  { %4046 = vmatpush.msra.mxu3 %v3965_v57  ;;  %v4146_v57 = vld [vmem:[#allocation2 + $0x8a8] sm:$0xff] }
0x1eed   :  { %4047 = vmatpush.msra.mxu3 %v3964_v58  ;;  %v4117_v58 = vld [vmem:[#allocation2 + $0x918] sm:$0xff] }
0x1f4f   :  { %v3903_v14 = vpop.f32.mrf.mxu1 }
0x1f50   :  { %v3906_v30 = vmul.f32 0.00625, %v3903_v14  ;;  %v4152_v14 = vld [vmem:[#allocation2 + $0x8d8] sm:$0xff] }
0x1f51   :  { %4162 = vmatpush.msra.mxu0 %v4152_v14  ;;  %v4320_v14 = vld [vmem:[#allocation2 + $0xa00] sm:$0xff] }
0x1f52   :  { %3937 = vperm.xlu2 %8624, %v3906_v30   ;;  %v3941_v0 = vmul.f32 %v3906_v30, %v3906_v30  ;;  %v4151_v30 = vld [vmem:[#allocation2 + $0x8d0] sm:$0xff] }
0x1f53   :  { %4163 = vmatpush.msra.mxu0 %v4151_v30  ;;  %v4286_v30 = vld [vmem:[#allocation2 + $0x9a8] sm:$0xff] }
0x1f57   :  { %v3931_v15 = vpop.f32.mrf.mxu1 }
0x1f58   :  { %v3934_v17 = vmul.f32 0.00625, %v3931_v15  ;;  %v4227_v15 = vld [vmem:[#allocation2 + $0x978] sm:$0xff] }
0x1f5a   :  { %v3942_v21 = vsub.f32 %v3934_v17, %v3941_v0 }
0x1f5c   :  { %v3943_v24 = vadd.f32 1e-05, %v3942_v21  ;;  %v4150_v21 = vld [vmem:[#allocation2 + $0x8c8] sm:$0xff] }
0x1f5d   :  { %4164 = vmatpush.msra.mxu0 %v4150_v21  ;;  %v8657_v21 = vld [vmem:[#allocation2 + $0x998] ss:$0 sm:$0xff] }
0x1f5e   :  { %8706 = vrsqrt.f32 %v3943_v24  ;;  %vm3950_vm10 = vweird.f32 %v3943_v24 }
0x1f64   :  { %v8707_v33 = vpop.eup %8706 }
0x1f65   :  { %v3945_v27 = vmul.f32 %v8707_v33, %v3943_v24  ;;  %vm3951_vm7 = vweird.f32 %v8707_v33  ;;  %v4226_v24 = vld [vmem:[#allocation2 + $0x970] sm:$0xff] }
0x1f66   :  { %vm3952_vm13 = vmor %vm3950_vm10, %vm3951_vm7 }
0x1f67   :  { %v3946_v34 = vmul.f32 %v8707_v33, %v3945_v27 }
0x1f69   :  { %v3947_v48 = vmul.f32 0.5, %v3946_v34  ;;  %v8655_v34 = vld [vmem:[#allocation2 + $0x888] ss:$0 sm:$0xff] }
0x1f6b   :  { %v3948_v28 = vsub.f32 1.5, %v3947_v48  ;;  %v4225_v48 = vld [vmem:[#allocation2 + $0x968] sm:$0xff] }
0x1f6d   :  { %v3949_v29 = vmul.f32 %v8707_v33, %v3948_v28  ;;  %v4149_v28 = vld [vmem:[#allocation2 + $0x8c0] sm:$0xff] }
0x1f6e   :  { %4165 = vmatpush.msra.mxu0 %v4149_v28  ;;  %v8656_v28 = vld [vmem:[#allocation2 + $0x980] ss:$0 sm:$0xff] }
0x1f6f   :  { %v3953_v43 = vsel %vm3952_vm13, %v8707_v33, %v3949_v29 }
0x1f70   :  { %3956 = vperm.xlu0 %8626, %v3953_v43   ;;  %v4224_v43 = vld [vmem:[#allocation2 + $0x960] sm:$0xff]  ;;  %4166 = vmatpush.msra.mxu0 %v4148_v47 }
0x1f72   :  { %4167 = vmatpush.msra.mxu0 %v4147_v37  ;;  %v4412_v37 = vld [vmem:[#allocation2 + $0x1348] sm:$0xff] }
0x1f74   :  { %4168 = vmatpush.msra.mxu0 %v4146_v57 }
0x1f76   :  { %4169 = vmatpush.msra.mxu0 %v4145_v59  ;;  %v4406_v59 = vld [vmem:[#allocation2 + $0x1318] sm:$0xff] }
0x1f78   :  { %4170 = vmatpush.msra.mxu0 %v4144_v23  ;;  %v4404_v23 = vld [vmem:[#allocation2 + $0x1308] sm:$0xff] }
0x1f7a   :  { %4171 = vmatpush.msra.mxu0 %v4143_v50 }
0x1fac   :  { %v3938_v42 = vpop.permute.xlu2 %3937 }
0x1fad   :  { %v3940_v53 = vsub.f32 %v9353_v9, %v3938_v42  ;;  %v4073_v9 = vld [vmem:[#allocation2 + $0x840] sm:$0xff]  ;;  %v4221_v42 = vld [vmem:[#allocation2 + $0x948] sm:$0xff] }
0x1fe2   :  { %v3957_v62 = vpop.permute.xlu0 %3956 }
0x1fe3   :  { %v3959_v44 = vmul.f32 %v3957_v62, %v3940_v53  ;;  %v4220_v53 = vld [vmem:[#allocation2 + $0x940] sm:$0xff]  ;;  %v4218_v62 = vld [vmem:[#allocation2 + $0x930] sm:$0xff] }
0x1fe5   :  { %v3961_v52 = vmul.f32 %v3960_v51, %v3959_v44  ;;  %v4219_v51 = vld [vmem:[#allocation2 + $0x938] sm:$0xff]  ;;  %v4257_v44 = vld [vmem:[#allocation2 + $0x990] sm:$0x3] }
0x1fe7   :  { %v3963_v20 = vadd.f32 %v3962_v26, %v3961_v52  ;;  %v4256_v26 = vld [vmem:[#allocation2 + $0x988] sm:$0xff] }
0x1fe9   :  { %8330 = vmatpush.msk.msra.mxu2 %vm1899_vm11, %v3963_v20  ;;  %8333 = vmatmul.msk.f32.vlgmr.msra.gmra.mxu3 %vm3775_vm5, %v3963_v20 }
0x1fea   :  { %8334 = vmatpush.msk.msrb.mxu1 %vm1899_vm11, %v3963_v20  ;;  %8331 = vmatmul.msk.f32.vlgmr.msra.gmra.mxu2 %vm3510_vm9, %v9331_v4 }
0x1feb   :  { %8335 = vmatmul.msk.f32.vlgmr.msrb.gmra.mxu1 %vm3510_vm9, %v9333_v5  ;;  %4091 = vmatpush.msrb.mxu2 %v4081_v54  ;;  %v4294_v54 = vld [vmem:[#allocation2 + $0x9e8] sm:$0xff] }
0x1fed   :  { %4092 = vmatpush.msrb.mxu2 %v4080_v55  ;;  %v4327_v55 = vld [vmem:[#allocation2 + $0xa38] sm:$0xff] }
0x1fef   :  { %4093 = vmatpush.msrb.mxu2 %v4079_v56  ;;  %v4293_v56 = vld [vmem:[#allocation2 + $0x9e0] sm:$0xff] }
0x1ff1   :  { %4094 = vmatpush.msrb.mxu2 %v4078_v1  ;;  %v4326_v1 = vld [vmem:[#allocation2 + $0xa30] sm:$0xff] }
0x1ff3   :  { %4095 = vmatpush.msrb.mxu2 %v4077_v2  ;;  %v4292_v2 = vld [vmem:[#allocation2 + $0x9d8] sm:$0xff] }
0x1ff5   :  { %4096 = vmatpush.msrb.mxu2 %v4076_v60  ;;  %v4325_v60 = vld [vmem:[#allocation2 + $0xa28] sm:$0xff] }
0x1ff7   :  { %4097 = vmatpush.msrb.mxu2 %v4075_v6  ;;  %v4291_v6 = vld [vmem:[#allocation2 + $0x9d0] sm:$0xff] }
0x1ff9   :  { %4098 = vmatpush.msrb.mxu2 %v4074_v7  ;;  %v4324_v7 = vld [vmem:[#allocation2 + $0xa20] sm:$0xff] }
0x1ffb   :  { %4099 = vmatpush.msrb.mxu2 %v4073_v9  ;;  %v4323_v9 = vld [vmem:[#allocation2 + $0xa18] sm:$0xff] }
0x1ffd   :  { %4100 = vmatpush.msrb.mxu2 %v4072_v10  ;;  %v4289_v10 = vld [vmem:[#allocation2 + $0x9c0] sm:$0xff] }
0x1fff   :  { %4237 = vmatpush.msra.mxu2 %v4227_v15  ;;  %v4319_v15 = vld [vmem:[#allocation2 + $0x9f8] sm:$0xff] }
0x2001   :  { %4238 = vmatpush.msra.mxu2 %v4226_v24 }
0x2003   :  { %4239 = vmatpush.msra.mxu2 %v4225_v48 }
0x2005   :  { %4240 = vmatpush.msra.mxu2 %v4224_v43 }
0x2007   :  { %4241 = vmatpush.msra.mxu2 %v4223_v31  ;;  %v8738_v31 = vld [vmem:[#allocation2 + $0x1138] sm:$0xff] }
0x2009   :  { %4242 = vmatpush.msra.mxu2 %v4222_v39  ;;  %v4411_v39 = vld [vmem:[#allocation2 + $0x1340] sm:$0xff] }
0x200b   :  { %4243 = vmatpush.msra.mxu2 %v4221_v42 }
0x200d   :  { %4244 = vmatpush.msra.mxu2 %v4220_v53 }
0x200f   :  { %4245 = vmatpush.msra.mxu2 %v4219_v51 }
0x2011   :  { %4246 = vmatpush.msra.mxu2 %v4218_v62 }
0x2068   :  { %v4069_v12 = vpop.f32.mrf.mxu1 }
0x2069   :  { %8336 = vmatmul.msk.f32.vlgmr.msrb.gmra.mxu2 %vm3775_vm5, %v4069_v12  ;;  %v4321_v12 = vld [vmem:[#allocation2 + $0xa08] sm:$0xff] }
0x206c   :  { %v4049_v0 = vpop.f32.mrf.mxu3 }
0x206d   :  { %v3994_v13 = vpop.f32.mrf.mxu2 }
0x206e   :  { %8332 = vmatmul.msk.f32.vlgmr.msrb.gmra.mxu0 %vm3775_vm5, %v3994_v13  ;;  %v4287_v13 = vld [vmem:[#allocation2 + $0x9b0] sm:$0xff] }
0x206f   :  { %4334 = vmatpush.msrb.mxu0 %v4327_v55 }
0x2071   :  { %4335 = vmatpush.msrb.mxu0 %v4326_v1  ;;  %v9404_v1 = vld [vmem:[#allocation2 + $0x1130] sm:$0xff] }
0x2073   :  { %4336 = vmatpush.msrb.mxu0 %v4325_v60  ;;  %v4569_v60 = vld [vmem:[#allocation2 + $0xae8] sm:$0xff] }
0x2075   :  { %4337 = vmatpush.msrb.mxu0 %v4324_v7  ;;  %v4567_v7 = vld [vmem:[#allocation2 + $0xad8] sm:$0xff] }
0x2077   :  { %4338 = vmatpush.msrb.mxu0 %v4323_v9 }
0x2079   :  { %4339 = vmatpush.msrb.mxu0 %v4322_v11 }
0x207b   :  { %4340 = vmatpush.msrb.mxu0 %v4321_v12 }
0x207d   :  { %4341 = vmatpush.msrb.mxu0 %v4320_v14 }
0x207f   :  { %4342 = vmatpush.msrb.mxu0 %v4319_v15 }
0x20eb   :  { %v4027_v17 = vpop.f32.mrf.mxu0 }
0x20ec   :  { %v4050_v33 = vadd.f32 %v4049_v0, %v4027_v17  ;;  %v4102_v27 = vpop.f32.mrf.mxu2  ;;  %v4285_v0 = vld [vmem:[#allocation2 + $0x9a0] sm:$0xff]  ;;  %v4318_v17 = vld [vmem:[#allocation2 + $0x9f0] sm:$0xff] }
0x20ed   :  { %4343 = vmatpush.msrb.mxu0 %v4318_v17 }
0x20ee   :  { %v4105_v29 = vadd.f32 %v4102_v27, %v4050_v33 }
0x20f0   :  { %v4108_v49 = vadd.f32 %v8655_v34, %v4105_v29 }
0x20f2   :  { %v4109_v35 = vmax.f32 %v4108_v49, 0.0 }
0x20f4   :  { %8337 = vmatpush.msk.msra.mxu1 %vm1899_vm11, %v4109_v35  ;;  %8341 = vmatpush.msk.msrb.mxu3 %vm1899_vm11, %v4109_v35 }
0x20f5   :  { %8338 = vmatmul.msk.f32.vlgmr.msra.gmra.mxu1 %vm3510_vm9, %v9331_v4  ;;  %8342 = vmatmul.msk.f32.vlgmr.msrb.gmra.mxu3 %vm3510_vm9, %v9333_v5  ;;  %v4114_v4 = vld [vmem:[#allocation2 + $0x900] sm:$0xff]  ;;  %v4112_v5 = vld [vmem:[#allocation2 + $0x8f0] sm:$0xff] }
0x20f6   :  { %4184 = vmatpush.msrb.mxu1 %v4119_v36  ;;  %8344 = vmatpush.msk.msra.mxu3 %vm75_vm0, %v4257_v44 }
0x20f8   :  { %4185 = vmatpush.msrb.mxu1 %v4118_v40  ;;  %4278 = vmatpush.msra.mxu3 %v4256_v26  ;;  %v4283_v40 = vld [vmem:[#allocation2 + $0x12a0] sm:$0xff] }
0x20fa   :  { %4186 = vmatpush.msrb.mxu1 %v4117_v58  ;;  %4304 = vmatpush.msrb.mxu3 %v4294_v54  ;;  %v4407_v58 = vld [vmem:[#allocation2 + $0x1320] sm:$0xff] }
0x20fc   :  { %4187 = vmatpush.msrb.mxu1 %v4116_v61  ;;  %4305 = vmatpush.msrb.mxu3 %v4293_v56  ;;  %v4405_v61 = vld [vmem:[#allocation2 + $0x1310] sm:$0xff] }
0x20fd   :  { %8345 = vmatmul.msk.f32.vlgmr.msra.gmra.mxu3 %vm71_vm1, %v9315_v8  ;;  %v4290_v8 = vld [vmem:[#allocation2 + $0x9c8] sm:$0xff] }
0x20fe   :  { %4188 = vmatpush.msrb.mxu1 %v4115_v25  ;;  %4306 = vmatpush.msrb.mxu3 %v4292_v2  ;;  %v4403_v25 = vld [vmem:[#allocation2 + $0x1300] sm:$0xff]  ;;  %v4570_v2 = vld [vmem:[#allocation2 + $0xaf0] sm:$0xff] }
0x2100   :  { %4189 = vmatpush.msrb.mxu1 %v4114_v4  ;;  %4307 = vmatpush.msrb.mxu3 %v4291_v6  ;;  %v4410_v4 = vld [vmem:[#allocation2 + $0x1338] sm:$0xff]  ;;  %v4568_v6 = vld [vmem:[#allocation2 + $0xae0] sm:$0xff] }
0x2102   :  { %4190 = vmatpush.msrb.mxu1 %v4113_v63  ;;  %4308 = vmatpush.msrb.mxu3 %v4290_v8  ;;  %v4409_v63 = vld [vmem:[#allocation2 + $0x1330] sm:$0xff] }
0x2104   :  { %4191 = vmatpush.msrb.mxu1 %v4112_v5  ;;  %4309 = vmatpush.msrb.mxu3 %v4289_v10  ;;  %v4408_v5 = vld [vmem:[#allocation2 + $0x1328] sm:$0xff]  ;;  %v4566_v10 = vld [vmem:[#allocation2 + $0xad0] sm:$0xff] }
0x2106   :  { %4192 = vmatpush.msrb.mxu1 %v4111_v46  ;;  %4310 = vmatpush.msrb.mxu3 %v4288_v22 }
0x2108   :  { %4193 = vmatpush.msrb.mxu1 %v4110_v41  ;;  %4311 = vmatpush.msrb.mxu3 %v4287_v13  ;;  %v8658_v41 = vld [vmem:[#allocation2 + $0xa40] ss:$0 sm:$0xff]  ;;  %v4565_v13 = vld [vmem:[#allocation2 + $0xac8] sm:$0xff] }
0x2109   :  { %8340 = vmatmul.msk.f32.vlgmr.msrb.gmra.mxu1 %vm3775_vm5, %v4109_v35  ;;  %v4284_v35 = vld [vmem:[#allocation2 + $0x12a8] sm:$0xff] }
0x210a   :  { %4312 = vmatpush.msrb.mxu3 %v4286_v30 }
0x210c   :  { %4313 = vmatpush.msrb.mxu3 %v4285_v0 }
0x2172   :  { %v4140_v52 = vpop.f32.mrf.mxu1 }
0x2173   :  { %8339 = vmatmul.msk.f32.vlgmr.msra.gmra.mxu0 %vm3775_vm5, %v4140_v52 }
0x2178   :  { %v4215_v20 = vpop.f32.mrf.mxu3 }
0x2179   :  { %8343 = vmatmul.msk.f32.vlgmr.msra.gmra.mxu2 %vm3775_vm5, %v4215_v20 }
0x2180   :  { %v4280_v24 = vpop.f32.mrf.mxu3 }
0x2181   :  { %v4281_v33 = vadd.f32 %v8657_v21, %v4280_v24 }
0x2183   :  { %8354 = vmatpush.msk.msra.mxu3 %vm75_vm0, %v4281_v33 }
0x2186   :  { %v4195_v34 = vpop.f32.mrf.mxu1 }
0x21f0   :  { %v4173_v27 = vpop.f32.mrf.mxu0 }
0x21f1   :  { %v4196_v48 = vadd.f32 %v4195_v34, %v4173_v27  ;;  %v4564_v34 = vld [vmem:[#allocation2 + $0xac0] sm:$0xff] }
0x21fc   :  { %v4248_v29 = vpop.f32.mrf.mxu2 }
0x21fd   :  { %v4251_v43 = vadd.f32 %v4248_v29, %v4196_v48  ;;  %v4563_v48 = vld [vmem:[#allocation2 + $0xab8] sm:$0xff]  ;;  %v4561_v29 = vld [vmem:[#allocation2 + $0xaa8] sm:$0xff] }
0x21ff   :  { %v4254_v47 = vadd.f32 %v8656_v28, %v4251_v43  ;;  %v4562_v28 = vld [vmem:[#allocation2 + $0xab0] sm:$0xff]  ;;  %v4600_v43 = vld [vmem:[#allocation2 + $0xaa0] sm:$0xff] }
0x2201   :  { %v4255_v49 = vmax.f32 %v4254_v47, 0.0  ;;  %v4599_v47 = vld [vmem:[#allocation2 + $0xa98] sm:$0xff] }
0x2203   :  { %8346 = vmatmul.msk.f32.vlgmr.msrb.gmra.mxu3 %vm3775_vm5, %v4255_v49  ;;  %8347 = vmatmul.msk.f32.vlgmr.msrb.gmra.mxu0 %vm3775_vm5, %v4255_v49  ;;  %v4598_v49 = vld [vmem:[#allocation2 + $0xa90] sm:$0xff] }
0x2204   :  { %4610 = vmatpush.msrb.mxu3 %v4600_v43 }
0x2206   :  { %4611 = vmatpush.msrb.mxu3 %v4599_v47 }
0x2208   :  { %4612 = vmatpush.msrb.mxu3 %v4598_v49 }
0x220b   :  { %8355 = vmatmul.msk.f32.vlgmr.msra.gmra.mxu3 %vm106_vm2, %v8738_v31  ;;  %v4597_v31 = vld [vmem:[#allocation2 + $0xa88] sm:$0xff] }
0x220c   :  { %4613 = vmatpush.msrb.mxu3 %v4597_v31  ;;  %v8660_v31 = vld [vmem:[#allocation2 + $0xbc8] ss:$0 sm:$0xff] }
0x2280   :  { %v4345_v36 = vpop.f32.mrf.mxu0 }
0x2281   :  { %8348 = vmatpush.msk.msra.mxu1 %vm1899_vm11, %v4345_v36  ;;  %v4595_v36 = vld [vmem:[#allocation2 + $0xa78] sm:$0xff] }
0x2282   :  { %8349 = vmatmul.msk.f32.vlgmr.msra.gmra.mxu1 %vm3510_vm9, %v4284_v35  ;;  %v4596_v35 = vld [vmem:[#allocation2 + $0xa80] sm:$0xff] }
0x2283   :  { %4427 = vmatpush.msrb.mxu1 %v4412_v37  ;;  %4614 = vmatpush.msrb.mxu3 %v4596_v35 }
0x2285   :  { %4428 = vmatpush.msrb.mxu1 %v4411_v39  ;;  %4615 = vmatpush.msrb.mxu3 %v4595_v36 }
0x2286   :  { %v4315_v57 = vpop.f32.mrf.mxu3 }
0x2287   :  { %8350 = vmatpush.msk.msrb.mxu2 %vm1899_vm11, %v4315_v57  ;;  %4429 = vmatpush.msrb.mxu1 %v4410_v4  ;;  %v9412_v4 = vld [vmem:[#allocation2 + $0x1120] sm:$0xff] }
0x2288   :  { %8351 = vmatmul.msk.f32.vlgmr.msrb.gmra.mxu2 %vm3510_vm9, %v4283_v40  ;;  %v4557_v40 = vld [vmem:[#allocation2 + $0xa48] sm:$0xff] }
0x2289   :  { %4450 = vmatpush.msra.mxu2 %v4407_v58  ;;  %4430 = vmatpush.msrb.mxu1 %v4409_v63  ;;  %v4675_v63 = vld [vmem:[#allocation2 + $0xb38] sm:$0xff] }
0x228b   :  { %4451 = vmatpush.msra.mxu2 %v4406_v59  ;;  %4431 = vmatpush.msrb.mxu1 %v4408_v5  ;;  %v4559_v59 = vld [vmem:[#allocation2 + $0xa50] sm:$0xff]  ;;  %v9416_v5 = vld [vmem:[#allocation2 + $0x1128] sm:$0xff] }
0x228d   :  { %4452 = vmatpush.msra.mxu2 %v4405_v61 }
0x228e   :  { %v4479_v44 = vpop.f32.mrf.mxu3 }
0x228f   :  { %4453 = vmatpush.msra.mxu2 %v4404_v23 }
0x2291   :  { %4454 = vmatpush.msra.mxu2 %v4403_v25  ;;  %v4676_v25 = vld [vmem:[#allocation2 + $0xb40] sm:$0xff] }
0x2292   :  { %8353 = vmatmul.msk.f32.vlgmr.msra.gmra.mxu2 %vm2909_vm14, %v9305_v3 }
0x22ff   :  { %v4371_v46 = vpop.f32.mrf.mxu1 }
0x230b   :  { %v4397_v50 = vpop.f32.mrf.mxu2 }
0x230c   :  { %v4398_v42 = vadd.f32 %v4397_v50, %v4371_v46  ;;  %v4674_v46 = vld [vmem:[#allocation2 + $0xb30] sm:$0xff]  ;;  %v4672_v50 = vld [vmem:[#allocation2 + $0xb20] sm:$0xff] }
0x230e   :  { %v4402_v53 = vadd.f32 %v8658_v41, %v4398_v42  ;;  %v4673_v41 = vld [vmem:[#allocation2 + $0xb28] sm:$0xff]  ;;  %v4594_v42 = vld [vmem:[#allocation2 + $0xa70] sm:$0xff] }
0x230f   :  { %4616 = vmatpush.msrb.mxu3 %v4594_v42 }
0x2310   :  { %8352 = vmatmul.msk.f32.vlgmr.msrb.gmra.mxu1 %vm2909_vm14, %v4402_v53  ;;  %v4671_v53 = vld [vmem:[#allocation2 + $0xb18] sm:$0xff] }
0x2315   :  { %v4456_v51 = vpop.f32.mrf.mxu2 }
0x238d   :  { %v4433_v62 = vpop.f32.mrf.mxu1 }
0x238e   :  { %v4457_v26 = vadd.f32 %v4456_v51, %v4433_v62  ;;  %v4593_v51 = vld [vmem:[#allocation2 + $0xa68] sm:$0xff]  ;;  %v4670_v62 = vld [vmem:[#allocation2 + $0xb10] sm:$0xff] }
0x238f   :  { %4617 = vmatpush.msrb.mxu3 %v4593_v51 }
0x2390   :  { %v9397_v52 = vadd.f32 %v4479_v44, %v4457_v26  ;;  %v4592_v44 = vld [vmem:[#allocation2 + $0xa60] sm:$0xff]  ;;  %v4669_v26 = vld [vmem:[#allocation2 + $0xb08] sm:$0xff] }
0x2391   :  { %4618 = vmatpush.msrb.mxu3 %v4592_v44 }
0x2392   :  { %v4483_v3 = vsel %vm3775_vm5, %v9397_v52, 0.0  ;;  %v4507_v20 = vmul.f32 %v9397_v52, %v9397_v52 }
0x2393   :  { %4484 = vadd.xlane.f32.xlu2 %v4483_v3  ;;  %v4668_v3 = vld [vmem:[#allocation2 + $0xb00] sm:$0xff] }
0x2394   :  { %v4508_v54 = vsel %vm3775_vm5, %v4507_v20, 0.0  ;;  %v4667_v20 = vld [vmem:[#allocation2 + $0xaf8] sm:$0xff] }
0x2395   :  { %4509 = vadd.xlane.f32.xlu0 %v4508_v54 }
0x2406   :  { %v4485_v55 = vpop.xlane.xlu2 %4484 }
0x2407   :  { %4501 = vmatpush.msra.mxu0 %v4485_v55 }
0x2408   :  { %v4510_v56 = vpop.xlane.xlu0 %4509  ;;  %8356 = vmatmul.msk.f32.vlgmr.msra.gmra.mxu0 %vm2662_vm8, %v9404_v1 }
0x2409   :  { %4526 = vmatpush.msra.mxu1 %v4510_v56  ;;  %4633 = vmatpush.msrb.mxu0 %v4570_v2  ;;  %v4709_v56 = vld [vmem:[#allocation2 + $0xb98] sm:$0xff]  ;;  %v4708_v2 = vld [vmem:[#allocation2 + $0xb90] sm:$0xff] }
0x240a   :  { %8357 = vmatmul.msk.f32.vlgmr.msra.gmra.mxu1 %vm2662_vm8, %v9404_v1 }
0x240b   :  { %4634 = vmatpush.msrb.mxu0 %v4569_v60  ;;  %v4707_v60 = vld [vmem:[#allocation2 + $0xb88] sm:$0xff] }
0x240d   :  { %4635 = vmatpush.msrb.mxu0 %v4568_v6  ;;  %v4706_v6 = vld [vmem:[#allocation2 + $0xb80] sm:$0xff] }
0x240f   :  { %4636 = vmatpush.msrb.mxu0 %v4567_v7  ;;  %v4705_v7 = vld [vmem:[#allocation2 + $0xb78] sm:$0xff] }
0x2411   :  { %4637 = vmatpush.msrb.mxu0 %v4566_v10  ;;  %v4803_v10 = vld [vmem:[#allocation2 + $0xbb0] sm:$0xff] }
0x2413   :  { %4638 = vmatpush.msrb.mxu0 %v4565_v13 }
0x2415   :  { %4639 = vmatpush.msrb.mxu0 %v4564_v34  ;;  %v4730_v34 = vld [vmem:[#allocation2 + $0xb50] sm:$0xff] }
0x2417   :  { %4640 = vmatpush.msrb.mxu0 %v4563_v48  ;;  %v4801_v48 = vld [vmem:[#allocation2 + $0xba0] sm:$0xff] }
0x2419   :  { %4641 = vmatpush.msrb.mxu0 %v4562_v28 }
0x241b   :  { %4642 = vmatpush.msrb.mxu0 %v4561_v29 }
0x2485   :  { %v4503_v8 = vpop.f32.mrf.mxu0 }
0x2486   :  { %v4506_v9 = vmul.f32 0.003125, %v4503_v8  ;;  %v4805_v8 = vld [vmem:[#allocation2 + $0xbc0] sm:$0xff] }
0x2487   :  { %v4528_v11 = vpop.f32.mrf.mxu1 }
0x2488   :  { %v4538_v22 = vmul.f32 %v4506_v9, %v4506_v9  ;;  %v4531_v12 = vmul.f32 0.003125, %v4528_v11  ;;  %4534 = vperm.xlu1 %8625, %v4506_v9   ;;  %v4804_v9 = vld [vmem:[#allocation2 + $0xbb8] sm:$0xff]  ;;  %v4802_v11 = vld [vmem:[#allocation2 + $0xba8] sm:$0xff] }
0x248a   :  { %v4539_v14 = vsub.f32 %v4531_v12, %v4538_v22 }
0x248c   :  { %v4540_v30 = vadd.f32 1e-05, %v4539_v14 }
0x248e   :  { %8708 = vrsqrt.f32 %v4540_v30  ;;  %vm4547_vm15 = vweird.f32 %v4540_v30 }
0x2494   :  { %v8709_v15 = vpop.eup %8708 }
0x2495   :  { %v4542_v0 = vmul.f32 %v8709_v15, %v4540_v30  ;;  %vm4548_vm9 = vweird.f32 %v8709_v15  ;;  %v8659_v30 = vld [vmem:[#allocation2 + $0xb48] ss:$0 sm:$0xff] }
0x2496   :  { %vm4549_vm6 = vmor %vm4547_vm15, %vm4548_vm9 }
0x2497   :  { %v4543_v17 = vmul.f32 %v8709_v15, %v4542_v0 }
0x2499   :  { %v4544_v21 = vmul.f32 0.5, %v4543_v17 }
0x249b   :  { %v4545_v24 = vsub.f32 1.5, %v4544_v21  ;;  %v4734_v21 = vld [vmem:[#allocation2 + $0xb70] sm:$0xff] }
0x249d   :  { %v4546_v33 = vmul.f32 %v8709_v15, %v4545_v24  ;;  %v4733_v24 = vld [vmem:[#allocation2 + $0xb68] sm:$0xff] }
0x249f   :  { %v4550_v27 = vsel %vm4549_vm6, %v8709_v15, %v4546_v33  ;;  %v4732_v33 = vld [vmem:[#allocation2 + $0xb60] sm:$0xff] }
0x24a0   :  { %4553 = vperm.xlu2 %8624, %v4550_v27   ;;  %v4731_v27 = vld [vmem:[#allocation2 + $0xb58] sm:$0xff] }
0x24fa   :  { %v4535_v37 = vpop.permute.xlu1 %4534  ;;  %v4554_v57 = vpop.permute.xlu2 %4553 }
0x24fb   :  { %v4537_v39 = vsub.f32 %v9397_v52, %v4535_v37  ;;  %v4591_v52 = vld [vmem:[#allocation2 + $0xa58] sm:$0xff] }
0x24fc   :  { %4619 = vmatpush.msrb.mxu3 %v4591_v52 }
0x24fd   :  { %v4556_v58 = vmul.f32 %v4554_v57, %v4537_v39 }
0x24fe   :  { %4772 = vmatpush.msra.mxu3 %v4709_v56  ;;  %v4912_v56 = vld [vmem:[#allocation2 + $0xc08] sm:$0xff] }
0x24ff   :  { %v4558_v61 = vmul.f32 %v4557_v40, %v4556_v58 }
0x2500   :  { %4773 = vmatpush.msra.mxu3 %v4708_v2  ;;  %v4941_v2 = vld [vmem:[#allocation2 + $0xc00] sm:$0xff] }
0x2501   :  { %v4560_v23 = vadd.f32 %v4559_v59, %v4558_v61 }
0x2502   :  { %4774 = vmatpush.msra.mxu3 %v4707_v60  ;;  %v4940_v60 = vld [vmem:[#allocation2 + $0xbf8] sm:$0xff] }
0x2503   :  { %4586 = vmatpush.msrb.mxu2 %v4560_v23  ;;  %8360 = vmatmul.msk.f32.vlgmr.msrb.gmra.mxu0 %vm3775_vm5, %v4560_v23 }
0x2504   :  { %4662 = vmatpush.msrb.mxu1 %v4560_v23  ;;  %8358 = vmatmul.msk.f32.vlgmr.msrb.gmra.mxu2 %vm2662_vm8, %v9412_v4 }
0x2505   :  { %8361 = vmatmul.msk.f32.vlgmr.msrb.gmra.mxu1 %vm2662_vm8, %v9416_v5  ;;  %4686 = vmatpush.msra.mxu2 %v4676_v25 }
0x2506   :  { %4775 = vmatpush.msra.mxu3 %v4706_v6  ;;  %v4939_v6 = vld [vmem:[#allocation2 + $0xbf0] sm:$0xff] }
0x2507   :  { %4687 = vmatpush.msra.mxu2 %v4675_v63 }
0x2508   :  { %4776 = vmatpush.msra.mxu3 %v4705_v7 }
0x2509   :  { %4688 = vmatpush.msra.mxu2 %v4674_v46 }
0x250b   :  { %4689 = vmatpush.msra.mxu2 %v4673_v41 }
0x250d   :  { %4690 = vmatpush.msra.mxu2 %v4672_v50 }
0x250f   :  { %4691 = vmatpush.msra.mxu2 %v4671_v53 }
0x2511   :  { %4692 = vmatpush.msra.mxu2 %v4670_v62 }
0x2513   :  { %4693 = vmatpush.msra.mxu2 %v4669_v26 }
0x2515   :  { %4694 = vmatpush.msra.mxu2 %v4668_v3 }
0x2517   :  { %4695 = vmatpush.msra.mxu2 %v4667_v20  ;;  %v4915_v20 = vld [vmem:[#allocation2 + $0xc20] sm:$0xff] }
0x2519   :  { %4820 = vmatpush.msrb.mxu2 %v4805_v8 }
0x251b   :  { %4821 = vmatpush.msrb.mxu2 %v4804_v9  ;;  %v4908_v9 = vld [vmem:[#allocation2 + $0xbd0] sm:$0xff] }
0x251d   :  { %4822 = vmatpush.msrb.mxu2 %v4803_v10 }
0x251f   :  { %4823 = vmatpush.msrb.mxu2 %v4802_v11 }
0x2521   :  { %4824 = vmatpush.msrb.mxu2 %v4801_v48  ;;  %v5044_v48 = vld [vmem:[#allocation2 + $0xca0] sm:$0xff] }
0x2580   :  { %v4644_v22 = vpop.f32.mrf.mxu0 }
0x2582   :  { %v4664_v54 = vpop.f32.mrf.mxu1 }
0x2583   :  { %8362 = vmatmul.msk.f32.vlgmr.msra.gmra.mxu2 %vm3775_vm5, %v4664_v54  ;;  %v4914_v54 = vld [vmem:[#allocation2 + $0xc18] sm:$0xff] }
0x2587   :  { %v4588_v55 = vpop.f32.mrf.mxu2 }
0x2588   :  { %8359 = vmatmul.msk.f32.vlgmr.msrb.gmra.mxu3 %vm3775_vm5, %v4588_v55  ;;  %v4913_v55 = vld [vmem:[#allocation2 + $0xc10] sm:$0xff] }
0x2606   :  { %v4697_v13 = vpop.f32.mrf.mxu2 }
0x260b   :  { %v4621_v12 = vpop.f32.mrf.mxu3 }
0x260c   :  { %v4645_v14 = vadd.f32 %v4644_v22, %v4621_v12  ;;  %v4910_v22 = vld [vmem:[#allocation2 + $0xbd8] sm:$0xff] }
0x260e   :  { %v4700_v15 = vadd.f32 %v4697_v13, %v4645_v14  ;;  %v5012_v14 = vld [vmem:[#allocation2 + $0xc50] sm:$0xff] }
0x2610   :  { %v4703_v0 = vadd.f32 %v8659_v30, %v4700_v15  ;;  %v5011_v30 = vld [vmem:[#allocation2 + $0xc48] sm:$0xff]  ;;  %v5010_v15 = vld [vmem:[#allocation2 + $0xc40] sm:$0xff] }
0x2612   :  { %v4704_v17 = vmax.f32 %v4703_v0, 0.0  ;;  %v5009_v0 = vld [vmem:[#allocation2 + $0xc38] sm:$0xff] }
0x2614   :  { %4725 = vmatpush.msra.mxu1 %v4704_v17  ;;  %8365 = vmatmul.msk.f32.vlgmr.msra.gmra.mxu3 %vm2909_vm14, %v4704_v17 }
0x2615   :  { %4796 = vmatpush.msra.mxu0 %v4704_v17  ;;  %8363 = vmatmul.msk.f32.vlgmr.msra.gmra.mxu1 %vm2662_vm8, %v9412_v4  ;;  %v5008_v17 = vld [vmem:[#allocation2 + $0xc30] sm:$0xff] }
0x2616   :  { %8366 = vmatmul.msk.f32.vlgmr.msra.gmra.mxu0 %vm2662_vm8, %v9416_v5  ;;  %4749 = vmatpush.msrb.mxu1 %v4734_v21  ;;  %v4938_v21 = vld [vmem:[#allocation2 + $0xbe8] sm:$0xff] }
0x2618   :  { %4750 = vmatpush.msrb.mxu1 %v4733_v24  ;;  %v4937_v24 = vld [vmem:[#allocation2 + $0xbe0] sm:$0xff] }
0x261a   :  { %4751 = vmatpush.msrb.mxu1 %v4732_v33 }
0x261c   :  { %4752 = vmatpush.msrb.mxu1 %v4731_v27 }
0x261e   :  { %4753 = vmatpush.msrb.mxu1 %v4730_v34  ;;  %v5045_v34 = vld [vmem:[#allocation2 + $0xca8] sm:$0xff] }
0x2692   :  { %v4727_v28 = vpop.f32.mrf.mxu1 }
0x2693   :  { %v4798_v29 = vpop.f32.mrf.mxu0  ;;  %8364 = vmatmul.msk.f32.vlgmr.msrb.gmra.mxu1 %vm2909_vm14, %v4727_v28  ;;  %v5043_v28 = vld [vmem:[#allocation2 + $0xc98] sm:$0xff] }
0x2694   :  { %8367 = vmatmul.msk.f32.vlgmr.msrb.gmra.mxu2 %vm2909_vm14, %v4798_v29  ;;  %v5042_v29 = vld [vmem:[#allocation2 + $0xc90] sm:$0xff] }
0x2697   :  { %v4778_v47 = vpop.f32.mrf.mxu3 }
0x2710   :  { %v4755_v43 = vpop.f32.mrf.mxu1 }
0x2711   :  { %v4779_v49 = vadd.f32 %v4778_v47, %v4755_v43  ;;  %v5041_v43 = vld [vmem:[#allocation2 + $0xc88] sm:$0xff]  ;;  %v5070_v47 = vld [vmem:[#allocation2 + $0xc80] sm:$0xff] }
0x2717   :  { %v4826_v35 = vpop.f32.mrf.mxu2 }
0x2718   :  { %v4829_v36 = vadd.f32 %v4826_v35, %v4779_v49  ;;  %v5069_v49 = vld [vmem:[#allocation2 + $0xc78] sm:$0xff]  ;;  %v5067_v35 = vld [vmem:[#allocation2 + $0xc68] sm:$0xff] }
0x271a   :  { %v4832_v37 = vadd.f32 %v8660_v31, %v4829_v36  ;;  %v5068_v31 = vld [vmem:[#allocation2 + $0xc70] sm:$0xff] }
0x271c   :  { %v4833_v39 = vmax.f32 %v4832_v37, 0.0 }
0x271e   :  { %v4834_v40 = vsel %vm2909_vm14, %v4833_v39, 0.0  ;;  %v4858_v57 = vmul.f32 %v4833_v39, %v4833_v39 }
0x271f   :  { %4835 = vadd.xlane.f32.xlu1 %v4834_v40 }
0x2720   :  { %v4859_v58 = vsel %vm2909_vm14, %v4858_v57, 0.0  ;;  %v8661_v57 = vld [vmem:[#allocation2 + $0xc58] ss:$0 sm:$0xff] }
0x2721   :  { %4860 = vadd.xlane.f32.xlu0 %v4859_v58 }
0x2792   :  { %v4836_v59 = vpop.xlane.xlu1 %4835 }
0x2793   :  { %4852 = vmatpush.msra.mxu1 %v4836_v59 }
0x2794   :  { %v4861_v61 = vpop.xlane.xlu0 %4860  ;;  %8368 = vmatmul.msk.f32.vlgmr.msra.gmra.mxu1 %vm2662_vm8, %v9404_v1 }
0x2795   :  { %4877 = vmatpush.msrb.mxu0 %v4861_v61  ;;  %4956 = vmatpush.msrb.mxu1 %v4941_v2  ;;  %v5171_v2 = vld [vmem:[#allocation2 + $0xce8] sm:$0x3] }
0x2796   :  { %8369 = vmatmul.msk.f32.vlgmr.msrb.gmra.mxu0 %vm2662_vm8, %v9404_v1  ;;  %v4916_v1 = vld [vmem:[#allocation2 + $0xc28] sm:$0xff] }
0x2797   :  { %4979 = vmatpush.msra.mxu2 %v4916_v1  ;;  %4957 = vmatpush.msrb.mxu1 %v4940_v60  ;;  %v5201_v1 = vld [vmem:[#allocation2 + $0xcf8] sm:$0xff]  ;;  %v5170_v60 = vld [vmem:[#allocation2 + $0xce0] sm:$0xff] }
0x2799   :  { %4980 = vmatpush.msra.mxu2 %v4915_v20  ;;  %4958 = vmatpush.msrb.mxu1 %v4939_v6  ;;  %v5229_v20 = vld [vmem:[#allocation2 + $0xd20] sm:$0xff] }
0x279a   :  { %v9454_v6 = vld [vmem:[%s9923_s1] sm:$0x3] }
0x279b   :  { %4981 = vmatpush.msra.mxu2 %v4914_v54  ;;  %4959 = vmatpush.msrb.mxu1 %v4938_v21  ;;  %v5318_v54 = vld [vmem:[#allocation2 + $0x12e0] sm:$0xf] }
0x279d   :  { %4982 = vmatpush.msra.mxu2 %v4913_v55  ;;  %4960 = vmatpush.msrb.mxu1 %v4937_v24  ;;  %v5317_v55 = vld [vmem:[#allocation2 + $0x12d8] sm:$0xff] }
0x279f   :  { %4983 = vmatpush.msra.mxu2 %v4912_v56  ;;  %5085 = vmatpush.msra.mxu1 %v5070_v47  ;;  %v5316_v56 = vld [vmem:[#allocation2 + $0x12d0] sm:$0xff] }
0x27a1   :  { %5108 = vmatpush.msrb.mxu2 %v5045_v34  ;;  %5086 = vmatpush.msra.mxu1 %v5069_v49  ;;  %v5321_v34 = vld [vmem:[#allocation2 + $0x12f8] sm:$0xf] }
0x27a3   :  { %5109 = vmatpush.msrb.mxu2 %v5044_v48  ;;  %5087 = vmatpush.msra.mxu1 %v5068_v31  ;;  %v5320_v48 = vld [vmem:[#allocation2 + $0x12f0] sm:$0xff] }
0x27a5   :  { %5110 = vmatpush.msrb.mxu2 %v5043_v28  ;;  %5088 = vmatpush.msra.mxu1 %v5067_v35  ;;  %v5319_v28 = vld [vmem:[#allocation2 + $0x12e8] sm:$0xff] }
0x27a7   :  { %5111 = vmatpush.msrb.mxu2 %v5042_v29  ;;  %v8664_v29 = vld [vmem:[#allocation2 + $0xd48] ss:$0 sm:$0xff] }
0x27a9   :  { %5112 = vmatpush.msrb.mxu2 %v5041_v43 }
0x2811   :  { %v4854_v23 = vpop.f32.mrf.mxu1 }
0x2812   :  { %v4857_v25 = vmul.f32 0.00625, %v4854_v23  ;;  %v5141_v23 = vld [vmem:[#allocation2 + $0xcd0] sm:$0xff] }
0x2813   :  { %v4879_v63 = vpop.f32.mrf.mxu0 }
0x2814   :  { %v4889_v46 = vmul.f32 %v4857_v25, %v4857_v25  ;;  %v4882_v41 = vmul.f32 0.00625, %v4879_v63  ;;  %4885 = vperm.xlu2 %8624, %v4857_v25   ;;  %v5066_v25 = vld [vmem:[#allocation2 + $0xc60] sm:$0xff]  ;;  %v5140_v63 = vld [vmem:[#allocation2 + $0xcc8] sm:$0xff] }
0x2815   :  { %5089 = vmatpush.msra.mxu1 %v5066_v25 }
0x2816   :  { %v4890_v50 = vsub.f32 %v4882_v41, %v4889_v46  ;;  %v5139_v46 = vld [vmem:[#allocation2 + $0xcc0] sm:$0xff]  ;;  %v5138_v41 = vld [vmem:[#allocation2 + $0xcb8] sm:$0xff] }
0x2818   :  { %v4891_v42 = vadd.f32 1e-05, %v4890_v50  ;;  %v5137_v50 = vld [vmem:[#allocation2 + $0xcb0] sm:$0xff] }
0x281a   :  { %8710 = vrsqrt.f32 %v4891_v42  ;;  %vm4898_vm7 = vweird.f32 %v4891_v42 }
0x2820   :  { %v8711_v53 = vpop.eup %8710 }
0x2821   :  { %v4893_v51 = vmul.f32 %v8711_v53, %v4891_v42  ;;  %vm4899_vm5 = vweird.f32 %v8711_v53 }
0x2822   :  { %vm4900_vm10 = vmor %vm4898_vm7, %vm4899_vm5 }
0x2823   :  { %v4894_v62 = vmul.f32 %v8711_v53, %v4893_v51  ;;  %v5233_v51 = vld [vmem:[#allocation2 + $0xd40] sm:$0xff] }
0x2825   :  { %v4895_v44 = vmul.f32 0.5, %v4894_v62  ;;  %v5232_v62 = vld [vmem:[#allocation2 + $0xd38] sm:$0xff] }
0x2827   :  { %v4896_v26 = vsub.f32 1.5, %v4895_v44  ;;  %v5203_v44 = vld [vmem:[#allocation2 + $0xd08] sm:$0xff] }
0x2829   :  { %v4897_v52 = vmul.f32 %v8711_v53, %v4896_v26  ;;  %v5231_v26 = vld [vmem:[#allocation2 + $0xd30] sm:$0xff] }
0x282b   :  { %v4901_v3 = vsel %vm4900_vm10, %v8711_v53, %v4897_v52  ;;  %v5202_v52 = vld [vmem:[#allocation2 + $0xd00] sm:$0xff] }
0x282c   :  { %4904 = vperm.xlu0 %8626, %v4901_v3   ;;  %v5230_v3 = vld [vmem:[#allocation2 + $0xd28] sm:$0xff] }
0x286e   :  { %v4886_v7 = vpop.permute.xlu2 %4885 }
0x286f   :  { %v4888_v8 = vsub.f32 %v4833_v39, %v4886_v7 }
0x289e   :  { %v4905_v10 = vpop.permute.xlu0 %4904 }
0x289f   :  { %v4907_v11 = vmul.f32 %v4905_v10, %v4888_v8  ;;  %v8662_v10 = vld [vmem:[#allocation2 + $0xcd8] ss:$0 sm:$0xff] }
0x28a1   :  { %v4909_v12 = vmul.f32 %v4908_v9, %v4907_v11 }
0x28a3   :  { %v4911_v13 = vadd.f32 %v4910_v22, %v4909_v12 }
0x28a5   :  { %4932 = vmatpush.msrb.mxu3 %v4911_v13  ;;  %8372 = vmatmul.msk.f32.vlgmr.msra.gmra.mxu2 %vm2909_vm14, %v4911_v13 }
0x28a6   :  { %5003 = vmatpush.msra.mxu0 %v4911_v13  ;;  %8370 = vmatmul.msk.f32.vlgmr.msrb.gmra.mxu3 %vm2662_vm8, %v9412_v4 }
0x28a7   :  { %8373 = vmatmul.msk.f32.vlgmr.msra.gmra.mxu0 %vm2662_vm8, %v9416_v5  ;;  %5027 = vmatpush.msra.mxu3 %v5012_v14  ;;  %v8663_v14 = vld [vmem:[#allocation2 + $0xcf0] ss:$0 sm:$0xff] }
0x28a9   :  { %5028 = vmatpush.msra.mxu3 %v5011_v30 }
0x28ab   :  { %5029 = vmatpush.msra.mxu3 %v5010_v15  ;;  %v5199_v15 = vld [vmem:[#allocation2 + $0x1290] sm:$0xff] }
0x28ad   :  { %5030 = vmatpush.msra.mxu3 %v5009_v0  ;;  %v5197_v0 = vld [vmem:[#allocation2 + $0x1280] sm:$0xff] }
0x28af   :  { %5031 = vmatpush.msra.mxu3 %v5008_v17 }
0x2924   :  { %v5005_v33 = vpop.f32.mrf.mxu0 }
0x2925   :  { %8374 = vmatmul.msk.f32.vlgmr.msra.gmra.mxu3 %vm2909_vm14, %v5005_v33  ;;  %v5200_v33 = vld [vmem:[#allocation2 + $0x1298] sm:$0xff] }
0x2928   :  { %v4985_v36 = vpop.f32.mrf.mxu2 }
0x2929   :  { %v4934_v27 = vpop.f32.mrf.mxu3 }
0x292a   :  { %8371 = vmatmul.msk.f32.vlgmr.msrb.gmra.mxu1 %vm2909_vm14, %v4934_v27  ;;  %v8744_v27 = vld [vmem:[#allocation2 + $0x1178] sm:$0xff] }
0x292b   :  { %8380 = vmatpush.msk.msrb.mxu1 %vm75_vm0, %v5171_v2 }
0x292d   :  { %5192 = vmatpush.msrb.mxu1 %v5170_v60 }
0x29a7   :  { %v4962_v37 = vpop.f32.mrf.mxu1 }
0x29a8   :  { %v4986_v39 = vadd.f32 %v4985_v36, %v4962_v37  ;;  %v5033_v40 = vpop.f32.mrf.mxu3 }
0x29aa   :  { %v5036_v58 = vadd.f32 %v5033_v40, %v4986_v39 }
0x29ac   :  { %v5039_v59 = vadd.f32 %v8661_v57, %v5036_v58 }
0x29ae   :  { %v5040_v61 = vmax.f32 %v5039_v59, 0.0 }
0x29b0   :  { %5061 = vmatpush.msrb.mxu0 %v5040_v61  ;;  %8377 = vmatmul.msk.f32.vlgmr.msrb.gmra.mxu2 %vm2909_vm14, %v5040_v61 }
0x29b1   :  { %5132 = vmatpush.msrb.mxu3 %v5040_v61  ;;  %8375 = vmatmul.msk.f32.vlgmr.msrb.gmra.mxu0 %vm2662_vm8, %v9412_v4  ;;  %v5205_v4 = vld [vmem:[#allocation2 + $0xd18] sm:$0xff] }
0x29b2   :  { %8378 = vmatmul.msk.f32.vlgmr.msrb.gmra.mxu3 %vm2662_vm8, %v9416_v5  ;;  %5156 = vmatpush.msra.mxu0 %v5141_v23  ;;  %v5204_v5 = vld [vmem:[#allocation2 + $0xd10] sm:$0xff] }
0x29b3   :  { %5220 = vmatpush.msra.mxu2 %v5205_v4  ;;  %5245 = vmatpush.msra.mxu3 %v5233_v51 }
0x29b4   :  { %5157 = vmatpush.msra.mxu0 %v5140_v63 }
0x29b5   :  { %5221 = vmatpush.msra.mxu2 %v5204_v5  ;;  %5246 = vmatpush.msra.mxu3 %v5232_v62 }
0x29b6   :  { %5158 = vmatpush.msra.mxu0 %v5139_v46 }
0x29b7   :  { %5222 = vmatpush.msra.mxu2 %v5203_v44  ;;  %5247 = vmatpush.msra.mxu3 %v5231_v26 }
0x29b8   :  { %5159 = vmatpush.msra.mxu0 %v5138_v41 }
0x29b9   :  { %5223 = vmatpush.msra.mxu2 %v5202_v52  ;;  %5248 = vmatpush.msra.mxu3 %v5230_v3  ;;  %v9488_v52 = vld [vmem:[#allocation2 + $0x1160] sm:$0xff] }
0x29ba   :  { %5160 = vmatpush.msra.mxu0 %v5137_v50 }
0x29bb   :  { %5224 = vmatpush.msra.mxu2 %v5201_v1  ;;  %5249 = vmatpush.msra.mxu3 %v5229_v20  ;;  %v9494_v1 = vld [vmem:[#allocation2 + $0x1168] sm:$0xff] }
0x29bd   :  { %8391 = vmatpush.msk.msrb.mxu3 %vm1899_vm11, %v5318_v54  ;;  %8388 = vmatpush.msk.msrb.mxu2 %vm1899_vm11, %v5321_v34 }
0x29bf   :  { %5377 = vmatpush.msrb.mxu3 %v5317_v55  ;;  %5345 = vmatpush.msrb.mxu2 %v5320_v48 }
0x29c1   :  { %5378 = vmatpush.msrb.mxu3 %v5316_v56  ;;  %5346 = vmatpush.msrb.mxu2 %v5319_v28 }
0x2a2e   :  { %v5063_v42 = vpop.f32.mrf.mxu0 }
0x2a2f   :  { %8376 = vmatmul.msk.f32.vlgmr.msra.gmra.mxu1 %vm2909_vm14, %v5063_v42 }
0x2a33   :  { %v5114_v8 = vpop.f32.mrf.mxu2 }
0x2a35   :  { %v5134_v53 = vpop.f32.mrf.mxu3 }
0x2a36   :  { %8379 = vmatmul.msk.f32.vlgmr.msra.gmra.mxu0 %vm2909_vm14, %v5134_v53 }
0x2a37   :  { %8381 = vmatmul.msk.f32.vlgmr.msrb.gmra.mxu1 %vm71_vm1, %v9454_v6 }
0x2aac   :  { %v5091_v7 = vpop.f32.mrf.mxu1 }
0x2aad   :  { %v5115_v9 = vadd.f32 %v5114_v8, %v5091_v7 }
0x2ab3   :  { %v5162_v11 = vpop.f32.mrf.mxu0 }
0x2ab4   :  { %v5165_v22 = vadd.f32 %v5162_v11, %v5115_v9  ;;  %v5194_v30 = vpop.f32.mrf.mxu1 }
0x2ab5   :  { %v5195_v17 = vadd.f32 %v8663_v14, %v5194_v30 }
0x2ab6   :  { %v5168_v12 = vadd.f32 %v8662_v10, %v5165_v22 }
0x2ab8   :  { %v5169_v13 = vmax.f32 %v5168_v12, 0.0 }
0x2aba   :  { %8382 = vmatmul.msk.f32.vlgmr.msra.gmra.mxu2 %vm2909_vm14, %v5169_v13  ;;  %8383 = vmatmul.msk.f32.vlgmr.msra.gmra.mxu3 %vm2909_vm14, %v5169_v13 }
0x2ac2   :  { %8392 = vmatmul.msk.f32.vlgmr.msrb.gmra.mxu3 %vm1892_vm12, %v9240_v38  ;;  %v5198_v38 = vld [vmem:[#allocation2 + $0x1288] sm:$0xff] }
0x2aca   :  { %8393 = vmatmul.msk.f32.gmra.mxu3 %vm1892_vm12, %v9236_v45  ;;  %v8743_v45 = vld [vmem:[#allocation2 + $0x1170] sm:$0xff] }
0x2b3d   :  { %v5226_v21 = vpop.f32.mrf.mxu2  ;;  %v5251_v24 = vpop.f32.mrf.mxu3 }
0x2b3e   :  { %5275 = vmatpush.msrb.mxu0 %v5251_v24  ;;  %5304 = vmatpush.msra.mxu1 %v5226_v21 }
0x2b3f   :  { %8384 = vmatmul.msk.f32.vlgmr.msrb.gmra.mxu0 %vm2662_vm8, %v5199_v15  ;;  %8386 = vmatmul.msk.f32.vlgmr.msra.gmra.mxu1 %vm2662_vm8, %v5197_v0 }
0x2b40   :  { %8394 = vmatpush.msk.msra.mxu0 %vm75_vm0, %v5195_v17 }
0x2b45   :  { %v5380_v40 = vpop.f32.mrf.mxu3 }
0x2b47   :  { %8385 = vmatmul.msk.f32.gmra.mxu0 %vm2662_vm8, %v5200_v33  ;;  %8387 = vmatmul.msk.f32.gmra.mxu1 %vm2662_vm8, %v5198_v38 }
0x2b4d   :  { %v5383_v25 = vpop.f32.mrf.mxu3 }
0x2b4f   :  { %8395 = vmatmul.msk.f32.vlgmr.msra.gmra.mxu0 %vm106_vm2, %v8743_v45 }
0x2b57   :  { %8396 = vmatmul.msk.f32.gmra.mxu0 %vm106_vm2, %v8744_v27 }
0x2bbc   :  { %v5277_v43 = vpop.f32.mrf.mxu0  ;;  %v5306_v47 = vpop.f32.mrf.mxu1 }
0x2bbd   :  { %v5307_v49 = vadd.f32 %v5306_v47, %v5277_v43  ;;  %v5539_v43 = vld [vmem:[#allocation2 + $0xdb0] sm:$0xff]  ;;  %v5538_v47 = vld [vmem:[#allocation2 + $0xda8] sm:$0xff] }
0x2bbf   :  { %v5314_v31 = vadd.f32 %v8664_v29, %v5307_v49  ;;  %v5537_v49 = vld [vmem:[#allocation2 + $0xda0] sm:$0xff] }
0x2bc1   :  { %8389 = vmatmul.msk.f32.vlgmr.msrb.gmra.mxu2 %vm1892_vm12, %v5314_v31  ;;  %v5536_v31 = vld [vmem:[#allocation2 + $0xd98] sm:$0xff] }
0x2bc4   :  { %v5280_v35 = vpop.f32.mrf.mxu0  ;;  %v5309_v36 = vpop.f32.mrf.mxu1 }
0x2bc5   :  { %v5310_v37 = vadd.f32 %v5309_v36, %v5280_v35 }
0x2bc7   :  { %v5315_v39 = vadd.f32 %v8664_v29, %v5310_v37  ;;  %v5540_v29 = vld [vmem:[#allocation2 + $0xdb8] sm:$0xff] }
0x2bc9   :  { %8390 = vmatmul.msk.f32.gmra.mxu2 %vm1892_vm12, %v5315_v39  ;;  %v5528_v39 = vld [vmem:[#allocation2 + $0xd50] sm:$0xff] }
0x2bcc   :  { %v5406_v57 = vpop.f32.mrf.mxu0 }
0x2bd4   :  { %v5409_v41 = vpop.f32.mrf.mxu0 }
0x2c44   :  { %v5348_v58 = vpop.f32.mrf.mxu2 }
0x2c45   :  { %v5381_v59 = vadd.f32 %v5380_v40, %v5348_v58  ;;  %v5532_v58 = vld [vmem:[#allocation2 + $0xd60] sm:$0xff] }
0x2c47   :  { %v9474_v61 = vadd.f32 %v5406_v57, %v5381_v59 }
0x2c49   :  { %v5445_v23 = vmul.f32 %v9474_v61, %v9474_v61  ;;  %v5414_v5 = vsel %vm2909_vm14, %v9474_v61, 0.0 }
0x2c4b   :  { %v5447_v63 = vsel %vm2909_vm14, %v5445_v23, 0.0 }
0x2c4c   :  { %5448 = vadd.xlane.f32.xlu0 %v5447_v63  ;;  %v5351_v46 = vpop.f32.mrf.mxu2  ;;  %v5529_v63 = vld [vmem:[#allocation2 + $0xd58] sm:$0xff] }
0x2c4d   :  { %v5384_v50 = vadd.f32 %v5383_v25, %v5351_v46 }
0x2c4f   :  { %v9479_v42 = vadd.f32 %v5409_v41, %v5384_v50  ;;  %v5533_v50 = vld [vmem:[#allocation2 + $0xd68] sm:$0xff] }
0x2c51   :  { %v5417_v53 = vsel %vm2909_vm14, %v9479_v42, 0.0  ;;  %v5446_v4 = vmul.f32 %v9479_v42, %v9479_v42 }
0x2c52   :  { %5418 = vadd.xlane.f32.xlu1 %v5417_v53 }
0x2c53   :  { %v5450_v51 = vsel %vm2909_vm14, %v5446_v4, 0.0 }
0x2c54   :  { %5451 = vadd.xlane.f32.xlu2 %v5450_v51  ;;  %v9508_v51 = vld [vmem:[#allocation2 + $0x1150] sm:$0xff] }
0x2c5a   :  { %5415 = vadd.xlane.f32.xlu1 %v5414_v5  ;;  %v9516_v5 = vld [vmem:[#allocation2 + $0x1158] sm:$0xff] }
0x2cbf   :  { %v5449_v26 = vpop.xlane.xlu0 %5448 }
0x2cc5   :  { %v5419_v62 = vpop.xlane.xlu1 %5418 }
0x2cc6   :  { %5434 = vmatpush.msrb.mxu1 %v5419_v62  ;;  %v5568_v62 = vld [vmem:[#allocation2 + $0xd90] sm:$0xff] }
0x2cc7   :  { %v5452_v44 = vpop.xlane.xlu2 %5451  ;;  %5586 = vmatpush.msrb.mxu0 %v5568_v62 }
0x2cc8   :  { %5467 = vmatpush.msra.mxu2 %v5452_v44  ;;  %v5654_v44 = vld [vmem:[#allocation2 + $0xde0] sm:$0xff] }
0x2cca   :  { %5468 = vmatpush.msra.mxu2 %v5449_v26  ;;  %v5567_v26 = vld [vmem:[#allocation2 + $0xd88] sm:$0xff] }
0x2ccb   :  { %8399 = vmatmul.msk.f32.vlgmr.msra.gmra.mxu2 %vm1572_vm4, %v9488_v52  ;;  %5587 = vmatpush.msrb.mxu0 %v5567_v26 }
0x2ccd   :  { %v5416_v3 = vpop.xlane.xlu1 %5415 }
0x2cce   :  { %5435 = vmatpush.msrb.mxu1 %v5416_v3  ;;  %v5653_v3 = vld [vmem:[#allocation2 + $0xdd8] sm:$0xff] }
0x2ccf   :  { %8397 = vmatmul.msk.f32.vlgmr.msrb.gmra.mxu1 %vm1572_vm4, %v9488_v52 }
0x2cd0   :  { %5615 = vmatpush.msra.mxu1 %v5540_v29  ;;  %v5720_v29 = vld [vmem:[#allocation2 + $0xe00] sm:$0xf] }
0x2cd2   :  { %5616 = vmatpush.msra.mxu1 %v5539_v43  ;;  %v5719_v43 = vld [vmem:[#allocation2 + $0xdf8] sm:$0xff] }
0x2cd3   :  { %8400 = vmatmul.msk.f32.gmra.mxu2 %vm1572_vm4, %v9494_v1 }
0x2cd4   :  { %5617 = vmatpush.msra.mxu1 %v5538_v47  ;;  %v5718_v47 = vld [vmem:[#allocation2 + $0xdf0] sm:$0xff] }
0x2cd6   :  { %5618 = vmatpush.msra.mxu1 %v5537_v49  ;;  %v5810_v49 = vld [vmem:[#allocation2 + $0xe30] sm:$0xf] }
0x2cd7   :  { %8398 = vmatmul.msk.f32.gmra.mxu1 %vm1572_vm4, %v9494_v1 }
0x2cd8   :  { %5619 = vmatpush.msra.mxu1 %v5536_v31  ;;  %v5809_v31 = vld [vmem:[#allocation2 + $0xe28] sm:$0xff] }
0x2cda   :  { %8413 = vmatpush.msk.msrb.mxu1 %vm1899_vm11, %v5720_v29 }
0x2cdc   :  { %5744 = vmatpush.msrb.mxu1 %v5719_v43 }
0x2cde   :  { %5745 = vmatpush.msrb.mxu1 %v5718_v47 }
0x2d4c   :  { %v5437_v20 = vpop.f32.mrf.mxu1 }
0x2d4d   :  { %v5443_v54 = vmul.f32 0.003125, %v5437_v20  ;;  %v5566_v20 = vld [vmem:[#allocation2 + $0xd80] sm:$0xff] }
0x2d4e   :  { %v5470_v55 = vpop.f32.mrf.mxu2  ;;  %5588 = vmatpush.msrb.mxu0 %v5566_v20 }
0x2d4f   :  { %v5490_v56 = vmul.f32 %v5443_v54, %v5443_v54  ;;  %v5476_v2 = vmul.f32 0.003125, %v5470_v55  ;;  %5480 = vperm.xlu1 %8625, %v5443_v54   ;;  %v5652_v54 = vld [vmem:[#allocation2 + $0xdd0] sm:$0xff]  ;;  %v5565_v55 = vld [vmem:[#allocation2 + $0xd78] sm:$0xff] }
0x2d50   :  { %5589 = vmatpush.msrb.mxu0 %v5565_v55 }
0x2d51   :  { %v5492_v60 = vsub.f32 %v5476_v2, %v5490_v56  ;;  %v5651_v56 = vld [vmem:[#allocation2 + $0xdc8] sm:$0xff]  ;;  %v5564_v2 = vld [vmem:[#allocation2 + $0xd70] sm:$0xff] }
0x2d52   :  { %5590 = vmatpush.msrb.mxu0 %v5564_v2 }
0x2d53   :  { %v5494_v7 = vadd.f32 1e-05, %v5492_v60  ;;  %v5650_v60 = vld [vmem:[#allocation2 + $0xdc0] sm:$0xff] }
0x2d54   :  { %v5440_v8 = vpop.f32.mrf.mxu1 }
0x2d55   :  { %8712 = vrsqrt.f32 %v5494_v7  ;;  %v5444_v9 = vmul.f32 0.003125, %v5440_v8  ;;  %vm5502_vm13 = vweird.f32 %v5494_v7 }
0x2d56   :  { %v5473_v10 = vpop.f32.mrf.mxu2 }
0x2d57   :  { %v5491_v11 = vmul.f32 %v5444_v9, %v5444_v9  ;;  %v5477_v22 = vmul.f32 0.003125, %v5473_v10  ;;  %5485 = vperm.xlu2 %8624, %v5444_v9  }
0x2d59   :  { %v5493_v12 = vsub.f32 %v5477_v22, %v5491_v11  ;;  %v5694_v11 = vld [vmem:[#allocation2 + $0xe18] sm:$0xf]  ;;  %v5693_v22 = vld [vmem:[#allocation2 + $0xe10] sm:$0xff] }
0x2d5b   :  { %v8713_v13 = vpop.eup %8712  ;;  %v5495_v14 = vadd.f32 1e-05, %v5493_v12  ;;  %v5692_v12 = vld [vmem:[#allocation2 + $0xe08] sm:$0xff] }
0x2d5c   :  { %v5497_v30 = vmul.f32 %v8713_v13, %v5494_v7  ;;  %vm5503_vm8 = vweird.f32 %v8713_v13 }
0x2d5d   :  { %8714 = vrsqrt.f32 %v5495_v14  ;;  %vm5504_vm9 = vmor %vm5502_vm13, %vm5503_vm8  ;;  %vm5512_vm6 = vweird.f32 %v5495_v14 }
0x2d5e   :  { %v5498_v15 = vmul.f32 %v8713_v13, %v5497_v30 }
0x2d60   :  { %v5499_v0 = vmul.f32 0.5, %v5498_v15  ;;  %v8665_v15 = vld [vmem:[#allocation2 + $0xde8] ss:$0 sm:$0xff] }
0x2d62   :  { %v5500_v17 = vsub.f32 1.5, %v5499_v0 }
0x2d63   :  { %v8715_v21 = vpop.eup %8714 }
0x2d64   :  { %v5507_v24 = vmul.f32 %v8715_v21, %v5495_v14  ;;  %v5501_v33 = vmul.f32 %v8713_v13, %v5500_v17  ;;  %vm5513_vm15 = vweird.f32 %v8715_v21 }
0x2d65   :  { %vm5514_vm5 = vmor %vm5512_vm6, %vm5513_vm15 }
0x2d66   :  { %v5505_v38 = vsel %vm5504_vm9, %v8713_v13, %v5501_v33  ;;  %v5508_v45 = vmul.f32 %v8715_v21, %v5507_v24 }
0x2d67   :  { %5518 = vperm.xlu2 %8624, %v5505_v38  }
0x2d68   :  { %v5509_v27 = vmul.f32 0.5, %v5508_v45 }
0x2d6a   :  { %v5510_v34 = vsub.f32 1.5, %v5509_v27 }
0x2d6c   :  { %v5511_v48 = vmul.f32 %v8715_v21, %v5510_v34 }
0x2d6e   :  { %v5515_v28 = vsel %vm5514_vm5, %v8715_v21, %v5511_v48 }
0x2d6f   :  { %5523 = vperm.xlu0 %8626, %v5515_v28  }
0x2db1   :  { %v5486_v35 = vpop.permute.xlu2 %5485 }
0x2db2   :  { %v5489_v25 = vsub.f32 %v9479_v42, %v5486_v35  ;;  %v9512_v42 = vld [vmem:[#allocation2 + $0x1148] sm:$0xff]  ;;  %v5808_v35 = vld [vmem:[#allocation2 + $0xe20] sm:$0xff] }
0x2dc1   :  { %v5481_v36 = vpop.permute.xlu1 %5480  ;;  %v5519_v40 = vpop.permute.xlu2 %5518 }
0x2dc2   :  { %v5488_v37 = vsub.f32 %v9474_v61, %v5481_v36  ;;  %v9504_v61 = vld [vmem:[#allocation2 + $0x1140] sm:$0xff] }
0x2dc4   :  { %v5526_v57 = vmul.f32 %v5519_v40, %v5488_v37 }
0x2dc6   :  { %v5530_v59 = vmul.f32 %v5528_v39, %v5526_v57 }
0x2dc8   :  { %v5534_v23 = vadd.f32 %v5532_v58, %v5530_v59 }
0x2dca   :  { %8405 = vmatmul.msk.f32.vlgmr.msra.gmra.mxu1 %vm2909_vm14, %v5534_v23 }
0x2de1   :  { %v5524_v46 = vpop.permute.xlu0 %5523 }
0x2de2   :  { %v5527_v41 = vmul.f32 %v5524_v46, %v5489_v25 }
0x2de4   :  { %v5531_v53 = vmul.f32 %v5529_v63, %v5527_v41 }
0x2de6   :  { %v5535_v4 = vadd.f32 %v5533_v50, %v5531_v53 }
0x2de8   :  { %5555 = vmatpush.msra.mxu3 %v5535_v4  ;;  %8406 = vmatmul.msk.f32.gmra.mxu1 %vm2909_vm14, %v5535_v4 }
0x2de9   :  { %5641 = vmatpush.msrb.mxu2 %v5535_v4 }
0x2dea   :  { %5556 = vmatpush.msra.mxu3 %v5534_v23 }
0x2deb   :  { %5642 = vmatpush.msrb.mxu2 %v5534_v23  ;;  %8401 = vmatmul.msk.f32.vlgmr.msra.gmra.mxu3 %vm1572_vm4, %v9504_v61  ;;  %v8666_v23 = vld [vmem:[#allocation2 + $0xe38] ss:$0 sm:$0xff] }
0x2dec   :  { %8407 = vmatmul.msk.f32.vlgmr.msrb.gmra.mxu2 %vm1572_vm4, %v9508_v51  ;;  %5672 = vmatpush.msrb.mxu3 %v5654_v44 }
0x2ded   :  { %8416 = vmatpush.msk.msra.mxu2 %vm1899_vm11, %v5694_v11 }
0x2dee   :  { %5673 = vmatpush.msrb.mxu3 %v5653_v3 }
0x2def   :  { %5776 = vmatpush.msra.mxu2 %v5693_v22 }
0x2df0   :  { %5674 = vmatpush.msrb.mxu3 %v5652_v54 }
0x2df1   :  { %5777 = vmatpush.msra.mxu2 %v5692_v12 }
0x2df2   :  { %5675 = vmatpush.msrb.mxu3 %v5651_v56 }
0x2df3   :  { %8402 = vmatmul.msk.f32.gmra.mxu3 %vm1572_vm4, %v9512_v42 }
0x2df4   :  { %8408 = vmatmul.msk.f32.gmra.mxu2 %vm1572_vm4, %v9516_v5  ;;  %5676 = vmatpush.msrb.mxu3 %v5650_v60 }
0x2e47   :  { %v5621_v14 = vpop.f32.mrf.mxu1 }
0x2e65   :  { %v5624_v38 = vpop.f32.mrf.mxu1 }
0x2e6e   :  { %v5558_v7 = vpop.f32.mrf.mxu3 }
0x2e6f   :  { %v5644_v8 = vpop.f32.mrf.mxu2  ;;  %8403 = vmatmul.msk.f32.vlgmr.msrb.gmra.mxu0 %vm2909_vm14, %v5558_v7 }
0x2e70   :  { %8409 = vmatmul.msk.f32.vlgmr.msrb.gmra.mxu3 %vm2909_vm14, %v5644_v8 }
0x2e76   :  { %v5561_v9 = vpop.f32.mrf.mxu3 }
0x2e77   :  { %v5647_v10 = vpop.f32.mrf.mxu2  ;;  %8404 = vmatmul.msk.f32.gmra.mxu0 %vm2909_vm14, %v5561_v9 }
0x2e78   :  { %8410 = vmatmul.msk.f32.gmra.mxu3 %vm2909_vm14, %v5647_v10 }
0x2eec   :  { %v5592_v13 = vpop.f32.mrf.mxu0 }
0x2eed   :  { %v5622_v30 = vadd.f32 %v5621_v14, %v5592_v13 }
0x2ef3   :  { %v5678_v0 = vpop.f32.mrf.mxu3 }
0x2ef4   :  { %v5684_v17 = vadd.f32 %v5678_v0, %v5622_v30  ;;  %v5595_v24 = vpop.f32.mrf.mxu0 }
0x2ef5   :  { %v5625_v45 = vadd.f32 %v5624_v38, %v5595_v24 }
0x2ef6   :  { %v5688_v21 = vadd.f32 %v8665_v15, %v5684_v17 }
0x2ef8   :  { %v5690_v33 = vmax.f32 %v5688_v21, 0.0 }
0x2efa   :  { %8417 = vmatmul.msk.f32.vlgmr.msra.gmra.mxu2 %vm1892_vm12, %v5690_v33 }
0x2efb   :  { %v5681_v27 = vpop.f32.mrf.mxu3 }
0x2efc   :  { %v5685_v34 = vadd.f32 %v5681_v27, %v5625_v45 }
0x2efe   :  { %v5689_v48 = vadd.f32 %v8665_v15, %v5685_v34 }
0x2f00   :  { %v5691_v28 = vmax.f32 %v5689_v48, 0.0 }
0x2f02   :  { %5709 = vmatpush.msra.mxu0 %v5691_v28  ;;  %8418 = vmatmul.msk.f32.gmra.mxu2 %vm1892_vm12, %v5691_v28 }
0x2f03   :  { %5799 = vmatpush.msra.mxu3 %v5691_v28 }
0x2f04   :  { %5710 = vmatpush.msra.mxu0 %v5690_v33 }
0x2f05   :  { %5800 = vmatpush.msra.mxu3 %v5690_v33  ;;  %8411 = vmatmul.msk.f32.vlgmr.msra.gmra.mxu0 %vm1572_vm4, %v9504_v61 }
0x2f06   :  { %8419 = vmatmul.msk.f32.vlgmr.msra.gmra.mxu3 %vm1572_vm4, %v9508_v51  ;;  %8421 = vmatpush.msk.msrb.mxu0 %vm1899_vm11, %v5810_v49 }
0x2f08   :  { %5834 = vmatpush.msrb.mxu0 %v5809_v31 }
0x2f0a   :  { %5835 = vmatpush.msrb.mxu0 %v5808_v35 }
0x2f0d   :  { %8412 = vmatmul.msk.f32.gmra.mxu0 %vm1572_vm4, %v9512_v42 }
0x2f0e   :  { %8420 = vmatmul.msk.f32.gmra.mxu3 %vm1572_vm4, %v9516_v5 }
0x2f7d   :  { %v5779_v58 = vpop.f32.mrf.mxu2 }
0x2f82   :  { %v5712_v36 = vpop.f32.mrf.mxu0 }
0x2f83   :  { %8414 = vmatmul.msk.f32.vlgmr.msrb.gmra.mxu1 %vm1892_vm12, %v5712_v36 }
0x2f85   :  { %v5782_v53 = vpop.f32.mrf.mxu2 }
0x2f89   :  { %v5802_v37 = vpop.f32.mrf.mxu3 }
0x2f8a   :  { %8422 = vmatmul.msk.f32.vlgmr.msrb.gmra.mxu0 %vm1892_vm12, %v5802_v37  ;;  %v5715_v39 = vpop.f32.mrf.mxu0 }
0x2f8b   :  { %8415 = vmatmul.msk.f32.gmra.mxu1 %vm1892_vm12, %v5715_v39  ;;  %v5975_v39 = vld [vmem:[#allocation2 + $0xe88] sm:$0xf] }
0x2f91   :  { %v5805_v40 = vpop.f32.mrf.mxu3 }
0x2f92   :  { %8423 = vmatmul.msk.f32.gmra.mxu0 %vm1892_vm12, %v5805_v40  ;;  %v5974_v40 = vld [vmem:[#allocation2 + $0xe80] sm:$0xff] }
0x3000   :  { %v5747_v57 = vpop.f32.mrf.mxu1 }
0x3001   :  { %v5780_v59 = vadd.f32 %v5779_v58, %v5747_v57  ;;  %v5973_v57 = vld [vmem:[#allocation2 + $0xe78] sm:$0xff] }
0x3007   :  { %v5837_v25 = vpop.f32.mrf.mxu0 }
0x3008   :  { %v5843_v63 = vadd.f32 %v5837_v25, %v5780_v59  ;;  %v5750_v41 = vpop.f32.mrf.mxu1  ;;  %v5965_v25 = vld [vmem:[#allocation2 + $0xe40] sm:$0xff] }
0x3009   :  { %v5783_v4 = vadd.f32 %v5782_v53, %v5750_v41  ;;  %v5969_v41 = vld [vmem:[#allocation2 + $0xe50] sm:$0xff] }
0x300a   :  { %v5847_v46 = vadd.f32 %v8666_v23, %v5843_v63 }
0x300c   :  { %v9541_v50 = vmax.f32 %v5847_v46, 0.0 }
0x300e   :  { %v5882_v62 = vmul.f32 %v9541_v50, %v9541_v50  ;;  %v5851_v60 = vsel %vm1892_vm12, %v9541_v50, 0.0 }
0x300f   :  { %v5840_v44 = vpop.f32.mrf.mxu0 }
0x3010   :  { %v5844_v26 = vadd.f32 %v5840_v44, %v5783_v4  ;;  %v5884_v3 = vsel %vm1892_vm12, %v5882_v62, 0.0  ;;  %v5966_v44 = vld [vmem:[#allocation2 + $0xe48] sm:$0xff] }
0x3011   :  { %5885 = vadd.xlane.f32.xlu2 %v5884_v3 }
0x3012   :  { %v5848_v20 = vadd.f32 %v8666_v23, %v5844_v26 }
0x3014   :  { %v9546_v54 = vmax.f32 %v5848_v20, 0.0  ;;  %v5970_v20 = vld [vmem:[#allocation2 + $0xe58] sm:$0xff] }
0x3016   :  { %v5854_v55 = vsel %vm1892_vm12, %v9546_v54, 0.0  ;;  %v5883_v56 = vmul.f32 %v9546_v54, %v9546_v54 }
0x3017   :  { %5855 = vadd.xlane.f32.xlu0 %v5854_v55 }
0x3018   :  { %v5887_v2 = vsel %vm1892_vm12, %v5883_v56, 0.0 }
0x3019   :  { %5888 = vadd.xlane.f32.xlu1 %v5887_v2  ;;  %v6000_v2 = vld [vmem:[#allocation2 + $0xe68] sm:$0xff] }
0x3021   :  { %5852 = vadd.xlane.f32.xlu1 %v5851_v60  ;;  %v6090_v60 = vld [vmem:[#allocation2 + $0xe98] sm:$0xff] }
0x3084   :  { %v5886_v9 = vpop.xlane.xlu2 %5885 }
0x308a   :  { %v5856_v7 = vpop.xlane.xlu0 %5855 }
0x308b   :  { %5871 = vmatpush.msra.mxu1 %v5856_v7  ;;  %v5999_v7 = vld [vmem:[#allocation2 + $0xe60] sm:$0xff] }
0x308c   :  { %v5889_v8 = vpop.xlane.xlu1 %5888 }
0x308d   :  { %5904 = vmatpush.msrb.mxu2 %v5889_v8  ;;  %v6089_v8 = vld [vmem:[#allocation2 + $0xe90] sm:$0xff] }
0x308f   :  { %5905 = vmatpush.msrb.mxu2 %v5886_v9 }
0x3090   :  { %8426 = vmatmul.msk.f32.vlgmr.msrb.gmra.mxu2 %vm1572_vm4, %v9488_v52 }
0x3094   :  { %v5853_v10 = vpop.xlane.xlu1 %5852 }
0x3095   :  { %5872 = vmatpush.msra.mxu1 %v5853_v10 }
0x3096   :  { %8424 = vmatmul.msk.f32.vlgmr.msra.gmra.mxu1 %vm1572_vm4, %v9488_v52 }
0x3097   :  { %8433 = vmatpush.msk.msrb.mxu1 %vm1899_vm11, %v5975_v39  ;;  %v6327_v39 = vld [vmem:[#allocation2 + $0xf20] sm:$0xff] }
0x3098   :  { %8427 = vmatmul.msk.f32.gmra.mxu2 %vm1572_vm4, %v9494_v1 }
0x3099   :  { %6057 = vmatpush.msrb.mxu1 %v5974_v40  ;;  %v6362_v40 = vld [vmem:[#allocation2 + $0xf38] sm:$0xff] }
0x309b   :  { %6058 = vmatpush.msrb.mxu1 %v5973_v57  ;;  %v6326_v57 = vld [vmem:[#allocation2 + $0xf18] sm:$0xff] }
0x309e   :  { %8425 = vmatmul.msk.f32.gmra.mxu1 %vm1572_vm4, %v9494_v1 }
0x3113   :  { %v5874_v11 = vpop.f32.mrf.mxu1  ;;  %v5907_v22 = vpop.f32.mrf.mxu2 }
0x3114   :  { %v5880_v12 = vmul.f32 0.00625, %v5874_v11  ;;  %v5913_v13 = vmul.f32 0.00625, %v5907_v22 }
0x3116   :  { %v5927_v14 = vmul.f32 %v5880_v12, %v5880_v12  ;;  %5917 = vperm.xlu1 %8625, %v5880_v12   ;;  %v6134_v12 = vld [vmem:[#allocation2 + $0xed8] sm:$0xf] }
0x3118   :  { %v5929_v30 = vsub.f32 %v5913_v13, %v5927_v14  ;;  %v6133_v13 = vld [vmem:[#allocation2 + $0xed0] sm:$0xff]  ;;  %v6132_v14 = vld [vmem:[#allocation2 + $0xec8] sm:$0xff] }
0x311a   :  { %v5931_v15 = vadd.f32 1e-05, %v5929_v30 }
0x311b   :  { %v5877_v0 = vpop.f32.mrf.mxu1  ;;  %v5910_v17 = vpop.f32.mrf.mxu2 }
0x311c   :  { %8716 = vrsqrt.f32 %v5931_v15  ;;  %v5881_v21 = vmul.f32 0.00625, %v5877_v0  ;;  %v5914_v24 = vmul.f32 0.00625, %v5910_v17  ;;  %vm5939_vm7 = vweird.f32 %v5931_v15  ;;  %v8667_v17 = vld [vmem:[#allocation2 + $0xea8] ss:$0 sm:$0xff] }
0x311e   :  { %v5928_v52 = vmul.f32 %v5881_v21, %v5881_v21  ;;  %5922 = vperm.xlu2 %8624, %v5881_v21  }
0x3120   :  { %v5930_v33 = vsub.f32 %v5914_v24, %v5928_v52 }
0x3122   :  { %v8717_v38 = vpop.eup %8716  ;;  %v5932_v45 = vadd.f32 1e-05, %v5930_v33 }
0x3123   :  { %v5934_v27 = vmul.f32 %v8717_v38, %v5931_v15  ;;  %vm5940_vm14 = vweird.f32 %v8717_v38 }
0x3124   :  { %8718 = vrsqrt.f32 %v5932_v45  ;;  %vm5941_vm10 = vmor %vm5939_vm7, %vm5940_vm14  ;;  %vm5949_vm13 = vweird.f32 %v5932_v45 }
0x3125   :  { %v5935_v1 = vmul.f32 %v8717_v38, %v5934_v27 }
0x3127   :  { %v5936_v34 = vmul.f32 0.5, %v5935_v1 }
0x3129   :  { %v5937_v48 = vsub.f32 1.5, %v5936_v34 }
0x312a   :  { %v8719_v28 = vpop.eup %8718 }
0x312b   :  { %v5944_v29 = vmul.f32 %v8719_v28, %v5932_v45  ;;  %v5938_v43 = vmul.f32 %v8717_v38, %v5937_v48  ;;  %vm5950_vm8 = vweird.f32 %v8719_v28 }
0x312c   :  { %vm5951_vm9 = vmor %vm5949_vm13, %vm5950_vm8 }
0x312d   :  { %v5942_v47 = vsel %vm5941_vm10, %v8717_v38, %v5938_v43  ;;  %v5945_v49 = vmul.f32 %v8719_v28, %v5944_v29  ;;  %v6160_v29 = vld [vmem:[#allocation2 + $0xec0] sm:$0xf]  ;;  %v6159_v43 = vld [vmem:[#allocation2 + $0xeb8] sm:$0xff] }
0x312e   :  { %5955 = vperm.xlu2 %8624, %v5942_v47   ;;  %8443 = vmatpush.msk.msra.mxu1 %vm1899_vm11, %v6160_v29  ;;  %v6158_v47 = vld [vmem:[#allocation2 + $0xeb0] sm:$0xff] }
0x312f   :  { %v5946_v31 = vmul.f32 0.5, %v5945_v49  ;;  %v6250_v49 = vld [vmem:[#allocation2 + $0xef0] sm:$0xf] }
0x3130   :  { %6184 = vmatpush.msra.mxu1 %v6159_v43 }
0x3131   :  { %v5947_v35 = vsub.f32 1.5, %v5946_v31  ;;  %v6248_v31 = vld [vmem:[#allocation2 + $0xee0] sm:$0xff] }
0x3132   :  { %6185 = vmatpush.msra.mxu1 %v6158_v47 }
0x3133   :  { %v5948_v36 = vmul.f32 %v8719_v28, %v5947_v35 }
0x3135   :  { %v5952_v37 = vsel %vm5951_vm9, %v8719_v28, %v5948_v36  ;;  %v6328_v36 = vld [vmem:[#allocation2 + $0xf28] sm:$0xf] }
0x3136   :  { %5960 = vperm.xlu0 %8626, %v5952_v37   ;;  %v6363_v37 = vld [vmem:[#allocation2 + $0xf40] sm:$0xf] }
0x3178   :  { %v5923_v58 = vpop.permute.xlu2 %5922 }
0x3179   :  { %v5926_v62 = vsub.f32 %v9546_v54, %v5923_v58  ;;  %v6091_v54 = vld [vmem:[#allocation2 + $0xea0] sm:$0xf]  ;;  %v6361_v58 = vld [vmem:[#allocation2 + $0xf30] sm:$0xff] }
0x3188   :  { %v5918_v59 = vpop.permute.xlu1 %5917  ;;  %v5956_v63 = vpop.permute.xlu2 %5955 }
0x3189   :  { %v5925_v23 = vsub.f32 %v9541_v50, %v5918_v59  ;;  %v6001_v50 = vld [vmem:[#allocation2 + $0xe70] sm:$0xf]  ;;  %v6479_v59 = vld [vmem:[#allocation2 + $0x12b8] sm:$0x3] }
0x318a   :  { %8430 = vmatpush.msk.msra.mxu0 %vm1899_vm11, %v6001_v50 }
0x318b   :  { %v5963_v46 = vmul.f32 %v5956_v63, %v5925_v23  ;;  %v6478_v23 = vld [vmem:[#allocation2 + $0x12b0] sm:$0xff] }
0x318c   :  { %6025 = vmatpush.msra.mxu0 %v6000_v2  ;;  %v6292_v2 = vld [vmem:[#allocation2 + $0xf08] sm:$0x3] }
0x318d   :  { %v5967_v53 = vmul.f32 %v5965_v25, %v5963_v46 }
0x318e   :  { %6026 = vmatpush.msra.mxu0 %v5999_v7 }
0x318f   :  { %v5971_v4 = vadd.f32 %v5969_v41, %v5967_v53  ;;  %v8668_v41 = vld [vmem:[#allocation2 + $0xef8] ss:$0 sm:$0xff] }
0x3191   :  { %8434 = vmatmul.msk.f32.vlgmr.msrb.gmra.mxu1 %vm1892_vm12, %v5971_v4 }
0x3192   :  { %8454 = vmatpush.msk.msrb.mxu1 %vm75_vm0, %v6292_v2 }
0x31a8   :  { %v5961_v26 = vpop.permute.xlu0 %5960 }
0x31a9   :  { %v5964_v3 = vmul.f32 %v5961_v26, %v5926_v62 }
0x31ab   :  { %v5968_v55 = vmul.f32 %v5966_v44, %v5964_v3 }
0x31ad   :  { %v5972_v56 = vadd.f32 %v5970_v20, %v5968_v55 }
0x31af   :  { %5990 = vmatpush.msrb.mxu3 %v5972_v56  ;;  %8435 = vmatmul.msk.f32.gmra.mxu1 %vm1892_vm12, %v5972_v56 }
0x31b0   :  { %6080 = vmatpush.msra.mxu2 %v5972_v56 }
0x31b1   :  { %5991 = vmatpush.msrb.mxu3 %v5971_v4 }
0x31b2   :  { %6081 = vmatpush.msra.mxu2 %v5971_v4  ;;  %8428 = vmatmul.msk.f32.vlgmr.msrb.gmra.mxu3 %vm1572_vm4, %v9504_v61 }
0x31b3   :  { %8436 = vmatmul.msk.f32.vlgmr.msra.gmra.mxu2 %vm1572_vm4, %v9508_v51  ;;  %8438 = vmatpush.msk.msra.mxu3 %vm1899_vm11, %v6091_v54 }
0x31b4   :  { %8446 = vmatpush.msk.msrb.mxu2 %vm1899_vm11, %v6134_v12  ;;  %v6321_v12 = vld [vmem:[#allocation2 + $0x1258] sm:$0xff] }
0x31b5   :  { %6115 = vmatpush.msra.mxu3 %v6090_v60  ;;  %v6291_v60 = vld [vmem:[#allocation2 + $0xf00] sm:$0xff] }
0x31b6   :  { %6216 = vmatpush.msrb.mxu2 %v6133_v13  ;;  %6313 = vmatpush.msrb.mxu1 %v6291_v60  ;;  %v8669_v13 = vld [vmem:[#allocation2 + $0xf10] ss:$0 sm:$0xff] }
0x31b7   :  { %6116 = vmatpush.msra.mxu3 %v6089_v8 }
0x31b8   :  { %6217 = vmatpush.msrb.mxu2 %v6132_v14 }
0x31ba   :  { %8429 = vmatmul.msk.f32.gmra.mxu3 %vm1572_vm4, %v9512_v42  ;;  %8456 = vmatpush.msk.msra.mxu2 %vm1899_vm11, %v6328_v36 }
0x31bb   :  { %8437 = vmatmul.msk.f32.gmra.mxu2 %vm1572_vm4, %v9516_v5 }
0x31bc   :  { %6352 = vmatpush.msra.mxu2 %v6327_v39 }
0x31be   :  { %6353 = vmatpush.msra.mxu2 %v6326_v57 }
0x320e   :  { %v6060_v15 = vpop.f32.mrf.mxu1 }
0x322c   :  { %v6063_v45 = vpop.f32.mrf.mxu1 }
0x3235   :  { %v5993_v9 = vpop.f32.mrf.mxu3 }
0x3236   :  { %v6083_v10 = vpop.f32.mrf.mxu2  ;;  %8431 = vmatmul.msk.f32.vlgmr.msra.gmra.mxu0 %vm1892_vm12, %v5993_v9 }
0x3237   :  { %8439 = vmatmul.msk.f32.vlgmr.msra.gmra.mxu3 %vm1892_vm12, %v6083_v10  ;;  %v6318_v10 = vld [vmem:[#allocation2 + $0x1240] sm:$0xff] }
0x323d   :  { %v5996_v11 = vpop.f32.mrf.mxu3 }
0x323e   :  { %v6086_v22 = vpop.f32.mrf.mxu2  ;;  %8432 = vmatmul.msk.f32.gmra.mxu0 %vm1892_vm12, %v5996_v11  ;;  %v6320_v11 = vld [vmem:[#allocation2 + $0x1250] sm:$0xff] }
0x323f   :  { %8440 = vmatmul.msk.f32.gmra.mxu3 %vm1892_vm12, %v6086_v22  ;;  %v6325_v22 = vld [vmem:[#allocation2 + $0x1278] sm:$0xff] }
0x32b3   :  { %v6028_v30 = vpop.f32.mrf.mxu0 }
0x32b4   :  { %v6061_v0 = vadd.f32 %v6060_v15, %v6028_v30  ;;  %v8751_v15 = vld [vmem:[#allocation2 + $0x11e0] sm:$0xff] }
0x32ba   :  { %v6118_v21 = vpop.f32.mrf.mxu3 }
0x32bb   :  { %v6124_v24 = vadd.f32 %v6118_v21, %v6061_v0  ;;  %v6031_v33 = vpop.f32.mrf.mxu0  ;;  %v6481_v0 = vld [vmem:[#allocation2 + $0x12c8] sm:$0x3] }
0x32bc   :  { %v6064_v27 = vadd.f32 %v6063_v45, %v6031_v33  ;;  %v8752_v21 = vld [vmem:[#allocation2 + $0x11e8] sm:$0xff] }
0x32bd   :  { %v6128_v52 = vadd.f32 %v8667_v17, %v6124_v24  ;;  %v8753_v24 = vld [vmem:[#allocation2 + $0x11f0] sm:$0xff]  ;;  %v8670_v33 = vld [vmem:[#allocation2 + $0xf48] ss:$0 sm:$0xff] }
0x32bf   :  { %v6130_v38 = vmax.f32 %v6128_v52, 0.0  ;;  %v8754_v52 = vld [vmem:[#allocation2 + $0x11f8] sm:$0xff] }
0x32c1   :  { %8447 = vmatmul.msk.f32.vlgmr.msrb.gmra.mxu2 %vm1892_vm12, %v6130_v38 }
0x32c2   :  { %v6121_v1 = vpop.f32.mrf.mxu3  ;;  %8470 = vmatpush.msk.msrb.mxu2 %vm75_vm0, %v6481_v0  ;;  %v9675_v0 = vld [vmem:[#allocation2 + $0x11d0] sm:$0xff] }
0x32c3   :  { %v6125_v34 = vadd.f32 %v6121_v1, %v6064_v27 }
0x32c5   :  { %v6129_v48 = vadd.f32 %v8667_v17, %v6125_v34  ;;  %v6480_v17 = vld [vmem:[#allocation2 + $0x12c0] sm:$0xff] }
0x32c6   :  { %6512 = vmatpush.msrb.mxu2 %v6480_v17  ;;  %v9681_v17 = vld [vmem:[#allocation2 + $0x11d8] sm:$0xff] }
0x32c7   :  { %v6131_v28 = vmax.f32 %v6129_v48, 0.0 }
0x32c9   :  { %6149 = vmatpush.msrb.mxu0 %v6131_v28  ;;  %8448 = vmatmul.msk.f32.gmra.mxu2 %vm1892_vm12, %v6131_v28 }
0x32ca   :  { %6239 = vmatpush.msrb.mxu3 %v6131_v28 }
0x32cb   :  { %6150 = vmatpush.msrb.mxu0 %v6130_v38 }
0x32cc   :  { %6240 = vmatpush.msrb.mxu3 %v6130_v38  ;;  %8441 = vmatmul.msk.f32.vlgmr.msrb.gmra.mxu0 %vm1572_vm4, %v9504_v61  ;;  %v6249_v61 = vld [vmem:[#allocation2 + $0xee8] sm:$0xff] }
0x32cd   :  { %8449 = vmatmul.msk.f32.vlgmr.msrb.gmra.mxu3 %vm1572_vm4, %v9508_v51  ;;  %8451 = vmatpush.msk.msra.mxu0 %vm1899_vm11, %v6250_v49 }
0x32ce   :  { %8459 = vmatpush.msk.msra.mxu3 %vm1899_vm11, %v6363_v37 }
0x32cf   :  { %6274 = vmatpush.msra.mxu0 %v6249_v61 }
0x32d0   :  { %6381 = vmatpush.msra.mxu3 %v6362_v40 }
0x32d1   :  { %6275 = vmatpush.msra.mxu0 %v6248_v31 }
0x32d2   :  { %6382 = vmatpush.msra.mxu3 %v6361_v58 }
0x32d4   :  { %8442 = vmatmul.msk.f32.gmra.mxu0 %vm1572_vm4, %v9512_v42  ;;  %8475 = vmatpush.msk.msrb.mxu3 %vm75_vm0, %v6479_v59 }
0x32d5   :  { %8450 = vmatmul.msk.f32.gmra.mxu3 %vm1572_vm4, %v9516_v5 }
0x32d6   :  { %6556 = vmatpush.msrb.mxu3 %v6478_v23 }
0x3344   :  { %v6219_v63 = vpop.f32.mrf.mxu2 }
0x3349   :  { %v6152_v51 = vpop.f32.mrf.mxu0 }
0x334a   :  { %8444 = vmatmul.msk.f32.vlgmr.msra.gmra.mxu1 %vm1892_vm12, %v6152_v51 }
0x334c   :  { %v6222_v3 = vpop.f32.mrf.mxu2 }
0x3350   :  { %v6242_v42 = vpop.f32.mrf.mxu3 }
0x3351   :  { %8452 = vmatmul.msk.f32.vlgmr.msra.gmra.mxu0 %vm1892_vm12, %v6242_v42  ;;  %v6155_v5 = vpop.f32.mrf.mxu0 }
0x3352   :  { %8445 = vmatmul.msk.f32.gmra.mxu1 %vm1892_vm12, %v6155_v5 }
0x3358   :  { %v6245_v35 = vpop.f32.mrf.mxu3 }
0x3359   :  { %8453 = vmatmul.msk.f32.gmra.mxu0 %vm1892_vm12, %v6245_v35 }
0x335a   :  { %8455 = vmatmul.msk.f32.vlgmr.msrb.gmra.mxu1 %vm71_vm1, %v9454_v6  ;;  %v6324_v6 = vld [vmem:[#allocation2 + $0x1270] sm:$0xff] }
0x33c7   :  { %v6187_v25 = vpop.f32.mrf.mxu1 }
0x33c8   :  { %v6220_v46 = vadd.f32 %v6219_v63, %v6187_v25 }
0x33ce   :  { %v6277_v53 = vpop.f32.mrf.mxu0 }
0x33cf   :  { %v6283_v4 = vadd.f32 %v6277_v53, %v6220_v46  ;;  %v6190_v44 = vpop.f32.mrf.mxu1 }
0x33d0   :  { %v6223_v20 = vadd.f32 %v6222_v3, %v6190_v44 }
0x33d1   :  { %v6287_v62 = vadd.f32 %v8668_v41, %v6283_v4 }
0x33d3   :  { %v6289_v26 = vmax.f32 %v6287_v62, 0.0 }
0x33d5   :  { %8457 = vmatmul.msk.f32.vlgmr.msra.gmra.mxu2 %vm1892_vm12, %v6289_v26  ;;  %8460 = vmatmul.msk.f32.vlgmr.msra.gmra.mxu3 %vm1892_vm12, %v6289_v26 }
0x33d6   :  { %v6280_v55 = vpop.f32.mrf.mxu0 }
0x33d7   :  { %v6284_v56 = vadd.f32 %v6280_v55, %v6223_v20  ;;  %v6315_v14 = vpop.f32.mrf.mxu1 }
0x33d8   :  { %v6316_v30 = vadd.f32 %v8669_v13, %v6315_v14  ;;  %v9663_v14 = vld [vmem:[#allocation2 + $0x11c0] sm:$0xff] }
0x33d9   :  { %v6288_v50 = vadd.f32 %v8668_v41, %v6284_v56 }
0x33db   :  { %v6290_v54 = vmax.f32 %v6288_v50, 0.0 }
0x33dd   :  { %8458 = vmatmul.msk.f32.gmra.mxu2 %vm1892_vm12, %v6290_v54  ;;  %8461 = vmatmul.msk.f32.gmra.mxu3 %vm1892_vm12, %v6290_v54 }
0x33e5   :  { %8476 = vmatmul.msk.f32.vlgmr.msrb.gmra.mxu3 %vm71_vm1, %v9090_v19 }
0x33ed   :  { %8477 = vmatmul.msk.f32.gmra.mxu3 %vm71_vm1, %v9086_v32  ;;  %v6322_v32 = vld [vmem:[#allocation2 + $0x1260] sm:$0xff] }
0x33f5   :  { %8478 = vmatmul.msk.f32.gmra.mxu3 %vm71_vm1, %v9082_v18  ;;  %v6319_v18 = vld [vmem:[#allocation2 + $0x1248] sm:$0xff] }
0x33fd   :  { %8479 = vmatmul.msk.f32.gmra.mxu3 %vm71_vm1, %v9078_v16  ;;  %v6323_v16 = vld [vmem:[#allocation2 + $0x1268] sm:$0xff] }
0x3458   :  { %v6355_v7 = vpop.f32.mrf.mxu2  ;;  %v6384_v8 = vpop.f32.mrf.mxu3 }
0x3460   :  { %v6358_v19 = vpop.f32.mrf.mxu2  ;;  %v6387_v9 = vpop.f32.mrf.mxu3 }
0x3461   :  { %6416 = vmatpush.msra.mxu1 %v6387_v9  ;;  %6457 = vmatpush.msrb.mxu0 %v6358_v19 }
0x3463   :  { %6417 = vmatpush.msra.mxu1 %v6384_v8  ;;  %6458 = vmatpush.msrb.mxu0 %v6355_v7 }
0x3464   :  { %8462 = vmatmul.msk.f32.vlgmr.msra.gmra.mxu1 %vm1572_vm4, %v6322_v32  ;;  %8466 = vmatmul.msk.f32.vlgmr.msrb.gmra.mxu0 %vm1572_vm4, %v6318_v10 }
0x3465   :  { %8480 = vmatpush.msk.msrb.mxu1 %vm75_vm0, %v6316_v30 }
0x3468   :  { %v6558_v35 = vpop.f32.mrf.mxu3 }
0x346c   :  { %8463 = vmatmul.msk.f32.gmra.mxu1 %vm1572_vm4, %v6323_v16  ;;  %8467 = vmatmul.msk.f32.gmra.mxu0 %vm1572_vm4, %v6319_v18 }
0x3470   :  { %v6561_v39 = vpop.f32.mrf.mxu3 }
0x3474   :  { %8464 = vmatmul.msk.f32.gmra.mxu1 %vm1572_vm4, %v6324_v6  ;;  %8468 = vmatmul.msk.f32.gmra.mxu0 %vm1572_vm4, %v6320_v11 }
0x3478   :  { %v6564_v23 = vpop.f32.mrf.mxu3 }
0x347c   :  { %8465 = vmatmul.msk.f32.gmra.mxu1 %vm1572_vm4, %v6325_v22  ;;  %8469 = vmatmul.msk.f32.gmra.mxu0 %vm1572_vm4, %v6321_v12 }
0x3480   :  { %v6567_v44 = vpop.f32.mrf.mxu3 }
0x3484   :  { %8481 = vmatmul.msk.f32.vlgmr.msrb.gmra.mxu1 %vm106_vm2, %v8751_v15  ;;  %v9669_v15 = vld [vmem:[#allocation2 + $0x11c8] sm:$0xff] }
0x348c   :  { %8482 = vmatmul.msk.f32.gmra.mxu1 %vm106_vm2, %v8752_v21 }
0x3494   :  { %8483 = vmatmul.msk.f32.gmra.mxu1 %vm106_vm2, %v8753_v24 }
0x349c   :  { %8484 = vmatmul.msk.f32.gmra.mxu1 %vm106_vm2, %v8754_v52 }
0x34e1   :  { %v6419_v38 = vpop.f32.mrf.mxu1  ;;  %v6460_v45 = vpop.f32.mrf.mxu0 }
0x34e2   :  { %v6461_v27 = vadd.f32 %v6460_v45, %v6419_v38 }
0x34e4   :  { %v6474_v1 = vadd.f32 %v8670_v33, %v6461_v27 }
0x34e6   :  { %8471 = vmatmul.msk.f32.vlgmr.msrb.gmra.mxu2 %vm71_vm1, %v6474_v1 }
0x34e9   :  { %v6422_v34 = vpop.f32.mrf.mxu1  ;;  %v6463_v48 = vpop.f32.mrf.mxu0 }
0x34ea   :  { %v6464_v28 = vadd.f32 %v6463_v48, %v6422_v34 }
0x34ec   :  { %v6475_v29 = vadd.f32 %v8670_v33, %v6464_v28 }
0x34ee   :  { %8472 = vmatmul.msk.f32.gmra.mxu2 %vm71_vm1, %v6475_v29 }
0x34f1   :  { %v6425_v43 = vpop.f32.mrf.mxu1  ;;  %v6466_v47 = vpop.f32.mrf.mxu0 }
0x34f2   :  { %v6467_v49 = vadd.f32 %v6466_v47, %v6425_v43 }
0x34f4   :  { %v6476_v61 = vadd.f32 %v8670_v33, %v6467_v49 }
0x34f6   :  { %8473 = vmatmul.msk.f32.gmra.mxu2 %vm71_vm1, %v6476_v61 }
0x34f9   :  { %v6428_v31 = vpop.f32.mrf.mxu1  ;;  %v6469_v51 = vpop.f32.mrf.mxu0 }
0x34fa   :  { %v6470_v42 = vadd.f32 %v6469_v51, %v6428_v31 }
0x34fc   :  { %v6477_v5 = vadd.f32 %v8670_v33, %v6470_v42 }
0x34fe   :  { %8474 = vmatmul.msk.f32.gmra.mxu2 %vm71_vm1, %v6477_v5 }
0x3501   :  { %v6590_v36 = vpop.f32.mrf.mxu1 }
0x3509   :  { %v6593_v40 = vpop.f32.mrf.mxu1 }
0x3511   :  { %v6596_v63 = vpop.f32.mrf.mxu1 }
0x3519   :  { %v6599_v3 = vpop.f32.mrf.mxu1 }
0x3569   :  { %v6514_v37 = vpop.f32.mrf.mxu2 }
0x356a   :  { %v6559_v20 = vadd.f32 %v6558_v35, %v6514_v37 }
0x356c   :  { %v9648_v54 = vadd.f32 %v6590_v36, %v6559_v20 }
0x356e   :  { %v6651_v19 = vmul.f32 %v9648_v54, %v9648_v54  ;;  %v6606_v9 = vsel %vm1892_vm12, %v9648_v54, 0.0 }
0x3570   :  { %v6655_v32 = vsel %vm1892_vm12, %v6651_v19, 0.0 }
0x3571   :  { %v6517_v57 = vpop.f32.mrf.mxu2 }
0x3572   :  { %v6562_v58 = vadd.f32 %v6561_v39, %v6517_v57 }
0x3574   :  { %v9635_v59 = vadd.f32 %v6593_v40, %v6562_v58 }
0x3576   :  { %v6652_v25 = vmul.f32 %v9635_v59, %v9635_v59  ;;  %v6609_v10 = vsel %vm1892_vm12, %v9635_v59, 0.0 }
0x3578   :  { %v6658_v46 = vsel %vm1892_vm12, %v6652_v25, 0.0 }
0x3579   :  { %6659 = vadd.xlane.f32.xlu0 %v6658_v46  ;;  %v6520_v41 = vpop.f32.mrf.mxu2 }
0x357a   :  { %v6565_v53 = vadd.f32 %v6564_v23, %v6520_v41 }
0x357c   :  { %v9640_v4 = vadd.f32 %v6596_v63, %v6565_v53 }
0x357e   :  { %v6612_v62 = vsel %vm1892_vm12, %v9640_v4, 0.0  ;;  %v6653_v56 = vmul.f32 %v9640_v4, %v9640_v4 }
0x357f   :  { %6613 = vadd.xlane.f32.xlu1 %v6612_v62 }
0x3580   :  { %v6661_v2 = vsel %vm1892_vm12, %v6653_v56, 0.0 }
0x3581   :  { %v6523_v26 = vpop.f32.mrf.mxu2 }
0x3582   :  { %v6568_v55 = vadd.f32 %v6567_v44, %v6523_v26 }
0x3584   :  { %v9646_v50 = vadd.f32 %v6599_v3, %v6568_v55 }
0x3586   :  { %v6615_v60 = vsel %vm1892_vm12, %v9646_v50, 0.0  ;;  %v6654_v7 = vmul.f32 %v9646_v50, %v9646_v50 }
0x3587   :  { %6662 = vadd.xlane.f32.xlu1 %v6661_v2  ;;  %6616 = vadd.xlane.f32.xlu2 %v6615_v60 }
0x3588   :  { %v6664_v8 = vsel %vm1892_vm12, %v6654_v7, 0.0 }
0x3589   :  { %6665 = vadd.xlane.f32.xlu0 %v6664_v8 }
0x358f   :  { %6607 = vadd.xlane.f32.xlu1 %v6606_v9  ;;  %6656 = vadd.xlane.f32.xlu2 %v6655_v32 }
0x3591   :  { %6610 = vadd.xlane.f32.xlu0 %v6609_v10 }
0x35ec   :  { %v6660_v18 = vpop.xlane.xlu0 %6659 }
0x35f2   :  { %v6614_v16 = vpop.xlane.xlu1 %6613 }
0x35fa   :  { %v6617_v6 = vpop.xlane.xlu2 %6616  ;;  %v6663_v11 = vpop.xlane.xlu1 %6662 }
0x35fb   :  { %6630 = vmatpush.msra.mxu0 %v6617_v6 }
0x35fc   :  { %v6666_v22 = vpop.xlane.xlu0 %6665 }
0x35fd   :  { %6631 = vmatpush.msra.mxu0 %v6614_v16  ;;  %6679 = vmatpush.msra.mxu2 %v6666_v22 }
0x35ff   :  { %6680 = vmatpush.msra.mxu2 %v6663_v11 }
0x3601   :  { %6681 = vmatpush.msra.mxu2 %v6660_v18 }
0x3602   :  { %v6657_v12 = vpop.xlane.xlu2 %6656  ;;  %v6608_v30 = vpop.xlane.xlu1 %6607 }
0x3603   :  { %6682 = vmatpush.msra.mxu2 %v6657_v12 }
0x3604   :  { %v6611_v13 = vpop.xlane.xlu0 %6610  ;;  %8489 = vmatmul.msk.f32.vlgmr.msra.gmra.mxu2 %vm159_vm3, %v9663_v14 }
0x3605   :  { %6632 = vmatpush.msra.mxu0 %v6611_v13 }
0x3607   :  { %6633 = vmatpush.msra.mxu0 %v6608_v30 }
0x3608   :  { %8485 = vmatmul.msk.f32.vlgmr.msra.gmra.mxu0 %vm159_vm3, %v9663_v14 }
0x360c   :  { %8490 = vmatmul.msk.f32.gmra.mxu2 %vm159_vm3, %v9669_v15 }
0x3610   :  { %8486 = vmatmul.msk.f32.gmra.mxu0 %vm159_vm3, %v9669_v15 }
0x3614   :  { %8491 = vmatmul.msk.f32.gmra.mxu2 %vm159_vm3, %v9675_v0 }
0x3618   :  { %8487 = vmatmul.msk.f32.gmra.mxu0 %vm159_vm3, %v9675_v0 }
0x361c   :  { %8492 = vmatmul.msk.f32.gmra.mxu2 %vm159_vm3, %v9681_v17 }
0x3620   :  { %8488 = vmatmul.msk.f32.gmra.mxu0 %vm159_vm3, %v9681_v17 }
0x3685   :  { %v6635_v21 = vpop.f32.mrf.mxu0 }
0x3686   :  { %v6647_v52 = vmul.f32 0.003125, %v6635_v21  ;;  %v6818_v21 = vld [vmem:[#allocation2 + $0xfb8] sm:$0xf] }
0x3687   :  { %v6684_v24 = vpop.f32.mrf.mxu2  ;;  %8502 = vmatpush.msk.msrb.mxu0 %vm1899_vm11, %v6818_v21 }
0x3688   :  { %v6724_v38 = vmul.f32 %v6647_v52, %v6647_v52  ;;  %v6696_v45 = vmul.f32 0.003125, %v6684_v24  ;;  %v6817_v24 = vld [vmem:[#allocation2 + $0xfb0] sm:$0xff] }
0x3689   :  { %6924 = vmatpush.msrb.mxu0 %v6817_v24 }
0x368a   :  { %v6728_v34 = vsub.f32 %v6696_v45, %v6724_v38 }
0x368c   :  { %v6732_v28 = vadd.f32 1e-05, %v6728_v34 }
0x368d   :  { %v6638_v33 = vpop.f32.mrf.mxu0 }
0x368e   :  { %v6648_v27 = vmul.f32 0.003125, %v6638_v33  ;;  %8720 = vrsqrt.f32 %v6732_v28  ;;  %vm6742_vm14 = vweird.f32 %v6732_v28 }
0x368f   :  { %v6687_v1 = vpop.f32.mrf.mxu2 }
0x3690   :  { %6707 = vperm.xlu0 %8626, %v6648_v27   ;;  %v6725_v29 = vmul.f32 %v6648_v27, %v6648_v27  ;;  %v6697_v43 = vmul.f32 0.003125, %v6687_v1 }
0x3692   :  { %v6729_v51 = vsub.f32 %v6697_v43, %v6725_v29  ;;  %v6808_v43 = vld [vmem:[#allocation2 + $0xf70] sm:$0xff] }
0x3694   :  { %v6733_v36 = vadd.f32 1e-05, %v6729_v51  ;;  %v8721_v40 = vpop.eup %8720 }
0x3695   :  { %v6641_v48 = vpop.f32.mrf.mxu0  ;;  %v6737_v25 = vmul.f32 %v8721_v40, %v6732_v28  ;;  %vm6743_vm6 = vweird.f32 %v8721_v40 }
0x3696   :  { %v6649_v47 = vmul.f32 0.003125, %v6641_v48  ;;  %vm6744_vm7 = vmor %vm6742_vm14, %vm6743_vm6  ;;  %vm6752_vm9 = vweird.f32 %v6733_v36  ;;  %v6800_v48 = vld [vmem:[#allocation2 + $0xf50] sm:$0xff] }
0x3697   :  { %v6690_v49 = vpop.f32.mrf.mxu2  ;;  %v6738_v62 = vmul.f32 %v8721_v40, %v6737_v25  ;;  %v6801_v25 = vld [vmem:[#allocation2 + $0xf58] sm:$0xff] }
0x3698   :  { %v6726_v61 = vmul.f32 %v6649_v47, %v6649_v47  ;;  %v6698_v31 = vmul.f32 0.003125, %v6690_v49  ;;  %6712 = vperm.xlu0 %8626, %v6649_v47  }
0x3699   :  { %v6739_v55 = vmul.f32 0.5, %v6738_v62  ;;  %v9703_v62 = vld [vmem:[#allocation2 + $0x1188] sm:$0xff] }
0x369a   :  { %v6730_v42 = vsub.f32 %v6698_v31, %v6726_v61 }
0x369b   :  { %v6740_v8 = vsub.f32 1.5, %v6739_v55  ;;  %v9724_v55 = vld [vmem:[#allocation2 + $0x11b8] sm:$0xff] }
0x369c   :  { %v6734_v5 = vadd.f32 1e-05, %v6730_v42  ;;  %v6802_v42 = vld [vmem:[#allocation2 + $0xf60] sm:$0xff] }
0x369d   :  { %v6644_v35 = vpop.f32.mrf.mxu0  ;;  %v6741_v10 = vmul.f32 %v8721_v40, %v6740_v8  ;;  %v6848_v8 = vld [vmem:[#allocation2 + $0xf90] sm:$0xff] }
0x369e   :  { %8722 = vrsqrt.f32 %v6734_v5  ;;  %v6650_v37 = vmul.f32 0.003125, %v6644_v35  ;;  %vm6762_vm4 = vweird.f32 %v6734_v5 }
0x369f   :  { %v6693_v39 = vpop.f32.mrf.mxu2  ;;  %8724 = vrsqrt.f32 %v6733_v36  ;;  %v6745_v11 = vsel %vm6744_vm7, %v8721_v40, %v6741_v10  ;;  %v6810_v40 = vld [vmem:[#allocation2 + $0xf80] sm:$0xff] }
0x36a0   :  { %v6727_v57 = vmul.f32 %v6650_v37, %v6650_v37  ;;  %v6699_v58 = vmul.f32 0.003125, %v6693_v39  ;;  %6702 = vperm.xlu0 %8626, %v6647_v52   ;;  %6717 = vperm.xlu2 %8624, %v6650_v37   ;;  %v6816_v52 = vld [vmem:[#allocation2 + $0xfa8] sm:$0xff] }
0x36a1   :  { %6925 = vmatpush.msrb.mxu0 %v6816_v52  ;;  %v6811_v37 = vld [vmem:[#allocation2 + $0xf88] sm:$0xff]  ;;  %v8671_v52 = vld [vmem:[#allocation2 + $0xfd8] ss:$0 sm:$0xff] }
0x36a2   :  { %v6731_v23 = vsub.f32 %v6699_v58, %v6727_v57 }
0x36a4   :  { %v8723_v63 = vpop.eup %8722  ;;  %v6735_v46 = vadd.f32 1e-05, %v6731_v23 }
0x36a5   :  { %v6757_v41 = vmul.f32 %v8723_v63, %v6734_v5  ;;  %v8725_v44 = vpop.eup %8724  ;;  %vm6763_vm2 = vweird.f32 %v8723_v63  ;;  %v6803_v5 = vld [vmem:[#allocation2 + $0xf68] sm:$0xff] }
0x36a6   :  { %8726 = vrsqrt.f32 %v6735_v46  ;;  %v6747_v3 = vmul.f32 %v8725_v44, %v6733_v36  ;;  %vm6764_vm15 = vmor %vm6762_vm4, %vm6763_vm2  ;;  %vm6772_vm10 = vweird.f32 %v6735_v46  ;;  %vm6753_vm13 = vweird.f32 %v8725_v44 }
0x36a7   :  { %v6758_v53 = vmul.f32 %v8723_v63, %v6757_v41  ;;  %vm6754_vm2 = vmor %vm6752_vm9, %vm6753_vm13 }
0x36a8   :  { %v6748_v9 = vmul.f32 %v8725_v44, %v6747_v3  ;;  %v9716_v3 = vld [vmem:[#allocation2 + $0x11b0] sm:$0xff] }
0x36a9   :  { %v6759_v26 = vmul.f32 0.5, %v6758_v53  ;;  %v9694_v53 = vld [vmem:[#allocation2 + $0x1180] sm:$0xff] }
0x36aa   :  { %v6749_v18 = vmul.f32 0.5, %v6748_v9 }
0x36ab   :  { %v6760_v20 = vsub.f32 1.5, %v6759_v26  ;;  %v9712_v26 = vld [vmem:[#allocation2 + $0x1190] sm:$0xff] }
0x36ac   :  { %v8727_v56 = vpop.eup %8726  ;;  %v6750_v12 = vsub.f32 1.5, %v6749_v18 }
0x36ad   :  { %v6767_v2 = vmul.f32 %v8727_v56, %v6735_v46  ;;  %v6761_v60 = vmul.f32 %v8723_v63, %v6760_v20  ;;  %vm6773_vm5 = vweird.f32 %v8727_v56  ;;  %v9720_v20 = vld [vmem:[#allocation2 + $0x1198] sm:$0xff] }
0x36ae   :  { %vm6774_vm8 = vmor %vm6772_vm10, %vm6773_vm5  ;;  %v6751_v13 = vmul.f32 %v8725_v44, %v6750_v12  ;;  %v7030_v12 = vld [vmem:[#allocation2 + $0xff8] sm:$0x3] }
0x36af   :  { %v6765_v7 = vsel %vm6764_vm15, %v8723_v63, %v6761_v60  ;;  %v6768_v19 = vmul.f32 %v8727_v56, %v6767_v2  ;;  %v6850_v2 = vld [vmem:[#allocation2 + $0xfa0] sm:$0xf]  ;;  %v6849_v60 = vld [vmem:[#allocation2 + $0xf98] sm:$0xff] }
0x36b0   :  { %6788 = vperm.xlu2 %8624, %v6765_v7   ;;  %v6755_v30 = vsel %vm6754_vm2, %v8725_v44, %v6751_v13  ;;  %v9707_v44 = vld [vmem:[#allocation2 + $0x11a8] sm:$0xff]  ;;  %8497 = vmatpush.msk.msra.mxu1 %vm1899_vm11, %v6850_v2  ;;  %v7029_v13 = vld [vmem:[#allocation2 + $0xff0] sm:$0xff] }
0x36b1   :  { %v6769_v32 = vmul.f32 0.5, %v6768_v19  ;;  %v6969_v7 = vld [vmem:[#allocation2 + $0xfc8] sm:$0xff]  ;;  %v6968_v19 = vld [vmem:[#allocation2 + $0xfc0] sm:$0xff] }
0x36b2   :  { %6880 = vmatpush.msra.mxu1 %v6849_v60 }
0x36b3   :  { %v6770_v16 = vsub.f32 1.5, %v6769_v32 }
0x36b4   :  { %6881 = vmatpush.msra.mxu1 %v6848_v8 }
0x36b5   :  { %v6771_v6 = vmul.f32 %v8727_v56, %v6770_v16 }
0x36b7   :  { %v6775_v22 = vsel %vm6774_vm8, %v8727_v56, %v6771_v6  ;;  %v6970_v56 = vld [vmem:[#allocation2 + $0xfd0] sm:$0xf] }
0x36b8   :  { %6778 = vperm.xlu2 %8624, %v6745_v11   ;;  %6793 = vperm.xlu1 %8625, %v6775_v22  }
0x36c0   :  { %6783 = vperm.xlu1 %8625, %v6755_v30  }
0x36fa   :  { %v6718_v33 = vpop.permute.xlu2 %6717 }
0x36fb   :  { %v6723_v31 = vsub.f32 %v9646_v50, %v6718_v33  ;;  %v6809_v50 = vld [vmem:[#allocation2 + $0xf78] sm:$0xff] }
0x3702   :  { %v6708_v38 = vpop.permute.xlu0 %6707 }
0x3703   :  { %v6721_v58 = vsub.f32 %v9635_v59, %v6708_v38  ;;  %v9698_v59 = vld [vmem:[#allocation2 + $0x11a0] sm:$0xff] }
0x370a   :  { %v6713_v45 = vpop.permute.xlu0 %6712  ;;  %v6789_v27 = vpop.permute.xlu2 %6788 }
0x370b   :  { %v6722_v61 = vsub.f32 %v9640_v4, %v6713_v45 }
0x370d   :  { %v6798_v51 = vmul.f32 %v6789_v27, %v6722_v61 }
0x370f   :  { %v6806_v39 = vmul.f32 %v6802_v42, %v6798_v51 }
0x3711   :  { %v6814_v23 = vadd.f32 %v6810_v40, %v6806_v39 }
0x3712   :  { %v6703_v1 = vpop.permute.xlu0 %6702  ;;  %v6779_v28 = vpop.permute.xlu2 %6778 }
0x3713   :  { %v6720_v34 = vsub.f32 %v9648_v54, %v6703_v1 }
0x3715   :  { %v6796_v29 = vmul.f32 %v6779_v28, %v6720_v34 }
0x3717   :  { %v6804_v47 = vmul.f32 %v6800_v48, %v6796_v29 }
0x3719   :  { %v6812_v49 = vadd.f32 %v6808_v43, %v6804_v47 }
0x371b   :  { %8503 = vmatmul.msk.f32.vlgmr.msrb.gmra.mxu0 %vm1892_vm12, %v6812_v49 }
0x372a   :  { %v6794_v35 = vpop.permute.xlu1 %6793 }
0x372b   :  { %v6799_v36 = vmul.f32 %v6794_v35, %v6723_v31 }
0x372d   :  { %v6807_v54 = vmul.f32 %v6803_v5, %v6799_v36 }
0x372f   :  { %v6815_v57 = vadd.f32 %v6811_v37, %v6807_v54 }
0x3731   :  { %6831 = vmatpush.msra.mxu3 %v6815_v57  ;;  %6951 = vmatpush.msrb.mxu2 %v6815_v57 }
0x3732   :  { %v6784_v63 = vpop.permute.xlu1 %6783 }
0x3733   :  { %v6797_v4 = vmul.f32 %v6784_v63, %v6721_v58  ;;  %6832 = vmatpush.msra.mxu3 %v6814_v23  ;;  %6952 = vmatpush.msrb.mxu2 %v6814_v23  ;;  %v7180_v63 = vld [vmem:[#allocation2 + $0x1008] sm:$0x3] }
0x3735   :  { %v6805_v46 = vmul.f32 %v6801_v25, %v6797_v4  ;;  %v7060_v25 = vld [vmem:[#allocation2 + $0xfe0] sm:$0xff] }
0x3736   :  { %v7179_v4 = vld [vmem:[#allocation2 + $0x1000] sm:$0xff] }
0x3737   :  { %v6813_v41 = vadd.f32 %v6809_v50, %v6805_v46 }
0x3739   :  { %6833 = vmatpush.msra.mxu3 %v6813_v41  ;;  %8504 = vmatmul.msk.f32.gmra.mxu0 %vm1892_vm12, %v6813_v41 }
0x373a   :  { %6953 = vmatpush.msrb.mxu2 %v6813_v41 }
0x373b   :  { %6834 = vmatpush.msra.mxu3 %v6812_v49 }
0x373c   :  { %6954 = vmatpush.msrb.mxu2 %v6812_v49  ;;  %8493 = vmatmul.msk.f32.vlgmr.msra.gmra.mxu3 %vm159_vm3, %v9694_v53 }
0x373d   :  { %8507 = vmatmul.msk.f32.vlgmr.msrb.gmra.mxu2 %vm159_vm3, %v9698_v59  ;;  %8511 = vmatpush.msk.msrb.mxu3 %vm1899_vm11, %v6970_v56 }
0x373e   :  { %8525 = vmatpush.msk.msra.mxu2 %vm75_vm0, %v7030_v12 }
0x373f   :  { %7000 = vmatpush.msrb.mxu3 %v6969_v7 }
0x3740   :  { %7136 = vmatpush.msra.mxu2 %v7029_v13 }
0x3741   :  { %8505 = vmatmul.msk.f32.gmra.mxu0 %vm1892_vm12, %v6814_v23  ;;  %7001 = vmatpush.msrb.mxu3 %v6968_v19  ;;  %v7061_v23 = vld [vmem:[#allocation2 + $0xfe8] sm:$0x3] }
0x3742   :  { %8520 = vmatpush.msk.msra.mxu0 %vm75_vm0, %v7061_v23 }
0x3744   :  { %8494 = vmatmul.msk.f32.gmra.mxu3 %vm159_vm3, %v9703_v62  ;;  %7092 = vmatpush.msra.mxu0 %v7060_v25 }
0x3745   :  { %8508 = vmatmul.msk.f32.gmra.mxu2 %vm159_vm3, %v9707_v44 }
0x3749   :  { %8506 = vmatmul.msk.f32.gmra.mxu0 %vm1892_vm12, %v6815_v57 }
0x374c   :  { %8495 = vmatmul.msk.f32.gmra.mxu3 %vm159_vm3, %v9712_v26 }
0x374d   :  { %8509 = vmatmul.msk.f32.gmra.mxu2 %vm159_vm3, %v9716_v3 }
0x3754   :  { %8496 = vmatmul.msk.f32.gmra.mxu3 %vm159_vm3, %v9720_v20 }
0x3755   :  { %8510 = vmatmul.msk.f32.gmra.mxu2 %vm159_vm3, %v9724_v55 }
0x3798   :  { %v6927_v21 = vpop.f32.mrf.mxu0 }
0x37b6   :  { %v6930_v27 = vpop.f32.mrf.mxu0 }
0x37be   :  { %v6933_v49 = vpop.f32.mrf.mxu0 }
0x37bf   :  { %v6836_v9 = vpop.f32.mrf.mxu3 }
0x37c0   :  { %v6956_v32 = vpop.f32.mrf.mxu2  ;;  %8498 = vmatmul.msk.f32.vlgmr.msra.gmra.mxu1 %vm1892_vm12, %v6836_v9 }
0x37c1   :  { %8512 = vmatmul.msk.f32.vlgmr.msrb.gmra.mxu3 %vm1892_vm12, %v6956_v32 }
0x37c6   :  { %v6936_v37 = vpop.f32.mrf.mxu0 }
0x37c7   :  { %v6839_v10 = vpop.f32.mrf.mxu3 }
0x37c8   :  { %v6959_v16 = vpop.f32.mrf.mxu2  ;;  %8499 = vmatmul.msk.f32.gmra.mxu1 %vm1892_vm12, %v6839_v10 }
0x37c9   :  { %8513 = vmatmul.msk.f32.gmra.mxu3 %vm1892_vm12, %v6959_v16 }
0x37cf   :  { %v6842_v18 = vpop.f32.mrf.mxu3 }
0x37d0   :  { %v6962_v6 = vpop.f32.mrf.mxu2  ;;  %8500 = vmatmul.msk.f32.gmra.mxu1 %vm1892_vm12, %v6842_v18 }
0x37d1   :  { %8514 = vmatmul.msk.f32.gmra.mxu3 %vm1892_vm12, %v6962_v6 }
0x37d7   :  { %v6845_v11 = vpop.f32.mrf.mxu3 }
0x37d8   :  { %v6965_v22 = vpop.f32.mrf.mxu2  ;;  %8501 = vmatmul.msk.f32.gmra.mxu1 %vm1892_vm12, %v6845_v11  ;;  %v8672_v11 = vld [vmem:[#allocation2 + $0x1010] ss:$0 sm:$0xff] }
0x37d9   :  { %8515 = vmatmul.msk.f32.gmra.mxu3 %vm1892_vm12, %v6965_v22 }
0x383d   :  { %v6883_v30 = vpop.f32.mrf.mxu1 }
0x383e   :  { %v6928_v24 = vadd.f32 %v6927_v21, %v6883_v30 }
0x3844   :  { %v7003_v33 = vpop.f32.mrf.mxu3 }
0x3845   :  { %v7015_v38 = vadd.f32 %v7003_v33, %v6928_v24  ;;  %v6886_v45 = vpop.f32.mrf.mxu1 }
0x3846   :  { %v6931_v48 = vadd.f32 %v6930_v27, %v6886_v45 }
0x3847   :  { %v7021_v1 = vadd.f32 %v8671_v52, %v7015_v38 }
0x3849   :  { %v7025_v34 = vmax.f32 %v7021_v1, 0.0 }
0x384b   :  { %8526 = vmatmul.msk.f32.vlgmr.msra.gmra.mxu2 %vm71_vm1, %v7025_v34 }
0x384c   :  { %v7006_v28 = vpop.f32.mrf.mxu3 }
0x384d   :  { %v7016_v29 = vadd.f32 %v7006_v28, %v6931_v48  ;;  %v6889_v43 = vpop.f32.mrf.mxu1 }
0x384e   :  { %v6934_v31 = vadd.f32 %v6933_v49, %v6889_v43 }
0x384f   :  { %v7022_v47 = vadd.f32 %v8671_v52, %v7016_v29 }
0x3851   :  { %v7026_v61 = vmax.f32 %v7022_v47, 0.0 }
0x3853   :  { %8527 = vmatmul.msk.f32.gmra.mxu2 %vm71_vm1, %v7026_v61 }
0x3854   :  { %v7009_v51 = vpop.f32.mrf.mxu3 }
0x3855   :  { %v7017_v42 = vadd.f32 %v7009_v51, %v6934_v31  ;;  %v6892_v35 = vpop.f32.mrf.mxu1 }
0x3856   :  { %v6937_v39 = vadd.f32 %v6936_v37, %v6892_v35 }
0x3857   :  { %v7023_v5 = vadd.f32 %v8671_v52, %v7017_v42 }
0x3859   :  { %v7027_v36 = vmax.f32 %v7023_v5, 0.0 }
0x385b   :  { %8528 = vmatmul.msk.f32.gmra.mxu2 %vm71_vm1, %v7027_v36 }
0x385c   :  { %v7012_v54 = vpop.f32.mrf.mxu3 }
0x385d   :  { %v7018_v40 = vadd.f32 %v7012_v54, %v6937_v39 }
0x385f   :  { %v7024_v57 = vadd.f32 %v8671_v52, %v7018_v40 }
0x3861   :  { %v7028_v58 = vmax.f32 %v7024_v57, 0.0 }
0x3863   :  { %7043 = vmatpush.msrb.mxu1 %v7028_v58  ;;  %8529 = vmatmul.msk.f32.gmra.mxu2 %vm71_vm1, %v7028_v58 }
0x3864   :  { %7162 = vmatpush.msra.mxu3 %v7028_v58 }
0x3865   :  { %7044 = vmatpush.msrb.mxu1 %v7027_v36 }
0x3866   :  { %7163 = vmatpush.msra.mxu3 %v7027_v36 }
0x3867   :  { %7045 = vmatpush.msrb.mxu1 %v7026_v61 }
0x3868   :  { %7164 = vmatpush.msra.mxu3 %v7026_v61 }
0x3869   :  { %7046 = vmatpush.msrb.mxu1 %v7025_v34 }
0x386a   :  { %7165 = vmatpush.msra.mxu3 %v7025_v34  ;;  %8516 = vmatmul.msk.f32.vlgmr.msrb.gmra.mxu1 %vm159_vm3, %v9694_v53 }
0x386b   :  { %8530 = vmatmul.msk.f32.vlgmr.msra.gmra.mxu3 %vm159_vm3, %v9698_v59  ;;  %8534 = vmatpush.msk.msra.mxu1 %vm75_vm0, %v7180_v63 }
0x386d   :  { %7211 = vmatpush.msra.mxu1 %v7179_v4 }
0x3872   :  { %8517 = vmatmul.msk.f32.gmra.mxu1 %vm159_vm3, %v9703_v62 }
0x3873   :  { %8531 = vmatmul.msk.f32.gmra.mxu3 %vm159_vm3, %v9707_v44 }
0x387a   :  { %8518 = vmatmul.msk.f32.gmra.mxu1 %vm159_vm3, %v9712_v26 }
0x387b   :  { %8532 = vmatmul.msk.f32.gmra.mxu3 %vm159_vm3, %v9716_v3 }
0x3882   :  { %8519 = vmatmul.msk.f32.gmra.mxu1 %vm159_vm3, %v9720_v20 }
0x3883   :  { %8533 = vmatmul.msk.f32.gmra.mxu3 %vm159_vm3, %v9724_v55 }
0x38ce   :  { %v7138_v19 = vpop.f32.mrf.mxu2 }
0x38d6   :  { %v7141_v16 = vpop.f32.mrf.mxu2 }
0x38de   :  { %v7144_v30 = vpop.f32.mrf.mxu2 }
0x38e6   :  { %v7147_v43 = vpop.f32.mrf.mxu2 }
0x38e7   :  { %v7048_v50 = vpop.f32.mrf.mxu1 }
0x38e8   :  { %8521 = vmatmul.msk.f32.vlgmr.msra.gmra.mxu0 %vm71_vm1, %v7048_v50 }
0x38ee   :  { %v7167_v46 = vpop.f32.mrf.mxu3 }
0x38ef   :  { %8535 = vmatmul.msk.f32.vlgmr.msra.gmra.mxu1 %vm71_vm1, %v7167_v46  ;;  %v7051_v41 = vpop.f32.mrf.mxu1 }
0x38f0   :  { %8522 = vmatmul.msk.f32.gmra.mxu0 %vm71_vm1, %v7051_v41 }
0x38f6   :  { %v7170_v56 = vpop.f32.mrf.mxu3 }
0x38f7   :  { %8536 = vmatmul.msk.f32.gmra.mxu1 %vm71_vm1, %v7170_v56  ;;  %v7054_v2 = vpop.f32.mrf.mxu1 }
0x38f8   :  { %8523 = vmatmul.msk.f32.gmra.mxu0 %vm71_vm1, %v7054_v2 }
0x38fe   :  { %v7173_v60 = vpop.f32.mrf.mxu3 }
0x38ff   :  { %8537 = vmatmul.msk.f32.gmra.mxu1 %vm71_vm1, %v7173_v60  ;;  %v7057_v7 = vpop.f32.mrf.mxu1 }
0x3900   :  { %8524 = vmatmul.msk.f32.gmra.mxu0 %vm71_vm1, %v7057_v7 }
0x3906   :  { %v7176_v8 = vpop.f32.mrf.mxu3 }
0x3907   :  { %8538 = vmatmul.msk.f32.gmra.mxu1 %vm71_vm1, %v7176_v8 }
0x3965   :  { %v7094_v9 = vpop.f32.mrf.mxu0 }
0x3966   :  { %v7139_v24 = vadd.f32 %v7138_v19, %v7094_v9 }
0x396c   :  { %v7213_v32 = vpop.f32.mrf.mxu1 }
0x396d   :  { %v7097_v10 = vpop.f32.mrf.mxu0  ;;  %v7225_v45 = vadd.f32 %v7213_v32, %v7139_v24 }
0x396e   :  { %v7142_v18 = vadd.f32 %v7141_v16, %v7097_v10 }
0x396f   :  { %v7231_v28 = vadd.f32 %v8672_v11, %v7225_v45 }
0x3971   :  { %v9778_v31 = vmax.f32 %v7231_v28, 0.0 }
0x3973   :  { %v7284_v36 = vmul.f32 %v9778_v31, %v9778_v31  ;;  %v7239_v23 = vsel %vm71_vm1, %v9778_v31, 0.0 }
0x3974   :  { %v7216_v6 = vpop.f32.mrf.mxu1 }
0x3975   :  { %v7226_v22 = vadd.f32 %v7216_v6, %v7142_v18  ;;  %v7100_v12 = vpop.f32.mrf.mxu0  ;;  %v7288_v54 = vsel %vm71_vm1, %v7284_v36, 0.0 }
0x3976   :  { %v7145_v52 = vadd.f32 %v7144_v30, %v7100_v12 }
0x3977   :  { %v7232_v13 = vadd.f32 %v8672_v11, %v7226_v22 }
0x3979   :  { %v9769_v21 = vmax.f32 %v7232_v13, 0.0 }
0x397b   :  { %v7285_v33 = vmul.f32 %v9769_v21, %v9769_v21  ;;  %v7242_v57 = vsel %vm71_vm1, %v9769_v21, 0.0 }
0x397c   :  { %v7219_v38 = vpop.f32.mrf.mxu1 }
0x397d   :  { %v7227_v27 = vadd.f32 %v7219_v38, %v7145_v52  ;;  %v7291_v1 = vsel %vm71_vm1, %v7285_v33, 0.0  ;;  %v7103_v48 = vpop.f32.mrf.mxu0 }
0x397e   :  { %7292 = vadd.xlane.f32.xlu2 %v7291_v1  ;;  %v7148_v47 = vadd.f32 %v7147_v43, %v7103_v48 }
0x397f   :  { %v7233_v34 = vadd.f32 %v8672_v11, %v7227_v27 }
0x3981   :  { %v9774_v29 = vmax.f32 %v7233_v34, 0.0 }
0x3983   :  { %v7286_v49 = vmul.f32 %v9774_v29, %v9774_v29  ;;  %v7245_v58 = vsel %vm71_vm1, %v9774_v29, 0.0 }
0x3984   :  { %v7222_v61 = vpop.f32.mrf.mxu1 }
0x3985   :  { %v7228_v51 = vadd.f32 %v7222_v61, %v7148_v47  ;;  %v7294_v42 = vsel %vm71_vm1, %v7286_v49, 0.0 }
0x3986   :  { %7295 = vadd.xlane.f32.xlu1 %v7294_v42 }
0x3987   :  { %v7234_v5 = vadd.f32 %v8672_v11, %v7228_v51 }
0x3989   :  { %v9781_v35 = vmax.f32 %v7234_v5, 0.0 }
0x398b   :  { %v7248_v37 = vsel %vm71_vm1, %v9781_v35, 0.0  ;;  %v7287_v39 = vmul.f32 %v9781_v35, %v9781_v35 }
0x398c   :  { %7249 = vadd.xlane.f32.xlu2 %v7248_v37 }
0x398d   :  { %v7297_v40 = vsel %vm71_vm1, %v7287_v39, 0.0 }
0x398e   :  { %7289 = vadd.xlane.f32.xlu1 %v7288_v54  ;;  %7298 = vadd.xlane.f32.xlu0 %v7297_v40 }
0x3994   :  { %7243 = vadd.xlane.f32.xlu2 %v7242_v57 }
0x3996   :  { %7246 = vadd.xlane.f32.xlu0 %v7245_v58 }
0x399e   :  { %7240 = vadd.xlane.f32.xlu0 %v7239_v23 }
0x39f1   :  { %v7293_v25 = vpop.xlane.xlu2 %7292 }
0x39f9   :  { %v7296_v63 = vpop.xlane.xlu1 %7295 }
0x39ff   :  { %v7250_v4 = vpop.xlane.xlu2 %7249 }
0x3a00   :  { %7263 = vmatpush.msrb.mxu0 %v7250_v4 }
0x3a01   :  { %v7299_v50 = vpop.xlane.xlu0 %7298  ;;  %v7290_v46 = vpop.xlane.xlu1 %7289 }
0x3a02   :  { %7312 = vmatpush.msrb.mxu2 %v7299_v50 }
0x3a04   :  { %7313 = vmatpush.msrb.mxu2 %v7296_v63 }
0x3a06   :  { %7314 = vmatpush.msrb.mxu2 %v7293_v25 }
0x3a07   :  { %v7244_v56 = vpop.xlane.xlu2 %7243 }
0x3a08   :  { %7315 = vmatpush.msrb.mxu2 %v7290_v46 }
0x3a09   :  { %v7247_v41 = vpop.xlane.xlu0 %7246  ;;  %8543 = vmatmul.msk.f32.vlgmr.msrb.gmra.mxu2 %vm159_vm3, %v9663_v14 }
0x3a0a   :  { %7264 = vmatpush.msrb.mxu0 %v7247_v41 }
0x3a0c   :  { %7265 = vmatpush.msrb.mxu0 %v7244_v56 }
0x3a11   :  { %v7241_v2 = vpop.xlane.xlu0 %7240  ;;  %8544 = vmatmul.msk.f32.gmra.mxu2 %vm159_vm3, %v9669_v15 }
0x3a12   :  { %7266 = vmatpush.msrb.mxu0 %v7241_v2 }
0x3a13   :  { %8539 = vmatmul.msk.f32.vlgmr.msrb.gmra.mxu0 %vm159_vm3, %v9663_v14 }
0x3a19   :  { %8545 = vmatmul.msk.f32.gmra.mxu2 %vm159_vm3, %v9675_v0 }
0x3a1b   :  { %8540 = vmatmul.msk.f32.gmra.mxu0 %vm159_vm3, %v9669_v15 }
0x3a21   :  { %8546 = vmatmul.msk.f32.gmra.mxu2 %vm159_vm3, %v9681_v17 }
0x3a23   :  { %8541 = vmatmul.msk.f32.gmra.mxu0 %vm159_vm3, %v9675_v0 }
0x3a2b   :  { %8542 = vmatmul.msk.f32.gmra.mxu0 %vm159_vm3, %v9681_v17 }
0x3a8c   :  { %v7317_v60 = vpop.f32.mrf.mxu2 }
0x3a8d   :  { %v7329_v6 = vmul.f32 0.00625, %v7317_v60 }
0x3a90   :  { %v7268_v7 = vpop.f32.mrf.mxu0 }
0x3a91   :  { %v7280_v16 = vmul.f32 0.00625, %v7268_v7 }
0x3a93   :  { %v7357_v22 = vmul.f32 %v7280_v16, %v7280_v16 }
0x3a94   :  { %v7320_v8 = vpop.f32.mrf.mxu2 }
0x3a95   :  { %v7330_v9 = vmul.f32 0.00625, %v7320_v8  ;;  %v7361_v17 = vsub.f32 %v7329_v6, %v7357_v22 }
0x3a97   :  { %v7365_v27 = vadd.f32 1e-05, %v7361_v17 }
0x3a98   :  { %v7271_v19 = vpop.f32.mrf.mxu0 }
0x3a99   :  { %v7281_v14 = vmul.f32 0.00625, %v7271_v19  ;;  %vm7375_vm13 = vweird.f32 %v7365_v27 }
0x3a9b   :  { %v7358_v32 = vmul.f32 %v7281_v14, %v7281_v14  ;;  %7340 = vperm.xlu1 %8625, %v7281_v14   ;;  %v7450_v14 = vld [vmem:[#allocation2 + $0x1070] sm:$0x3] }
0x3a9c   :  { %v7323_v10 = vpop.f32.mrf.mxu2  ;;  %8556 = vmatpush.msk.msra.mxu0 %vm75_vm0, %v7450_v14 }
0x3a9d   :  { %v7362_v15 = vsub.f32 %v7330_v9, %v7358_v32  ;;  %v7331_v12 = vmul.f32 0.00625, %v7323_v10  ;;  %v7449_v9 = vld [vmem:[#allocation2 + $0x1068] sm:$0xff] }
0x3a9e   :  { %7556 = vmatpush.msra.mxu0 %v7449_v9 }
0x3a9f   :  { %v7366_v18 = vadd.f32 1e-05, %v7362_v15 }
0x3aa0   :  { %v7274_v11 = vpop.f32.mrf.mxu0 }
0x3aa1   :  { %8728 = vrsqrt.f32 %v7366_v18  ;;  %v7282_v0 = vmul.f32 0.00625, %v7274_v11  ;;  %vm7385_vm12 = vweird.f32 %v7366_v18 }
0x3aa3   :  { %v7359_v13 = vmul.f32 %v7282_v0, %v7282_v0  ;;  %7345 = vperm.xlu2 %8624, %v7282_v0  }
0x3aa4   :  { %v7326_v24 = vpop.f32.mrf.mxu2 }
0x3aa5   :  { %v7363_v30 = vsub.f32 %v7331_v12, %v7359_v13  ;;  %v7332_v34 = vmul.f32 0.00625, %v7326_v24  ;;  %v7435_v12 = vld [vmem:[#allocation2 + $0x1028] sm:$0xff]  ;;  %v7436_v13 = vld [vmem:[#allocation2 + $0x1030] sm:$0xff] }
0x3aa7   :  { %v8729_v52 = vpop.eup %8728  ;;  %v7367_v33 = vadd.f32 1e-05, %v7363_v30 }
0x3aa8   :  { %v7380_v38 = vmul.f32 %v8729_v52, %v7366_v18  ;;  %v7277_v45 = vpop.f32.mrf.mxu0  ;;  %vm7386_vm11 = vweird.f32 %v8729_v52 }
0x3aa9   :  { %8730 = vrsqrt.f32 %v7367_v33  ;;  %v7283_v1 = vmul.f32 0.00625, %v7277_v45  ;;  %vm7387_vm4 = vmor %vm7385_vm12, %vm7386_vm11  ;;  %vm7395_vm6 = vweird.f32 %v7367_v33 }
0x3aaa   :  { %v7381_v48 = vmul.f32 %v8729_v52, %v7380_v38  ;;  %8732 = vrsqrt.f32 %v7365_v27 }
0x3aab   :  { %v7360_v28 = vmul.f32 %v7283_v1, %v7283_v1  ;;  %7335 = vperm.xlu2 %8624, %v7280_v16   ;;  %7350 = vperm.xlu1 %8625, %v7283_v1   ;;  %v7443_v1 = vld [vmem:[#allocation2 + $0x1048] sm:$0xff] }
0x3aac   :  { %v7382_v43 = vmul.f32 0.5, %v7381_v48 }
0x3aad   :  { %v7364_v47 = vsub.f32 %v7332_v34, %v7360_v28 }
0x3aae   :  { %v7383_v49 = vsub.f32 1.5, %v7382_v43 }
0x3aaf   :  { %v8731_v61 = vpop.eup %8730  ;;  %v7368_v51 = vadd.f32 1e-05, %v7364_v47 }
0x3ab0   :  { %v7390_v42 = vmul.f32 %v8731_v61, %v7367_v33  ;;  %v7384_v5 = vmul.f32 %v8729_v52, %v7383_v49  ;;  %v8733_v39 = vpop.eup %8732  ;;  %vm7396_vm15 = vweird.f32 %v8731_v61  ;;  %v7444_v33 = vld [vmem:[#allocation2 + $0x1050] sm:$0xff] }
0x3ab1   :  { %8734 = vrsqrt.f32 %v7368_v51  ;;  %v7370_v40 = vmul.f32 %v8733_v39, %v7365_v27  ;;  %vm7397_vm5 = vmor %vm7395_vm6, %vm7396_vm15  ;;  %vm7405_vm7 = vweird.f32 %v7368_v51  ;;  %vm7376_vm8 = vweird.f32 %v8733_v39 }
0x3ab2   :  { %v7388_v36 = vsel %vm7387_vm4, %v8729_v52, %v7384_v5  ;;  %v7391_v37 = vmul.f32 %v8731_v61, %v7390_v42  ;;  %vm7377_vm9 = vmor %vm7375_vm13, %vm7376_vm8  ;;  %v7434_v52 = vld [vmem:[#allocation2 + $0x1020] sm:$0xff] }
0x3ab3   :  { %7416 = vperm.xlu1 %8625, %v7388_v36   ;;  %v7371_v50 = vmul.f32 %v8733_v39, %v7370_v40  ;;  %v7481_v5 = vld [vmem:[#allocation2 + $0x1060] sm:$0x3]  ;;  %v7480_v36 = vld [vmem:[#allocation2 + $0x1058] sm:$0xff] }
0x3ab4   :  { %v7392_v54 = vmul.f32 0.5, %v7391_v37  ;;  %8551 = vmatpush.msk.msrb.mxu1 %vm75_vm0, %v7481_v5  ;;  %v7599_v37 = vld [vmem:[#allocation2 + $0x1078] sm:$0xff] }
0x3ab5   :  { %v7372_v56 = vmul.f32 0.5, %v7371_v50  ;;  %v7659_v50 = vld [vmem:[#allocation2 + $0x10a0] sm:$0xff] }
0x3ab6   :  { %v7393_v57 = vsub.f32 1.5, %v7392_v54  ;;  %7512 = vmatpush.msrb.mxu1 %v7480_v36 }
0x3ab7   :  { %v8735_v58 = vpop.eup %8734  ;;  %v7373_v7 = vsub.f32 1.5, %v7372_v56 }
0x3ab8   :  { %v7400_v23 = vmul.f32 %v8735_v58, %v7368_v51  ;;  %v7394_v25 = vmul.f32 %v8731_v61, %v7393_v57  ;;  %vm7406_vm14 = vweird.f32 %v8735_v58 }
0x3ab9   :  { %vm7407_vm10 = vmor %vm7405_vm7, %vm7406_vm14  ;;  %v7374_v8 = vmul.f32 %v8733_v39, %v7373_v7 }
0x3aba   :  { %v7398_v63 = vsel %vm7397_vm5, %v8731_v61, %v7394_v25  ;;  %v7401_v4 = vmul.f32 %v8735_v58, %v7400_v23  ;;  %v7441_v61 = vld [vmem:[#allocation2 + $0x1038] sm:$0xff] }
0x3abb   :  { %7421 = vperm.xlu0 %8626, %v7398_v63   ;;  %v7378_v19 = vsel %vm7377_vm9, %v8733_v39, %v7374_v8 }
0x3abc   :  { %v7402_v46 = vmul.f32 0.5, %v7401_v4  ;;  %v7660_v4 = vld [vmem:[#allocation2 + $0x10a8] sm:$0x3] }
0x3abe   :  { %v7403_v41 = vsub.f32 1.5, %v7402_v46 }
0x3ac0   :  { %v7404_v2 = vmul.f32 %v8735_v58, %v7403_v41 }
0x3ac2   :  { %v7408_v60 = vsel %vm7407_vm10, %v8735_v58, %v7404_v2  ;;  %v8673_v2 = vld [vmem:[#allocation2 + $0x1088] ss:$0 sm:$0xff] }
0x3ac3   :  { %7426 = vperm.xlu0 %8626, %v7408_v60  }
0x3acb   :  { %7411 = vperm.xlu0 %8626, %v7378_v19  }
0x3afd   :  { %v7346_v15 = vpop.permute.xlu2 %7345 }
0x3afe   :  { %v7355_v18 = vsub.f32 %v9774_v29, %v7346_v15  ;;  %v7442_v29 = vld [vmem:[#allocation2 + $0x1040] sm:$0xff] }
0x3b05   :  { %v7336_v27 = vpop.permute.xlu2 %7335 }
0x3b06   :  { %v7353_v28 = vsub.f32 %v9778_v31, %v7336_v27  ;;  %v7600_v31 = vld [vmem:[#allocation2 + $0x1080] sm:$0x3] }
0x3b0d   :  { %v7341_v32 = vpop.permute.xlu1 %7340 }
0x3b0e   :  { %v7354_v11 = vsub.f32 %v9769_v21, %v7341_v32 }
0x3b1d   :  { %v7351_v10 = vpop.permute.xlu1 %7350 }
0x3b1e   :  { %v7356_v22 = vsub.f32 %v9781_v35, %v7351_v10  ;;  %v7433_v35 = vld [vmem:[#allocation2 + $0x1018] sm:$0xff] }
0x3b25   :  { %v7417_v6 = vpop.permute.xlu1 %7416 }
0x3b26   :  { %v7430_v30 = vmul.f32 %v7417_v6, %v7354_v11 }
0x3b28   :  { %v7438_v34 = vmul.f32 %v7434_v52, %v7430_v30 }
0x3b2a   :  { %v7446_v49 = vadd.f32 %v7442_v29, %v7438_v34  ;;  %v7690_v34 = vld [vmem:[#allocation2 + $0x1090] sm:$0xff] }
0x3b2b   :  { %v7809_v29 = vld [vmem:[#allocation2 + $0x10b0] sm:$0xff] }
0x3b2d   :  { %v7422_v16 = vpop.permute.xlu0 %7421 }
0x3b2e   :  { %v7431_v0 = vmul.f32 %v7422_v16, %v7355_v18 }
0x3b30   :  { %v7439_v38 = vmul.f32 %v7435_v12, %v7431_v0 }
0x3b32   :  { %v7447_v21 = vadd.f32 %v7443_v1, %v7439_v38  ;;  %v7691_v1 = vld [vmem:[#allocation2 + $0x1098] sm:$0x3] }
0x3b33   :  { %8574 = vmatpush.msk.msrb.mxu0 %vm75_vm0, %v7691_v1 }
0x3b35   :  { %v7427_v17 = vpop.permute.xlu0 %7426  ;;  %7722 = vmatpush.msrb.mxu0 %v7690_v34 }
0x3b36   :  { %v7432_v24 = vmul.f32 %v7427_v17, %v7356_v22 }
0x3b38   :  { %v7440_v45 = vmul.f32 %v7436_v13, %v7432_v24 }
0x3b3a   :  { %v7448_v48 = vadd.f32 %v7444_v33, %v7440_v45 }
0x3b3c   :  { %7463 = vmatpush.msrb.mxu3 %v7448_v48  ;;  %7582 = vmatpush.msra.mxu2 %v7448_v48 }
0x3b3d   :  { %v7412_v43 = vpop.permute.xlu0 %7411 }
0x3b3e   :  { %v7429_v47 = vmul.f32 %v7412_v43, %v7353_v28  ;;  %7464 = vmatpush.msrb.mxu3 %v7447_v21  ;;  %7583 = vmatpush.msra.mxu2 %v7447_v21 }
0x3b40   :  { %v7437_v51 = vmul.f32 %v7433_v35, %v7429_v47  ;;  %7465 = vmatpush.msrb.mxu3 %v7446_v49  ;;  %7584 = vmatpush.msra.mxu2 %v7446_v49 }
0x3b42   :  { %v7445_v42 = vadd.f32 %v7441_v61, %v7437_v51 }
0x3b44   :  { %7466 = vmatpush.msrb.mxu3 %v7445_v42  ;;  %8557 = vmatmul.msk.f32.vlgmr.msra.gmra.mxu0 %vm71_vm1, %v7445_v42 }
0x3b45   :  { %7585 = vmatpush.msra.mxu2 %v7445_v42  ;;  %8547 = vmatmul.msk.f32.vlgmr.msrb.gmra.mxu3 %vm159_vm3, %v9694_v53  ;;  %v7870_v42 = vld [vmem:[#allocation2 + $0x10e0] sm:$0x3] }
0x3b46   :  { %8561 = vmatmul.msk.f32.vlgmr.msra.gmra.mxu2 %vm159_vm3, %v9698_v59  ;;  %8565 = vmatpush.msk.msra.mxu3 %vm75_vm0, %v7600_v31  ;;  %v7869_v31 = vld [vmem:[#allocation2 + $0x10d8] sm:$0xff] }
0x3b47   :  { %8579 = vmatpush.msk.msrb.mxu2 %vm75_vm0, %v7660_v4 }
0x3b48   :  { %7631 = vmatpush.msra.mxu3 %v7599_v37 }
0x3b49   :  { %7766 = vmatpush.msrb.mxu2 %v7659_v50 }
0x3b4c   :  { %8558 = vmatmul.msk.f32.gmra.mxu0 %vm71_vm1, %v7446_v49 }
0x3b4d   :  { %8548 = vmatmul.msk.f32.gmra.mxu3 %vm159_vm3, %v9703_v62 }
0x3b4e   :  { %8562 = vmatmul.msk.f32.gmra.mxu2 %vm159_vm3, %v9707_v44 }
0x3b54   :  { %8559 = vmatmul.msk.f32.gmra.mxu0 %vm71_vm1, %v7447_v21 }
0x3b55   :  { %8549 = vmatmul.msk.f32.gmra.mxu3 %vm159_vm3, %v9712_v26 }
0x3b56   :  { %8563 = vmatmul.msk.f32.gmra.mxu2 %vm159_vm3, %v9716_v3 }
0x3b5c   :  { %8560 = vmatmul.msk.f32.gmra.mxu0 %vm71_vm1, %v7448_v48  ;;  %v7810_v48 = vld [vmem:[#allocation2 + $0x10b8] sm:$0x3] }
0x3b5d   :  { %8550 = vmatmul.msk.f32.gmra.mxu3 %vm159_vm3, %v9720_v20 }
0x3b5e   :  { %8564 = vmatmul.msk.f32.gmra.mxu2 %vm159_vm3, %v9724_v55 }
0x3bc1   :  { %v7558_v46 = vpop.f32.mrf.mxu0 }
0x3bc8   :  { %v7468_v39 = vpop.f32.mrf.mxu3 }
0x3bc9   :  { %v7587_v54 = vpop.f32.mrf.mxu2  ;;  %8552 = vmatmul.msk.f32.vlgmr.msrb.gmra.mxu1 %vm71_vm1, %v7468_v39  ;;  %v7561_v19 = vpop.f32.mrf.mxu0  ;;  %v8674_v39 = vld [vmem:[#allocation2 + $0x10c0] ss:$0 sm:$0xff] }
0x3bca   :  { %8566 = vmatmul.msk.f32.vlgmr.msra.gmra.mxu3 %vm71_vm1, %v7587_v54 }
0x3bd0   :  { %v7471_v40 = vpop.f32.mrf.mxu3 }
0x3bd1   :  { %v7590_v57 = vpop.f32.mrf.mxu2  ;;  %8553 = vmatmul.msk.f32.gmra.mxu1 %vm71_vm1, %v7471_v40  ;;  %v7564_v6 = vpop.f32.mrf.mxu0 }
0x3bd2   :  { %8567 = vmatmul.msk.f32.gmra.mxu3 %vm71_vm1, %v7590_v57 }
0x3bd8   :  { %v7474_v58 = vpop.f32.mrf.mxu3 }
0x3bd9   :  { %v7593_v23 = vpop.f32.mrf.mxu2  ;;  %8554 = vmatmul.msk.f32.gmra.mxu1 %vm71_vm1, %v7474_v58  ;;  %v7567_v24 = vpop.f32.mrf.mxu0 }
0x3bda   :  { %8568 = vmatmul.msk.f32.gmra.mxu3 %vm71_vm1, %v7593_v23 }
0x3be0   :  { %v7477_v25 = vpop.f32.mrf.mxu3 }
0x3be1   :  { %v7596_v63 = vpop.f32.mrf.mxu2  ;;  %8555 = vmatmul.msk.f32.gmra.mxu1 %vm71_vm1, %v7477_v25 }
0x3be2   :  { %8569 = vmatmul.msk.f32.gmra.mxu3 %vm71_vm1, %v7596_v63 }
0x3c46   :  { %v7514_v41 = vpop.f32.mrf.mxu1 }
0x3c47   :  { %v7559_v56 = vadd.f32 %v7558_v46, %v7514_v41 }
0x3c4d   :  { %v7633_v60 = vpop.f32.mrf.mxu3 }
0x3c4e   :  { %v7645_v7 = vadd.f32 %v7633_v60, %v7559_v56  ;;  %v7517_v8 = vpop.f32.mrf.mxu1 }
0x3c4f   :  { %v7562_v32 = vadd.f32 %v7561_v19, %v7517_v8 }
0x3c50   :  { %v7651_v14 = vadd.f32 %v8673_v2, %v7645_v7 }
0x3c52   :  { %v7655_v9 = vmax.f32 %v7651_v14, 0.0 }
0x3c54   :  { %8580 = vmatmul.msk.f32.vlgmr.msrb.gmra.mxu2 %vm71_vm1, %v7655_v9 }
0x3c55   :  { %v7636_v10 = vpop.f32.mrf.mxu3 }
0x3c56   :  { %v7646_v16 = vadd.f32 %v7636_v10, %v7562_v32  ;;  %v7520_v15 = vpop.f32.mrf.mxu1 }
0x3c57   :  { %v7565_v22 = vadd.f32 %v7564_v6, %v7520_v15 }
0x3c58   :  { %v7652_v18 = vadd.f32 %v8673_v2, %v7646_v16 }
0x3c5a   :  { %v7656_v11 = vmax.f32 %v7652_v18, 0.0 }
0x3c5c   :  { %8581 = vmatmul.msk.f32.gmra.mxu2 %vm71_vm1, %v7656_v11 }
0x3c5d   :  { %v7639_v0 = vpop.f32.mrf.mxu3 }
0x3c5e   :  { %v7647_v12 = vadd.f32 %v7639_v0, %v7565_v22  ;;  %v7523_v17 = vpop.f32.mrf.mxu1 }
0x3c5f   :  { %v7568_v52 = vadd.f32 %v7567_v24, %v7523_v17 }
0x3c60   :  { %v7653_v13 = vadd.f32 %v8673_v2, %v7647_v12 }
0x3c62   :  { %v7657_v30 = vmax.f32 %v7653_v13, 0.0 }
0x3c64   :  { %8582 = vmatmul.msk.f32.gmra.mxu2 %vm71_vm1, %v7657_v30 }
0x3c65   :  { %v7642_v33 = vpop.f32.mrf.mxu3 }
0x3c66   :  { %v7648_v38 = vadd.f32 %v7642_v33, %v7568_v52  ;;  %v8675_v52 = vld [vmem:[#allocation2 + $0x10f8] ss:$0 sm:$0xff] }
0x3c68   :  { %v7654_v45 = vadd.f32 %v8673_v2, %v7648_v38 }
0x3c6a   :  { %v7658_v27 = vmax.f32 %v7654_v45, 0.0 }
0x3c6c   :  { %7673 = vmatpush.msra.mxu1 %v7658_v27  ;;  %8583 = vmatmul.msk.f32.gmra.mxu2 %vm71_vm1, %v7658_v27 }
0x3c6d   :  { %7792 = vmatpush.msrb.mxu3 %v7658_v27 }
0x3c6e   :  { %7674 = vmatpush.msra.mxu1 %v7657_v30 }
0x3c6f   :  { %7793 = vmatpush.msrb.mxu3 %v7657_v30 }
0x3c70   :  { %7675 = vmatpush.msra.mxu1 %v7656_v11 }
0x3c71   :  { %7794 = vmatpush.msrb.mxu3 %v7656_v11 }
0x3c72   :  { %7676 = vmatpush.msra.mxu1 %v7655_v9 }
0x3c73   :  { %7795 = vmatpush.msrb.mxu3 %v7655_v9  ;;  %8570 = vmatmul.msk.f32.vlgmr.msra.gmra.mxu1 %vm159_vm3, %v9694_v53 }
0x3c74   :  { %8584 = vmatmul.msk.f32.vlgmr.msrb.gmra.mxu3 %vm159_vm3, %v9698_v59  ;;  %8588 = vmatpush.msk.msrb.mxu1 %vm75_vm0, %v7810_v48 }
0x3c75   :  { %8602 = vmatpush.msk.msra.mxu3 %vm75_vm0, %v7870_v42 }
0x3c76   :  { %7841 = vmatpush.msrb.mxu1 %v7809_v29 }
0x3c77   :  { %7976 = vmatpush.msra.mxu3 %v7869_v31 }
0x3c7b   :  { %8571 = vmatmul.msk.f32.gmra.mxu1 %vm159_vm3, %v9703_v62 }
0x3c7c   :  { %8585 = vmatmul.msk.f32.gmra.mxu3 %vm159_vm3, %v9707_v44 }
0x3c83   :  { %8572 = vmatmul.msk.f32.gmra.mxu1 %vm159_vm3, %v9712_v26 }
0x3c84   :  { %8586 = vmatmul.msk.f32.gmra.mxu3 %vm159_vm3, %v9716_v3 }
0x3c8b   :  { %8573 = vmatmul.msk.f32.gmra.mxu1 %vm159_vm3, %v9720_v20 }
0x3c8c   :  { %8587 = vmatmul.msk.f32.gmra.mxu3 %vm159_vm3, %v9724_v55 }
0x3cd7   :  { %v7768_v5 = vpop.f32.mrf.mxu2 }
0x3cdf   :  { %v7771_v58 = vpop.f32.mrf.mxu2 }
0x3ce7   :  { %v7774_v56 = vpop.f32.mrf.mxu2 }
0x3cef   :  { %v7777_v32 = vpop.f32.mrf.mxu2 }
0x3cf0   :  { %v7678_v28 = vpop.f32.mrf.mxu1 }
0x3cf1   :  { %8575 = vmatmul.msk.f32.vlgmr.msrb.gmra.mxu0 %vm71_vm1, %v7678_v28 }
0x3cf7   :  { %v7797_v21 = vpop.f32.mrf.mxu3 }
0x3cf8   :  { %8589 = vmatmul.msk.f32.vlgmr.msrb.gmra.mxu1 %vm71_vm1, %v7797_v21  ;;  %v7681_v35 = vpop.f32.mrf.mxu1 }
0x3cf9   :  { %8576 = vmatmul.msk.f32.gmra.mxu0 %vm71_vm1, %v7681_v35 }
0x3cff   :  { %v7800_v43 = vpop.f32.mrf.mxu3 }
0x3d00   :  { %8590 = vmatmul.msk.f32.gmra.mxu1 %vm71_vm1, %v7800_v43  ;;  %v7684_v47 = vpop.f32.mrf.mxu1 }
0x3d01   :  { %8577 = vmatmul.msk.f32.gmra.mxu0 %vm71_vm1, %v7684_v47 }
0x3d07   :  { %v7803_v49 = vpop.f32.mrf.mxu3 }
0x3d08   :  { %8591 = vmatmul.msk.f32.gmra.mxu1 %vm71_vm1, %v7803_v49  ;;  %v7687_v61 = vpop.f32.mrf.mxu1 }
0x3d09   :  { %8578 = vmatmul.msk.f32.gmra.mxu0 %vm71_vm1, %v7687_v61 }
0x3d0f   :  { %v7806_v51 = vpop.f32.mrf.mxu3 }
0x3d10   :  { %8592 = vmatmul.msk.f32.gmra.mxu1 %vm71_vm1, %v7806_v51 }
0x3d6e   :  { %v7724_v36 = vpop.f32.mrf.mxu0 }
0x3d6f   :  { %v7769_v37 = vadd.f32 %v7768_v5, %v7724_v36 }
0x3d75   :  { %v7843_v54 = vpop.f32.mrf.mxu1 }
0x3d76   :  { %v7855_v40 = vadd.f32 %v7843_v54, %v7769_v37  ;;  %v7727_v57 = vpop.f32.mrf.mxu0 }
0x3d77   :  { %v7772_v63 = vadd.f32 %v7771_v58, %v7727_v57 }
0x3d78   :  { %v7861_v23 = vadd.f32 %v8674_v39, %v7855_v40 }
0x3d7a   :  { %v7865_v25 = vmax.f32 %v7861_v23, 0.0 }
0x3d7c   :  { %8603 = vmatmul.msk.f32.vlgmr.msra.gmra.mxu3 %vm71_vm1, %v7865_v25 }
0x3d7d   :  { %v7846_v4 = vpop.f32.mrf.mxu1 }
0x3d7e   :  { %v7856_v50 = vadd.f32 %v7846_v4, %v7772_v63  ;;  %v7730_v46 = vpop.f32.mrf.mxu0 }
0x3d7f   :  { %v7775_v60 = vadd.f32 %v7774_v56, %v7730_v46 }
0x3d80   :  { %v7862_v41 = vadd.f32 %v8674_v39, %v7856_v50 }
0x3d82   :  { %v7866_v2 = vmax.f32 %v7862_v41, 0.0 }
0x3d84   :  { %8604 = vmatmul.msk.f32.gmra.mxu3 %vm71_vm1, %v7866_v2 }
0x3d85   :  { %v7849_v7 = vpop.f32.mrf.mxu1 }
0x3d86   :  { %v7857_v8 = vadd.f32 %v7849_v7, %v7775_v60  ;;  %v7733_v14 = vpop.f32.mrf.mxu0 }
0x3d87   :  { %v7778_v10 = vadd.f32 %v7777_v32, %v7733_v14 }
0x3d88   :  { %v7863_v19 = vadd.f32 %v8674_v39, %v7857_v8 }
0x3d8a   :  { %v7867_v9 = vmax.f32 %v7863_v19, 0.0 }
0x3d8c   :  { %8605 = vmatmul.msk.f32.gmra.mxu3 %vm71_vm1, %v7867_v9 }
0x3d8d   :  { %v7852_v16 = vpop.f32.mrf.mxu1 }
0x3d8e   :  { %v7858_v15 = vadd.f32 %v7852_v16, %v7778_v10 }
0x3d90   :  { %v7864_v18 = vadd.f32 %v8674_v39, %v7858_v15 }
0x3d92   :  { %v7868_v6 = vmax.f32 %v7864_v18, 0.0 }
0x3d94   :  { %7883 = vmatpush.msra.mxu0 %v7868_v6  ;;  %8606 = vmatmul.msk.f32.gmra.mxu3 %vm71_vm1, %v7868_v6 }
0x3d95   :  { %8002 = vmatpush.msra.mxu1 %v7868_v6 }
0x3d96   :  { %7884 = vmatpush.msra.mxu0 %v7867_v9 }
0x3d97   :  { %8003 = vmatpush.msra.mxu1 %v7867_v9 }
0x3d98   :  { %7885 = vmatpush.msra.mxu0 %v7866_v2 }
0x3d99   :  { %8004 = vmatpush.msra.mxu1 %v7866_v2 }
0x3d9a   :  { %7886 = vmatpush.msra.mxu0 %v7865_v25 }
0x3d9b   :  { %8005 = vmatpush.msra.mxu1 %v7865_v25  ;;  %8593 = vmatmul.msk.f32.vlgmr.msra.gmra.mxu0 %vm159_vm3, %v9694_v53  ;;  %v7901_v53 = vld [vmem:[#allocation2 + $0x10d0] sm:$0x3] }
0x3d9c   :  { %8607 = vmatmul.msk.f32.vlgmr.msra.gmra.mxu1 %vm159_vm3, %v9698_v59  ;;  %8597 = vmatpush.msk.msra.mxu2 %vm75_vm0, %v7901_v53  ;;  %v7900_v59 = vld [vmem:[#allocation2 + $0x10c8] sm:$0xff] }
0x3d9e   :  { %7932 = vmatpush.msra.mxu2 %v7900_v59 }
0x3da3   :  { %8594 = vmatmul.msk.f32.gmra.mxu0 %vm159_vm3, %v9703_v62  ;;  %v8020_v62 = vld [vmem:[#allocation2 + $0x10f0] sm:$0x3] }
0x3da4   :  { %8608 = vmatmul.msk.f32.gmra.mxu1 %vm159_vm3, %v9707_v44  ;;  %8611 = vmatpush.msk.msrb.mxu0 %vm75_vm0, %v8020_v62  ;;  %v8019_v44 = vld [vmem:[#allocation2 + $0x10e8] sm:$0xff] }
0x3da6   :  { %8051 = vmatpush.msrb.mxu0 %v8019_v44 }
0x3dab   :  { %8595 = vmatmul.msk.f32.gmra.mxu0 %vm159_vm3, %v9712_v26 }
0x3dac   :  { %8609 = vmatmul.msk.f32.gmra.mxu1 %vm159_vm3, %v9716_v3 }
0x3db3   :  { %8596 = vmatmul.msk.f32.gmra.mxu0 %vm159_vm3, %v9720_v20 }
0x3db4   :  { %8610 = vmatmul.msk.f32.gmra.mxu1 %vm159_vm3, %v9724_v55 }
0x3dff   :  { %v7978_v13 = vpop.f32.mrf.mxu3 }
0x3e07   :  { %v7981_v33 = vpop.f32.mrf.mxu3 }
0x3e0f   :  { %v7984_v29 = vpop.f32.mrf.mxu3 }
0x3e17   :  { %v7987_v61 = vpop.f32.mrf.mxu3 }
0x3e18   :  { %v7888_v26 = vpop.f32.mrf.mxu0 }
0x3e19   :  { %8598 = vmatmul.msk.f32.vlgmr.msra.gmra.mxu2 %vm71_vm1, %v7888_v26  ;;  %v8007_v3 = vpop.f32.mrf.mxu1 }
0x3e1a   :  { %8612 = vmatmul.msk.f32.vlgmr.msrb.gmra.mxu0 %vm71_vm1, %v8007_v3 }
0x3e20   :  { %v7891_v20 = vpop.f32.mrf.mxu0 }
0x3e21   :  { %8599 = vmatmul.msk.f32.gmra.mxu2 %vm71_vm1, %v7891_v20  ;;  %v8010_v55 = vpop.f32.mrf.mxu1 }
0x3e22   :  { %8613 = vmatmul.msk.f32.gmra.mxu0 %vm71_vm1, %v8010_v55 }
0x3e28   :  { %v7894_v11 = vpop.f32.mrf.mxu0 }
0x3e29   :  { %8600 = vmatmul.msk.f32.gmra.mxu2 %vm71_vm1, %v7894_v11  ;;  %v8013_v22 = vpop.f32.mrf.mxu1 }
0x3e2a   :  { %8614 = vmatmul.msk.f32.gmra.mxu0 %vm71_vm1, %v8013_v22 }
0x3e30   :  { %v7897_v0 = vpop.f32.mrf.mxu0 }
0x3e31   :  { %8601 = vmatmul.msk.f32.gmra.mxu2 %vm71_vm1, %v7897_v0  ;;  %v8016_v12 = vpop.f32.mrf.mxu1 }
0x3e32   :  { %8615 = vmatmul.msk.f32.gmra.mxu0 %vm71_vm1, %v8016_v12 }
0x3e97   :  { %v8053_v17 = vpop.f32.mrf.mxu0 }
0x3e9c   :  { %v7934_v30 = vpop.f32.mrf.mxu2 }
0x3e9d   :  { %v7979_v24 = vadd.f32 %v7978_v13, %v7934_v30 }
0x3e9f   :  { %v8065_v38 = vadd.f32 %v8053_v17, %v7979_v24  ;;  %v8056_v45 = vpop.f32.mrf.mxu0 }
0x3ea1   :  { %v8071_v27 = vadd.f32 %v8675_v52, %v8065_v38 }
0x3ea3   :  { %8075 = vst [vmem:[%s9925_s3] sm:$0xff] %v8071_v27 }
0x3ea4   :  { %v7937_v1 = vpop.f32.mrf.mxu2 }
0x3ea5   :  { %v7982_v34 = vadd.f32 %v7981_v33, %v7937_v1 }
0x3ea7   :  { %v8066_v48 = vadd.f32 %v8056_v45, %v7982_v34  ;;  %v8059_v21 = vpop.f32.mrf.mxu0 }
0x3ea9   :  { %v8072_v28 = vadd.f32 %v8675_v52, %v8066_v48 }
0x3eab   :  { %8076 = vst [vmem:[%s9925_s3 + $0x8] sm:$0xff] %v8072_v28 }
0x3eac   :  { %v7940_v35 = vpop.f32.mrf.mxu2 }
0x3ead   :  { %v7985_v43 = vadd.f32 %v7984_v29, %v7940_v35 }
0x3eaf   :  { %v8067_v47 = vadd.f32 %v8059_v21, %v7985_v43  ;;  %v8062_v42 = vpop.f32.mrf.mxu0 }
0x3eb1   :  { %v8073_v49 = vadd.f32 %v8675_v52, %v8067_v47 }
0x3eb3   :  { %8077 = vst [vmem:[%s9925_s3 + $0x10] sm:$0xff] %v8073_v49 }
0x3eb4   :  { %v7943_v51 = vpop.f32.mrf.mxu2 }
0x3eb5   :  { %v7988_v31 = vadd.f32 %v7987_v61, %v7943_v51 }
0x3eb7   :  { %v8068_v5 = vadd.f32 %v8062_v42, %v7988_v31 }
0x3eb9   :  { %v8074_v36 = vadd.f32 %v8675_v52, %v8068_v5 }
0x3ebb   :  { %8078 = vst [vmem:[%s9925_s3 + $0x18] sm:$0xff] %v8074_v36 }
0x3ebc   :  { %8083 = vsyncpa [#allocation3], 1 }

</bundles_post_ra>
